<compile_context>
chip_gen: v6e
topology: v6e:2x2x1
jax: 0.10.0
libtpu: 0.0.40
codegen_flags: <defaults>
</compile_context>

<pallas_src>
import numpy as np
import jax
import jax.numpy as jnp
from jax import lax
from jax.experimental import pallas as pl
from jax.experimental.pallas import tpu as pltpu


_BATCH = 2  # layer args are repacked for this batch (kron with I_B)


# ----------------------------------------------------------------------------
# The fused Pallas kernel: whole AE forward, everything in VMEM.
# ----------------------------------------------------------------------------
def _ae_fused_kernel(
        patches_ref,
        w1k_ref, b1_ref,
        wm2_ref, p2_ref, b2_ref, a16_ref, ge_ref, be_ref,
        wm3_ref, p3_ref, b3_ref,
        wf1_ref, bf1_ref, wlat_ref, blat_ref, wg2_ref, bg2_ref, sdec_ref,
        wt1_ref, q1_ref, c1_ref, gd1_ref, bd1_ref,
        wt2_ref, q2_ref, c2_ref, a8_ref, gd2_ref, bd2_ref,
        wt3_ref, tmat_ref, c3_ref,
        o_ref):
    f32, bf16 = jnp.float32, jnp.bfloat16
    relu = lambda v: jnp.maximum(v, 0.0)

    def conv_taps(h, wm_ref, p_ref, b_ref):
        # h: (Cin*B, Sin).  Y = sum_t kron(W_t, I_B) @ h @ P_t, realised as
        # 9 tiny channel-mix GEMMs, one lane concat, ONE stacked 0/1 spatial
        # selection GEMM, fused bias add.  f32 accumulation throughout.
        hb = h.astype(bf16)
        mixed = [jnp.dot(wm_ref[t], hb, preferred_element_type=f32).astype(bf16)
                 for t in range(9)]
        cat = jnp.concatenate(mixed, axis=1)                  # (Cout*B, 9*Sin)
        y = jnp.dot(cat, p_ref[...], preferred_element_type=f32)
        return y + b_ref[...]

    def bn(h, a_ref, g_ref, b_ref):
        # Train-mode BatchNorm2d on (C*B, S): per-channel stats via lane
        # reduction + one tiny (C*B, C*B) averaging matmul (all f32).
        rs = jnp.sum(h, axis=1, keepdims=True)
        rs2 = jnp.sum(h * h, axis=1, keepdims=True)
        mean = jnp.dot(a_ref[...], rs, preferred_element_type=f32)
        ex2 = jnp.dot(a_ref[...], rs2, preferred_element_type=f32)
        var = ex2 - mean * mean
        scale = g_ref[...] * lax.rsqrt(var + 1e-5)
        return (h - mean) * scale + b_ref[...]

    # ---------------- encoder ----------------
    h = jnp.dot(w1k_ref[...], patches_ref[...].astype(bf16),
                preferred_element_type=f32) + b1_ref[...]      # Conv(1->8,s2,p1)
    h = relu(h)                                                # (8B, 196)
    h = conv_taps(h, wm2_ref, p2_ref, b2_ref)                  # Conv(8->16) (16B,49)
    h = relu(bn(h, a16_ref, ge_ref, be_ref))                   # BN16 + ReLU
    h = relu(conv_taps(h, wm3_ref, p3_ref, b3_ref))            # Conv(16->32) (32B,9)

    # Flatten (PyTorch c-major order) -> (B, 288) via lane concat of the
    # per-channel row blocks (no in-kernel reshape/transposes needed).
    hflat = jnp.concatenate([h[2 * c:2 * c + 2, :] for c in range(32)], axis=1)
    h = relu(jnp.dot(hflat.astype(bf16), wf1_ref[...],
                     preferred_element_type=f32) + bf1_ref[...])   # Linear 288->128
    h = relu(jnp.dot(h.astype(bf16), wlat_ref[...],
                     preferred_element_type=f32) + blat_ref[...])  # 128->2->128 fused
    h = relu(jnp.dot(h.astype(bf16), wg2_ref[...],
                     preferred_element_type=f32) + bg2_ref[...])   # Linear 128->288

    # Unflatten back to (32B, 9) with tiny 0/1 scatter matmuls.
    hb = h.astype(bf16)
    hdec = None
    for c in range(32):
        part = jnp.dot(sdec_ref[c], hb[:, 9 * c:9 * (c + 1)],
                       preferred_element_type=f32)
        hdec = part if hdec is None else hdec + part
    h = hdec                                                   # (32B, 9)

    # ---------------- decoder ----------------
    h = conv_taps(h, wt1_ref, q1_ref, c1_ref)                  # ConvT(32->16) (16B,49)
    h = relu(bn(h, a16_ref, gd1_ref, bd1_ref))
    h = conv_taps(h, wt2_ref, q2_ref, c2_ref)                  # ConvT(16->8) (8B,196)
    h = relu(bn(h, a8_ref, gd2_ref, bd2_ref))

    # ConvT(8->1,s2,p1,op1) via output-phase decomposition: 4 phase-grouped
    # channel mixes + 3 tiny translation matmuls; rows = (phase, b).
    hb = h.astype(bf16)
    acc = jnp.dot(wt3_ref[0], hb, preferred_element_type=f32)  # tau=(0,0): identity
    for i in range(3):
        m = jnp.dot(wt3_ref[i + 1], hb, preferred_element_type=f32).astype(bf16)
        acc = acc + jnp.dot(m, tmat_ref[i], preferred_element_type=f32)
    acc = acc + c3_ref[...]
    o_ref[...] = jax.nn.sigmoid(acc).astype(o_ref.dtype)       # (4B, 196)


def ae_fused_forward(layer_args, x):
    """x: (2, 1, 28, 28) -> (2, 1, 28, 28), one pallas_call."""
    B, C, H, W = x.shape
    assert (B, C, H, W) == (_BATCH, 1, 28, 28), "layer args are repacked for (2,1,28,28)"

    # Wrapper-side im2col of the *input* (pure data movement): rows = (tap, b).
    xpad = jnp.pad(x[:, 0], ((0, 0), (1, 1), (1, 1)))
    slabs = [xpad[:, kh:kh + 28:2, kw:kw + 28:2]
             for kh in range(3) for kw in range(3)]
    patches = jnp.stack(slabs, axis=0).reshape(9 * B, 14 * 14).astype(jnp.float32)

    def _conv_cost(co, ci, sin, sout):
        return 2 * (9 * co * B * ci * B * sin + co * B * 9 * sin * sout)
    flops = (2 * 8 * B * 9 * B * 196
             + _conv_cost(16, 8, 196, 49) + _conv_cost(32, 16, 49, 9)
             + _conv_cost(16, 32, 9, 49) + _conv_cost(8, 16, 49, 196)
             + 2 * (4 * 4 * B * 8 * B * 196 + 3 * 4 * B * 196 * 196)
             + 2 * B * (288 * 128 + 128 * 128 + 128 * 288)
             + 2 * 32 * 64 * 2 * 9)
    bytes_accessed = (int(patches.size) * 4 + 4 * B * 196 * 4 +
                      sum(int(a.size) * a.dtype.itemsize for a in layer_args))

    y8 = pl.pallas_call(
        _ae_fused_kernel,
        out_shape=jax.ShapeDtypeStruct((4 * B, 196), jnp.float32),
        in_specs=[pl.BlockSpec(memory_space=pltpu.MemorySpace.VMEM)]
        * (1 + len(layer_args)),
        out_specs=pl.BlockSpec(memory_space=pltpu.MemorySpace.VMEM),
        compiler_params=pltpu.CompilerParams(vmem_limit_bytes=8 * 1024 * 1024),
        cost_estimate=pl.CostEstimate(flops=int(flops),
                                      transcendentals=4 * B * 196 + 128,
                                      bytes_accessed=int(bytes_accessed)),
    )(patches, *layer_args)

    # Interleave the 4 output phases (rows are (phase, b)) -> (B, 1, 28, 28).
    y = (y8.reshape(2, 2, B, 14, 14)
            .transpose(2, 3, 0, 4, 1)
            .reshape(B, 28, 28))
    return y[:, None, :, :]


# ----------------------------------------------------------------------------
# One-time host-side repack: true conv weights -> per-tap channel mixes,
# 0/1 spatial-selection stacks, BN averaging matrices, fused latent GEMM.
# ----------------------------------------------------------------------------
def prepare_args(params, batch=_BATCH):
    B = batch
    P = {k: np.asarray(v, np.float32) for k, v in params.items()}
    eyeB = np.eye(B, dtype=np.float32)

    def conv_mix(w):                      # (Cout, Cin, 3, 3) -> (9, Cout*B, Cin*B)
        Cout, Cin = w.shape[:2]
        m = np.zeros((9, Cout * B, Cin * B), np.float32)
        for kh in range(3):
            for kw in range(3):
                m[kh * 3 + kw] = np.kron(w[:, :, kh, kw], eyeB)
        return m

    def convT_mix(w):                     # (Cin, Cout, 3, 3) -> (9, Cout*B, Cin*B)
        Cin, Cout = w.shape[:2]
        m = np.zeros((9, Cout * B, Cin * B), np.float32)
        for kh in range(3):
            for kw in range(3):
                m[kh * 3 + kw] = np.kron(w[:, :, kh, kw].T, eyeB)
        return m

    def conv_spatial(Hin, Win, stride, pad):
        Hout = (Hin + 2 * pad - 3) // stride + 1
        Wout = (Win + 2 * pad - 3) // stride + 1
        sp = np.zeros((9, Hin * Win, Hout * Wout), np.float32)
        for kh in range(3):
            for kw in range(3):
                t = kh * 3 + kw
                for ho in range(Hout):
                    hi = stride * ho + kh - pad
                    if not (0 <= hi < Hin):
                        continue
                    for wo in range(Wout):
                        wi = stride * wo + kw - pad
                        if 0 <= wi < Win:
                            sp[t, hi * Win + wi, ho * Wout + wo] = 1.0
        return sp.reshape(9 * Hin * Win, Hout * Wout)

    def convT_spatial(Hin, Win, stride, pad, opad):
        Hout = (Hin - 1) * stride - 2 * pad + 3 + opad
        Wout = (Win - 1) * stride - 2 * pad + 3 + opad
        sp = np.zeros((9, Hin * Win, Hout * Wout), np.float32)
        for kh in range(3):
            for kw in range(3):
                t = kh * 3 + kw
                for hi in range(Hin):
                    ho = stride * hi - pad + kh
                    if not (0 <= ho < Hout):
                        continue
                    for wi in range(Win):
                        wo = stride * wi - pad + kw
                        if 0 <= wo < Wout:
                            sp[t, hi * Win + wi, ho * Wout + wo] = 1.0
        return sp.reshape(9 * Hin * Win, Hout * Wout)

    def rows(v):                          # per-(channel, batch) row vector
        return np.repeat(np.asarray(v, np.float32), B).reshape(-1, 1)

    def bn_avg(C, count):
        return (np.kron(np.eye(C, dtype=np.float32),
                        np.ones((B, B), np.float32)) / float(count))

    # conv1 folded with the batch identity (consumes wrapper im2col patches)
    w1k = np.kron(P["e_conv1_w"].reshape(8, 9), eyeB)          # (8B, 9B)

    # convT3: phase-grouped channel mixes + translation matrices (14x14 grid)
    taus = [(0, 0), (0, 1), (1, 0), (1, 1)]
    w3t = P["d_ct3_w"]                                         # (8, 1, 3, 3)
    wt3 = np.zeros((4, 4 * B, 8 * B), np.float32)

    def _axis_hits(d):
        hits = []
        for k in range(3):
            num = d + 1 - k
            if num % 2 == 0 and num // 2 in (0, 1):
                hits.append((k, num // 2))
        return hits

    for dh in (0, 1):
        for dw in (0, 1):
            ph = dh * 2 + dw
            for kh, th in _axis_hits(dh):
                for kw, tw in _axis_hits(dw):
                    ti = taus.index((th, tw))
                    wt3[ti, ph * B:(ph + 1) * B, :] += np.kron(
                        w3t[:, 0, kh, kw][None, :], eyeB)

    tmats = np.zeros((3, 196, 196), np.float32)
    for idx, (th, tw) in enumerate(taus[1:]):
        for i in range(14):
            if i + th >= 14:
                continue
            for j in range(14):
                if j + tw >= 14:
                    continue
                tmats[idx, (i + th) * 14 + (j + tw), i * 14 + j] = 1.0

    # decoder unflatten scatter: place y4[:, 9c:9c+9] at rows (c, b)
    sdec = np.zeros((32, 32 * B, B), np.float32)
    for c in range(32):
        for b in range(B):
            sdec[c, c * B + b, b] = 1.0

    # latent bottleneck pre-composed (Linear(128,2) -> Linear(2,128), no act)
    wlat = P["e_fc2_w"].T @ P["d_fc1_w"].T                     # (128, 128)
    blat = P["d_fc1_w"] @ P["e_fc2_b"] + P["d_fc1_b"]          # (128,)

    bf16 = lambda a: jnp.asarray(a, jnp.bfloat16)
    f32 = lambda a: jnp.asarray(a, jnp.float32)
    row1 = lambda a: jnp.asarray(a, jnp.float32).reshape(1, -1)

    return (
        bf16(w1k), f32(rows(P["e_conv1_b"])),
        bf16(conv_mix(P["e_conv2_w"])), bf16(conv_spatial(14, 14, 2, 1)),
        f32(rows(P["e_conv2_b"])),
        f32(bn_avg(16, B * 49)), f32(rows(P["e_bn_g"])), f32(rows(P["e_bn_b"])),
        bf16(conv_mix(P["e_conv3_w"])), bf16(conv_spatial(7, 7, 2, 0)),
        f32(rows(P["e_conv3_b"])),
        bf16(P["e_fc1_w"].T), row1(P["e_fc1_b"]),
        bf16(wlat), row1(blat),
        bf16(P["d_fc2_w"].T), row1(P["d_fc2_b"]),
        bf16(sdec),
        bf16(convT_mix(P["d_ct1_w"])), bf16(convT_spatial(3, 3, 2, 0, 0)),
        f32(rows(P["d_ct1_b"])),
        f32(rows(P["d_bn1_g"])), f32(rows(P["d_bn1_b"])),
        bf16(convT_mix(P["d_ct2_w"])), bf16(convT_spatial(7, 7, 2, 1, 1)),
        f32(rows(P["d_ct2_b"])),
        f32(bn_avg(8, B * 196)), f32(rows(P["d_bn2_g"])), f32(rows(P["d_bn2_b"])),
        bf16(wt3), bf16(tmats), f32(np.asarray(P["d_ct3_b"]).reshape(1, 1)),
    )


# ----------------------------------------------------------------------------
# Deterministic synthetic parameters (shapes exactly as in AE.__init__).
# ----------------------------------------------------------------------------
def init_params(key):
    ks = jax.random.split(key, 16)

    def w(k, shape, scale=0.05):
        return (scale * jax.random.normal(k, shape)).astype(jnp.float32)

    z = lambda n: jnp.zeros((n,), jnp.float32)
    o = lambda n: jnp.ones((n,), jnp.float32)
    return {
        "e_conv1_w": w(ks[0], (8, 1, 3, 3)),   "e_conv1_b": z(8),
        "e_conv2_w": w(ks[1], (16, 8, 3, 3)),  "e_conv2_b": z(16),
        "e_bn_g": o(16),                        "e_bn_b": z(16),
        "e_conv3_w": w(ks[2], (32, 16, 3, 3)), "e_conv3_b": z(32),
        "e_fc1_w": w(ks[3], (128, 288)),       "e_fc1_b": z(128),
        "e_fc2_w": w(ks[4], (2, 128)),         "e_fc2_b": z(2),
        "d_fc1_w": w(ks[5], (128, 2)),         "d_fc1_b": z(128),
        "d_fc2_w": w(ks[6], (288, 128)),       "d_fc2_b": z(288),
        "d_ct1_w": w(ks[7], (32, 16, 3, 3)),   "d_ct1_b": z(16),
        "d_bn1_g": o(16),                       "d_bn1_b": z(16),
        "d_ct2_w": w(ks[8], (16, 8, 3, 3)),    "d_ct2_b": z(8),
        "d_bn2_g": o(8),                        "d_bn2_b": z(8),
        "d_ct3_w": w(ks[9], (8, 1, 3, 3)),     "d_ct3_b": z(1),
    }


# ----------------------------------------------------------------------------
# Pure-JAX f32 reference of the PyTorch module (for tolerance validation).
# ----------------------------------------------------------------------------
def _conv_ref(x, w, b, s, p):
    y = lax.conv_general_dilated(x, w, (s, s), ((p, p), (p, p)),
                                 dimension_numbers=("NCHW", "OIHW", "NCHW"))
    return y + b.reshape(1, -1, 1, 1)


def _convT_ref(x, w, b, s, p, op):
    k = w.shape[2]
    w_eff = jnp.flip(w, (2, 3)).transpose(1, 0, 2, 3)      # (Cout, Cin, k, k)
    pad = ((k - 1 - p, k - 1 - p + op), (k - 1 - p, k - 1 - p + op))
    y = lax.conv_general_dilated(x, w_eff, (1, 1), pad, lhs_dilation=(s, s),
                                 dimension_numbers=("NCHW", "OIHW", "NCHW"))
    return y + b.reshape(1, -1, 1, 1)


def _bn_ref(x, g, b, eps=1e-5):
    mean = x.mean(axis=(0, 2, 3), keepdims=True)
    var = ((x - mean) ** 2).mean(axis=(0, 2, 3), keepdims=True)
    return (x - mean) * lax.rsqrt(var + eps) * g.reshape(1, -1, 1, 1) + b.reshape(1, -1, 1, 1)


def ae_reference(params, x):
    relu = lambda v: jnp.maximum(v, 0.0)
    B = x.shape[0]
    h = relu(_conv_ref(x, params["e_conv1_w"], params["e_conv1_b"], 2, 1))
    h = relu(_bn_ref(_conv_ref(h, params["e_conv2_w"], params["e_conv2_b"], 2, 1),
                     params["e_bn_g"], params["e_bn_b"]))
    h = relu(_conv_ref(h, params["e_conv3_w"], params["e_conv3_b"], 2, 0))
    h = h.reshape(B, 288)
    h = relu(h @ params["e_fc1_w"].T + params["e_fc1_b"])
    z = h @ params["e_fc2_w"].T + params["e_fc2_b"]
    h = relu(z @ params["d_fc1_w"].T + params["d_fc1_b"])
    h = relu(h @ params["d_fc2_w"].T + params["d_fc2_b"])
    h = h.reshape(B, 32, 3, 3)
    h = relu(_bn_ref(_convT_ref(h, params["d_ct1_w"], params["d_ct1_b"], 2, 0, 0),
                     params["d_bn1_g"], params["d_bn1_b"]))
    h = relu(_bn_ref(_convT_ref(h, params["d_ct2_w"], params["d_ct2_b"], 2, 1, 1),
                     params["d_bn2_g"], params["d_bn2_b"]))
    return jax.nn.sigmoid(_convT_ref(h, params["d_ct3_w"], params["d_ct3_b"], 2, 1, 1))


if __name__ == "__main__":
    key = jax.random.PRNGKey(0)
    pkey, xkey = jax.random.split(key)
    params = init_params(pkey)
    # Linear(3*3*32, 128) pins the spatial size: input must be (B, 1, 28, 28).
    x = jax.random.uniform(xkey, (2, 1, 28, 28), dtype=jnp.float32)

    layer_args = prepare_args(params)        # one-time weight repack (host side)

    fwd = jax.jit(ae_fused_forward)
    y = fwd(layer_args, x)
    jax.block_until_ready(y)

    y_ref = jax.jit(ae_reference)(params, x)
    jax.block_until_ready(y_ref)

    assert y.shape == (2, 1, 28, 28), y.shape
    assert bool(jnp.all(jnp.isfinite(y)))
    assert bool(jnp.all((y >= 0.0) & (y <= 1.0)))          # sigmoid output range
    max_err = float(jnp.max(jnp.abs(y - y_ref)))
    assert max_err < 5e-2, f"mismatch vs f32 reference: {max_err}"
    print("KERNEL_OK")
</pallas_src>

<mosaic_0001>
module attributes {stable_mosaic.version = 11 : i64} {
  func.func @_ae_fused_kernel(%arg0: memref<18x196xf32, #tpu.memory_space<vmem>>, %arg1: memref<16x18xbf16, #tpu.memory_space<vmem>>, %arg2: memref<16x1xf32, #tpu.memory_space<vmem>>, %arg3: memref<9x32x16xbf16, #tpu.memory_space<vmem>>, %arg4: memref<1764x49xbf16, #tpu.memory_space<vmem>>, %arg5: memref<32x1xf32, #tpu.memory_space<vmem>>, %arg6: memref<32x32xf32, #tpu.memory_space<vmem>>, %arg7: memref<32x1xf32, #tpu.memory_space<vmem>>, %arg8: memref<32x1xf32, #tpu.memory_space<vmem>>, %arg9: memref<9x64x32xbf16, #tpu.memory_space<vmem>>, %arg10: memref<441x9xbf16, #tpu.memory_space<vmem>>, %arg11: memref<64x1xf32, #tpu.memory_space<vmem>>, %arg12: memref<288x128xbf16, #tpu.memory_space<vmem>>, %arg13: memref<1x128xf32, #tpu.memory_space<vmem>>, %arg14: memref<128x128xbf16, #tpu.memory_space<vmem>>, %arg15: memref<1x128xf32, #tpu.memory_space<vmem>>, %arg16: memref<128x288xbf16, #tpu.memory_space<vmem>>, %arg17: memref<1x288xf32, #tpu.memory_space<vmem>>, %arg18: memref<32x64x2xbf16, #tpu.memory_space<vmem>>, %arg19: memref<9x32x64xbf16, #tpu.memory_space<vmem>>, %arg20: memref<81x49xbf16, #tpu.memory_space<vmem>>, %arg21: memref<32x1xf32, #tpu.memory_space<vmem>>, %arg22: memref<32x1xf32, #tpu.memory_space<vmem>>, %arg23: memref<32x1xf32, #tpu.memory_space<vmem>>, %arg24: memref<9x16x32xbf16, #tpu.memory_space<vmem>>, %arg25: memref<441x196xbf16, #tpu.memory_space<vmem>>, %arg26: memref<16x1xf32, #tpu.memory_space<vmem>>, %arg27: memref<16x16xf32, #tpu.memory_space<vmem>>, %arg28: memref<16x1xf32, #tpu.memory_space<vmem>>, %arg29: memref<16x1xf32, #tpu.memory_space<vmem>>, %arg30: memref<4x8x16xbf16, #tpu.memory_space<vmem>>, %arg31: memref<3x196x196xbf16, #tpu.memory_space<vmem>>, %arg32: memref<1x1xf32, #tpu.memory_space<vmem>>, %arg33: memref<8x196xf32, #tpu.memory_space<vmem>>) attributes {dimension_semantics = [], scalar_prefetch = 0 : i64, scratch_operands = 0 : i64, tpu.core_type = #tpu.core_type<tc>} {
    %c0 = arith.constant 0 : index
    %c0_0 = arith.constant 0 : index
    %0 = vector.load %arg1[%c0, %c0_0] : memref<16x18xbf16, #tpu.memory_space<vmem>>, vector<16x18xbf16>
    %c0_1 = arith.constant 0 : index
    %c0_2 = arith.constant 0 : index
    %1 = vector.load %arg0[%c0_1, %c0_2] : memref<18x196xf32, #tpu.memory_space<vmem>>, vector<18x196xf32>
    %2 = arith.truncf %1 : vector<18x196xf32> to vector<18x196xbf16>
    %cst = arith.constant dense<0.000000e+00> : vector<16x196xf32>
    %3 = tpu.matmul %0, %2, %cst {dimension_numbers = #tpu.dot_dimension_numbers<[1], [0], [0], [1], [0, 0, 1, 1], [], []>} : vector<16x18xbf16>, vector<18x196xbf16>, vector<16x196xf32> -> vector<16x196xf32>
    %c0_3 = arith.constant 0 : index
    %c0_4 = arith.constant 0 : index
    %4 = vector.load %arg2[%c0_3, %c0_4] : memref<16x1xf32, #tpu.memory_space<vmem>>, vector<16x1xf32>
    %5 = vector.broadcast %4 : vector<16x1xf32> to vector<16x196xf32>
    %6 = arith.addf %3, %5 : vector<16x196xf32>
    %cst_5 = arith.constant 0.000000e+00 : f32
    %7 = vector.broadcast %cst_5 : f32 to vector<16x196xf32>
    %8 = arith.maximumf %6, %7 : vector<16x196xf32>
    %9 = arith.truncf %8 : vector<16x196xf32> to vector<16x196xbf16>
    %c0_6 = arith.constant 0 : index
    %c0_7 = arith.constant 0 : index
    %c0_8 = arith.constant 0 : index
    %10 = vector.load %arg3[%c0_6, %c0_7, %c0_8] : memref<9x32x16xbf16, #tpu.memory_space<vmem>>, vector<1x32x16xbf16>
    %11 = vector.shape_cast %10 : vector<1x32x16xbf16> to vector<32x16xbf16>
    %cst_9 = arith.constant dense<0.000000e+00> : vector<32x196xf32>
    %12 = tpu.matmul %11, %9, %cst_9 {dimension_numbers = #tpu.dot_dimension_numbers<[1], [0], [0], [1], [0, 0, 1, 1], [], []>} : vector<32x16xbf16>, vector<16x196xbf16>, vector<32x196xf32> -> vector<32x196xf32>
    %13 = arith.truncf %12 : vector<32x196xf32> to vector<32x196xbf16>
    %c1 = arith.constant 1 : index
    %c0_10 = arith.constant 0 : index
    %c0_11 = arith.constant 0 : index
    %14 = vector.load %arg3[%c1, %c0_10, %c0_11] : memref<9x32x16xbf16, #tpu.memory_space<vmem>>, vector<1x32x16xbf16>
    %15 = vector.shape_cast %14 : vector<1x32x16xbf16> to vector<32x16xbf16>
    %cst_12 = arith.constant dense<0.000000e+00> : vector<32x196xf32>
    %16 = tpu.matmul %15, %9, %cst_12 {dimension_numbers = #tpu.dot_dimension_numbers<[1], [0], [0], [1], [0, 0, 1, 1], [], []>} : vector<32x16xbf16>, vector<16x196xbf16>, vector<32x196xf32> -> vector<32x196xf32>
    %17 = arith.truncf %16 : vector<32x196xf32> to vector<32x196xbf16>
    %c2 = arith.constant 2 : index
    %c0_13 = arith.constant 0 : index
    %c0_14 = arith.constant 0 : index
    %18 = vector.load %arg3[%c2, %c0_13, %c0_14] : memref<9x32x16xbf16, #tpu.memory_space<vmem>>, vector<1x32x16xbf16>
    %19 = vector.shape_cast %18 : vector<1x32x16xbf16> to vector<32x16xbf16>
    %cst_15 = arith.constant dense<0.000000e+00> : vector<32x196xf32>
    %20 = tpu.matmul %19, %9, %cst_15 {dimension_numbers = #tpu.dot_dimension_numbers<[1], [0], [0], [1], [0, 0, 1, 1], [], []>} : vector<32x16xbf16>, vector<16x196xbf16>, vector<32x196xf32> -> vector<32x196xf32>
    %21 = arith.truncf %20 : vector<32x196xf32> to vector<32x196xbf16>
    %c3 = arith.constant 3 : index
    %c0_16 = arith.constant 0 : index
    %c0_17 = arith.constant 0 : index
    %22 = vector.load %arg3[%c3, %c0_16, %c0_17] : memref<9x32x16xbf16, #tpu.memory_space<vmem>>, vector<1x32x16xbf16>
    %23 = vector.shape_cast %22 : vector<1x32x16xbf16> to vector<32x16xbf16>
    %cst_18 = arith.constant dense<0.000000e+00> : vector<32x196xf32>
    %24 = tpu.matmul %23, %9, %cst_18 {dimension_numbers = #tpu.dot_dimension_numbers<[1], [0], [0], [1], [0, 0, 1, 1], [], []>} : vector<32x16xbf16>, vector<16x196xbf16>, vector<32x196xf32> -> vector<32x196xf32>
    %25 = arith.truncf %24 : vector<32x196xf32> to vector<32x196xbf16>
    %c4 = arith.constant 4 : index
    %c0_19 = arith.constant 0 : index
    %c0_20 = arith.constant 0 : index
    %26 = vector.load %arg3[%c4, %c0_19, %c0_20] : memref<9x32x16xbf16, #tpu.memory_space<vmem>>, vector<1x32x16xbf16>
    %27 = vector.shape_cast %26 : vector<1x32x16xbf16> to vector<32x16xbf16>
    %cst_21 = arith.constant dense<0.000000e+00> : vector<32x196xf32>
    %28 = tpu.matmul %27, %9, %cst_21 {dimension_numbers = #tpu.dot_dimension_numbers<[1], [0], [0], [1], [0, 0, 1, 1], [], []>} : vector<32x16xbf16>, vector<16x196xbf16>, vector<32x196xf32> -> vector<32x196xf32>
    %29 = arith.truncf %28 : vector<32x196xf32> to vector<32x196xbf16>
    %c5 = arith.constant 5 : index
    %c0_22 = arith.constant 0 : index
    %c0_23 = arith.constant 0 : index
    %30 = vector.load %arg3[%c5, %c0_22, %c0_23] : memref<9x32x16xbf16, #tpu.memory_space<vmem>>, vector<1x32x16xbf16>
    %31 = vector.shape_cast %30 : vector<1x32x16xbf16> to vector<32x16xbf16>
    %cst_24 = arith.constant dense<0.000000e+00> : vector<32x196xf32>
    %32 = tpu.matmul %31, %9, %cst_24 {dimension_numbers = #tpu.dot_dimension_numbers<[1], [0], [0], [1], [0, 0, 1, 1], [], []>} : vector<32x16xbf16>, vector<16x196xbf16>, vector<32x196xf32> -> vector<32x196xf32>
    %33 = arith.truncf %32 : vector<32x196xf32> to vector<32x196xbf16>
    %c6 = arith.constant 6 : index
    %c0_25 = arith.constant 0 : index
    %c0_26 = arith.constant 0 : index
    %34 = vector.load %arg3[%c6, %c0_25, %c0_26] : memref<9x32x16xbf16, #tpu.memory_space<vmem>>, vector<1x32x16xbf16>
    %35 = vector.shape_cast %34 : vector<1x32x16xbf16> to vector<32x16xbf16>
    %cst_27 = arith.constant dense<0.000000e+00> : vector<32x196xf32>
    %36 = tpu.matmul %35, %9, %cst_27 {dimension_numbers = #tpu.dot_dimension_numbers<[1], [0], [0], [1], [0, 0, 1, 1], [], []>} : vector<32x16xbf16>, vector<16x196xbf16>, vector<32x196xf32> -> vector<32x196xf32>
    %37 = arith.truncf %36 : vector<32x196xf32> to vector<32x196xbf16>
    %c7 = arith.constant 7 : index
    %c0_28 = arith.constant 0 : index
    %c0_29 = arith.constant 0 : index
    %38 = vector.load %arg3[%c7, %c0_28, %c0_29] : memref<9x32x16xbf16, #tpu.memory_space<vmem>>, vector<1x32x16xbf16>
    %39 = vector.shape_cast %38 : vector<1x32x16xbf16> to vector<32x16xbf16>
    %cst_30 = arith.constant dense<0.000000e+00> : vector<32x196xf32>
    %40 = tpu.matmul %39, %9, %cst_30 {dimension_numbers = #tpu.dot_dimension_numbers<[1], [0], [0], [1], [0, 0, 1, 1], [], []>} : vector<32x16xbf16>, vector<16x196xbf16>, vector<32x196xf32> -> vector<32x196xf32>
    %41 = arith.truncf %40 : vector<32x196xf32> to vector<32x196xbf16>
    %c8 = arith.constant 8 : index
    %c0_31 = arith.constant 0 : index
    %c0_32 = arith.constant 0 : index
    %42 = vector.load %arg3[%c8, %c0_31, %c0_32] : memref<9x32x16xbf16, #tpu.memory_space<vmem>>, vector<1x32x16xbf16>
    %43 = vector.shape_cast %42 : vector<1x32x16xbf16> to vector<32x16xbf16>
    %cst_33 = arith.constant dense<0.000000e+00> : vector<32x196xf32>
    %44 = tpu.matmul %43, %9, %cst_33 {dimension_numbers = #tpu.dot_dimension_numbers<[1], [0], [0], [1], [0, 0, 1, 1], [], []>} : vector<32x16xbf16>, vector<16x196xbf16>, vector<32x196xf32> -> vector<32x196xf32>
    %45 = arith.truncf %44 : vector<32x196xf32> to vector<32x196xbf16>
    %46 = tpu.concatenate %13, %17, %21, %25, %29, %33, %37, %41, %45 in 1 : vector<32x196xbf16>, vector<32x196xbf16>, vector<32x196xbf16>, vector<32x196xbf16>, vector<32x196xbf16>, vector<32x196xbf16>, vector<32x196xbf16>, vector<32x196xbf16>, vector<32x196xbf16> -> vector<32x1764xbf16>
    %c0_34 = arith.constant 0 : index
    %c0_35 = arith.constant 0 : index
    %47 = vector.load %arg4[%c0_34, %c0_35] : memref<1764x49xbf16, #tpu.memory_space<vmem>>, vector<1764x49xbf16>
    %cst_36 = arith.constant dense<0.000000e+00> : vector<32x49xf32>
    %48 = tpu.matmul %46, %47, %cst_36 {dimension_numbers = #tpu.dot_dimension_numbers<[1], [0], [0], [1], [0, 0, 1, 1], [], []>} : vector<32x1764xbf16>, vector<1764x49xbf16>, vector<32x49xf32> -> vector<32x49xf32>
    %c0_37 = arith.constant 0 : index
    %c0_38 = arith.constant 0 : index
    %49 = vector.load %arg5[%c0_37, %c0_38] : memref<32x1xf32, #tpu.memory_space<vmem>>, vector<32x1xf32>
    %50 = vector.broadcast %49 : vector<32x1xf32> to vector<32x49xf32>
    %51 = arith.addf %48, %50 : vector<32x49xf32>
    %cst_39 = arith.constant dense<0.000000e+00> : vector<32xf32>
    %52 = vector.multi_reduction <add>, %51, %cst_39 [1] : vector<32x49xf32> to vector<32xf32>
    %53 = vector.shape_cast %52 : vector<32xf32> to vector<32x1xf32>
    %54 = arith.mulf %51, %51 : vector<32x49xf32>
    %cst_40 = arith.constant dense<0.000000e+00> : vector<32xf32>
    %55 = vector.multi_reduction <add>, %54, %cst_40 [1] : vector<32x49xf32> to vector<32xf32>
    %56 = vector.shape_cast %55 : vector<32xf32> to vector<32x1xf32>
    %c0_41 = arith.constant 0 : index
    %c0_42 = arith.constant 0 : index
    %57 = vector.load %arg6[%c0_41, %c0_42] : memref<32x32xf32, #tpu.memory_space<vmem>>, vector<32x32xf32>
    %cst_43 = arith.constant dense<0.000000e+00> : vector<32x1xf32>
    %58 = tpu.matmul %57, %53, %cst_43 {dimension_numbers = #tpu.dot_dimension_numbers<[1], [0], [0], [1], [0, 0, 1, 1], [], []>} : vector<32x32xf32>, vector<32x1xf32>, vector<32x1xf32> -> vector<32x1xf32>
    %c0_44 = arith.constant 0 : index
    %c0_45 = arith.constant 0 : index
    %59 = vector.load %arg6[%c0_44, %c0_45] : memref<32x32xf32, #tpu.memory_space<vmem>>, vector<32x32xf32>
    %cst_46 = arith.constant dense<0.000000e+00> : vector<32x1xf32>
    %60 = tpu.matmul %59, %56, %cst_46 {dimension_numbers = #tpu.dot_dimension_numbers<[1], [0], [0], [1], [0, 0, 1, 1], [], []>} : vector<32x32xf32>, vector<32x1xf32>, vector<32x1xf32> -> vector<32x1xf32>
    %61 = arith.mulf %58, %58 : vector<32x1xf32>
    %62 = arith.subf %60, %61 : vector<32x1xf32>
    %c0_47 = arith.constant 0 : index
    %c0_48 = arith.constant 0 : index
    %63 = vector.load %arg7[%c0_47, %c0_48] : memref<32x1xf32, #tpu.memory_space<vmem>>, vector<32x1xf32>
    %cst_49 = arith.constant 9.99999974E-6 : f32
    %64 = vector.broadcast %cst_49 : f32 to vector<32x1xf32>
    %65 = arith.addf %62, %64 : vector<32x1xf32>
    %66 = math.rsqrt %65 : vector<32x1xf32>
    %67 = arith.mulf %63, %66 : vector<32x1xf32>
    %68 = vector.broadcast %58 : vector<32x1xf32> to vector<32x49xf32>
    %69 = arith.subf %51, %68 : vector<32x49xf32>
    %70 = vector.broadcast %67 : vector<32x1xf32> to vector<32x49xf32>
    %71 = arith.mulf %69, %70 : vector<32x49xf32>
    %c0_50 = arith.constant 0 : index
    %c0_51 = arith.constant 0 : index
    %72 = vector.load %arg8[%c0_50, %c0_51] : memref<32x1xf32, #tpu.memory_space<vmem>>, vector<32x1xf32>
    %73 = vector.broadcast %72 : vector<32x1xf32> to vector<32x49xf32>
    %74 = arith.addf %71, %73 : vector<32x49xf32>
    %cst_52 = arith.constant 0.000000e+00 : f32
    %75 = vector.broadcast %cst_52 : f32 to vector<32x49xf32>
    %76 = arith.maximumf %74, %75 : vector<32x49xf32>
    %77 = arith.truncf %76 : vector<32x49xf32> to vector<32x49xbf16>
    %c0_53 = arith.constant 0 : index
    %c0_54 = arith.constant 0 : index
    %c0_55 = arith.constant 0 : index
    %78 = vector.load %arg9[%c0_53, %c0_54, %c0_55] : memref<9x64x32xbf16, #tpu.memory_space<vmem>>, vector<1x64x32xbf16>
    %79 = vector.shape_cast %78 : vector<1x64x32xbf16> to vector<64x32xbf16>
    %cst_56 = arith.constant dense<0.000000e+00> : vector<64x49xf32>
    %80 = tpu.matmul %79, %77, %cst_56 {dimension_numbers = #tpu.dot_dimension_numbers<[1], [0], [0], [1], [0, 0, 1, 1], [], []>} : vector<64x32xbf16>, vector<32x49xbf16>, vector<64x49xf32> -> vector<64x49xf32>
    %81 = arith.truncf %80 : vector<64x49xf32> to vector<64x49xbf16>
    %c1_57 = arith.constant 1 : index
    %c0_58 = arith.constant 0 : index
    %c0_59 = arith.constant 0 : index
    %82 = vector.load %arg9[%c1_57, %c0_58, %c0_59] : memref<9x64x32xbf16, #tpu.memory_space<vmem>>, vector<1x64x32xbf16>
    %83 = vector.shape_cast %82 : vector<1x64x32xbf16> to vector<64x32xbf16>
    %cst_60 = arith.constant dense<0.000000e+00> : vector<64x49xf32>
    %84 = tpu.matmul %83, %77, %cst_60 {dimension_numbers = #tpu.dot_dimension_numbers<[1], [0], [0], [1], [0, 0, 1, 1], [], []>} : vector<64x32xbf16>, vector<32x49xbf16>, vector<64x49xf32> -> vector<64x49xf32>
    %85 = arith.truncf %84 : vector<64x49xf32> to vector<64x49xbf16>
    %c2_61 = arith.constant 2 : index
    %c0_62 = arith.constant 0 : index
    %c0_63 = arith.constant 0 : index
    %86 = vector.load %arg9[%c2_61, %c0_62, %c0_63] : memref<9x64x32xbf16, #tpu.memory_space<vmem>>, vector<1x64x32xbf16>
    %87 = vector.shape_cast %86 : vector<1x64x32xbf16> to vector<64x32xbf16>
    %cst_64 = arith.constant dense<0.000000e+00> : vector<64x49xf32>
    %88 = tpu.matmul %87, %77, %cst_64 {dimension_numbers = #tpu.dot_dimension_numbers<[1], [0], [0], [1], [0, 0, 1, 1], [], []>} : vector<64x32xbf16>, vector<32x49xbf16>, vector<64x49xf32> -> vector<64x49xf32>
    %89 = arith.truncf %88 : vector<64x49xf32> to vector<64x49xbf16>
    %c3_65 = arith.constant 3 : index
    %c0_66 = arith.constant 0 : index
    %c0_67 = arith.constant 0 : index
    %90 = vector.load %arg9[%c3_65, %c0_66, %c0_67] : memref<9x64x32xbf16, #tpu.memory_space<vmem>>, vector<1x64x32xbf16>
    %91 = vector.shape_cast %90 : vector<1x64x32xbf16> to vector<64x32xbf16>
    %cst_68 = arith.constant dense<0.000000e+00> : vector<64x49xf32>
    %92 = tpu.matmul %91, %77, %cst_68 {dimension_numbers = #tpu.dot_dimension_numbers<[1], [0], [0], [1], [0, 0, 1, 1], [], []>} : vector<64x32xbf16>, vector<32x49xbf16>, vector<64x49xf32> -> vector<64x49xf32>
    %93 = arith.truncf %92 : vector<64x49xf32> to vector<64x49xbf16>
    %c4_69 = arith.constant 4 : index
    %c0_70 = arith.constant 0 : index
    %c0_71 = arith.constant 0 : index
    %94 = vector.load %arg9[%c4_69, %c0_70, %c0_71] : memref<9x64x32xbf16, #tpu.memory_space<vmem>>, vector<1x64x32xbf16>
    %95 = vector.shape_cast %94 : vector<1x64x32xbf16> to vector<64x32xbf16>
    %cst_72 = arith.constant dense<0.000000e+00> : vector<64x49xf32>
    %96 = tpu.matmul %95, %77, %cst_72 {dimension_numbers = #tpu.dot_dimension_numbers<[1], [0], [0], [1], [0, 0, 1, 1], [], []>} : vector<64x32xbf16>, vector<32x49xbf16>, vector<64x49xf32> -> vector<64x49xf32>
    %97 = arith.truncf %96 : vector<64x49xf32> to vector<64x49xbf16>
    %c5_73 = arith.constant 5 : index
    %c0_74 = arith.constant 0 : index
    %c0_75 = arith.constant 0 : index
    %98 = vector.load %arg9[%c5_73, %c0_74, %c0_75] : memref<9x64x32xbf16, #tpu.memory_space<vmem>>, vector<1x64x32xbf16>
    %99 = vector.shape_cast %98 : vector<1x64x32xbf16> to vector<64x32xbf16>
    %cst_76 = arith.constant dense<0.000000e+00> : vector<64x49xf32>
    %100 = tpu.matmul %99, %77, %cst_76 {dimension_numbers = #tpu.dot_dimension_numbers<[1], [0], [0], [1], [0, 0, 1, 1], [], []>} : vector<64x32xbf16>, vector<32x49xbf16>, vector<64x49xf32> -> vector<64x49xf32>
    %101 = arith.truncf %100 : vector<64x49xf32> to vector<64x49xbf16>
    %c6_77 = arith.constant 6 : index
    %c0_78 = arith.constant 0 : index
    %c0_79 = arith.constant 0 : index
    %102 = vector.load %arg9[%c6_77, %c0_78, %c0_79] : memref<9x64x32xbf16, #tpu.memory_space<vmem>>, vector<1x64x32xbf16>
    %103 = vector.shape_cast %102 : vector<1x64x32xbf16> to vector<64x32xbf16>
    %cst_80 = arith.constant dense<0.000000e+00> : vector<64x49xf32>
    %104 = tpu.matmul %103, %77, %cst_80 {dimension_numbers = #tpu.dot_dimension_numbers<[1], [0], [0], [1], [0, 0, 1, 1], [], []>} : vector<64x32xbf16>, vector<32x49xbf16>, vector<64x49xf32> -> vector<64x49xf32>
    %105 = arith.truncf %104 : vector<64x49xf32> to vector<64x49xbf16>
    %c7_81 = arith.constant 7 : index
    %c0_82 = arith.constant 0 : index
    %c0_83 = arith.constant 0 : index
    %106 = vector.load %arg9[%c7_81, %c0_82, %c0_83] : memref<9x64x32xbf16, #tpu.memory_space<vmem>>, vector<1x64x32xbf16>
    %107 = vector.shape_cast %106 : vector<1x64x32xbf16> to vector<64x32xbf16>
    %cst_84 = arith.constant dense<0.000000e+00> : vector<64x49xf32>
    %108 = tpu.matmul %107, %77, %cst_84 {dimension_numbers = #tpu.dot_dimension_numbers<[1], [0], [0], [1], [0, 0, 1, 1], [], []>} : vector<64x32xbf16>, vector<32x49xbf16>, vector<64x49xf32> -> vector<64x49xf32>
    %109 = arith.truncf %108 : vector<64x49xf32> to vector<64x49xbf16>
    %c8_85 = arith.constant 8 : index
    %c0_86 = arith.constant 0 : index
    %c0_87 = arith.constant 0 : index
    %110 = vector.load %arg9[%c8_85, %c0_86, %c0_87] : memref<9x64x32xbf16, #tpu.memory_space<vmem>>, vector<1x64x32xbf16>
    %111 = vector.shape_cast %110 : vector<1x64x32xbf16> to vector<64x32xbf16>
    %cst_88 = arith.constant dense<0.000000e+00> : vector<64x49xf32>
    %112 = tpu.matmul %111, %77, %cst_88 {dimension_numbers = #tpu.dot_dimension_numbers<[1], [0], [0], [1], [0, 0, 1, 1], [], []>} : vector<64x32xbf16>, vector<32x49xbf16>, vector<64x49xf32> -> vector<64x49xf32>
    %113 = arith.truncf %112 : vector<64x49xf32> to vector<64x49xbf16>
    %114 = tpu.concatenate %81, %85, %89, %93, %97, %101, %105, %109, %113 in 1 : vector<64x49xbf16>, vector<64x49xbf16>, vector<64x49xbf16>, vector<64x49xbf16>, vector<64x49xbf16>, vector<64x49xbf16>, vector<64x49xbf16>, vector<64x49xbf16>, vector<64x49xbf16> -> vector<64x441xbf16>
    %c0_89 = arith.constant 0 : index
    %c0_90 = arith.constant 0 : index
    %115 = vector.load %arg10[%c0_89, %c0_90] : memref<441x9xbf16, #tpu.memory_space<vmem>>, vector<441x9xbf16>
    %cst_91 = arith.constant dense<0.000000e+00> : vector<64x9xf32>
    %116 = tpu.matmul %114, %115, %cst_91 {dimension_numbers = #tpu.dot_dimension_numbers<[1], [0], [0], [1], [0, 0, 1, 1], [], []>} : vector<64x441xbf16>, vector<441x9xbf16>, vector<64x9xf32> -> vector<64x9xf32>
    %c0_92 = arith.constant 0 : index
    %c0_93 = arith.constant 0 : index
    %117 = vector.load %arg11[%c0_92, %c0_93] : memref<64x1xf32, #tpu.memory_space<vmem>>, vector<64x1xf32>
    %118 = vector.broadcast %117 : vector<64x1xf32> to vector<64x9xf32>
    %119 = arith.addf %116, %118 : vector<64x9xf32>
    %cst_94 = arith.constant 0.000000e+00 : f32
    %120 = vector.broadcast %cst_94 : f32 to vector<64x9xf32>
    %121 = arith.maximumf %119, %120 : vector<64x9xf32>
    %122 = vector.extract_strided_slice %121 {offsets = [0, 0], sizes = [2, 9], strides = [1, 1]} : vector<64x9xf32> to vector<2x9xf32>
    %123 = vector.extract_strided_slice %121 {offsets = [2, 0], sizes = [2, 9], strides = [1, 1]} : vector<64x9xf32> to vector<2x9xf32>
    %124 = vector.extract_strided_slice %121 {offsets = [4, 0], sizes = [2, 9], strides = [1, 1]} : vector<64x9xf32> to vector<2x9xf32>
    %125 = vector.extract_strided_slice %121 {offsets = [6, 0], sizes = [2, 9], strides = [1, 1]} : vector<64x9xf32> to vector<2x9xf32>
    %126 = vector.extract_strided_slice %121 {offsets = [8, 0], sizes = [2, 9], strides = [1, 1]} : vector<64x9xf32> to vector<2x9xf32>
    %127 = vector.extract_strided_slice %121 {offsets = [10, 0], sizes = [2, 9], strides = [1, 1]} : vector<64x9xf32> to vector<2x9xf32>
    %128 = vector.extract_strided_slice %121 {offsets = [12, 0], sizes = [2, 9], strides = [1, 1]} : vector<64x9xf32> to vector<2x9xf32>
    %129 = vector.extract_strided_slice %121 {offsets = [14, 0], sizes = [2, 9], strides = [1, 1]} : vector<64x9xf32> to vector<2x9xf32>
    %130 = vector.extract_strided_slice %121 {offsets = [16, 0], sizes = [2, 9], strides = [1, 1]} : vector<64x9xf32> to vector<2x9xf32>
    %131 = vector.extract_strided_slice %121 {offsets = [18, 0], sizes = [2, 9], strides = [1, 1]} : vector<64x9xf32> to vector<2x9xf32>
    %132 = vector.extract_strided_slice %121 {offsets = [20, 0], sizes = [2, 9], strides = [1, 1]} : vector<64x9xf32> to vector<2x9xf32>
    %133 = vector.extract_strided_slice %121 {offsets = [22, 0], sizes = [2, 9], strides = [1, 1]} : vector<64x9xf32> to vector<2x9xf32>
    %134 = vector.extract_strided_slice %121 {offsets = [24, 0], sizes = [2, 9], strides = [1, 1]} : vector<64x9xf32> to vector<2x9xf32>
    %135 = vector.extract_strided_slice %121 {offsets = [26, 0], sizes = [2, 9], strides = [1, 1]} : vector<64x9xf32> to vector<2x9xf32>
    %136 = vector.extract_strided_slice %121 {offsets = [28, 0], sizes = [2, 9], strides = [1, 1]} : vector<64x9xf32> to vector<2x9xf32>
    %137 = vector.extract_strided_slice %121 {offsets = [30, 0], sizes = [2, 9], strides = [1, 1]} : vector<64x9xf32> to vector<2x9xf32>
    %138 = vector.extract_strided_slice %121 {offsets = [32, 0], sizes = [2, 9], strides = [1, 1]} : vector<64x9xf32> to vector<2x9xf32>
    %139 = vector.extract_strided_slice %121 {offsets = [34, 0], sizes = [2, 9], strides = [1, 1]} : vector<64x9xf32> to vector<2x9xf32>
    %140 = vector.extract_strided_slice %121 {offsets = [36, 0], sizes = [2, 9], strides = [1, 1]} : vector<64x9xf32> to vector<2x9xf32>
    %141 = vector.extract_strided_slice %121 {offsets = [38, 0], sizes = [2, 9], strides = [1, 1]} : vector<64x9xf32> to vector<2x9xf32>
    %142 = vector.extract_strided_slice %121 {offsets = [40, 0], sizes = [2, 9], strides = [1, 1]} : vector<64x9xf32> to vector<2x9xf32>
    %143 = vector.extract_strided_slice %121 {offsets = [42, 0], sizes = [2, 9], strides = [1, 1]} : vector<64x9xf32> to vector<2x9xf32>
    %144 = vector.extract_strided_slice %121 {offsets = [44, 0], sizes = [2, 9], strides = [1, 1]} : vector<64x9xf32> to vector<2x9xf32>
    %145 = vector.extract_strided_slice %121 {offsets = [46, 0], sizes = [2, 9], strides = [1, 1]} : vector<64x9xf32> to vector<2x9xf32>
    %146 = vector.extract_strided_slice %121 {offsets = [48, 0], sizes = [2, 9], strides = [1, 1]} : vector<64x9xf32> to vector<2x9xf32>
    %147 = vector.extract_strided_slice %121 {offsets = [50, 0], sizes = [2, 9], strides = [1, 1]} : vector<64x9xf32> to vector<2x9xf32>
    %148 = vector.extract_strided_slice %121 {offsets = [52, 0], sizes = [2, 9], strides = [1, 1]} : vector<64x9xf32> to vector<2x9xf32>
    %149 = vector.extract_strided_slice %121 {offsets = [54, 0], sizes = [2, 9], strides = [1, 1]} : vector<64x9xf32> to vector<2x9xf32>
    %150 = vector.extract_strided_slice %121 {offsets = [56, 0], sizes = [2, 9], strides = [1, 1]} : vector<64x9xf32> to vector<2x9xf32>
    %151 = vector.extract_strided_slice %121 {offsets = [58, 0], sizes = [2, 9], strides = [1, 1]} : vector<64x9xf32> to vector<2x9xf32>
    %152 = vector.extract_strided_slice %121 {offsets = [60, 0], sizes = [2, 9], strides = [1, 1]} : vector<64x9xf32> to vector<2x9xf32>
    %153 = vector.extract_strided_slice %121 {offsets = [62, 0], sizes = [2, 9], strides = [1, 1]} : vector<64x9xf32> to vector<2x9xf32>
    %154 = tpu.concatenate %122, %123, %124, %125, %126, %127, %128, %129, %130, %131, %132, %133, %134, %135, %136, %137 in 1 : vector<2x9xf32>, vector<2x9xf32>, vector<2x9xf32>, vector<2x9xf32>, vector<2x9xf32>, vector<2x9xf32>, vector<2x9xf32>, vector<2x9xf32>, vector<2x9xf32>, vector<2x9xf32>, vector<2x9xf32>, vector<2x9xf32>, vector<2x9xf32>, vector<2x9xf32>, vector<2x9xf32>, vector<2x9xf32> -> vector<2x144xf32>
    %155 = tpu.concatenate %138, %139, %140, %141, %142, %143, %144, %145, %146, %147, %148, %149, %150, %151, %152, %153 in 1 : vector<2x9xf32>, vector<2x9xf32>, vector<2x9xf32>, vector<2x9xf32>, vector<2x9xf32>, vector<2x9xf32>, vector<2x9xf32>, vector<2x9xf32>, vector<2x9xf32>, vector<2x9xf32>, vector<2x9xf32>, vector<2x9xf32>, vector<2x9xf32>, vector<2x9xf32>, vector<2x9xf32>, vector<2x9xf32> -> vector<2x144xf32>
    %156 = tpu.concatenate %154, %155 in 1 : vector<2x144xf32>, vector<2x144xf32> -> vector<2x288xf32>
    %157 = arith.truncf %156 : vector<2x288xf32> to vector<2x288xbf16>
    %c0_95 = arith.constant 0 : index
    %c0_96 = arith.constant 0 : index
    %158 = vector.load %arg12[%c0_95, %c0_96] : memref<288x128xbf16, #tpu.memory_space<vmem>>, vector<288x128xbf16>
    %cst_97 = arith.constant dense<0.000000e+00> : vector<2x128xf32>
    %159 = tpu.matmul %157, %158, %cst_97 {dimension_numbers = #tpu.dot_dimension_numbers<[1], [0], [0], [1], [0, 0, 1, 1], [], []>} : vector<2x288xbf16>, vector<288x128xbf16>, vector<2x128xf32> -> vector<2x128xf32>
    %c0_98 = arith.constant 0 : index
    %c0_99 = arith.constant 0 : index
    %160 = vector.load %arg13[%c0_98, %c0_99] : memref<1x128xf32, #tpu.memory_space<vmem>>, vector<1x128xf32>
    %161 = vector.broadcast %160 : vector<1x128xf32> to vector<2x128xf32>
    %162 = arith.addf %159, %161 : vector<2x128xf32>
    %cst_100 = arith.constant 0.000000e+00 : f32
    %163 = vector.broadcast %cst_100 : f32 to vector<2x128xf32>
    %164 = arith.maximumf %162, %163 : vector<2x128xf32>
    %165 = arith.truncf %164 : vector<2x128xf32> to vector<2x128xbf16>
    %c0_101 = arith.constant 0 : index
    %c0_102 = arith.constant 0 : index
    %166 = vector.load %arg14[%c0_101, %c0_102] : memref<128x128xbf16, #tpu.memory_space<vmem>>, vector<128x128xbf16>
    %cst_103 = arith.constant dense<0.000000e+00> : vector<2x128xf32>
    %167 = tpu.matmul %165, %166, %cst_103 {dimension_numbers = #tpu.dot_dimension_numbers<[1], [0], [0], [1], [0, 0, 1, 1], [], []>} : vector<2x128xbf16>, vector<128x128xbf16>, vector<2x128xf32> -> vector<2x128xf32>
    %c0_104 = arith.constant 0 : index
    %c0_105 = arith.constant 0 : index
    %168 = vector.load %arg15[%c0_104, %c0_105] : memref<1x128xf32, #tpu.memory_space<vmem>>, vector<1x128xf32>
    %169 = vector.broadcast %168 : vector<1x128xf32> to vector<2x128xf32>
    %170 = arith.addf %167, %169 : vector<2x128xf32>
    %cst_106 = arith.constant 0.000000e+00 : f32
    %171 = vector.broadcast %cst_106 : f32 to vector<2x128xf32>
    %172 = arith.maximumf %170, %171 : vector<2x128xf32>
    %173 = arith.truncf %172 : vector<2x128xf32> to vector<2x128xbf16>
    %c0_107 = arith.constant 0 : index
    %c0_108 = arith.constant 0 : index
    %174 = vector.load %arg16[%c0_107, %c0_108] : memref<128x288xbf16, #tpu.memory_space<vmem>>, vector<128x288xbf16>
    %cst_109 = arith.constant dense<0.000000e+00> : vector<2x288xf32>
    %175 = tpu.matmul %173, %174, %cst_109 {dimension_numbers = #tpu.dot_dimension_numbers<[1], [0], [0], [1], [0, 0, 1, 1], [], []>} : vector<2x128xbf16>, vector<128x288xbf16>, vector<2x288xf32> -> vector<2x288xf32>
    %c0_110 = arith.constant 0 : index
    %c0_111 = arith.constant 0 : index
    %176 = vector.load %arg17[%c0_110, %c0_111] : memref<1x288xf32, #tpu.memory_space<vmem>>, vector<1x288xf32>
    %177 = vector.broadcast %176 : vector<1x288xf32> to vector<2x288xf32>
    %178 = arith.addf %175, %177 : vector<2x288xf32>
    %cst_112 = arith.constant 0.000000e+00 : f32
    %179 = vector.broadcast %cst_112 : f32 to vector<2x288xf32>
    %180 = arith.maximumf %178, %179 : vector<2x288xf32>
    %181 = arith.truncf %180 : vector<2x288xf32> to vector<2x288xbf16>
    %c0_113 = arith.constant 0 : index
    %c0_114 = arith.constant 0 : index
    %c0_115 = arith.constant 0 : index
    %182 = vector.load %arg18[%c0_113, %c0_114, %c0_115] : memref<32x64x2xbf16, #tpu.memory_space<vmem>>, vector<1x64x2xbf16>
    %183 = vector.shape_cast %182 : vector<1x64x2xbf16> to vector<64x2xbf16>
    %184 = vector.extract_strided_slice %181 {offsets = [0, 0], sizes = [2, 9], strides = [1, 1]} : vector<2x288xbf16> to vector<2x9xbf16>
    %cst_116 = arith.constant dense<0.000000e+00> : vector<64x9xf32>
    %185 = tpu.matmul %183, %184, %cst_116 {dimension_numbers = #tpu.dot_dimension_numbers<[1], [0], [0], [1], [0, 0, 1, 1], [], []>} : vector<64x2xbf16>, vector<2x9xbf16>, vector<64x9xf32> -> vector<64x9xf32>
    %c1_117 = arith.constant 1 : index
    %c0_118 = arith.constant 0 : index
    %c0_119 = arith.constant 0 : index
    %186 = vector.load %arg18[%c1_117, %c0_118, %c0_119] : memref<32x64x2xbf16, #tpu.memory_space<vmem>>, vector<1x64x2xbf16>
    %187 = vector.shape_cast %186 : vector<1x64x2xbf16> to vector<64x2xbf16>
    %188 = vector.extract_strided_slice %181 {offsets = [0, 9], sizes = [2, 9], strides = [1, 1]} : vector<2x288xbf16> to vector<2x9xbf16>
    %cst_120 = arith.constant dense<0.000000e+00> : vector<64x9xf32>
    %189 = tpu.matmul %187, %188, %cst_120 {dimension_numbers = #tpu.dot_dimension_numbers<[1], [0], [0], [1], [0, 0, 1, 1], [], []>} : vector<64x2xbf16>, vector<2x9xbf16>, vector<64x9xf32> -> vector<64x9xf32>
    %190 = arith.addf %185, %189 : vector<64x9xf32>
    %c2_121 = arith.constant 2 : index
    %c0_122 = arith.constant 0 : index
    %c0_123 = arith.constant 0 : index
    %191 = vector.load %arg18[%c2_121, %c0_122, %c0_123] : memref<32x64x2xbf16, #tpu.memory_space<vmem>>, vector<1x64x2xbf16>
    %192 = vector.shape_cast %191 : vector<1x64x2xbf16> to vector<64x2xbf16>
    %193 = vector.extract_strided_slice %181 {offsets = [0, 18], sizes = [2, 9], strides = [1, 1]} : vector<2x288xbf16> to vector<2x9xbf16>
    %cst_124 = arith.constant dense<0.000000e+00> : vector<64x9xf32>
    %194 = tpu.matmul %192, %193, %cst_124 {dimension_numbers = #tpu.dot_dimension_numbers<[1], [0], [0], [1], [0, 0, 1, 1], [], []>} : vector<64x2xbf16>, vector<2x9xbf16>, vector<64x9xf32> -> vector<64x9xf32>
    %195 = arith.addf %190, %194 : vector<64x9xf32>
    %c3_125 = arith.constant 3 : index
    %c0_126 = arith.constant 0 : index
    %c0_127 = arith.constant 0 : index
    %196 = vector.load %arg18[%c3_125, %c0_126, %c0_127] : memref<32x64x2xbf16, #tpu.memory_space<vmem>>, vector<1x64x2xbf16>
    %197 = vector.shape_cast %196 : vector<1x64x2xbf16> to vector<64x2xbf16>
    %198 = vector.extract_strided_slice %181 {offsets = [0, 27], sizes = [2, 9], strides = [1, 1]} : vector<2x288xbf16> to vector<2x9xbf16>
    %cst_128 = arith.constant dense<0.000000e+00> : vector<64x9xf32>
    %199 = tpu.matmul %197, %198, %cst_128 {dimension_numbers = #tpu.dot_dimension_numbers<[1], [0], [0], [1], [0, 0, 1, 1], [], []>} : vector<64x2xbf16>, vector<2x9xbf16>, vector<64x9xf32> -> vector<64x9xf32>
    %200 = arith.addf %195, %199 : vector<64x9xf32>
    %c4_129 = arith.constant 4 : index
    %c0_130 = arith.constant 0 : index
    %c0_131 = arith.constant 0 : index
    %201 = vector.load %arg18[%c4_129, %c0_130, %c0_131] : memref<32x64x2xbf16, #tpu.memory_space<vmem>>, vector<1x64x2xbf16>
    %202 = vector.shape_cast %201 : vector<1x64x2xbf16> to vector<64x2xbf16>
    %203 = vector.extract_strided_slice %181 {offsets = [0, 36], sizes = [2, 9], strides = [1, 1]} : vector<2x288xbf16> to vector<2x9xbf16>
    %cst_132 = arith.constant dense<0.000000e+00> : vector<64x9xf32>
    %204 = tpu.matmul %202, %203, %cst_132 {dimension_numbers = #tpu.dot_dimension_numbers<[1], [0], [0], [1], [0, 0, 1, 1], [], []>} : vector<64x2xbf16>, vector<2x9xbf16>, vector<64x9xf32> -> vector<64x9xf32>
    %205 = arith.addf %200, %204 : vector<64x9xf32>
    %c5_133 = arith.constant 5 : index
    %c0_134 = arith.constant 0 : index
    %c0_135 = arith.constant 0 : index
    %206 = vector.load %arg18[%c5_133, %c0_134, %c0_135] : memref<32x64x2xbf16, #tpu.memory_space<vmem>>, vector<1x64x2xbf16>
    %207 = vector.shape_cast %206 : vector<1x64x2xbf16> to vector<64x2xbf16>
    %208 = vector.extract_strided_slice %181 {offsets = [0, 45], sizes = [2, 9], strides = [1, 1]} : vector<2x288xbf16> to vector<2x9xbf16>
    %cst_136 = arith.constant dense<0.000000e+00> : vector<64x9xf32>
    %209 = tpu.matmul %207, %208, %cst_136 {dimension_numbers = #tpu.dot_dimension_numbers<[1], [0], [0], [1], [0, 0, 1, 1], [], []>} : vector<64x2xbf16>, vector<2x9xbf16>, vector<64x9xf32> -> vector<64x9xf32>
    %210 = arith.addf %205, %209 : vector<64x9xf32>
    %c6_137 = arith.constant 6 : index
    %c0_138 = arith.constant 0 : index
    %c0_139 = arith.constant 0 : index
    %211 = vector.load %arg18[%c6_137, %c0_138, %c0_139] : memref<32x64x2xbf16, #tpu.memory_space<vmem>>, vector<1x64x2xbf16>
    %212 = vector.shape_cast %211 : vector<1x64x2xbf16> to vector<64x2xbf16>
    %213 = vector.extract_strided_slice %181 {offsets = [0, 54], sizes = [2, 9], strides = [1, 1]} : vector<2x288xbf16> to vector<2x9xbf16>
    %cst_140 = arith.constant dense<0.000000e+00> : vector<64x9xf32>
    %214 = tpu.matmul %212, %213, %cst_140 {dimension_numbers = #tpu.dot_dimension_numbers<[1], [0], [0], [1], [0, 0, 1, 1], [], []>} : vector<64x2xbf16>, vector<2x9xbf16>, vector<64x9xf32> -> vector<64x9xf32>
    %215 = arith.addf %210, %214 : vector<64x9xf32>
    %c7_141 = arith.constant 7 : index
    %c0_142 = arith.constant 0 : index
    %c0_143 = arith.constant 0 : index
    %216 = vector.load %arg18[%c7_141, %c0_142, %c0_143] : memref<32x64x2xbf16, #tpu.memory_space<vmem>>, vector<1x64x2xbf16>
    %217 = vector.shape_cast %216 : vector<1x64x2xbf16> to vector<64x2xbf16>
    %218 = vector.extract_strided_slice %181 {offsets = [0, 63], sizes = [2, 9], strides = [1, 1]} : vector<2x288xbf16> to vector<2x9xbf16>
    %cst_144 = arith.constant dense<0.000000e+00> : vector<64x9xf32>
    %219 = tpu.matmul %217, %218, %cst_144 {dimension_numbers = #tpu.dot_dimension_numbers<[1], [0], [0], [1], [0, 0, 1, 1], [], []>} : vector<64x2xbf16>, vector<2x9xbf16>, vector<64x9xf32> -> vector<64x9xf32>
    %220 = arith.addf %215, %219 : vector<64x9xf32>
    %c8_145 = arith.constant 8 : index
    %c0_146 = arith.constant 0 : index
    %c0_147 = arith.constant 0 : index
    %221 = vector.load %arg18[%c8_145, %c0_146, %c0_147] : memref<32x64x2xbf16, #tpu.memory_space<vmem>>, vector<1x64x2xbf16>
    %222 = vector.shape_cast %221 : vector<1x64x2xbf16> to vector<64x2xbf16>
    %223 = vector.extract_strided_slice %181 {offsets = [0, 72], sizes = [2, 9], strides = [1, 1]} : vector<2x288xbf16> to vector<2x9xbf16>
    %cst_148 = arith.constant dense<0.000000e+00> : vector<64x9xf32>
    %224 = tpu.matmul %222, %223, %cst_148 {dimension_numbers = #tpu.dot_dimension_numbers<[1], [0], [0], [1], [0, 0, 1, 1], [], []>} : vector<64x2xbf16>, vector<2x9xbf16>, vector<64x9xf32> -> vector<64x9xf32>
    %225 = arith.addf %220, %224 : vector<64x9xf32>
    %c9 = arith.constant 9 : index
    %c0_149 = arith.constant 0 : index
    %c0_150 = arith.constant 0 : index
    %226 = vector.load %arg18[%c9, %c0_149, %c0_150] : memref<32x64x2xbf16, #tpu.memory_space<vmem>>, vector<1x64x2xbf16>
    %227 = vector.shape_cast %226 : vector<1x64x2xbf16> to vector<64x2xbf16>
    %228 = vector.extract_strided_slice %181 {offsets = [0, 81], sizes = [2, 9], strides = [1, 1]} : vector<2x288xbf16> to vector<2x9xbf16>
    %cst_151 = arith.constant dense<0.000000e+00> : vector<64x9xf32>
    %229 = tpu.matmul %227, %228, %cst_151 {dimension_numbers = #tpu.dot_dimension_numbers<[1], [0], [0], [1], [0, 0, 1, 1], [], []>} : vector<64x2xbf16>, vector<2x9xbf16>, vector<64x9xf32> -> vector<64x9xf32>
    %230 = arith.addf %225, %229 : vector<64x9xf32>
    %c10 = arith.constant 10 : index
    %c0_152 = arith.constant 0 : index
    %c0_153 = arith.constant 0 : index
    %231 = vector.load %arg18[%c10, %c0_152, %c0_153] : memref<32x64x2xbf16, #tpu.memory_space<vmem>>, vector<1x64x2xbf16>
    %232 = vector.shape_cast %231 : vector<1x64x2xbf16> to vector<64x2xbf16>
    %233 = vector.extract_strided_slice %181 {offsets = [0, 90], sizes = [2, 9], strides = [1, 1]} : vector<2x288xbf16> to vector<2x9xbf16>
    %cst_154 = arith.constant dense<0.000000e+00> : vector<64x9xf32>
    %234 = tpu.matmul %232, %233, %cst_154 {dimension_numbers = #tpu.dot_dimension_numbers<[1], [0], [0], [1], [0, 0, 1, 1], [], []>} : vector<64x2xbf16>, vector<2x9xbf16>, vector<64x9xf32> -> vector<64x9xf32>
    %235 = arith.addf %230, %234 : vector<64x9xf32>
    %c11 = arith.constant 11 : index
    %c0_155 = arith.constant 0 : index
    %c0_156 = arith.constant 0 : index
    %236 = vector.load %arg18[%c11, %c0_155, %c0_156] : memref<32x64x2xbf16, #tpu.memory_space<vmem>>, vector<1x64x2xbf16>
    %237 = vector.shape_cast %236 : vector<1x64x2xbf16> to vector<64x2xbf16>
    %238 = vector.extract_strided_slice %181 {offsets = [0, 99], sizes = [2, 9], strides = [1, 1]} : vector<2x288xbf16> to vector<2x9xbf16>
    %cst_157 = arith.constant dense<0.000000e+00> : vector<64x9xf32>
    %239 = tpu.matmul %237, %238, %cst_157 {dimension_numbers = #tpu.dot_dimension_numbers<[1], [0], [0], [1], [0, 0, 1, 1], [], []>} : vector<64x2xbf16>, vector<2x9xbf16>, vector<64x9xf32> -> vector<64x9xf32>
    %240 = arith.addf %235, %239 : vector<64x9xf32>
    %c12 = arith.constant 12 : index
    %c0_158 = arith.constant 0 : index
    %c0_159 = arith.constant 0 : index
    %241 = vector.load %arg18[%c12, %c0_158, %c0_159] : memref<32x64x2xbf16, #tpu.memory_space<vmem>>, vector<1x64x2xbf16>
    %242 = vector.shape_cast %241 : vector<1x64x2xbf16> to vector<64x2xbf16>
    %243 = vector.extract_strided_slice %181 {offsets = [0, 108], sizes = [2, 9], strides = [1, 1]} : vector<2x288xbf16> to vector<2x9xbf16>
    %cst_160 = arith.constant dense<0.000000e+00> : vector<64x9xf32>
    %244 = tpu.matmul %242, %243, %cst_160 {dimension_numbers = #tpu.dot_dimension_numbers<[1], [0], [0], [1], [0, 0, 1, 1], [], []>} : vector<64x2xbf16>, vector<2x9xbf16>, vector<64x9xf32> -> vector<64x9xf32>
    %245 = arith.addf %240, %244 : vector<64x9xf32>
    %c13 = arith.constant 13 : index
    %c0_161 = arith.constant 0 : index
    %c0_162 = arith.constant 0 : index
    %246 = vector.load %arg18[%c13, %c0_161, %c0_162] : memref<32x64x2xbf16, #tpu.memory_space<vmem>>, vector<1x64x2xbf16>
    %247 = vector.shape_cast %246 : vector<1x64x2xbf16> to vector<64x2xbf16>
    %248 = vector.extract_strided_slice %181 {offsets = [0, 117], sizes = [2, 9], strides = [1, 1]} : vector<2x288xbf16> to vector<2x9xbf16>
    %cst_163 = arith.constant dense<0.000000e+00> : vector<64x9xf32>
    %249 = tpu.matmul %247, %248, %cst_163 {dimension_numbers = #tpu.dot_dimension_numbers<[1], [0], [0], [1], [0, 0, 1, 1], [], []>} : vector<64x2xbf16>, vector<2x9xbf16>, vector<64x9xf32> -> vector<64x9xf32>
    %250 = arith.addf %245, %249 : vector<64x9xf32>
    %c14 = arith.constant 14 : index
    %c0_164 = arith.constant 0 : index
    %c0_165 = arith.constant 0 : index
    %251 = vector.load %arg18[%c14, %c0_164, %c0_165] : memref<32x64x2xbf16, #tpu.memory_space<vmem>>, vector<1x64x2xbf16>
    %252 = vector.shape_cast %251 : vector<1x64x2xbf16> to vector<64x2xbf16>
    %253 = vector.extract_strided_slice %181 {offsets = [0, 126], sizes = [2, 9], strides = [1, 1]} : vector<2x288xbf16> to vector<2x9xbf16>
    %cst_166 = arith.constant dense<0.000000e+00> : vector<64x9xf32>
    %254 = tpu.matmul %252, %253, %cst_166 {dimension_numbers = #tpu.dot_dimension_numbers<[1], [0], [0], [1], [0, 0, 1, 1], [], []>} : vector<64x2xbf16>, vector<2x9xbf16>, vector<64x9xf32> -> vector<64x9xf32>
    %255 = arith.addf %250, %254 : vector<64x9xf32>
    %c15 = arith.constant 15 : index
    %c0_167 = arith.constant 0 : index
    %c0_168 = arith.constant 0 : index
    %256 = vector.load %arg18[%c15, %c0_167, %c0_168] : memref<32x64x2xbf16, #tpu.memory_space<vmem>>, vector<1x64x2xbf16>
    %257 = vector.shape_cast %256 : vector<1x64x2xbf16> to vector<64x2xbf16>
    %258 = vector.extract_strided_slice %181 {offsets = [0, 135], sizes = [2, 9], strides = [1, 1]} : vector<2x288xbf16> to vector<2x9xbf16>
    %cst_169 = arith.constant dense<0.000000e+00> : vector<64x9xf32>
    %259 = tpu.matmul %257, %258, %cst_169 {dimension_numbers = #tpu.dot_dimension_numbers<[1], [0], [0], [1], [0, 0, 1, 1], [], []>} : vector<64x2xbf16>, vector<2x9xbf16>, vector<64x9xf32> -> vector<64x9xf32>
    %260 = arith.addf %255, %259 : vector<64x9xf32>
    %c16 = arith.constant 16 : index
    %c0_170 = arith.constant 0 : index
    %c0_171 = arith.constant 0 : index
    %261 = vector.load %arg18[%c16, %c0_170, %c0_171] : memref<32x64x2xbf16, #tpu.memory_space<vmem>>, vector<1x64x2xbf16>
    %262 = vector.shape_cast %261 : vector<1x64x2xbf16> to vector<64x2xbf16>
    %263 = vector.extract_strided_slice %181 {offsets = [0, 144], sizes = [2, 9], strides = [1, 1]} : vector<2x288xbf16> to vector<2x9xbf16>
    %cst_172 = arith.constant dense<0.000000e+00> : vector<64x9xf32>
    %264 = tpu.matmul %262, %263, %cst_172 {dimension_numbers = #tpu.dot_dimension_numbers<[1], [0], [0], [1], [0, 0, 1, 1], [], []>} : vector<64x2xbf16>, vector<2x9xbf16>, vector<64x9xf32> -> vector<64x9xf32>
    %265 = arith.addf %260, %264 : vector<64x9xf32>
    %c17 = arith.constant 17 : index
    %c0_173 = arith.constant 0 : index
    %c0_174 = arith.constant 0 : index
    %266 = vector.load %arg18[%c17, %c0_173, %c0_174] : memref<32x64x2xbf16, #tpu.memory_space<vmem>>, vector<1x64x2xbf16>
    %267 = vector.shape_cast %266 : vector<1x64x2xbf16> to vector<64x2xbf16>
    %268 = vector.extract_strided_slice %181 {offsets = [0, 153], sizes = [2, 9], strides = [1, 1]} : vector<2x288xbf16> to vector<2x9xbf16>
    %cst_175 = arith.constant dense<0.000000e+00> : vector<64x9xf32>
    %269 = tpu.matmul %267, %268, %cst_175 {dimension_numbers = #tpu.dot_dimension_numbers<[1], [0], [0], [1], [0, 0, 1, 1], [], []>} : vector<64x2xbf16>, vector<2x9xbf16>, vector<64x9xf32> -> vector<64x9xf32>
    %270 = arith.addf %265, %269 : vector<64x9xf32>
    %c18 = arith.constant 18 : index
    %c0_176 = arith.constant 0 : index
    %c0_177 = arith.constant 0 : index
    %271 = vector.load %arg18[%c18, %c0_176, %c0_177] : memref<32x64x2xbf16, #tpu.memory_space<vmem>>, vector<1x64x2xbf16>
    %272 = vector.shape_cast %271 : vector<1x64x2xbf16> to vector<64x2xbf16>
    %273 = vector.extract_strided_slice %181 {offsets = [0, 162], sizes = [2, 9], strides = [1, 1]} : vector<2x288xbf16> to vector<2x9xbf16>
    %cst_178 = arith.constant dense<0.000000e+00> : vector<64x9xf32>
    %274 = tpu.matmul %272, %273, %cst_178 {dimension_numbers = #tpu.dot_dimension_numbers<[1], [0], [0], [1], [0, 0, 1, 1], [], []>} : vector<64x2xbf16>, vector<2x9xbf16>, vector<64x9xf32> -> vector<64x9xf32>
    %275 = arith.addf %270, %274 : vector<64x9xf32>
    %c19 = arith.constant 19 : index
    %c0_179 = arith.constant 0 : index
    %c0_180 = arith.constant 0 : index
    %276 = vector.load %arg18[%c19, %c0_179, %c0_180] : memref<32x64x2xbf16, #tpu.memory_space<vmem>>, vector<1x64x2xbf16>
    %277 = vector.shape_cast %276 : vector<1x64x2xbf16> to vector<64x2xbf16>
    %278 = vector.extract_strided_slice %181 {offsets = [0, 171], sizes = [2, 9], strides = [1, 1]} : vector<2x288xbf16> to vector<2x9xbf16>
    %cst_181 = arith.constant dense<0.000000e+00> : vector<64x9xf32>
    %279 = tpu.matmul %277, %278, %cst_181 {dimension_numbers = #tpu.dot_dimension_numbers<[1], [0], [0], [1], [0, 0, 1, 1], [], []>} : vector<64x2xbf16>, vector<2x9xbf16>, vector<64x9xf32> -> vector<64x9xf32>
    %280 = arith.addf %275, %279 : vector<64x9xf32>
    %c20 = arith.constant 20 : index
    %c0_182 = arith.constant 0 : index
    %c0_183 = arith.constant 0 : index
    %281 = vector.load %arg18[%c20, %c0_182, %c0_183] : memref<32x64x2xbf16, #tpu.memory_space<vmem>>, vector<1x64x2xbf16>
    %282 = vector.shape_cast %281 : vector<1x64x2xbf16> to vector<64x2xbf16>
    %283 = vector.extract_strided_slice %181 {offsets = [0, 180], sizes = [2, 9], strides = [1, 1]} : vector<2x288xbf16> to vector<2x9xbf16>
    %cst_184 = arith.constant dense<0.000000e+00> : vector<64x9xf32>
    %284 = tpu.matmul %282, %283, %cst_184 {dimension_numbers = #tpu.dot_dimension_numbers<[1], [0], [0], [1], [0, 0, 1, 1], [], []>} : vector<64x2xbf16>, vector<2x9xbf16>, vector<64x9xf32> -> vector<64x9xf32>
    %285 = arith.addf %280, %284 : vector<64x9xf32>
    %c21 = arith.constant 21 : index
    %c0_185 = arith.constant 0 : index
    %c0_186 = arith.constant 0 : index
    %286 = vector.load %arg18[%c21, %c0_185, %c0_186] : memref<32x64x2xbf16, #tpu.memory_space<vmem>>, vector<1x64x2xbf16>
    %287 = vector.shape_cast %286 : vector<1x64x2xbf16> to vector<64x2xbf16>
    %288 = vector.extract_strided_slice %181 {offsets = [0, 189], sizes = [2, 9], strides = [1, 1]} : vector<2x288xbf16> to vector<2x9xbf16>
    %cst_187 = arith.constant dense<0.000000e+00> : vector<64x9xf32>
    %289 = tpu.matmul %287, %288, %cst_187 {dimension_numbers = #tpu.dot_dimension_numbers<[1], [0], [0], [1], [0, 0, 1, 1], [], []>} : vector<64x2xbf16>, vector<2x9xbf16>, vector<64x9xf32> -> vector<64x9xf32>
    %290 = arith.addf %285, %289 : vector<64x9xf32>
    %c22 = arith.constant 22 : index
    %c0_188 = arith.constant 0 : index
    %c0_189 = arith.constant 0 : index
    %291 = vector.load %arg18[%c22, %c0_188, %c0_189] : memref<32x64x2xbf16, #tpu.memory_space<vmem>>, vector<1x64x2xbf16>
    %292 = vector.shape_cast %291 : vector<1x64x2xbf16> to vector<64x2xbf16>
    %293 = vector.extract_strided_slice %181 {offsets = [0, 198], sizes = [2, 9], strides = [1, 1]} : vector<2x288xbf16> to vector<2x9xbf16>
    %cst_190 = arith.constant dense<0.000000e+00> : vector<64x9xf32>
    %294 = tpu.matmul %292, %293, %cst_190 {dimension_numbers = #tpu.dot_dimension_numbers<[1], [0], [0], [1], [0, 0, 1, 1], [], []>} : vector<64x2xbf16>, vector<2x9xbf16>, vector<64x9xf32> -> vector<64x9xf32>
    %295 = arith.addf %290, %294 : vector<64x9xf32>
    %c23 = arith.constant 23 : index
    %c0_191 = arith.constant 0 : index
    %c0_192 = arith.constant 0 : index
    %296 = vector.load %arg18[%c23, %c0_191, %c0_192] : memref<32x64x2xbf16, #tpu.memory_space<vmem>>, vector<1x64x2xbf16>
    %297 = vector.shape_cast %296 : vector<1x64x2xbf16> to vector<64x2xbf16>
    %298 = vector.extract_strided_slice %181 {offsets = [0, 207], sizes = [2, 9], strides = [1, 1]} : vector<2x288xbf16> to vector<2x9xbf16>
    %cst_193 = arith.constant dense<0.000000e+00> : vector<64x9xf32>
    %299 = tpu.matmul %297, %298, %cst_193 {dimension_numbers = #tpu.dot_dimension_numbers<[1], [0], [0], [1], [0, 0, 1, 1], [], []>} : vector<64x2xbf16>, vector<2x9xbf16>, vector<64x9xf32> -> vector<64x9xf32>
    %300 = arith.addf %295, %299 : vector<64x9xf32>
    %c24 = arith.constant 24 : index
    %c0_194 = arith.constant 0 : index
    %c0_195 = arith.constant 0 : index
    %301 = vector.load %arg18[%c24, %c0_194, %c0_195] : memref<32x64x2xbf16, #tpu.memory_space<vmem>>, vector<1x64x2xbf16>
    %302 = vector.shape_cast %301 : vector<1x64x2xbf16> to vector<64x2xbf16>
    %303 = vector.extract_strided_slice %181 {offsets = [0, 216], sizes = [2, 9], strides = [1, 1]} : vector<2x288xbf16> to vector<2x9xbf16>
    %cst_196 = arith.constant dense<0.000000e+00> : vector<64x9xf32>
    %304 = tpu.matmul %302, %303, %cst_196 {dimension_numbers = #tpu.dot_dimension_numbers<[1], [0], [0], [1], [0, 0, 1, 1], [], []>} : vector<64x2xbf16>, vector<2x9xbf16>, vector<64x9xf32> -> vector<64x9xf32>
    %305 = arith.addf %300, %304 : vector<64x9xf32>
    %c25 = arith.constant 25 : index
    %c0_197 = arith.constant 0 : index
    %c0_198 = arith.constant 0 : index
    %306 = vector.load %arg18[%c25, %c0_197, %c0_198] : memref<32x64x2xbf16, #tpu.memory_space<vmem>>, vector<1x64x2xbf16>
    %307 = vector.shape_cast %306 : vector<1x64x2xbf16> to vector<64x2xbf16>
    %308 = vector.extract_strided_slice %181 {offsets = [0, 225], sizes = [2, 9], strides = [1, 1]} : vector<2x288xbf16> to vector<2x9xbf16>
    %cst_199 = arith.constant dense<0.000000e+00> : vector<64x9xf32>
    %309 = tpu.matmul %307, %308, %cst_199 {dimension_numbers = #tpu.dot_dimension_numbers<[1], [0], [0], [1], [0, 0, 1, 1], [], []>} : vector<64x2xbf16>, vector<2x9xbf16>, vector<64x9xf32> -> vector<64x9xf32>
    %310 = arith.addf %305, %309 : vector<64x9xf32>
    %c26 = arith.constant 26 : index
    %c0_200 = arith.constant 0 : index
    %c0_201 = arith.constant 0 : index
    %311 = vector.load %arg18[%c26, %c0_200, %c0_201] : memref<32x64x2xbf16, #tpu.memory_space<vmem>>, vector<1x64x2xbf16>
    %312 = vector.shape_cast %311 : vector<1x64x2xbf16> to vector<64x2xbf16>
    %313 = vector.extract_strided_slice %181 {offsets = [0, 234], sizes = [2, 9], strides = [1, 1]} : vector<2x288xbf16> to vector<2x9xbf16>
    %cst_202 = arith.constant dense<0.000000e+00> : vector<64x9xf32>
    %314 = tpu.matmul %312, %313, %cst_202 {dimension_numbers = #tpu.dot_dimension_numbers<[1], [0], [0], [1], [0, 0, 1, 1], [], []>} : vector<64x2xbf16>, vector<2x9xbf16>, vector<64x9xf32> -> vector<64x9xf32>
    %315 = arith.addf %310, %314 : vector<64x9xf32>
    %c27 = arith.constant 27 : index
    %c0_203 = arith.constant 0 : index
    %c0_204 = arith.constant 0 : index
    %316 = vector.load %arg18[%c27, %c0_203, %c0_204] : memref<32x64x2xbf16, #tpu.memory_space<vmem>>, vector<1x64x2xbf16>
    %317 = vector.shape_cast %316 : vector<1x64x2xbf16> to vector<64x2xbf16>
    %318 = vector.extract_strided_slice %181 {offsets = [0, 243], sizes = [2, 9], strides = [1, 1]} : vector<2x288xbf16> to vector<2x9xbf16>
    %cst_205 = arith.constant dense<0.000000e+00> : vector<64x9xf32>
    %319 = tpu.matmul %317, %318, %cst_205 {dimension_numbers = #tpu.dot_dimension_numbers<[1], [0], [0], [1], [0, 0, 1, 1], [], []>} : vector<64x2xbf16>, vector<2x9xbf16>, vector<64x9xf32> -> vector<64x9xf32>
    %320 = arith.addf %315, %319 : vector<64x9xf32>
    %c28 = arith.constant 28 : index
    %c0_206 = arith.constant 0 : index
    %c0_207 = arith.constant 0 : index
    %321 = vector.load %arg18[%c28, %c0_206, %c0_207] : memref<32x64x2xbf16, #tpu.memory_space<vmem>>, vector<1x64x2xbf16>
    %322 = vector.shape_cast %321 : vector<1x64x2xbf16> to vector<64x2xbf16>
    %323 = vector.extract_strided_slice %181 {offsets = [0, 252], sizes = [2, 9], strides = [1, 1]} : vector<2x288xbf16> to vector<2x9xbf16>
    %cst_208 = arith.constant dense<0.000000e+00> : vector<64x9xf32>
    %324 = tpu.matmul %322, %323, %cst_208 {dimension_numbers = #tpu.dot_dimension_numbers<[1], [0], [0], [1], [0, 0, 1, 1], [], []>} : vector<64x2xbf16>, vector<2x9xbf16>, vector<64x9xf32> -> vector<64x9xf32>
    %325 = arith.addf %320, %324 : vector<64x9xf32>
    %c29 = arith.constant 29 : index
    %c0_209 = arith.constant 0 : index
    %c0_210 = arith.constant 0 : index
    %326 = vector.load %arg18[%c29, %c0_209, %c0_210] : memref<32x64x2xbf16, #tpu.memory_space<vmem>>, vector<1x64x2xbf16>
    %327 = vector.shape_cast %326 : vector<1x64x2xbf16> to vector<64x2xbf16>
    %328 = vector.extract_strided_slice %181 {offsets = [0, 261], sizes = [2, 9], strides = [1, 1]} : vector<2x288xbf16> to vector<2x9xbf16>
    %cst_211 = arith.constant dense<0.000000e+00> : vector<64x9xf32>
    %329 = tpu.matmul %327, %328, %cst_211 {dimension_numbers = #tpu.dot_dimension_numbers<[1], [0], [0], [1], [0, 0, 1, 1], [], []>} : vector<64x2xbf16>, vector<2x9xbf16>, vector<64x9xf32> -> vector<64x9xf32>
    %330 = arith.addf %325, %329 : vector<64x9xf32>
    %c30 = arith.constant 30 : index
    %c0_212 = arith.constant 0 : index
    %c0_213 = arith.constant 0 : index
    %331 = vector.load %arg18[%c30, %c0_212, %c0_213] : memref<32x64x2xbf16, #tpu.memory_space<vmem>>, vector<1x64x2xbf16>
    %332 = vector.shape_cast %331 : vector<1x64x2xbf16> to vector<64x2xbf16>
    %333 = vector.extract_strided_slice %181 {offsets = [0, 270], sizes = [2, 9], strides = [1, 1]} : vector<2x288xbf16> to vector<2x9xbf16>
    %cst_214 = arith.constant dense<0.000000e+00> : vector<64x9xf32>
    %334 = tpu.matmul %332, %333, %cst_214 {dimension_numbers = #tpu.dot_dimension_numbers<[1], [0], [0], [1], [0, 0, 1, 1], [], []>} : vector<64x2xbf16>, vector<2x9xbf16>, vector<64x9xf32> -> vector<64x9xf32>
    %335 = arith.addf %330, %334 : vector<64x9xf32>
    %c31 = arith.constant 31 : index
    %c0_215 = arith.constant 0 : index
    %c0_216 = arith.constant 0 : index
    %336 = vector.load %arg18[%c31, %c0_215, %c0_216] : memref<32x64x2xbf16, #tpu.memory_space<vmem>>, vector<1x64x2xbf16>
    %337 = vector.shape_cast %336 : vector<1x64x2xbf16> to vector<64x2xbf16>
    %338 = vector.extract_strided_slice %181 {offsets = [0, 279], sizes = [2, 9], strides = [1, 1]} : vector<2x288xbf16> to vector<2x9xbf16>
    %cst_217 = arith.constant dense<0.000000e+00> : vector<64x9xf32>
    %339 = tpu.matmul %337, %338, %cst_217 {dimension_numbers = #tpu.dot_dimension_numbers<[1], [0], [0], [1], [0, 0, 1, 1], [], []>} : vector<64x2xbf16>, vector<2x9xbf16>, vector<64x9xf32> -> vector<64x9xf32>
    %340 = arith.addf %335, %339 : vector<64x9xf32>
    %341 = arith.truncf %340 : vector<64x9xf32> to vector<64x9xbf16>
    %c0_218 = arith.constant 0 : index
    %c0_219 = arith.constant 0 : index
    %c0_220 = arith.constant 0 : index
    %342 = vector.load %arg19[%c0_218, %c0_219, %c0_220] : memref<9x32x64xbf16, #tpu.memory_space<vmem>>, vector<1x32x64xbf16>
    %343 = vector.shape_cast %342 : vector<1x32x64xbf16> to vector<32x64xbf16>
    %cst_221 = arith.constant dense<0.000000e+00> : vector<32x9xf32>
    %344 = tpu.matmul %343, %341, %cst_221 {dimension_numbers = #tpu.dot_dimension_numbers<[1], [0], [0], [1], [0, 0, 1, 1], [], []>} : vector<32x64xbf16>, vector<64x9xbf16>, vector<32x9xf32> -> vector<32x9xf32>
    %345 = arith.truncf %344 : vector<32x9xf32> to vector<32x9xbf16>
    %c1_222 = arith.constant 1 : index
    %c0_223 = arith.constant 0 : index
    %c0_224 = arith.constant 0 : index
    %346 = vector.load %arg19[%c1_222, %c0_223, %c0_224] : memref<9x32x64xbf16, #tpu.memory_space<vmem>>, vector<1x32x64xbf16>
    %347 = vector.shape_cast %346 : vector<1x32x64xbf16> to vector<32x64xbf16>
    %cst_225 = arith.constant dense<0.000000e+00> : vector<32x9xf32>
    %348 = tpu.matmul %347, %341, %cst_225 {dimension_numbers = #tpu.dot_dimension_numbers<[1], [0], [0], [1], [0, 0, 1, 1], [], []>} : vector<32x64xbf16>, vector<64x9xbf16>, vector<32x9xf32> -> vector<32x9xf32>
    %349 = arith.truncf %348 : vector<32x9xf32> to vector<32x9xbf16>
    %c2_226 = arith.constant 2 : index
    %c0_227 = arith.constant 0 : index
    %c0_228 = arith.constant 0 : index
    %350 = vector.load %arg19[%c2_226, %c0_227, %c0_228] : memref<9x32x64xbf16, #tpu.memory_space<vmem>>, vector<1x32x64xbf16>
    %351 = vector.shape_cast %350 : vector<1x32x64xbf16> to vector<32x64xbf16>
    %cst_229 = arith.constant dense<0.000000e+00> : vector<32x9xf32>
    %352 = tpu.matmul %351, %341, %cst_229 {dimension_numbers = #tpu.dot_dimension_numbers<[1], [0], [0], [1], [0, 0, 1, 1], [], []>} : vector<32x64xbf16>, vector<64x9xbf16>, vector<32x9xf32> -> vector<32x9xf32>
    %353 = arith.truncf %352 : vector<32x9xf32> to vector<32x9xbf16>
    %c3_230 = arith.constant 3 : index
    %c0_231 = arith.constant 0 : index
    %c0_232 = arith.constant 0 : index
    %354 = vector.load %arg19[%c3_230, %c0_231, %c0_232] : memref<9x32x64xbf16, #tpu.memory_space<vmem>>, vector<1x32x64xbf16>
    %355 = vector.shape_cast %354 : vector<1x32x64xbf16> to vector<32x64xbf16>
    %cst_233 = arith.constant dense<0.000000e+00> : vector<32x9xf32>
    %356 = tpu.matmul %355, %341, %cst_233 {dimension_numbers = #tpu.dot_dimension_numbers<[1], [0], [0], [1], [0, 0, 1, 1], [], []>} : vector<32x64xbf16>, vector<64x9xbf16>, vector<32x9xf32> -> vector<32x9xf32>
    %357 = arith.truncf %356 : vector<32x9xf32> to vector<32x9xbf16>
    %c4_234 = arith.constant 4 : index
    %c0_235 = arith.constant 0 : index
    %c0_236 = arith.constant 0 : index
    %358 = vector.load %arg19[%c4_234, %c0_235, %c0_236] : memref<9x32x64xbf16, #tpu.memory_space<vmem>>, vector<1x32x64xbf16>
    %359 = vector.shape_cast %358 : vector<1x32x64xbf16> to vector<32x64xbf16>
    %cst_237 = arith.constant dense<0.000000e+00> : vector<32x9xf32>
    %360 = tpu.matmul %359, %341, %cst_237 {dimension_numbers = #tpu.dot_dimension_numbers<[1], [0], [0], [1], [0, 0, 1, 1], [], []>} : vector<32x64xbf16>, vector<64x9xbf16>, vector<32x9xf32> -> vector<32x9xf32>
    %361 = arith.truncf %360 : vector<32x9xf32> to vector<32x9xbf16>
    %c5_238 = arith.constant 5 : index
    %c0_239 = arith.constant 0 : index
    %c0_240 = arith.constant 0 : index
    %362 = vector.load %arg19[%c5_238, %c0_239, %c0_240] : memref<9x32x64xbf16, #tpu.memory_space<vmem>>, vector<1x32x64xbf16>
    %363 = vector.shape_cast %362 : vector<1x32x64xbf16> to vector<32x64xbf16>
    %cst_241 = arith.constant dense<0.000000e+00> : vector<32x9xf32>
    %364 = tpu.matmul %363, %341, %cst_241 {dimension_numbers = #tpu.dot_dimension_numbers<[1], [0], [0], [1], [0, 0, 1, 1], [], []>} : vector<32x64xbf16>, vector<64x9xbf16>, vector<32x9xf32> -> vector<32x9xf32>
    %365 = arith.truncf %364 : vector<32x9xf32> to vector<32x9xbf16>
    %c6_242 = arith.constant 6 : index
    %c0_243 = arith.constant 0 : index
    %c0_244 = arith.constant 0 : index
    %366 = vector.load %arg19[%c6_242, %c0_243, %c0_244] : memref<9x32x64xbf16, #tpu.memory_space<vmem>>, vector<1x32x64xbf16>
    %367 = vector.shape_cast %366 : vector<1x32x64xbf16> to vector<32x64xbf16>
    %cst_245 = arith.constant dense<0.000000e+00> : vector<32x9xf32>
    %368 = tpu.matmul %367, %341, %cst_245 {dimension_numbers = #tpu.dot_dimension_numbers<[1], [0], [0], [1], [0, 0, 1, 1], [], []>} : vector<32x64xbf16>, vector<64x9xbf16>, vector<32x9xf32> -> vector<32x9xf32>
    %369 = arith.truncf %368 : vector<32x9xf32> to vector<32x9xbf16>
    %c7_246 = arith.constant 7 : index
    %c0_247 = arith.constant 0 : index
    %c0_248 = arith.constant 0 : index
    %370 = vector.load %arg19[%c7_246, %c0_247, %c0_248] : memref<9x32x64xbf16, #tpu.memory_space<vmem>>, vector<1x32x64xbf16>
    %371 = vector.shape_cast %370 : vector<1x32x64xbf16> to vector<32x64xbf16>
    %cst_249 = arith.constant dense<0.000000e+00> : vector<32x9xf32>
    %372 = tpu.matmul %371, %341, %cst_249 {dimension_numbers = #tpu.dot_dimension_numbers<[1], [0], [0], [1], [0, 0, 1, 1], [], []>} : vector<32x64xbf16>, vector<64x9xbf16>, vector<32x9xf32> -> vector<32x9xf32>
    %373 = arith.truncf %372 : vector<32x9xf32> to vector<32x9xbf16>
    %c8_250 = arith.constant 8 : index
    %c0_251 = arith.constant 0 : index
    %c0_252 = arith.constant 0 : index
    %374 = vector.load %arg19[%c8_250, %c0_251, %c0_252] : memref<9x32x64xbf16, #tpu.memory_space<vmem>>, vector<1x32x64xbf16>
    %375 = vector.shape_cast %374 : vector<1x32x64xbf16> to vector<32x64xbf16>
    %cst_253 = arith.constant dense<0.000000e+00> : vector<32x9xf32>
    %376 = tpu.matmul %375, %341, %cst_253 {dimension_numbers = #tpu.dot_dimension_numbers<[1], [0], [0], [1], [0, 0, 1, 1], [], []>} : vector<32x64xbf16>, vector<64x9xbf16>, vector<32x9xf32> -> vector<32x9xf32>
    %377 = arith.truncf %376 : vector<32x9xf32> to vector<32x9xbf16>
    %378 = tpu.concatenate %345, %349, %353, %357, %361, %365, %369, %373, %377 in 1 : vector<32x9xbf16>, vector<32x9xbf16>, vector<32x9xbf16>, vector<32x9xbf16>, vector<32x9xbf16>, vector<32x9xbf16>, vector<32x9xbf16>, vector<32x9xbf16>, vector<32x9xbf16> -> vector<32x81xbf16>
    %c0_254 = arith.constant 0 : index
    %c0_255 = arith.constant 0 : index
    %379 = vector.load %arg20[%c0_254, %c0_255] : memref<81x49xbf16, #tpu.memory_space<vmem>>, vector<81x49xbf16>
    %cst_256 = arith.constant dense<0.000000e+00> : vector<32x49xf32>
    %380 = tpu.matmul %378, %379, %cst_256 {dimension_numbers = #tpu.dot_dimension_numbers<[1], [0], [0], [1], [0, 0, 1, 1], [], []>} : vector<32x81xbf16>, vector<81x49xbf16>, vector<32x49xf32> -> vector<32x49xf32>
    %c0_257 = arith.constant 0 : index
    %c0_258 = arith.constant 0 : index
    %381 = vector.load %arg21[%c0_257, %c0_258] : memref<32x1xf32, #tpu.memory_space<vmem>>, vector<32x1xf32>
    %382 = vector.broadcast %381 : vector<32x1xf32> to vector<32x49xf32>
    %383 = arith.addf %380, %382 : vector<32x49xf32>
    %cst_259 = arith.constant dense<0.000000e+00> : vector<32xf32>
    %384 = vector.multi_reduction <add>, %383, %cst_259 [1] : vector<32x49xf32> to vector<32xf32>
    %385 = vector.shape_cast %384 : vector<32xf32> to vector<32x1xf32>
    %386 = arith.mulf %383, %383 : vector<32x49xf32>
    %cst_260 = arith.constant dense<0.000000e+00> : vector<32xf32>
    %387 = vector.multi_reduction <add>, %386, %cst_260 [1] : vector<32x49xf32> to vector<32xf32>
    %388 = vector.shape_cast %387 : vector<32xf32> to vector<32x1xf32>
    %c0_261 = arith.constant 0 : index
    %c0_262 = arith.constant 0 : index
    %389 = vector.load %arg6[%c0_261, %c0_262] : memref<32x32xf32, #tpu.memory_space<vmem>>, vector<32x32xf32>
    %cst_263 = arith.constant dense<0.000000e+00> : vector<32x1xf32>
    %390 = tpu.matmul %389, %385, %cst_263 {dimension_numbers = #tpu.dot_dimension_numbers<[1], [0], [0], [1], [0, 0, 1, 1], [], []>} : vector<32x32xf32>, vector<32x1xf32>, vector<32x1xf32> -> vector<32x1xf32>
    %c0_264 = arith.constant 0 : index
    %c0_265 = arith.constant 0 : index
    %391 = vector.load %arg6[%c0_264, %c0_265] : memref<32x32xf32, #tpu.memory_space<vmem>>, vector<32x32xf32>
    %cst_266 = arith.constant dense<0.000000e+00> : vector<32x1xf32>
    %392 = tpu.matmul %391, %388, %cst_266 {dimension_numbers = #tpu.dot_dimension_numbers<[1], [0], [0], [1], [0, 0, 1, 1], [], []>} : vector<32x32xf32>, vector<32x1xf32>, vector<32x1xf32> -> vector<32x1xf32>
    %393 = arith.mulf %390, %390 : vector<32x1xf32>
    %394 = arith.subf %392, %393 : vector<32x1xf32>
    %c0_267 = arith.constant 0 : index
    %c0_268 = arith.constant 0 : index
    %395 = vector.load %arg22[%c0_267, %c0_268] : memref<32x1xf32, #tpu.memory_space<vmem>>, vector<32x1xf32>
    %cst_269 = arith.constant 9.99999974E-6 : f32
    %396 = vector.broadcast %cst_269 : f32 to vector<32x1xf32>
    %397 = arith.addf %394, %396 : vector<32x1xf32>
    %398 = math.rsqrt %397 : vector<32x1xf32>
    %399 = arith.mulf %395, %398 : vector<32x1xf32>
    %400 = vector.broadcast %390 : vector<32x1xf32> to vector<32x49xf32>
    %401 = arith.subf %383, %400 : vector<32x49xf32>
    %402 = vector.broadcast %399 : vector<32x1xf32> to vector<32x49xf32>
    %403 = arith.mulf %401, %402 : vector<32x49xf32>
    %c0_270 = arith.constant 0 : index
    %c0_271 = arith.constant 0 : index
    %404 = vector.load %arg23[%c0_270, %c0_271] : memref<32x1xf32, #tpu.memory_space<vmem>>, vector<32x1xf32>
    %405 = vector.broadcast %404 : vector<32x1xf32> to vector<32x49xf32>
    %406 = arith.addf %403, %405 : vector<32x49xf32>
    %cst_272 = arith.constant 0.000000e+00 : f32
    %407 = vector.broadcast %cst_272 : f32 to vector<32x49xf32>
    %408 = arith.maximumf %406, %407 : vector<32x49xf32>
    %409 = arith.truncf %408 : vector<32x49xf32> to vector<32x49xbf16>
    %c0_273 = arith.constant 0 : index
    %c0_274 = arith.constant 0 : index
    %c0_275 = arith.constant 0 : index
    %410 = vector.load %arg24[%c0_273, %c0_274, %c0_275] : memref<9x16x32xbf16, #tpu.memory_space<vmem>>, vector<1x16x32xbf16>
    %411 = vector.shape_cast %410 : vector<1x16x32xbf16> to vector<16x32xbf16>
    %cst_276 = arith.constant dense<0.000000e+00> : vector<16x49xf32>
    %412 = tpu.matmul %411, %409, %cst_276 {dimension_numbers = #tpu.dot_dimension_numbers<[1], [0], [0], [1], [0, 0, 1, 1], [], []>} : vector<16x32xbf16>, vector<32x49xbf16>, vector<16x49xf32> -> vector<16x49xf32>
    %413 = arith.truncf %412 : vector<16x49xf32> to vector<16x49xbf16>
    %c1_277 = arith.constant 1 : index
    %c0_278 = arith.constant 0 : index
    %c0_279 = arith.constant 0 : index
    %414 = vector.load %arg24[%c1_277, %c0_278, %c0_279] : memref<9x16x32xbf16, #tpu.memory_space<vmem>>, vector<1x16x32xbf16>
    %415 = vector.shape_cast %414 : vector<1x16x32xbf16> to vector<16x32xbf16>
    %cst_280 = arith.constant dense<0.000000e+00> : vector<16x49xf32>
    %416 = tpu.matmul %415, %409, %cst_280 {dimension_numbers = #tpu.dot_dimension_numbers<[1], [0], [0], [1], [0, 0, 1, 1], [], []>} : vector<16x32xbf16>, vector<32x49xbf16>, vector<16x49xf32> -> vector<16x49xf32>
    %417 = arith.truncf %416 : vector<16x49xf32> to vector<16x49xbf16>
    %c2_281 = arith.constant 2 : index
    %c0_282 = arith.constant 0 : index
    %c0_283 = arith.constant 0 : index
    %418 = vector.load %arg24[%c2_281, %c0_282, %c0_283] : memref<9x16x32xbf16, #tpu.memory_space<vmem>>, vector<1x16x32xbf16>
    %419 = vector.shape_cast %418 : vector<1x16x32xbf16> to vector<16x32xbf16>
    %cst_284 = arith.constant dense<0.000000e+00> : vector<16x49xf32>
    %420 = tpu.matmul %419, %409, %cst_284 {dimension_numbers = #tpu.dot_dimension_numbers<[1], [0], [0], [1], [0, 0, 1, 1], [], []>} : vector<16x32xbf16>, vector<32x49xbf16>, vector<16x49xf32> -> vector<16x49xf32>
    %421 = arith.truncf %420 : vector<16x49xf32> to vector<16x49xbf16>
    %c3_285 = arith.constant 3 : index
    %c0_286 = arith.constant 0 : index
    %c0_287 = arith.constant 0 : index
    %422 = vector.load %arg24[%c3_285, %c0_286, %c0_287] : memref<9x16x32xbf16, #tpu.memory_space<vmem>>, vector<1x16x32xbf16>
    %423 = vector.shape_cast %422 : vector<1x16x32xbf16> to vector<16x32xbf16>
    %cst_288 = arith.constant dense<0.000000e+00> : vector<16x49xf32>
    %424 = tpu.matmul %423, %409, %cst_288 {dimension_numbers = #tpu.dot_dimension_numbers<[1], [0], [0], [1], [0, 0, 1, 1], [], []>} : vector<16x32xbf16>, vector<32x49xbf16>, vector<16x49xf32> -> vector<16x49xf32>
    %425 = arith.truncf %424 : vector<16x49xf32> to vector<16x49xbf16>
    %c4_289 = arith.constant 4 : index
    %c0_290 = arith.constant 0 : index
    %c0_291 = arith.constant 0 : index
    %426 = vector.load %arg24[%c4_289, %c0_290, %c0_291] : memref<9x16x32xbf16, #tpu.memory_space<vmem>>, vector<1x16x32xbf16>
    %427 = vector.shape_cast %426 : vector<1x16x32xbf16> to vector<16x32xbf16>
    %cst_292 = arith.constant dense<0.000000e+00> : vector<16x49xf32>
    %428 = tpu.matmul %427, %409, %cst_292 {dimension_numbers = #tpu.dot_dimension_numbers<[1], [0], [0], [1], [0, 0, 1, 1], [], []>} : vector<16x32xbf16>, vector<32x49xbf16>, vector<16x49xf32> -> vector<16x49xf32>
    %429 = arith.truncf %428 : vector<16x49xf32> to vector<16x49xbf16>
    %c5_293 = arith.constant 5 : index
    %c0_294 = arith.constant 0 : index
    %c0_295 = arith.constant 0 : index
    %430 = vector.load %arg24[%c5_293, %c0_294, %c0_295] : memref<9x16x32xbf16, #tpu.memory_space<vmem>>, vector<1x16x32xbf16>
    %431 = vector.shape_cast %430 : vector<1x16x32xbf16> to vector<16x32xbf16>
    %cst_296 = arith.constant dense<0.000000e+00> : vector<16x49xf32>
    %432 = tpu.matmul %431, %409, %cst_296 {dimension_numbers = #tpu.dot_dimension_numbers<[1], [0], [0], [1], [0, 0, 1, 1], [], []>} : vector<16x32xbf16>, vector<32x49xbf16>, vector<16x49xf32> -> vector<16x49xf32>
    %433 = arith.truncf %432 : vector<16x49xf32> to vector<16x49xbf16>
    %c6_297 = arith.constant 6 : index
    %c0_298 = arith.constant 0 : index
    %c0_299 = arith.constant 0 : index
    %434 = vector.load %arg24[%c6_297, %c0_298, %c0_299] : memref<9x16x32xbf16, #tpu.memory_space<vmem>>, vector<1x16x32xbf16>
    %435 = vector.shape_cast %434 : vector<1x16x32xbf16> to vector<16x32xbf16>
    %cst_300 = arith.constant dense<0.000000e+00> : vector<16x49xf32>
    %436 = tpu.matmul %435, %409, %cst_300 {dimension_numbers = #tpu.dot_dimension_numbers<[1], [0], [0], [1], [0, 0, 1, 1], [], []>} : vector<16x32xbf16>, vector<32x49xbf16>, vector<16x49xf32> -> vector<16x49xf32>
    %437 = arith.truncf %436 : vector<16x49xf32> to vector<16x49xbf16>
    %c7_301 = arith.constant 7 : index
    %c0_302 = arith.constant 0 : index
    %c0_303 = arith.constant 0 : index
    %438 = vector.load %arg24[%c7_301, %c0_302, %c0_303] : memref<9x16x32xbf16, #tpu.memory_space<vmem>>, vector<1x16x32xbf16>
    %439 = vector.shape_cast %438 : vector<1x16x32xbf16> to vector<16x32xbf16>
    %cst_304 = arith.constant dense<0.000000e+00> : vector<16x49xf32>
    %440 = tpu.matmul %439, %409, %cst_304 {dimension_numbers = #tpu.dot_dimension_numbers<[1], [0], [0], [1], [0, 0, 1, 1], [], []>} : vector<16x32xbf16>, vector<32x49xbf16>, vector<16x49xf32> -> vector<16x49xf32>
    %441 = arith.truncf %440 : vector<16x49xf32> to vector<16x49xbf16>
    %c8_305 = arith.constant 8 : index
    %c0_306 = arith.constant 0 : index
    %c0_307 = arith.constant 0 : index
    %442 = vector.load %arg24[%c8_305, %c0_306, %c0_307] : memref<9x16x32xbf16, #tpu.memory_space<vmem>>, vector<1x16x32xbf16>
    %443 = vector.shape_cast %442 : vector<1x16x32xbf16> to vector<16x32xbf16>
    %cst_308 = arith.constant dense<0.000000e+00> : vector<16x49xf32>
    %444 = tpu.matmul %443, %409, %cst_308 {dimension_numbers = #tpu.dot_dimension_numbers<[1], [0], [0], [1], [0, 0, 1, 1], [], []>} : vector<16x32xbf16>, vector<32x49xbf16>, vector<16x49xf32> -> vector<16x49xf32>
    %445 = arith.truncf %444 : vector<16x49xf32> to vector<16x49xbf16>
    %446 = tpu.concatenate %413, %417, %421, %425, %429, %433, %437, %441, %445 in 1 : vector<16x49xbf16>, vector<16x49xbf16>, vector<16x49xbf16>, vector<16x49xbf16>, vector<16x49xbf16>, vector<16x49xbf16>, vector<16x49xbf16>, vector<16x49xbf16>, vector<16x49xbf16> -> vector<16x441xbf16>
    %c0_309 = arith.constant 0 : index
    %c0_310 = arith.constant 0 : index
    %447 = vector.load %arg25[%c0_309, %c0_310] : memref<441x196xbf16, #tpu.memory_space<vmem>>, vector<441x196xbf16>
    %cst_311 = arith.constant dense<0.000000e+00> : vector<16x196xf32>
    %448 = tpu.matmul %446, %447, %cst_311 {dimension_numbers = #tpu.dot_dimension_numbers<[1], [0], [0], [1], [0, 0, 1, 1], [], []>} : vector<16x441xbf16>, vector<441x196xbf16>, vector<16x196xf32> -> vector<16x196xf32>
    %c0_312 = arith.constant 0 : index
    %c0_313 = arith.constant 0 : index
    %449 = vector.load %arg26[%c0_312, %c0_313] : memref<16x1xf32, #tpu.memory_space<vmem>>, vector<16x1xf32>
    %450 = vector.broadcast %449 : vector<16x1xf32> to vector<16x196xf32>
    %451 = arith.addf %448, %450 : vector<16x196xf32>
    %cst_314 = arith.constant dense<0.000000e+00> : vector<16xf32>
    %452 = vector.multi_reduction <add>, %451, %cst_314 [1] : vector<16x196xf32> to vector<16xf32>
    %453 = vector.shape_cast %452 : vector<16xf32> to vector<16x1xf32>
    %454 = arith.mulf %451, %451 : vector<16x196xf32>
    %cst_315 = arith.constant dense<0.000000e+00> : vector<16xf32>
    %455 = vector.multi_reduction <add>, %454, %cst_315 [1] : vector<16x196xf32> to vector<16xf32>
    %456 = vector.shape_cast %455 : vector<16xf32> to vector<16x1xf32>
    %c0_316 = arith.constant 0 : index
    %c0_317 = arith.constant 0 : index
    %457 = vector.load %arg27[%c0_316, %c0_317] : memref<16x16xf32, #tpu.memory_space<vmem>>, vector<16x16xf32>
    %cst_318 = arith.constant dense<0.000000e+00> : vector<16x1xf32>
    %458 = tpu.matmul %457, %453, %cst_318 {dimension_numbers = #tpu.dot_dimension_numbers<[1], [0], [0], [1], [0, 0, 1, 1], [], []>} : vector<16x16xf32>, vector<16x1xf32>, vector<16x1xf32> -> vector<16x1xf32>
    %c0_319 = arith.constant 0 : index
    %c0_320 = arith.constant 0 : index
    %459 = vector.load %arg27[%c0_319, %c0_320] : memref<16x16xf32, #tpu.memory_space<vmem>>, vector<16x16xf32>
    %cst_321 = arith.constant dense<0.000000e+00> : vector<16x1xf32>
    %460 = tpu.matmul %459, %456, %cst_321 {dimension_numbers = #tpu.dot_dimension_numbers<[1], [0], [0], [1], [0, 0, 1, 1], [], []>} : vector<16x16xf32>, vector<16x1xf32>, vector<16x1xf32> -> vector<16x1xf32>
    %461 = arith.mulf %458, %458 : vector<16x1xf32>
    %462 = arith.subf %460, %461 : vector<16x1xf32>
    %c0_322 = arith.constant 0 : index
    %c0_323 = arith.constant 0 : index
    %463 = vector.load %arg28[%c0_322, %c0_323] : memref<16x1xf32, #tpu.memory_space<vmem>>, vector<16x1xf32>
    %cst_324 = arith.constant 9.99999974E-6 : f32
    %464 = vector.broadcast %cst_324 : f32 to vector<16x1xf32>
    %465 = arith.addf %462, %464 : vector<16x1xf32>
    %466 = math.rsqrt %465 : vector<16x1xf32>
    %467 = arith.mulf %463, %466 : vector<16x1xf32>
    %468 = vector.broadcast %458 : vector<16x1xf32> to vector<16x196xf32>
    %469 = arith.subf %451, %468 : vector<16x196xf32>
    %470 = vector.broadcast %467 : vector<16x1xf32> to vector<16x196xf32>
    %471 = arith.mulf %469, %470 : vector<16x196xf32>
    %c0_325 = arith.constant 0 : index
    %c0_326 = arith.constant 0 : index
    %472 = vector.load %arg29[%c0_325, %c0_326] : memref<16x1xf32, #tpu.memory_space<vmem>>, vector<16x1xf32>
    %473 = vector.broadcast %472 : vector<16x1xf32> to vector<16x196xf32>
    %474 = arith.addf %471, %473 : vector<16x196xf32>
    %cst_327 = arith.constant 0.000000e+00 : f32
    %475 = vector.broadcast %cst_327 : f32 to vector<16x196xf32>
    %476 = arith.maximumf %474, %475 : vector<16x196xf32>
    %477 = arith.truncf %476 : vector<16x196xf32> to vector<16x196xbf16>
    %c0_328 = arith.constant 0 : index
    %c0_329 = arith.constant 0 : index
    %c0_330 = arith.constant 0 : index
    %478 = vector.load %arg30[%c0_328, %c0_329, %c0_330] : memref<4x8x16xbf16, #tpu.memory_space<vmem>>, vector<1x8x16xbf16>
    %479 = vector.shape_cast %478 : vector<1x8x16xbf16> to vector<8x16xbf16>
    %cst_331 = arith.constant dense<0.000000e+00> : vector<8x196xf32>
    %480 = tpu.matmul %479, %477, %cst_331 {dimension_numbers = #tpu.dot_dimension_numbers<[1], [0], [0], [1], [0, 0, 1, 1], [], []>} : vector<8x16xbf16>, vector<16x196xbf16>, vector<8x196xf32> -> vector<8x196xf32>
    %c1_332 = arith.constant 1 : index
    %c0_333 = arith.constant 0 : index
    %c0_334 = arith.constant 0 : index
    %481 = vector.load %arg30[%c1_332, %c0_333, %c0_334] : memref<4x8x16xbf16, #tpu.memory_space<vmem>>, vector<1x8x16xbf16>
    %482 = vector.shape_cast %481 : vector<1x8x16xbf16> to vector<8x16xbf16>
    %cst_335 = arith.constant dense<0.000000e+00> : vector<8x196xf32>
    %483 = tpu.matmul %482, %477, %cst_335 {dimension_numbers = #tpu.dot_dimension_numbers<[1], [0], [0], [1], [0, 0, 1, 1], [], []>} : vector<8x16xbf16>, vector<16x196xbf16>, vector<8x196xf32> -> vector<8x196xf32>
    %484 = arith.truncf %483 : vector<8x196xf32> to vector<8x196xbf16>
    %c0_336 = arith.constant 0 : index
    %c0_337 = arith.constant 0 : index
    %c0_338 = arith.constant 0 : index
    %485 = vector.load %arg31[%c0_336, %c0_337, %c0_338] : memref<3x196x196xbf16, #tpu.memory_space<vmem>>, vector<1x196x196xbf16>
    %486 = vector.shape_cast %485 : vector<1x196x196xbf16> to vector<196x196xbf16>
    %cst_339 = arith.constant dense<0.000000e+00> : vector<8x196xf32>
    %487 = tpu.matmul %484, %486, %cst_339 {dimension_numbers = #tpu.dot_dimension_numbers<[1], [0], [0], [1], [0, 0, 1, 1], [], []>} : vector<8x196xbf16>, vector<196x196xbf16>, vector<8x196xf32> -> vector<8x196xf32>
    %488 = arith.addf %480, %487 : vector<8x196xf32>
    %c2_340 = arith.constant 2 : index
    %c0_341 = arith.constant 0 : index
    %c0_342 = arith.constant 0 : index
    %489 = vector.load %arg30[%c2_340, %c0_341, %c0_342] : memref<4x8x16xbf16, #tpu.memory_space<vmem>>, vector<1x8x16xbf16>
    %490 = vector.shape_cast %489 : vector<1x8x16xbf16> to vector<8x16xbf16>
    %cst_343 = arith.constant dense<0.000000e+00> : vector<8x196xf32>
    %491 = tpu.matmul %490, %477, %cst_343 {dimension_numbers = #tpu.dot_dimension_numbers<[1], [0], [0], [1], [0, 0, 1, 1], [], []>} : vector<8x16xbf16>, vector<16x196xbf16>, vector<8x196xf32> -> vector<8x196xf32>
    %492 = arith.truncf %491 : vector<8x196xf32> to vector<8x196xbf16>
    %c1_344 = arith.constant 1 : index
    %c0_345 = arith.constant 0 : index
    %c0_346 = arith.constant 0 : index
    %493 = vector.load %arg31[%c1_344, %c0_345, %c0_346] : memref<3x196x196xbf16, #tpu.memory_space<vmem>>, vector<1x196x196xbf16>
    %494 = vector.shape_cast %493 : vector<1x196x196xbf16> to vector<196x196xbf16>
    %cst_347 = arith.constant dense<0.000000e+00> : vector<8x196xf32>
    %495 = tpu.matmul %492, %494, %cst_347 {dimension_numbers = #tpu.dot_dimension_numbers<[1], [0], [0], [1], [0, 0, 1, 1], [], []>} : vector<8x196xbf16>, vector<196x196xbf16>, vector<8x196xf32> -> vector<8x196xf32>
    %496 = arith.addf %488, %495 : vector<8x196xf32>
    %c3_348 = arith.constant 3 : index
    %c0_349 = arith.constant 0 : index
    %c0_350 = arith.constant 0 : index
    %497 = vector.load %arg30[%c3_348, %c0_349, %c0_350] : memref<4x8x16xbf16, #tpu.memory_space<vmem>>, vector<1x8x16xbf16>
    %498 = vector.shape_cast %497 : vector<1x8x16xbf16> to vector<8x16xbf16>
    %cst_351 = arith.constant dense<0.000000e+00> : vector<8x196xf32>
    %499 = tpu.matmul %498, %477, %cst_351 {dimension_numbers = #tpu.dot_dimension_numbers<[1], [0], [0], [1], [0, 0, 1, 1], [], []>} : vector<8x16xbf16>, vector<16x196xbf16>, vector<8x196xf32> -> vector<8x196xf32>
    %500 = arith.truncf %499 : vector<8x196xf32> to vector<8x196xbf16>
    %c2_352 = arith.constant 2 : index
    %c0_353 = arith.constant 0 : index
    %c0_354 = arith.constant 0 : index
    %501 = vector.load %arg31[%c2_352, %c0_353, %c0_354] : memref<3x196x196xbf16, #tpu.memory_space<vmem>>, vector<1x196x196xbf16>
    %502 = vector.shape_cast %501 : vector<1x196x196xbf16> to vector<196x196xbf16>
    %cst_355 = arith.constant dense<0.000000e+00> : vector<8x196xf32>
    %503 = tpu.matmul %500, %502, %cst_355 {dimension_numbers = #tpu.dot_dimension_numbers<[1], [0], [0], [1], [0, 0, 1, 1], [], []>} : vector<8x196xbf16>, vector<196x196xbf16>, vector<8x196xf32> -> vector<8x196xf32>
    %504 = arith.addf %496, %503 : vector<8x196xf32>
    %c0_356 = arith.constant 0 : index
    %c0_357 = arith.constant 0 : index
    %505 = vector.load %arg32[%c0_356, %c0_357] : memref<1x1xf32, #tpu.memory_space<vmem>>, vector<1x1xf32>
    %506 = vector.broadcast %505 : vector<1x1xf32> to vector<8x196xf32>
    %507 = arith.addf %504, %506 : vector<8x196xf32>
    %508 = arith.negf %507 : vector<8x196xf32>
    %509 = math.exp %508 : vector<8x196xf32>
    %cst_358 = arith.constant 1.000000e+00 : f32
    %510 = vector.broadcast %cst_358 : f32 to vector<8x196xf32>
    %511 = arith.addf %510, %509 : vector<8x196xf32>
    %512 = arith.divf %510, %511 : vector<8x196xf32>
    %c0_359 = arith.constant 0 : index
    %c0_360 = arith.constant 0 : index
    %513 = vector.load %arg33[%c0_359, %c0_360] : memref<8x196xf32, #tpu.memory_space<vmem>>, vector<8x196xf32>
    tpu.vector_store %arg33[%c0_359, %c0_360], %512 {strides = array<i32>} : memref<8x196xf32, #tpu.memory_space<vmem>>, vector<8x196xf32>,
    return
  }
}

</mosaic_0001>

<bundles_post_ra>
// kernel: ae_fused_forward.1
= control target key start
LH: loop header
LB: loop body
LE: loop exit
PB: predicated region body
PF: predicated region fallthrough
CT: control target
= control target key end

     0   :  { %v17699_v0 = vmov 0   ;;  %s15452_s6 = smov 1   ;;  %s15453_s10 = smov 2   ;;  %vm17693_vm0 = vcmask 1040384   ;;  %vm170_vm1 = vcmask 146432   ;;  %vm17695_vm2 = vcmask 130048   ;;  %s17674_s0 = inlined_call_operand.smem [shape: u32[34], index: -1, kind: input, shape index: {}] }
   0x1   :  { %s1_s5 = sld [smem:[%s17674_s0]]   ;;  %213 = vmatprep.mubr.bf16.mxu0 %v17699_v0  ;;  %14806 = vset.pattern.permute.xlu0 %v17699_v0  ;;  %s15454_s14 = smov 3   ;;  %vm17690_vm3 = vcmask 556032   ;;  %vm976_vm4 = vcmask 621568   ;;  %vm17687_vm5 = vcmask 64512   ;;  %vm1025_vm6 = vcmask 195584  }
   0x2   :  { %s12090_s9 = sld [smem:[%s17674_s0 + %s15452_s6]]   ;;  %283 = vmatprep.mubr.bf16.mxu1 %v17699_v0  ;;  %14807 = vset.pattern.permute.xlu1 %v17699_v0  ;;  %s15455_s18 = smov 16   ;;  %vm1008_vm7 = vcmask 687104   ;;  %vm1040_vm8 = vcmask 752640   ;;  %vm2039_vm9 = vcmask 818176   ;;  %vm17694_vm10 = vcmask 261120  }
   0x3   :  { %s12091_s13 = sld [smem:[%s17674_s0 + %s15453_s10]]   ;;  %s15456_s22 = smov 24   ;;  %vm17684_vm11 = vcmask 1041408   ;;  %vm17692_vm12 = vcmask 400384   ;;  %vm4164_vm13 = vcmask 1043456   ;;  %vm4165_vm14 = vcmask 1044480  }
   0x4   :  { %s15552_s17 = sld [smem:[%s17674_s0 + %s15454_s14]]   ;;  %s15457_s26 = smov 32   ;;  %vm17691_vm15 = vcmask 154624  }
   0x5   :  { %s15610_s21 = sld [smem:[%s17674_s0 + %s15455_s18]]   ;;  %s15458_s30 = smov 4  }
   0x6   :  { %s15616_s25 = sld [smem:[%s17674_s0 + %s15456_s22]]   ;;  %s17677_s4 = smov 68  }
   0x7   :  { %v148_v1 = vld [vmem:[%s1_s5 + $0x28] sm:$0x3]  ;;  %v147_v2 = vld [vmem:[%s1_s5 + $0x20] sm:$0x3]  ;;  %v146_v6 = vld [vmem:[%s1_s5 + $0x18] sm:$0xff]  ;;  %s12121_s29 = sld [smem:[%s17674_s0 + %s15457_s26]]   ;;  %s15461_s6 = smov 76  }
   0x8   :  { %v144_v3 = vld [vmem:[%s1_s5 + $0x8] sm:$0xff]  ;;  %v152_v4 = vpack.c.bf16 %v148_v1, %v148_v1  ;;  %v151_v5 = vpack.c.bf16 %v147_v2, %v147_v2  ;;  %v143_v7 = vld [vmem:[%s1_s5] sm:$0xff]  ;;  %v145_v8 = vld [vmem:[%s1_s5 + $0x10] sm:$0xff]  ;;  %s15626_s3 = sld [smem:[%s17674_s0 + %s15458_s30]]   ;;  %s17675_s5 = smov 8  }
   0x9   :  { %v150_v9 = vpack.c.bf16 %v146_v6, %v144_v3  ;;  %v153_v11 = vld [vmem:[%s12091_s13] sm:$0xff]  ;;  %v149_v12 = vpack.c.bf16 %v145_v8, %v143_v7  ;;  %v154_v13 = vld [vmem:[%s12091_s13 + $0x8] sm:$0xff]  ;;  %s15462_s7 = smov 84   ;;  %s15463_s8 = smov 92  }
   0xa   :  { %12124 = vmatprep.subr.msk.bf16.mxu0 %vm17693_vm0, %v152_v4  ;;  %v176_v10 = vsel %vm17693_vm0, %v151_v5, 0  ;;  %157 = vperm.xlu0 %14806, %v153_v11   ;;  %v14808_v14 = vld [vmem:[%s12090_s9] sm:$0xff]   ;;  %v14810_v32 = vld [vmem:[%s15552_s17 + $0x10] sm:$0xff]   ;;  %v14811_v33 = vld [vmem:[%s15552_s17 + $0x8] sm:$0xff]   ;;  %s15464_s9 = smov 5   ;;  %s15977_s16 = sld [smem:[%s17674_s0 + %s17675_s5]]   ;;  %vm4394_vm0 = vcmask 1031168  }
   0xb   :  { %194 = vmatpush1.bf16.msra.mxu0 %v176_v10  ;;  %v14809_v31 = vld [vmem:[%s15552_s17] sm:$0xff]   ;;  %v14812_v34 = vld [vmem:[%s15552_s17 + $0x18] sm:$0xff]   ;;  %v14814_v36 = vld [vmem:[%s15552_s17 + $0x30] sm:$0xff]   ;;  %s12094_s13 = sld [smem:[%s17674_s0 + %s15464_s9]]   ;;  %s15466_s23 = smov 7  }
   0xc   :  { %195 = vmatprep.subr.bf16.mxu0 %v150_v9  ;;  %v14813_v35 = vld [vmem:[%s15552_s17 + $0x20] sm:$0xff]   ;;  %v14815_v37 = vld [vmem:[%s15552_s17 + $0x28] sm:$0xff]   ;;  %v14816_v38 = vld [vmem:[%s15552_s17 + $0x38] sm:$0xff]   ;;  %s12096_s27 = sld [smem:[%s17674_s0 + %s15466_s23]]   ;;  %s15467_s28 = smov 9  }
   0xd   :  { %v14817_v39 = vld [vmem:[%s15552_s17 + $0x40] sm:$0xff]   ;;  %v14818_v40 = vld [vmem:[%s15552_s17 + $0x50] sm:$0xff]   ;;  %v14819_v41 = vld [vmem:[%s15552_s17 + $0x48] sm:$0xff]   ;;  %v72_v49 = vstv %s12121_s29  ;;  %s16009_s2 = sld [smem:[%s17674_s0 + %s15467_s28]]   ;;  %s15469_s12 = smov 10  }
   0xe   :  { %162 = vperm.xlu0 %14806, %v154_v13   ;;  %v14821_v42 = vld [vmem:[%s15552_s17 + $0x58] sm:$0xff]   ;;  %v14820_v43 = vld [vmem:[%s15552_s17 + $0x60] sm:$0xff]   ;;  %v14823_v44 = vld [vmem:[%s15552_s17 + $0x70] sm:$0xff]   ;;  %73 = vst [vmem:[#allocation2] sm:$0x1] %v72_v49  ;;  %s16155_s15 = sld [smem:[%s17674_s0 + %s15469_s12]]   ;;  %s17678_s19 = smov 98  }
   0xf   :  { %196 = vmatpush1.bf16.msra.mxu0 %v149_v12  ;;  %v14822_v45 = vld [vmem:[%s15552_s17 + $0x68] sm:$0xff]   ;;  %v14825_v46 = vld [vmem:[%s15552_s17 + $0x78] sm:$0xff]   ;;  %v14824_v47 = vld [vmem:[%s15552_s17 + $0x80] sm:$0xff]   ;;  %s17676_s20 = smov 87   ;;  %s15475_s24 = smov 38  }
  0x10   :  { %v14826_v48 = vld [vmem:[%s15552_s17 + $0x88] sm:$0xff]   ;;  %v14827_v50 = vld [vmem:[%s15626_s3 + $0x78] sm:$0xff]   ;;  %v14829_v52 = vld [vmem:[%s15626_s3 + $0x70] sm:$0xff]   ;;  %s15465_s17 = smov 6   ;;  %s15479_s14 = smov 27  }
  0x11   :  { %v14828_v51 = vld [vmem:[%s15626_s3 + $0x38] sm:$0xff]   ;;  %v14830_v53 = vld [vmem:[%s15626_s3 + $0x30] sm:$0xff]   ;;  %v14831_v54 = vld [vmem:[%s15626_s3 + $0x68] sm:$0xff]   ;;  %s15482_s29 = smov 72   ;;  %s15485_s9 = smov 81  }
  0x12   :  { %12125 = vmatmul.mubr.msk.bf16.vlgmr.msra.gmra.mxu0 %vm170_vm1, %v14808_v14  ;;  %v14832_v55 = vld [vmem:[%s15626_s3 + $0x28] sm:$0xff]   ;;  %v14833_v56 = vld [vmem:[%s15626_s3 + $0x60] sm:$0xff]   ;;  %v14835_v58 = vld [vmem:[%s15626_s3 + $0x58] sm:$0xff]  }
  0x13   :  { %361 = vmatprep.mubr.bf16.mxu0 %v17699_v0  ;;  %v14834_v57 = vld [vmem:[%s15626_s3 + $0x20] sm:$0xff]   ;;  %v14836_v59 = vld [vmem:[%s15626_s3 + $0x18] sm:$0xff]   ;;  %v14837_v60 = vld [vmem:[%s15626_s3 + $0x50] sm:$0xff]  }
  0x14   :  { %v14841_v61 = vld [vmem:[%s15626_s3 + $0xf8] sm:$0xff]   ;;  %v14838_v63 = vld [vmem:[%s15626_s3 + $0x10] sm:$0xff]   ;;  %v14839_v1 = vld [vmem:[%s15626_s3 + $0x48] sm:$0xff]  }
  0x15   :  { %v14842_v62 = vld [vmem:[%s15626_s3 + $0xb8] sm:$0xff]   ;;  %v14845_v2 = vld [vmem:[%s15626_s3 + $0xf0] sm:$0xff]   ;;  %v14840_v3 = vld [vmem:[%s15626_s3 + $0x8] sm:$0xff]  }
  0x16   :  { %v14843_v4 = vld [vmem:[%s15626_s3 + $0x40] sm:$0xff]   ;;  %v14846_v6 = vld [vmem:[%s15626_s3 + $0xb0] sm:$0xff]   ;;  %v14847_v7 = vld [vmem:[%s15626_s3 + $0x178] sm:$0xff]  }
  0x17   :  { %v14844_v5 = vld [vmem:[%s15626_s3] sm:$0xff]   ;;  %v14848_v8 = vld [vmem:[%s15626_s3 + $0xe8] sm:$0xff]   ;;  %v14874_v49 = vld [vmem:[%s15626_s3 + $0x1f8] sm:$0xff]  }
  0x18   :  { %v14850_v9 = vld [vmem:[%s15626_s3 + $0xa8] sm:$0xff]   ;;  %v14852_v10 = vld [vmem:[%s15626_s3 + $0xe0] sm:$0xff]  }
  0x19   :  { %v14854_v13 = vld [vmem:[%s15626_s3 + $0xa0] sm:$0xff]  }
  0x85   :  { %v158_v15 = vpop.permute.xlu0 %157 }
  0x89   :  { %v163_v18 = vpop.permute.xlu0 %162 }
  0xd2   :  { %v215_v16 = vpop.f32.mrf.mxu0 }
  0xd3   :  { %v216_v22 = vadd.f32 %v215_v16, %v158_v15  ;;  %v14856_v16 = vld [vmem:[%s15626_s3 + $0xd8] sm:$0xff]  }
  0xd4   :  { %v217_v17 = vpop.f32.mrf.mxu0 }
  0xd5   :  { %v218_v20 = vadd.f32 %v217_v17, %v158_v15  ;;  %v224_v28 = vmax.f32 %v216_v22, 0.0 }
  0xd6   :  { %v219_v19 = vpop.f32.mrf.mxu0 }
  0xd7   :  { %v220_v21 = vadd.f32 %v219_v19, %v163_v18  ;;  %v225_v26 = vmax.f32 %v218_v20, 0.0  ;;  %v14858_v19 = vld [vmem:[%s15626_s3 + $0x98] sm:$0xff]  }
  0xd8   :  { %v221_v23 = vpop.f32.mrf.mxu0 }
  0xd9   :  { %v222_v24 = vadd.f32 %v221_v23, %v163_v18  ;;  %v226_v25 = vmax.f32 %v220_v21, 0.0 }
  0xdb   :  { %v227_v27 = vmax.f32 %v222_v24, 0.0  ;;  %v228_v30 = vpack.c.bf16 %v226_v25, %v224_v28  ;;  %v14860_v24 = vld [vmem:[%s15626_s3 + $0xd0] sm:$0xff]  }
  0xdd   :  { %v229_v29 = vpack.c.bf16 %v227_v27, %v225_v26  ;;  %v14862_v27 = vld [vmem:[%s15626_s3 + $0x90] sm:$0xff]  }
  0xdf   :  { %265 = vmatprep.subr.bf16.mxu1 %v229_v29  ;;  %343 = vmatprep.subr.bf16.mxu0 %v229_v29 }
  0xe0   :  { %266 = vmatpush1.bf16.msra.mxu1 %v228_v30  ;;  %344 = vmatpush1.bf16.msra.mxu0 %v228_v30 }
  0xe1   :  { %421 = vmatprep.subr.bf16.mxu1 %v229_v29  ;;  %499 = vmatprep.subr.bf16.mxu0 %v229_v29 }
  0xe3   :  { %12128 = vmatmul.mubr.msk.bf16.vlgmr.msra.gmra.mxu1 %vm17695_vm2, %v14809_v31  ;;  %12136 = vmatmul.mubr.msk.bf16.vlgmr.msra.gmra.mxu0 %vm17695_vm2, %v14810_v32 }
  0xe4   :  { %422 = vmatpush1.bf16.msra.mxu1 %v228_v30  ;;  %500 = vmatpush1.bf16.msra.mxu0 %v228_v30 }
  0xe5   :  { %577 = vmatprep.subr.bf16.mxu1 %v229_v29  ;;  %655 = vmatprep.subr.bf16.mxu0 %v229_v29 }
  0xe6   :  { %293 = vmatprep.mubr.bf16.mxu1 %v17699_v0  ;;  %371 = vmatprep.mubr.bf16.mxu0 %v17699_v0 }
  0xeb   :  { %12129 = vmatmul.mubr.msk.bf16.gmra.mxu1 %vm17695_vm2, %v14811_v33  ;;  %12137 = vmatmul.mubr.msk.bf16.gmra.mxu0 %vm17695_vm2, %v14812_v34  ;;  %v14866_v33 = vld [vmem:[%s15626_s3 + $0x88] sm:$0xff]  }
  0xec   :  { %439 = vmatprep.mubr.bf16.mxu1 %v17699_v0  ;;  %517 = vmatprep.mubr.bf16.mxu0 %v17699_v0 }
  0xf3   :  { %12144 = vmatmul.mubr.msk.bf16.vlgmr.msra.gmra.mxu1 %vm17695_vm2, %v14813_v35  ;;  %12152 = vmatmul.mubr.msk.bf16.vlgmr.msra.gmra.mxu0 %vm17695_vm2, %v14814_v36 }
  0xf4   :  { %578 = vmatpush1.bf16.msra.mxu1 %v228_v30  ;;  %656 = vmatpush1.bf16.msra.mxu0 %v228_v30 }
  0xf5   :  { %733 = vmatprep.subr.bf16.mxu1 %v229_v29  ;;  %811 = vmatprep.subr.bf16.mxu0 %v229_v29 }
  0xf6   :  { %449 = vmatprep.mubr.bf16.mxu1 %v17699_v0  ;;  %527 = vmatprep.mubr.bf16.mxu0 %v17699_v0 }
  0xfb   :  { %12145 = vmatmul.mubr.msk.bf16.gmra.mxu1 %vm17695_vm2, %v14815_v37  ;;  %12153 = vmatmul.mubr.msk.bf16.gmra.mxu0 %vm17695_vm2, %v14816_v38  ;;  %v14868_v38 = vld [vmem:[%s15626_s3 + $0xc0] sm:$0xff]  }
  0xfc   :  { %595 = vmatprep.mubr.bf16.mxu1 %v17699_v0  ;;  %673 = vmatprep.mubr.bf16.mxu0 %v17699_v0 }
 0x103   :  { %12160 = vmatmul.mubr.msk.bf16.vlgmr.msra.gmra.mxu1 %vm17695_vm2, %v14817_v39  ;;  %12168 = vmatmul.mubr.msk.bf16.vlgmr.msra.gmra.mxu0 %vm17695_vm2, %v14818_v40 }
 0x104   :  { %734 = vmatpush1.bf16.msra.mxu1 %v228_v30  ;;  %812 = vmatpush1.bf16.msra.mxu0 %v228_v30 }
 0x105   :  { %889 = vmatprep.subr.bf16.mxu1 %v229_v29  ;;  %605 = vmatprep.mubr.bf16.mxu1 %v17699_v0 }
 0x106   :  { %683 = vmatprep.mubr.bf16.mxu0 %v17699_v0  ;;  %13363 = vmatprep.subr.bf16.mxu0 %v14827_v50 }
 0x10b   :  { %12161 = vmatmul.mubr.msk.bf16.gmra.mxu1 %vm17695_vm2, %v14819_v41  ;;  %12169 = vmatmul.mubr.msk.bf16.gmra.mxu0 %vm17695_vm2, %v14821_v42  ;;  %v14870_v41 = vld [vmem:[%s15626_s3 + $0x80] sm:$0xff]  }
 0x10c   :  { %751 = vmatprep.mubr.bf16.mxu1 %v17699_v0  ;;  %829 = vmatprep.mubr.bf16.mxu0 %v17699_v0 }
 0x113   :  { %12176 = vmatmul.mubr.msk.bf16.vlgmr.msra.gmra.mxu1 %vm17695_vm2, %v14820_v43  ;;  %12184 = vmatmul.mubr.msk.bf16.vlgmr.msra.gmra.mxu0 %vm17695_vm2, %v14823_v44 }
 0x114   :  { %890 = vmatpush1.bf16.msra.mxu1 %v228_v30  ;;  %761 = vmatprep.mubr.bf16.mxu1 %v17699_v0  ;;  %v14864_v30 = vld [vmem:[%s15626_s3 + $0xc8] sm:$0xff]  }
 0x115   :  { %839 = vmatprep.mubr.bf16.mxu0 %v17699_v0  ;;  %13364 = vmatpush3.bf16.msra.mxu0 %v14828_v51 }
 0x116   :  { %13365 = vmatprep.subr.bf16.mxu0 %v14829_v52  ;;  %13391 = vmatprep.subr.bf16.mxu1 %v14841_v61 }
 0x119   :  { %13366 = vmatpush3.bf16.msra.mxu0 %v14830_v53 }
 0x11a   :  { %13367 = vmatprep.subr.bf16.mxu0 %v14831_v54 }
 0x11b   :  { %12177 = vmatmul.mubr.msk.bf16.gmra.mxu1 %vm17695_vm2, %v14822_v45  ;;  %12185 = vmatmul.mubr.msk.bf16.gmra.mxu0 %vm17695_vm2, %v14825_v46 }
 0x11c   :  { %907 = vmatprep.mubr.bf16.mxu1 %v17699_v0 }
 0x11d   :  { %13368 = vmatpush3.bf16.msra.mxu0 %v14832_v55 }
 0x11e   :  { %13369 = vmatprep.subr.bf16.mxu0 %v14833_v56 }
 0x121   :  { %13370 = vmatpush3.bf16.msra.mxu0 %v14834_v57 }
 0x122   :  { %13371 = vmatprep.subr.bf16.mxu0 %v14835_v58 }
 0x123   :  { %12192 = vmatmul.mubr.msk.bf16.vlgmr.msra.gmra.mxu1 %vm17695_vm2, %v14824_v47 }
 0x124   :  { %917 = vmatprep.mubr.bf16.mxu1 %v17699_v0  ;;  %13392 = vmatpush3.bf16.msra.mxu1 %v14842_v62 }
 0x125   :  { %13372 = vmatpush3.bf16.msra.mxu0 %v14836_v59  ;;  %13393 = vmatprep.subr.bf16.mxu1 %v14845_v2 }
 0x126   :  { %13373 = vmatprep.subr.bf16.mxu0 %v14837_v60 }
 0x128   :  { %13394 = vmatpush3.bf16.msra.mxu1 %v14846_v6 }
 0x129   :  { %13374 = vmatpush3.bf16.msra.mxu0 %v14838_v63  ;;  %13395 = vmatprep.subr.bf16.mxu1 %v14848_v8 }
 0x12a   :  { %13375 = vmatprep.subr.bf16.mxu0 %v14839_v1 }
 0x12b   :  { %12193 = vmatmul.mubr.msk.bf16.gmra.mxu1 %vm17695_vm2, %v14826_v48 }
 0x12c   :  { %13396 = vmatpush3.bf16.msra.mxu1 %v14850_v9 }
 0x12d   :  { %13376 = vmatpush3.bf16.msra.mxu0 %v14840_v3  ;;  %13397 = vmatprep.subr.bf16.mxu1 %v14852_v10 }
 0x12e   :  { %13377 = vmatprep.subr.bf16.mxu0 %v14843_v4 }
 0x130   :  { %13398 = vmatpush3.bf16.msra.mxu1 %v14854_v13 }
 0x131   :  { %13378 = vmatpush3.bf16.msra.mxu0 %v14844_v5  ;;  %13399 = vmatprep.subr.bf16.mxu1 %v14856_v16 }
 0x132   :  { %13419 = vmatprep.subr.bf16.mxu0 %v14847_v7 }
 0x134   :  { %13400 = vmatpush3.bf16.msra.mxu1 %v14858_v19 }
 0x135   :  { %13401 = vmatprep.subr.bf16.mxu1 %v14860_v24 }
 0x138   :  { %13402 = vmatpush3.bf16.msra.mxu1 %v14862_v27 }
 0x139   :  { %13403 = vmatprep.subr.bf16.mxu1 %v14864_v30 }
 0x13c   :  { %13404 = vmatpush3.bf16.msra.mxu1 %v14866_v33 }
 0x13d   :  { %13405 = vmatprep.subr.bf16.mxu1 %v14868_v38 }
 0x140   :  { %13406 = vmatpush3.bf16.msra.mxu1 %v14870_v41 }
 0x141   :  { %13447 = vmatprep.subr.bf16.mxu1 %v14874_v49 }
 0x1a3   :  { %v15652_v11 = vpop.f32.mrf.mxu1  ;;  %v363_v12 = vpop.f32.mrf.mxu0 }
 0x1a5   :  { %v15655_v14 = vpop.f32.mrf.mxu1  ;;  %v15657_v15 = vpop.f32.mrf.mxu0 }
 0x1a7   :  { %v15660_v17 = vpop.f32.mrf.mxu1  ;;  %v367_v18 = vpop.f32.mrf.mxu0 }
 0x1a8   :  { %v304_v20 = vpack.c.bf16 %v15660_v17, %v15652_v11  ;;  %v382_v21 = vpack.c.bf16 %v367_v18, %v363_v12  ;;  %v14859_v11 = vld [vmem:[%s15626_s3 + $0x160] sm:$0xff]  }
 0x1a9   :  { %v15665_v22 = vpop.f32.mrf.mxu1  ;;  %v369_v23 = vpop.f32.mrf.mxu0  ;;  %v14861_v17 = vld [vmem:[%s15626_s3 + $0x120] sm:$0xff]  }
 0x1aa   :  { %936 = vrot.lane.b32.xlu1 %v382_v21, %s17677_s4  ;;  %v383_v59 = vpack.c.bf16 %v369_v23, %v15657_v15 }
 0x1ab   :  { %v15669_v25 = vpop.f32.mrf.mxu1  ;;  %v373_v26 = vpop.f32.mrf.mxu0 }
 0x1ad   :  { %v15672_v28 = vpop.f32.mrf.mxu1  ;;  %v15674_v29 = vpop.f32.mrf.mxu0 }
 0x1af   :  { %v15677_v31 = vpop.f32.mrf.mxu1  ;;  %v377_v32 = vpop.f32.mrf.mxu0 }
 0x1b0   :  { %v306_v34 = vpack.c.bf16 %v15677_v31, %v15669_v25  ;;  %v384_v35 = vpack.c.bf16 %v377_v32, %v373_v26  ;;  %v14871_v25 = vld [vmem:[%s15626_s3 + $0x148] sm:$0xff]  }
 0x1b1   :  { %v15682_v36 = vpop.f32.mrf.mxu1  ;;  %v15684_v37 = vpop.f32.mrf.mxu0 }
 0x1b2   :  { %940 = vrot.lane.b32.xlu1 %v384_v35, %s17677_s4 }
 0x1b3   :  { %v441_v39 = vpop.f32.mrf.mxu1  ;;  %v519_v40 = vpop.f32.mrf.mxu0 }
 0x1b5   :  { %v443_v42 = vpop.f32.mrf.mxu1  ;;  %v521_v43 = vpop.f32.mrf.mxu0 }
 0x1b7   :  { %v445_v44 = vpop.f32.mrf.mxu1  ;;  %v523_v45 = vpop.f32.mrf.mxu0 }
 0x1b8   :  { %v460_v46 = vpack.c.bf16 %v445_v44, %v441_v39  ;;  %v538_v50 = vpack.c.bf16 %v523_v45, %v519_v40  ;;  %v385_v45 = vpack.c.bf16 %v15684_v37, %v15674_v29 }
 0x1b9   :  { %v447_v47 = vpop.f32.mrf.mxu1  ;;  %v525_v48 = vpop.f32.mrf.mxu0 }
 0x1ba   :  { %v461_v51 = vpack.c.bf16 %v447_v47, %v443_v42  ;;  %953 = vrot.lane.b32.xlu0 %v460_v46, %s17675_s5  ;;  %v539_v54 = vpack.c.bf16 %v525_v48, %v521_v43 }
 0x1bb   :  { %v451_v52 = vpop.f32.mrf.mxu1  ;;  %v529_v53 = vpop.f32.mrf.mxu0 }
 0x1bc   :  { %955 = vrot.lane.b32.xlu1 %v461_v51, %s17675_s5 }
 0x1bd   :  { %v453_v55 = vpop.f32.mrf.mxu1  ;;  %v531_v56 = vpop.f32.mrf.mxu0 }
 0x1be   :  { %968 = vrot.lane.b32.xlu0 %v538_v50, %s15461_s6 }
 0x1bf   :  { %v455_v57 = vpop.f32.mrf.mxu1  ;;  %v533_v58 = vpop.f32.mrf.mxu0 }
 0x1c0   :  { %v462_v60 = vpack.c.bf16 %v455_v57, %v451_v52  ;;  %970 = vrot.lane.b32.xlu1 %v539_v54, %s15461_s6  ;;  %v540_v3 = vpack.c.bf16 %v533_v58, %v529_v53 }
 0x1c1   :  { %v457_v61 = vpop.f32.mrf.mxu1  ;;  %v535_v62 = vpop.f32.mrf.mxu0 }
 0x1c2   :  { %v463_v63 = vpack.c.bf16 %v457_v61, %v453_v55  ;;  %938 = vrot.lane.b32.xlu0 %v383_v59, %s17677_s4  ;;  %v541_v6 = vpack.c.bf16 %v535_v62, %v531_v56 }
 0x1c3   :  { %v597_v1 = vpop.f32.mrf.mxu1  ;;  %v675_v2 = vpop.f32.mrf.mxu0 }
 0x1c4   :  { %957 = vrot.lane.b32.xlu1 %v462_v60, %s17675_s5 }
 0x1c5   :  { %v599_v4 = vpop.f32.mrf.mxu1  ;;  %v677_v5 = vpop.f32.mrf.mxu0 }
 0x1c6   :  { %959 = vrot.lane.b32.xlu0 %v463_v63, %s17675_s5 }
 0x1c7   :  { %v601_v7 = vpop.f32.mrf.mxu1  ;;  %v679_v8 = vpop.f32.mrf.mxu0 }
 0x1c8   :  { %972 = vrot.lane.b32.xlu1 %v540_v3, %s15461_s6  ;;  %v694_v16 = vpack.c.bf16 %v679_v8, %v675_v2  ;;  %v616_v24 = vpack.c.bf16 %v601_v7, %v597_v1 }
 0x1c9   :  { %v603_v9 = vpop.f32.mrf.mxu1  ;;  %v681_v10 = vpop.f32.mrf.mxu0 }
 0x1ca   :  { %v695_v12 = vpack.c.bf16 %v681_v10, %v677_v5  ;;  %974 = vrot.lane.b32.xlu0 %v541_v6, %s15461_s6  ;;  %v617_v51 = vpack.c.bf16 %v603_v9, %v599_v4  ;;  %v1354_v9 = vld [vmem:[%s12094_s13 + $0x10] sm:$0xff] }
 0x1cb   :  { %v607_v13 = vpop.f32.mrf.mxu1  ;;  %v685_v15 = vpop.f32.mrf.mxu0 }
 0x1cc   :  { %1002 = vrot.lane.b32.xlu1 %v695_v12, %s15462_s7  ;;  %v1352_v12 = vld [vmem:[%s12094_s13] sm:$0xff] }
 0x1cd   :  { %v609_v18 = vpop.f32.mrf.mxu1  ;;  %v687_v19 = vpop.f32.mrf.mxu0 }
 0x1cf   :  { %v611_v21 = vpop.f32.mrf.mxu1  ;;  %v689_v23 = vpop.f32.mrf.mxu0 }
 0x1d0   :  { %1000 = vrot.lane.b32.xlu1 %v694_v16, %s15462_s7  ;;  %v618_v33 = vpack.c.bf16 %v611_v21, %v607_v13  ;;  %v696_v41 = vpack.c.bf16 %v689_v23, %v685_v15  ;;  %v1355_v15 = vld [vmem:[%s12094_s13 + $0x18] sm:$0xff]  ;;  %v1353_v16 = vld [vmem:[%s12094_s13 + $0x8] sm:$0xff]  ;;  %s17682_s13 = smov 36  }
 0x1d1   :  { %v613_v26 = vpop.f32.mrf.mxu1  ;;  %v691_v27 = vpop.f32.mrf.mxu0  ;;  %v14849_v21 = vld [vmem:[%s15626_s3 + $0x138] sm:$0xff]  }
 0x1d2   :  { %v619_v29 = vpack.c.bf16 %v613_v26, %v609_v18  ;;  %v697_v57 = vpack.c.bf16 %v691_v27, %v687_v19  ;;  %v305_v18 = vpack.c.bf16 %v15665_v22, %v15655_v14  ;;  %v14853_v26 = vld [vmem:[%s15626_s3 + $0x130] sm:$0xff]   ;;  %v14855_v27 = vld [vmem:[%s15626_s3 + $0x168] sm:$0xff]   ;;  %v307_v14 = vpack.c.bf16 %v15682_v36, %v15672_v28  ;;  %v14865_v36 = vld [vmem:[%s15626_s3 + $0x118] sm:$0xff]  }
 0x1d3   :  { %v753_v30 = vpop.f32.mrf.mxu1  ;;  %v831_v32 = vpop.f32.mrf.mxu0 }
 0x1d4   :  { %985 = vrot.lane.b32.xlu1 %v616_v24, %s15455_s18  ;;  %v14851_v24 = vld [vmem:[%s15626_s3 + $0x170] sm:$0xff]  }
 0x1d5   :  { %v755_v35 = vpop.f32.mrf.mxu1  ;;  %v833_v38 = vpop.f32.mrf.mxu0 }
 0x1d7   :  { %v757_v39 = vpop.f32.mrf.mxu1  ;;  %v835_v43 = vpop.f32.mrf.mxu0 }
 0x1d8   :  { %v772_v40 = vpack.c.bf16 %v757_v39, %v753_v30  ;;  %989 = vrot.lane.b32.xlu1 %v618_v33, %s15455_s18  ;;  %v850_v46 = vpack.c.bf16 %v835_v43, %v831_v32  ;;  %v14857_v30 = vld [vmem:[%s15626_s3 + $0x128] sm:$0xff]   ;;  %v14867_v33 = vld [vmem:[%s15626_s3 + $0x150] sm:$0xff]  }
 0x1d9   :  { %v759_v42 = vpop.f32.mrf.mxu1  ;;  %v837_v48 = vpop.f32.mrf.mxu0  ;;  %v14869_v39 = vld [vmem:[%s15626_s3 + $0x110] sm:$0xff]  }
 0x1da   :  { %1017 = vrot.lane.b32.xlu0 %v772_v40, %s15456_s22  ;;  %v773_v1 = vpack.c.bf16 %v759_v42, %v755_v35  ;;  %v851_v4 = vpack.c.bf16 %v837_v48, %v833_v38  ;;  %v14876_v42 = vld [vmem:[%s15626_s3 + $0x1b8] sm:$0xff]   ;;  %v14875_v48 = vld [vmem:[%s15626_s3 + $0x100] sm:$0xff]  }
 0x1db   :  { %v763_v44 = vpop.f32.mrf.mxu1  ;;  %v841_v50 = vpop.f32.mrf.mxu0 }
 0x1dc   :  { %1004 = vrot.lane.b32.xlu1 %v696_v41, %s15462_s7  ;;  %v14872_v41 = vld [vmem:[%s15626_s3 + $0x108] sm:$0xff]  }
 0x1dd   :  { %v765_v47 = vpop.f32.mrf.mxu1  ;;  %v843_v55 = vpop.f32.mrf.mxu0 }
 0x1de   :  { %942 = vrot.lane.b32.xlu0 %v385_v45, %s17677_s4  ;;  %v14873_v45 = vld [vmem:[%s15626_s3 + $0x140] sm:$0xff]  }
 0x1df   :  { %v767_v49 = vpop.f32.mrf.mxu1  ;;  %v845_v59 = vpop.f32.mrf.mxu0 }
 0x1e0   :  { %v774_v52 = vpack.c.bf16 %v767_v49, %v763_v44  ;;  %1032 = vrot.lane.b32.xlu1 %v850_v46, %s15463_s8  ;;  %v852_v10 = vpack.c.bf16 %v845_v59, %v841_v50  ;;  %v14877_v46 = vld [vmem:[%s15626_s3 + $0x1f0] sm:$0xff]  }
 0x1e1   :  { %v769_v53 = vpop.f32.mrf.mxu1  ;;  %v847_v62 = vpop.f32.mrf.mxu0  ;;  %v14879_v49 = vld [vmem:[%s15626_s3 + $0x1b0] sm:$0xff]  }
 0x1e2   :  { %987 = vrot.lane.b32.xlu0 %v617_v51, %s15455_s18  ;;  %v775_v37 = vpack.c.bf16 %v769_v53, %v765_v47  ;;  %v853_v2 = vpack.c.bf16 %v847_v62, %v843_v55  ;;  %v14878_v51 = vld [vmem:[%s15626_s3 + $0x278] sm:$0xff]   ;;  %v14887_v62 = vld [vmem:[%s15626_s3 + $0x1a0] sm:$0xff]  }
 0x1e3   :  { %v909_v54 = vpop.f32.mrf.mxu1  ;;  %v14880_v55 = vld [vmem:[%s15626_s3 + $0x238] sm:$0xff]  }
 0x1e4   :  { %1021 = vrot.lane.b32.xlu1 %v774_v52, %s15456_s22  ;;  %v14881_v52 = vld [vmem:[%s15626_s3 + $0x1e8] sm:$0xff]  }
 0x1e5   :  { %v911_v56 = vpop.f32.mrf.mxu1 }
 0x1e6   :  { %991 = vrot.lane.b32.xlu0 %v619_v29, %s15455_s18  ;;  %v14883_v29 = vld [vmem:[%s15626_s3 + $0x1a8] sm:$0xff]  }
 0x1e7   :  { %v913_v58 = vpop.f32.mrf.mxu1 }
 0x1e8   :  { %v928_v60 = vpack.c.bf16 %v913_v58, %v909_v54  ;;  %1023 = vrot.lane.b32.xlu1 %v775_v37, %s15456_s22 }
 0x1e9   :  { %v915_v61 = vpop.f32.mrf.mxu1 }
 0x1ea   :  { %1006 = vrot.lane.b32.xlu0 %v697_v57, %s15462_s7  ;;  %v929_v7 = vpack.c.bf16 %v915_v61, %v911_v56  ;;  %v14882_v56 = vld [vmem:[%s15626_s3 + $0x270] sm:$0xff]   ;;  %s15484_s7 = smov 90  }
 0x1eb   :  { %v919_v63 = vpop.f32.mrf.mxu1  ;;  %v14884_v61 = vld [vmem:[%s15626_s3 + $0x230] sm:$0xff]  }
 0x1ec   :  { %1049 = vrot.lane.b32.xlu1 %v928_v60, %s15457_s26  ;;  %v14885_v60 = vld [vmem:[%s15626_s3 + $0x1e0] sm:$0xff]  }
 0x1ed   :  { %v921_v3 = vpop.f32.mrf.mxu1 }
 0x1ee   :  { %1019 = vrot.lane.b32.xlu0 %v773_v1, %s15456_s22  ;;  %v14889_v1 = vld [vmem:[%s15626_s3 + $0x1d8] sm:$0xff]   ;;  %s15982_s22 = sld [smem:[%s17674_s0 + %s15465_s17]]   ;;  %s17697_s17 = smov 117  }
 0x1ef   :  { %v923_v5 = vpop.f32.mrf.mxu1 }
 0x1f0   :  { %1038 = vrot.lane.b32.xlu1 %v853_v2, %s15463_s8  ;;  %v930_v13 = vpack.c.bf16 %v923_v5, %v919_v63  ;;  %v14886_v63 = vld [vmem:[%s15626_s3 + $0x268] sm:$0xff]   ;;  %v14891_v5 = vld [vmem:[%s15626_s3 + $0x198] sm:$0xff]  }
 0x1f1   :  { %v925_v6 = vpop.f32.mrf.mxu1 }
 0x1f2   :  { %1034 = vrot.lane.b32.xlu0 %v851_v4, %s15463_s8  ;;  %v931_v8 = vpack.c.bf16 %v925_v6, %v921_v3  ;;  %v14888_v4 = vld [vmem:[%s15626_s3 + $0x228] sm:$0xff]   ;;  %v14890_v6 = vld [vmem:[%s15626_s3 + $0x260] sm:$0xff]  }
 0x1f4   :  { %1055 = vrot.lane.b32.xlu1 %v931_v8, %s15457_s26 }
 0x1f6   :  { %1051 = vrot.lane.b32.xlu0 %v929_v7, %s15457_s26  ;;  %v14893_v7 = vld [vmem:[%s15626_s3 + $0x1d0] sm:$0xff]  }
 0x1f8   :  { %1368 = vperm.xlu1 %14807, %v1354_v9  }
 0x1fa   :  { %1036 = vrot.lane.b32.xlu0 %v852_v10, %s15463_s8  ;;  %v14892_v10 = vld [vmem:[%s15626_s3 + $0x220] sm:$0xff]  }
 0x1fc   :  { %1358 = vperm.xlu1 %14807, %v1352_v12   ;;  %v14895_v12 = vld [vmem:[%s15626_s3 + $0x190] sm:$0xff]  }
 0x1fe   :  { %1053 = vrot.lane.b32.xlu0 %v930_v13, %s15457_s26  ;;  %v14894_v13 = vld [vmem:[%s15626_s3 + $0x258] sm:$0xff]   ;;  %s15476_s26 = smov 11  }
 0x1ff   :  { %s16262_s1 = sld [smem:[%s17674_s0 + %s15476_s26]]  }
 0x202   :  { %1373 = vperm.xlu0 %14806, %v1355_v15   ;;  %v14897_v15 = vld [vmem:[%s15626_s3 + $0x1c8] sm:$0xff]  }
 0x206   :  { %1363 = vperm.xlu0 %14806, %v1353_v16  }
 0x21c   :  { %v937_v19 = vpop.permute.xlu1 %936 }
 0x21d   :  { %v1063_v23 = vsel %vm17690_vm3, %v305_v18, %v937_v19  ;;  %v14896_v18 = vld [vmem:[%s15626_s3 + $0x218] sm:$0xff]  }
 0x21e   :  { %2082 = vmatprep.mubr.bf16.mxu0 %v1063_v23 }
 0x21f   :  { %2083 = vmatmul.mubr.bf16.vlgmr.msra.gmra.mxu0 %v304_v20  ;;  %v14863_v20 = vld [vmem:[%s15626_s3 + $0x158] sm:$0xff]  }
 0x220   :  { %13420 = vmatpush3.bf16.msra.mxu0 %v14849_v21  ;;  %v14898_v21 = vld [vmem:[%s15626_s3 + $0x250] sm:$0xff]  }
 0x221   :  { %13421 = vmatprep.subr.bf16.mxu0 %v14851_v24  ;;  %v14901_v24 = vld [vmem:[%s15626_s3 + $0x1c0] sm:$0xff]  }
 0x224   :  { %13422 = vmatpush3.bf16.msra.mxu0 %v14853_v26  ;;  %v15738_v22 = vpop.permute.xlu1 %940 }
 0x225   :  { %v1067_v32 = vsel %vm17690_vm3, %v307_v14, %v15738_v22  ;;  %13423 = vmatprep.subr.bf16.mxu0 %v14855_v27  ;;  %v14900_v14 = vld [vmem:[%s15626_s3 + $0x210] sm:$0xff]  }
 0x226   :  { %2090 = vmatprep.mubr.bf16.mxu0 %v1067_v32 }
 0x227   :  { %2091 = vmatmul.mubr.bf16.gmra.mxu0 %v306_v34 }
 0x228   :  { %13424 = vmatpush3.bf16.msra.mxu0 %v14857_v30  ;;  %v14903_v30 = vld [vmem:[%s15626_s3 + $0x180] sm:$0xff]  }
 0x229   :  { %13425 = vmatprep.subr.bf16.mxu0 %v14859_v11 }
 0x22c   :  { %13426 = vmatpush3.bf16.msra.mxu0 %v14861_v17  ;;  %v954_v28 = vpop.permute.xlu0 %953  ;;  %v14902_v17 = vld [vmem:[%s15626_s3 + $0x248] sm:$0xff]  }
 0x22d   :  { %13427 = vmatprep.subr.bf16.mxu0 %v14863_v20  ;;  %v14906_v20 = vld [vmem:[%s15626_s3 + $0x2f8] sm:$0xff]  }
 0x22e   :  { %v956_v35 = vpop.permute.xlu1 %955 }
 0x22f   :  { %v962_v54 = vsel %vm17687_vm5, %v954_v28, %v956_v35 }
 0x230   :  { %13428 = vmatpush3.bf16.msra.mxu0 %v14865_v36  ;;  %v969_v38 = vpop.permute.xlu0 %968 }
 0x231   :  { %13429 = vmatprep.subr.bf16.mxu0 %v14867_v33  ;;  %v1081_v57 = vsel %vm976_vm4, %v962_v54, %v969_v38  ;;  %v14904_v33 = vld [vmem:[%s15626_s3 + $0x208] sm:$0xff]   ;;  %v14915_v54 = vld [vmem:[%s15626_s3 + $0x2e0] sm:$0xff]  }
 0x232   :  { %v15753_v31 = vpop.permute.xlu1 %970 }
 0x233   :  { %v977_v34 = vsel %vm976_vm4, %v969_v38, %v15753_v31  ;;  %v14905_v38 = vld [vmem:[%s15626_s3 + $0x240] sm:$0xff]  }
 0x234   :  { %13430 = vmatpush3.bf16.msra.mxu0 %v14869_v39  ;;  %v939_v40 = vpop.permute.xlu0 %938  ;;  %2180 = vmatprep.mubr.bf16.mxu0 %v977_v34  ;;  %v14907_v34 = vld [vmem:[%s15626_s3 + $0x200] sm:$0xff]  }
 0x235   :  { %v945_v43 = vsel %vm17690_vm3, %v937_v19, %v939_v40  ;;  %v1072_v44 = vsel %vm17687_vm5, %v939_v40, %v954_v28  ;;  %13431 = vmatprep.subr.bf16.mxu0 %v14871_v25  ;;  %v14899_v19 = vld [vmem:[%s15626_s3 + $0x188] sm:$0xff]   ;;  %v14908_v40 = vld [vmem:[%s15626_s3 + $0x2b8] sm:$0xff]  }
 0x236   :  { %2131 = vmatprep.mubr.bf16.mxu1 %v1072_v44  ;;  %v15763_v47 = vpop.permute.xlu1 %957 }
 0x237   :  { %2132 = vmatmul.mubr.bf16.vlgmr.msra.gmra.mxu1 %v945_v43 }
 0x238   :  { %13432 = vmatpush3.bf16.msra.mxu0 %v14872_v41  ;;  %13448 = vmatpush3.bf16.msra.mxu1 %v14876_v42  ;;  %v960_v50 = vpop.permute.xlu0 %959  ;;  %v14909_v42 = vld [vmem:[%s15626_s3 + $0x2f0] sm:$0xff]  }
 0x239   :  { %13433 = vmatprep.subr.bf16.mxu0 %v14873_v45  ;;  %13449 = vmatprep.subr.bf16.mxu1 %v14877_v46  ;;  %v963_v3 = vsel %vm17687_vm5, %v15763_v47, %v960_v50  ;;  %v14910_v46 = vld [vmem:[%s15626_s3 + $0x2b0] sm:$0xff]  }
 0x23a   :  { %v973_v53 = vpop.permute.xlu1 %972 }
 0x23b   :  { %v1085_v8 = vsel %vm976_vm4, %v963_v3, %v973_v53 }
 0x23c   :  { %13434 = vmatpush3.bf16.msra.mxu0 %v14875_v48  ;;  %13450 = vmatpush3.bf16.msra.mxu1 %v14879_v49  ;;  %v15772_v37 = vpop.permute.xlu0 %974  ;;  %v14912_v49 = vld [vmem:[%s15626_s3 + $0x2e8] sm:$0xff]  }
 0x23d   :  { %13475 = vmatprep.subr.bf16.mxu0 %v14878_v51  ;;  %13451 = vmatprep.subr.bf16.mxu1 %v14881_v52  ;;  %v978_v59 = vsel %vm976_vm4, %v973_v53, %v15772_v37  ;;  %v14913_v52 = vld [vmem:[%s15626_s3 + $0x2a8] sm:$0xff]   ;;  %v14914_v53 = vld [vmem:[%s15626_s3 + $0x330] sm:$0xff]   ;;  %vm17698_vm4 = vcmask 957440  }
 0x23e   :  { %v15776_v58 = vpop.permute.xlu1 %1002 }
 0x23f   :  { %2181 = vmatmul.mubr.bf16.vlgmr.msra.gmra.mxu0 %v1081_v57  ;;  %v14916_v57 = vld [vmem:[%s15626_s3 + $0x2a0] sm:$0xff]  }
 0x240   :  { %13476 = vmatpush3.bf16.msra.mxu0 %v14880_v55  ;;  %13452 = vmatpush3.bf16.msra.mxu1 %v14883_v29 }
 0x241   :  { %13477 = vmatprep.subr.bf16.mxu0 %v14882_v56  ;;  %2188 = vmatprep.mubr.bf16.mxu0 %v978_v59 }
 0x242   :  { %v15785_v2 = vpop.permute.xlu1 %1000  ;;  %13453 = vmatprep.subr.bf16.mxu1 %v14885_v60 }
 0x244   :  { %13478 = vmatpush3.bf16.msra.mxu0 %v14884_v61  ;;  %13454 = vmatpush3.bf16.msra.mxu1 %v14887_v62  ;;  %v14919_v61 = vld [vmem:[%s15626_s3 + $0x298] sm:$0xff]   ;;  %v14920_v62 = vld [vmem:[%s15626_s3 + $0x320] sm:$0xff]  }
 0x245   :  { %13479 = vmatprep.subr.bf16.mxu0 %v14886_v63  ;;  %13455 = vmatprep.subr.bf16.mxu1 %v14889_v1 }
 0x246   :  { %v986_v9 = vpop.permute.xlu1 %985 }
 0x247   :  { %2189 = vmatmul.mubr.bf16.gmra.mxu0 %v1085_v8  ;;  %v1089_v43 = vsel %vm17695_vm2, %v15753_v31, %v986_v9  ;;  %v1009_v31 = vsel %vm1008_vm7, %v15785_v2, %v15776_v58  ;;  %v14926_v8 = vld [vmem:[%s15626_s3 + $0x310] sm:$0xff]  }
 0x248   :  { %13480 = vmatpush3.bf16.msra.mxu0 %v14888_v4  ;;  %13456 = vmatpush3.bf16.msra.mxu1 %v14891_v5  ;;  %v14922_v4 = vld [vmem:[%s15626_s3 + $0x290] sm:$0xff]   ;;  %v14923_v5 = vld [vmem:[%s15626_s3 + $0x318] sm:$0xff]  }
 0x249   :  { %13481 = vmatprep.subr.bf16.mxu0 %v14890_v6  ;;  %13457 = vmatprep.subr.bf16.mxu1 %v14893_v7  ;;  %v14924_v6 = vld [vmem:[%s15626_s3 + $0x2c8] sm:$0xff]  }
 0x24a   :  { %v990_v26 = vpop.permute.xlu1 %989  ;;  %v14925_v7 = vld [vmem:[%s15626_s3 + $0x288] sm:$0xff]  }
 0x24b   :  { %v1093_v55 = vsel %vm17695_vm2, %v15772_v37, %v990_v26  ;;  %v14918_v37 = vld [vmem:[%s15626_s3 + $0x2d8] sm:$0xff]  }
 0x24c   :  { %13482 = vmatpush3.bf16.msra.mxu0 %v14892_v10  ;;  %v15798_v16 = vpop.permute.xlu0 %1017  ;;  %13458 = vmatpush3.bf16.msra.mxu1 %v14895_v12  ;;  %v14928_v10 = vld [vmem:[%s15626_s3 + $0x280] sm:$0xff]   ;;  %v14929_v12 = vld [vmem:[%s15626_s3 + $0x308] sm:$0xff]  }
 0x24d   :  { %13483 = vmatprep.subr.bf16.mxu0 %v14894_v13  ;;  %13459 = vmatprep.subr.bf16.mxu1 %v14897_v15  ;;  %v1107_v23 = vsel %vm1025_vm6, %v15776_v58, %v15798_v16  ;;  %v14917_v58 = vld [vmem:[%s15626_s3 + $0x328] sm:$0xff]  }
 0x24e   :  { %2278 = vmatprep.mubr.bf16.mxu0 %v1107_v23  ;;  %v1005_v28 = vpop.permute.xlu1 %1004 }
 0x250   :  { %13484 = vmatpush3.bf16.msra.mxu0 %v14896_v18  ;;  %v943_v27 = vpop.permute.xlu0 %942  ;;  %13460 = vmatpush3.bf16.msra.mxu1 %v14899_v19  ;;  %v14930_v19 = vld [vmem:[%s15626_s3 + $0x300] sm:$0xff]  }
 0x251   :  { %v1076_v32 = vsel %vm17687_vm5, %v943_v27, %v15763_v47  ;;  %13485 = vmatprep.subr.bf16.mxu0 %v14898_v21  ;;  %v946_v11 = vsel %vm17690_vm3, %v15738_v22, %v943_v27  ;;  %13461 = vmatprep.subr.bf16.mxu1 %v14901_v24  ;;  %v14911_v47 = vld [vmem:[%s15626_s3 + $0x338] sm:$0xff]   ;;  %v14931_v21 = vld [vmem:[%s15626_s3 + $0x370] ss:$0 sps:$4 sm:$0x33]  }
 0x252   :  { %2139 = vmatprep.mubr.bf16.mxu1 %v1076_v32  ;;  %v15820_v39 = vpop.permute.xlu1 %1032  ;;  %v14934_v32 = vld [vmem:[%s15626_s3 + $0x358] sm:$0xff]  }
 0x253   :  { %2140 = vmatmul.mubr.bf16.gmra.mxu1 %v946_v11  ;;  %v14935_v11 = vld [vmem:[%s15626_s3 + $0x350] sm:$0xff]  }
 0x254   :  { %13486 = vmatpush3.bf16.msra.mxu0 %v14900_v14  ;;  %v988_v36 = vpop.permute.xlu0 %987  ;;  %13462 = vmatpush3.bf16.msra.mxu1 %v14903_v30  ;;  %v14932_v14 = vld [vmem:[%s15626_s3 + $0x368] sm:$0xff]   ;;  %v14933_v30 = vld [vmem:[%s15626_s3 + $0x360] sm:$0xff]  }
 0x255   :  { %v994_v35 = vsel %vm17695_vm2, %v986_v9, %v988_v36  ;;  %13487 = vmatprep.subr.bf16.mxu0 %v14902_v17  ;;  %13503 = vmatprep.subr.bf16.mxu1 %v14906_v20  ;;  %v14927_v9 = vld [vmem:[%s15626_s3 + $0x2c0] sm:$0xff]   ;;  %v14936_v17 = vld [vmem:[%s15626_s3 + $0x348] sm:$0xff]  }
 0x256   :  { %v1098_v22 = vsel %vm1008_vm7, %v994_v35, %v15785_v2  ;;  %v15831_v48 = vpop.permute.xlu1 %1021  ;;  %v14921_v2 = vld [vmem:[%s15626_s3 + $0x2d0] sm:$0xff]   ;;  %v14937_v20 = vld [vmem:[%s15626_s3 + $0x340] sm:$0xff]   ;;  %s17679_s3 = smov 19  }
 0x257   :  { %2229 = vmatprep.mubr.bf16.mxu1 %v1098_v22  ;;  %s16130_s11 = sld [smem:[%s17674_s0 + %s17679_s3]]  }
 0x258   :  { %13488 = vmatpush3.bf16.msra.mxu0 %v14904_v33  ;;  %v992_v25 = vpop.permute.xlu0 %991 }
 0x259   :  { %v995_v41 = vsel %vm17695_vm2, %v990_v26, %v992_v25  ;;  %13489 = vmatprep.subr.bf16.mxu0 %v14905_v38  ;;  %v2048_v26 = vsel %vm17684_vm11, %v14931_v21, 0  ;;  %vm4375_vm11 = vcmask 293888   ;;  %vm4396_vm2 = vcmask 56320  }
 0x25a   :  { %v1102_v44 = vsel %vm1008_vm7, %v995_v41, %v1005_v28  ;;  %v15846_v29 = vpop.permute.xlu1 %1023 }
 0x25b   :  { %2230 = vmatmul.mubr.bf16.vlgmr.msra.gmra.mxu1 %v1089_v43 }
 0x25c   :  { %13490 = vmatpush3.bf16.msra.mxu0 %v14907_v34  ;;  %13504 = vmatpush3.bf16.msra.mxu1 %v14908_v40  ;;  %v1007_v45 = vpop.permute.xlu0 %1006 }
 0x25d   :  { %2237 = vmatprep.mubr.bf16.mxu1 %v1102_v44  ;;  %13505 = vmatprep.subr.bf16.mxu1 %v14909_v42  ;;  %v1111_v50 = vsel %vm1025_vm6, %v1007_v45, %v15831_v48  ;;  %v1010_v56 = vsel %vm1008_vm7, %v1005_v28, %v1007_v45  ;;  %vm17688_vm7 = vcmask 310272  }
 0x25e   :  { %2344 = vmatprep.subr.bf16.mxu0 %v17699_v0  ;;  %v15860_v1 = vpop.permute.xlu1 %1049 }
 0x25f   :  { %2279 = vmatmul.mubr.bf16.vlgmr.msra.gmra.mxu0 %v1009_v31 }
 0x260   :  { %13506 = vmatpush3.bf16.msra.mxu1 %v14910_v46  ;;  %2345 = vmatpush1.bf16.msra.mxu0 %v14911_v47  ;;  %v1020_v51 = vpop.permute.xlu0 %1019 }
 0x261   :  { %13507 = vmatprep.subr.bf16.mxu1 %v14912_v49  ;;  %2346 = vmatprep.subr.bf16.mxu0 %v17699_v0  ;;  %v1026_v15 = vsel %vm1025_vm6, %v15798_v16, %v1020_v51  ;;  %v1027_v16 = vsel %vm1025_vm6, %v15831_v48, %v15846_v29  ;;  %vm17689_vm6 = vcmask 801792  }
 0x262   :  { %2286 = vmatprep.mubr.bf16.mxu0 %v1111_v50  ;;  %v1039_v13 = vpop.permute.xlu1 %1038  ;;  %v1116_v24 = vsel %vm1040_vm8, %v1026_v15, %v15820_v39 }
 0x263   :  { %2238 = vmatmul.mubr.bf16.gmra.mxu1 %v1093_v55 }
 0x264   :  { %13508 = vmatpush3.bf16.msra.mxu1 %v14913_v52  ;;  %2347 = vmatpush1.bf16.msra.mxu0 %v14914_v53  ;;  %v15851_v59 = vpop.permute.xlu0 %1034 }
 0x265   :  { %13509 = vmatprep.subr.bf16.mxu1 %v14915_v54  ;;  %2348 = vmatprep.subr.bf16.mxu0 %v17699_v0  ;;  %v1041_v60 = vsel %vm1040_vm8, %v15820_v39, %v15851_v59  ;;  %v1125_v35 = vsel %vm17694_vm10, %v15851_v59, %v15860_v1 }
 0x266   :  { %2327 = vmatprep.mubr.bf16.mxu1 %v1041_v60  ;;  %v1056_v28 = vpop.permute.xlu1 %1055 }
 0x267   :  { %2287 = vmatmul.mubr.bf16.gmra.mxu0 %v1010_v56 }
 0x268   :  { %13510 = vmatpush3.bf16.msra.mxu1 %v14916_v57  ;;  %2349 = vmatpush1.bf16.msra.mxu0 %v14917_v58  ;;  %v1052_v63 = vpop.permute.xlu0 %1051 }
 0x269   :  { %13511 = vmatprep.subr.bf16.mxu1 %v14918_v37  ;;  %2350 = vmatprep.subr.bf16.mxu0 %v17699_v0  ;;  %v1058_v3 = vsel %vm17694_vm10, %v15860_v1, %v1052_v63 }
 0x26a   :  { %12305 = vmatprep.mubr.msk.bf16.mxu0 %vm2039_vm9, %v1058_v3 }
 0x26c   :  { %13512 = vmatpush3.bf16.msra.mxu1 %v14919_v61  ;;  %2351 = vmatpush1.bf16.msra.mxu0 %v14920_v62  ;;  %v1037_v18 = vpop.permute.xlu0 %1036 }
 0x26d   :  { %13513 = vmatprep.subr.bf16.mxu1 %v14921_v2  ;;  %2352 = vmatprep.subr.bf16.mxu0 %v17699_v0  ;;  %v1042_v23 = vsel %vm1040_vm8, %v1037_v18, %v1039_v13  ;;  %v1120_v27 = vsel %vm1040_vm8, %v1027_v16, %v1037_v18  ;;  %vm17685_vm8 = vcmask 465920  }
 0x270   :  { %13514 = vmatpush3.bf16.msra.mxu1 %v14922_v4  ;;  %2353 = vmatpush1.bf16.msra.mxu0 %v14923_v5  ;;  %v1054_v36 = vpop.permute.xlu0 %1053 }
 0x271   :  { %13515 = vmatprep.subr.bf16.mxu1 %v14924_v6  ;;  %2354 = vmatprep.subr.bf16.mxu0 %v17699_v0  ;;  %v1059_v33 = vsel %vm17694_vm10, %v1054_v36, %v1056_v28  ;;  %v1129_v38 = vsel %vm17694_vm10, %v1039_v13, %v1054_v36 }
 0x274   :  { %13516 = vmatpush3.bf16.msra.mxu1 %v14925_v7  ;;  %2355 = vmatpush1.bf16.msra.mxu0 %v14926_v8 }
 0x275   :  { %13517 = vmatprep.subr.bf16.mxu1 %v14927_v9  ;;  %2356 = vmatprep.subr.bf16.mxu0 %v17699_v0 }
 0x278   :  { %13518 = vmatpush3.bf16.msra.mxu1 %v14928_v10  ;;  %2357 = vmatpush1.bf16.msra.mxu0 %v14929_v12 }
 0x279   :  { %2358 = vmatprep.subr.bf16.mxu0 %v17699_v0 }
 0x27b   :  { %2328 = vmatmul.mubr.bf16.vlgmr.msra.gmra.mxu1 %v1116_v24 }
 0x27c   :  { %2359 = vmatpush1.bf16.msra.mxu0 %v14930_v19  ;;  %2335 = vmatprep.mubr.bf16.mxu1 %v1042_v23  ;;  %v1369_v19 = vpop.permute.xlu1 %1368 }
 0x27d   :  { %2362 = vmatprep.subr.bf16.mxu0 %v17699_v0  ;;  %v1374_v15 = vpop.permute.xlu0 %1373 }
 0x280   :  { %2363 = vmatpush2.bf16.msra.mxu0 %v2048_v26 }
 0x281   :  { %2364 = vmatprep.subr.bf16.mxu0 %v17699_v0 }
 0x283   :  { %2336 = vmatmul.mubr.bf16.gmra.mxu1 %v1120_v27 }
 0x284   :  { %2365 = vmatpush2.bf16.msra.mxu0 %v14932_v14 }
 0x285   :  { %2366 = vmatprep.subr.bf16.mxu0 %v17699_v0 }
 0x288   :  { %2367 = vmatpush2.bf16.msra.mxu0 %v14933_v30 }
 0x289   :  { %2368 = vmatprep.subr.bf16.mxu0 %v17699_v0 }
 0x28c   :  { %2369 = vmatpush2.bf16.msra.mxu0 %v14934_v32 }
 0x28d   :  { %2370 = vmatprep.subr.bf16.mxu0 %v17699_v0 }
 0x290   :  { %2371 = vmatpush2.bf16.msra.mxu0 %v14935_v11  ;;  %v1364_v11 = vpop.permute.xlu0 %1363 }
 0x291   :  { %2372 = vmatprep.subr.bf16.mxu0 %v17699_v0 }
 0x294   :  { %2373 = vmatpush2.bf16.msra.mxu0 %v14936_v17 }
 0x295   :  { %2374 = vmatprep.subr.bf16.mxu0 %v17699_v0 }
 0x298   :  { %2375 = vmatpush2.bf16.msra.mxu0 %v14937_v20 }
 0x29b   :  { %2377 = vmatmul.mubr.bf16.vlgmr.msra.gmra.mxu0 %v1125_v35 }
 0x29c   :  { %12306 = vmatprep.mubr.msk.bf16.mxu0 %vm2039_vm9, %v1059_v33  ;;  %vm17686_vm9 = vcmask 711680  }
 0x2a3   :  { %2385 = vmatmul.mubr.bf16.gmra.mxu0 %v1129_v38 }
 0x2df   :  { %v15910_v22 = vpop.f32.mrf.mxu0 }
 0x2e1   :  { %v15912_v39 = vpop.f32.mrf.mxu0 }
 0x2e3   :  { %v13382_v34 = vpop.f32.mrf.mxu0 }
 0x2e5   :  { %v13383_v41 = vpop.f32.mrf.mxu0 }
 0x2e6   :  { %v13384_v16 = vadd.f32 %v13383_v41, %v13382_v34 }
 0x2e7   :  { %v13385_v43 = vpop.f32.mrf.mxu0 }
 0x2e8   :  { %v2088_v36 = vadd.f32 %v13384_v16, %v1364_v11 }
 0x2e9   :  { %v13386_v45 = vpop.f32.mrf.mxu0 }
 0x2ea   :  { %v13387_v12 = vadd.f32 %v13386_v45, %v13385_v43  ;;  %v13381_v45 = vadd.f32 %v15912_v39, %v15910_v22 }
 0x2eb   :  { %v13388_v47 = vpop.f32.mrf.mxu0 }
 0x2ec   :  { %v2093_v23 = vadd.f32 %v13387_v12, %v1369_v19 }
 0x2ed   :  { %v13389_v49 = vpop.f32.mrf.mxu0 }
 0x2ee   :  { %v13390_v24 = vadd.f32 %v13389_v49, %v13388_v47 }
 0x2f0   :  { %v2096_v17 = vadd.f32 %v13390_v24, %v1374_v15 }
 0x2f7   :  { %v15914_v25 = vpop.f32.mrf.mxu1 }
 0x2f9   :  { %v15916_v40 = vpop.f32.mrf.mxu1 }
 0x2fb   :  { %v13410_v42 = vpop.f32.mrf.mxu1 }
 0x2fd   :  { %v13411_v44 = vpop.f32.mrf.mxu1 }
 0x2fe   :  { %v13412_v30 = vadd.f32 %v13411_v44, %v13410_v42 }
 0x2ff   :  { %v15918_v50 = vpop.f32.mrf.mxu0 }
 0x301   :  { %v15920_v52 = vpop.f32.mrf.mxu0 }
 0x302   :  { %v13437_v22 = vadd.f32 %v15920_v52, %v15918_v50 }
 0x303   :  { %v13438_v54 = vpop.f32.mrf.mxu0 }
 0x305   :  { %v13439_v29 = vpop.f32.mrf.mxu0 }
 0x306   :  { %v13440_v33 = vadd.f32 %v13439_v29, %v13438_v54 }
 0x307   :  { %v13441_v57 = vpop.f32.mrf.mxu0 }
 0x309   :  { %v13442_v59 = vpop.f32.mrf.mxu0 }
 0x30a   :  { %v13443_v20 = vadd.f32 %v13442_v59, %v13441_v57 }
 0x30b   :  { %v13444_v60 = vpop.f32.mrf.mxu0 }
 0x30d   :  { %v13445_v62 = vpop.f32.mrf.mxu0 }
 0x30e   :  { %v13446_v49 = vadd.f32 %v13445_v62, %v13444_v60 }
 0x313   :  { %v13413_v46 = vpop.f32.mrf.mxu1 }
 0x315   :  { %v13414_v48 = vpop.f32.mrf.mxu1 }
 0x316   :  { %v13415_v18 = vadd.f32 %v13414_v48, %v13413_v46  ;;  %v2137_v46 = vadd.f32 %v13412_v30, %v2088_v36  ;;  %v1359_v48 = vpop.permute.xlu1 %1358 }
 0x317   :  { %v13416_v31 = vpop.f32.mrf.mxu1 }
 0x318   :  { %v2142_v27 = vadd.f32 %v13415_v18, %v2093_v23  ;;  %v2186_v57 = vadd.f32 %v13440_v33, %v2137_v46 }
 0x319   :  { %v13417_v51 = vpop.f32.mrf.mxu1 }
 0x31a   :  { %v13418_v14 = vadd.f32 %v13417_v51, %v13416_v31  ;;  %v2191_v43 = vadd.f32 %v13443_v20, %v2142_v27  ;;  %v13409_v51 = vadd.f32 %v15916_v40, %v15914_v25 }
 0x31b   :  { %v15922_v53 = vpop.f32.mrf.mxu1 }
 0x31c   :  { %v2145_v38 = vadd.f32 %v13418_v14, %v2096_v17 }
 0x31d   :  { %v15924_v55 = vpop.f32.mrf.mxu1 }
 0x31e   :  { %v2194_v29 = vadd.f32 %v13446_v49, %v2145_v38  ;;  %v2683_v38 = vld [vmem:[%s15977_s16 + $0x18] sm:$0xff]  ;;  %v2424_v49 = vld [vmem:[%s15982_s22 + $0x10] sm:$0xff] }
 0x31f   :  { %v13466_v56 = vpop.f32.mrf.mxu1  ;;  %v15926_v63 = vpop.f32.mrf.mxu0 }
 0x321   :  { %v13467_v58 = vpop.f32.mrf.mxu1  ;;  %v15928_v2 = vpop.f32.mrf.mxu0 }
 0x322   :  { %v13468_v47 = vadd.f32 %v13467_v58, %v13466_v56 }
 0x323   :  { %v13469_v37 = vpop.f32.mrf.mxu1  ;;  %v13494_v5 = vpop.f32.mrf.mxu0 }
 0x324   :  { %v2235_v39 = vadd.f32 %v13468_v47, %v2186_v57 }
 0x325   :  { %v13470_v61 = vpop.f32.mrf.mxu1  ;;  %v13495_v7 = vpop.f32.mrf.mxu0 }
 0x326   :  { %v13471_v28 = vadd.f32 %v13470_v61, %v13469_v37  ;;  %v2085_v37 = vadd.f32 %v13381_v45, %v1359_v48  ;;  %v13496_v61 = vadd.f32 %v13495_v7, %v13494_v5  ;;  %v13493_v5 = vadd.f32 %v15928_v2, %v15926_v63  ;;  %v2423_v48 = vld [vmem:[%s15982_s22 + $0x8] sm:$0xff] }
 0x327   :  { %v13472_v1 = vpop.f32.mrf.mxu1  ;;  %v13497_v9 = vpop.f32.mrf.mxu0 }
 0x328   :  { %v2240_v42 = vadd.f32 %v13471_v28, %v2191_v43  ;;  %v2284_v19 = vadd.f32 %v13496_v61, %v2235_v39  ;;  %v2682_v43 = vld [vmem:[%s15977_s16 + $0x10] sm:$0xff] }
 0x329   :  { %v13473_v3 = vpop.f32.mrf.mxu1  ;;  %v13498_v13 = vpop.f32.mrf.mxu0 }
 0x32a   :  { %v13499_v44 = vadd.f32 %v13498_v13, %v13497_v9  ;;  %v13474_v31 = vadd.f32 %v13473_v3, %v13472_v1  ;;  %v2134_v9 = vadd.f32 %v13409_v51, %v2085_v37  ;;  %v13465_v1 = vadd.f32 %v15924_v55, %v15922_v53 }
 0x32b   :  { %v13500_v26 = vpop.f32.mrf.mxu0 }
 0x32c   :  { %v2289_v12 = vadd.f32 %v13499_v44, %v2240_v42  ;;  %v2243_v60 = vadd.f32 %v13474_v31, %v2194_v29  ;;  %v2183_v15 = vadd.f32 %v13437_v22, %v2134_v9  ;;  %v2425_v44 = vld [vmem:[%s15982_s22 + $0x18] sm:$0xff] }
 0x32d   :  { %v13501_v35 = vpop.f32.mrf.mxu0 }
 0x32e   :  { %v13502_v62 = vadd.f32 %v13501_v35, %v13500_v26  ;;  %v2232_v52 = vadd.f32 %v13465_v1, %v2183_v15  ;;  %v2422_v35 = vld [vmem:[%s15982_s22] sm:$0xff] }
 0x32f   :  { %13965 = vmatprep.mubr.msk.f32.mxu1 %vm17694_vm10, %v2422_v35 }
 0x330   :  { %v2281_v27 = vadd.f32 %v13493_v5, %v2232_v52 }
 0x33b   :  { %v15930_v4 = vpop.f32.mrf.mxu1 }
 0x33d   :  { %v15932_v6 = vpop.f32.mrf.mxu1 }
 0x33f   :  { %v13522_v8 = vpop.f32.mrf.mxu1 }
 0x341   :  { %v13523_v10 = vpop.f32.mrf.mxu1 }
 0x342   :  { %v13524_v40 = vadd.f32 %v13523_v10, %v13522_v8  ;;  %v13521_v8 = vadd.f32 %v15932_v6, %v15930_v4 }
 0x343   :  { %v13525_v21 = vpop.f32.mrf.mxu1 }
 0x344   :  { %v2333_v7 = vadd.f32 %v13524_v40, %v2284_v19  ;;  %v2330_v2 = vadd.f32 %v13521_v8, %v2281_v27 }
 0x345   :  { %v13526_v32 = vpop.f32.mrf.mxu1 }
 0x346   :  { %v13527_v59 = vadd.f32 %v13526_v32, %v13525_v21  ;;  %v2292_v21 = vadd.f32 %v13502_v62, %v2243_v60 }
 0x347   :  { %v13528_v34 = vpop.f32.mrf.mxu1 }
 0x348   :  { %v2338_v13 = vadd.f32 %v13527_v59, %v2289_v12 }
 0x349   :  { %v13529_v56 = vpop.f32.mrf.mxu1 }
 0x34a   :  { %v13530_v3 = vadd.f32 %v13529_v56, %v13528_v34 }
 0x34c   :  { %v2341_v24 = vadd.f32 %v13530_v3, %v2292_v21  ;;  %v2619_v21 = vld [vmem:[%s12096_s27 + $0x18] sm:$0xff] }
 0x35b   :  { %v2378_v41 = vpop.f32.mrf.mxu0 }
 0x35c   :  { %v15961_v4 = vadd.f32 %v2378_v41, %v2330_v2  ;;  %v14939_v2 = vld [vmem:[%s16009_s2 + $0x60] sm:$0xff]  }
 0x35d   :  { %v2380_v54 = vpop.f32.mrf.mxu0  ;;  %14025 = vmatprep.mubr.msk.bf16.mxu0 %vm17694_vm10, %v14939_v2  ;;  %v14972_v2 = vld [vmem:[%s16009_s2 + $0x110] sm:$0xff]  }
 0x35e   :  { %v2394_v17 = vsel %vm17692_vm12, %v15961_v4, 0.0  ;;  %v2406_v36 = vmul.f32 %v15961_v4, %v15961_v4 }
 0x35f   :  { %v2381_v58 = vpop.f32.mrf.mxu0 }
 0x360   :  { %v15950_v10 = vadd.f32 %v2381_v58, %v2333_v7  ;;  %v2410_v33 = vsel %vm17692_vm12, %v2406_v36, 0.0 }
 0x361   :  { %v2383_v25 = vpop.f32.mrf.mxu0 }
 0x362   :  { %v2407_v32 = vmul.f32 %v15950_v10, %v15950_v10  ;;  %v2397_v6 = vsel %vm17692_vm12, %v15950_v10, 0.0 }
 0x363   :  { %v2386_v18 = vpop.f32.mrf.mxu0 }
 0x364   :  { %v15942_v50 = vadd.f32 %v2386_v18, %v2338_v13  ;;  %v2413_v11 = vsel %vm17692_vm12, %v2407_v32, 0.0  ;;  %v2616_v18 = vld [vmem:[%s12096_s27] sm:$0xff] }
 0x365   :  { %v2388_v23 = vpop.f32.mrf.mxu0 }
 0x366   :  { %v2400_v53 = vsel %vm17692_vm12, %v15942_v50, 0.0  ;;  %v2408_v20 = vmul.f32 %v15942_v50, %v15942_v50 }
 0x367   :  { %v2389_v55 = vpop.f32.mrf.mxu0  ;;  %2401 = vadd.xlane.f32.xlu1 %v2400_v53  ;;  %v2618_v53 = vld [vmem:[%s12096_s27 + $0x10] sm:$0xff] }
 0x368   :  { %v15952_v16 = vadd.f32 %v2389_v55, %v2341_v24  ;;  %v2416_v28 = vsel %vm17692_vm12, %v2408_v20, 0.0  ;;  %v2680_v24 = vld [vmem:[%s15977_s16] sm:$0xff] }
 0x369   :  { %v2391_v26 = vpop.f32.mrf.mxu0 }
 0x36a   :  { %v2403_v14 = vsel %vm17692_vm12, %v15952_v16, 0.0  ;;  %v2409_v63 = vmul.f32 %v15952_v16, %v15952_v16  ;;  %v2617_v26 = vld [vmem:[%s12096_s27 + $0x8] sm:$0xff]  ;;  %s17680_s27 = smov 45  }
 0x36b   :  { %2404 = vadd.xlane.f32.xlu0 %v2403_v14  ;;  %v2681_v14 = vld [vmem:[%s15977_s16 + $0x8] sm:$0xff]  ;;  %s15470_s16 = smov 49  }
 0x36c   :  { %v2419_v30 = vsel %vm17692_vm12, %v2409_v63, 0.0  ;;  %v14938_v63 = vld [vmem:[%s16009_s2] sm:$0xff]  }
 0x36d   :  { %2420 = vadd.xlane.f32.xlu1 %v2419_v30 }
 0x36f   :  { %2398 = vadd.xlane.f32.xlu0 %v2397_v6 }
 0x371   :  { %2414 = vadd.xlane.f32.xlu1 %v2413_v11 }
 0x373   :  { %2395 = vadd.xlane.f32.xlu0 %v2394_v17 }
 0x377   :  { %2417 = vadd.xlane.f32.xlu0 %v2416_v28 }
 0x37b   :  { %2411 = vadd.xlane.f32.xlu0 %v2410_v33 }
 0x382   :  { %2701 = vperm.xlu1 %14807, %v2683_v38  }
 0x391   :  { %2696 = vperm.xlu0 %14806, %v2682_v43  }
 0x3f0   :  { %v2402_v46 = vpop.xlane.xlu1 %2401 }
 0x3f4   :  { %v2405_v45 = vpop.xlane.xlu0 %2404 }
 0x3f5   :  { %13957 = vmatprep.subr.mxu1 %v2405_v45 }
 0x3f6   :  { %13958 = vmatpush3.msra.mxu1 %v2405_v45  ;;  %v2421_v34 = vpop.xlane.xlu1 %2420 }
 0x3f7   :  { %13959 = vmatprep.subr.mxu1 %v2402_v46 }
 0x3f8   :  { %v2399_v47 = vpop.xlane.xlu0 %2398  ;;  %13960 = vmatpush3.msra.mxu1 %v2402_v46 }
 0x3f9   :  { %13961 = vmatprep.subr.mxu1 %v2399_v47 }
 0x3fa   :  { %13962 = vmatpush3.msra.mxu1 %v2399_v47  ;;  %v2415_v31 = vpop.xlane.xlu1 %2414 }
 0x3fc   :  { %v2396_v41 = vpop.xlane.xlu0 %2395 }
 0x3fd   :  { %13963 = vmatprep.subr.mxu1 %v2396_v41 }
 0x3fe   :  { %13964 = vmatpush3.msra.mxu1 %v2396_v41  ;;  %v2702_v32 = vpop.permute.xlu1 %2701 }
 0x3ff   :  { %13966 = vmatmul.mubr.msk.f32.vlgmr.msra.gmra.mxu1 %vm17694_vm10, %v2423_v48  ;;  %13971 = vmatprep.subr.mxu1 %v2421_v34 }
 0x400   :  { %v2418_v42 = vpop.xlane.xlu0 %2417  ;;  %13972 = vmatpush3.msra.mxu1 %v2421_v34  ;;  %13968 = vmatprep.mubr.msk.f32.mxu1 %vm17694_vm10, %v2424_v49 }
 0x401   :  { %13973 = vmatprep.subr.mxu1 %v2418_v42 }
 0x402   :  { %13974 = vmatpush3.msra.mxu1 %v2418_v42 }
 0x403   :  { %13969 = vmatmul.mubr.msk.f32.gmra.mxu1 %vm17694_vm10, %v2425_v44  ;;  %13975 = vmatprep.subr.mxu1 %v2415_v31 }
 0x404   :  { %v2412_v51 = vpop.xlane.xlu0 %2411  ;;  %13976 = vmatpush3.msra.mxu1 %v2415_v31  ;;  %13979 = vmatprep.mubr.msk.f32.mxu1 %vm17694_vm10, %v2422_v35 }
 0x405   :  { %13977 = vmatprep.subr.mxu1 %v2412_v51 }
 0x406   :  { %13978 = vmatpush3.msra.mxu1 %v2412_v51 }
 0x407   :  { %13980 = vmatmul.mubr.msk.f32.vlgmr.msra.gmra.mxu1 %vm17694_vm10, %v2423_v48 }
 0x408   :  { %13982 = vmatprep.mubr.msk.f32.mxu1 %vm17694_vm10, %v2424_v49 }
 0x40b   :  { %13983 = vmatmul.mubr.msk.f32.gmra.mxu1 %vm17694_vm10, %v2425_v44 }
 0x40c   :  { %13989 = vmatprep.mubr.msk.bf16.mxu1 %vm17694_vm10, %v14938_v63  ;;  %v2697_v30 = vpop.permute.xlu0 %2696  ;;  %v14971_v63 = vld [vmem:[%s16009_s2 + $0x108] sm:$0xff]  }
 0x4bf   :  { %v13967_v57 = vpop.f32.mrf.mxu1 }
 0x4c0   :  { %2639 = vperm.xlu1 %14807, %v13967_v57   ;;  %v2609_v12 = vmul.f32 %v13967_v57, %v13967_v57 }
 0x4c1   :  { %v2504_v54 = vpop.f32.mrf.mxu1 }
 0x4c2   :  { %2634 = vperm.xlu0 %14806, %v2504_v54   ;;  %v2608_v22 = vmul.f32 %v2504_v54, %v2504_v54 }
 0x4c3   :  { %v13970_v29 = vpop.f32.mrf.mxu1 }
 0x4c4   :  { %v2611_v56 = vmul.f32 %v13970_v29, %v13970_v29 }
 0x4c5   :  { %v2514_v59 = vpop.f32.mrf.mxu1 }
 0x4c6   :  { %2649 = vperm.xlu0 %14806, %v13970_v29   ;;  %2644 = vperm.xlu1 %14807, %v2514_v59   ;;  %v2610_v60 = vmul.f32 %v2514_v59, %v2514_v59  ;;  %v14940_v59 = vld [vmem:[%s16009_s2 + $0x8] sm:$0xff]  }
 0x4c7   :  { %v13981_v37 = vpop.f32.mrf.mxu1 }
 0x4c8   :  { %v2613_v25 = vsub.f32 %v13981_v37, %v2609_v12  ;;  %v14941_v37 = vld [vmem:[%s16009_s2 + $0x68] sm:$0xff]   ;;  %v14947_v12 = vld [vmem:[%s16009_s2 + $0xa0] sm:$0xff]  }
 0x4c9   :  { %v2589_v39 = vpop.f32.mrf.mxu1 }
 0x4ca   :  { %v2612_v58 = vsub.f32 %v2589_v39, %v2608_v22  ;;  %v2621_v15 = vadd.f32 1e-05, %v2613_v25  ;;  %v14942_v22 = vld [vmem:[%s16009_s2 + $0x10] sm:$0xff]   ;;  %v14951_v25 = vld [vmem:[%s16009_s2 + $0x38] sm:$0xff]  }
 0x4cb   :  { %v13984_v61 = vpop.f32.mrf.mxu1  ;;  %v14943_v39 = vld [vmem:[%s16009_s2 + $0x70] sm:$0xff]  }
 0x4cc   :  { %v2620_v62 = vadd.f32 1e-05, %v2612_v58  ;;  %v2615_v9 = vsub.f32 %v13984_v61, %v2611_v56  ;;  %v14944_v56 = vld [vmem:[%s16009_s2 + $0x18] sm:$0xff]   ;;  %v14946_v61 = vld [vmem:[%s16009_s2 + $0x20] sm:$0xff]  }
 0x4cd   :  { %v2599_v1 = vpop.f32.mrf.mxu1  ;;  %v14945_v58 = vld [vmem:[%s16009_s2 + $0x78] sm:$0xff]  }
 0x4ce   :  { %15419 = vrsqrt.f32 %v2620_v62  ;;  %v2623_v40 = vadd.f32 1e-05, %v2615_v9  ;;  %v2614_v3 = vsub.f32 %v2599_v1, %v2610_v60  ;;  %v14948_v60 = vld [vmem:[%s16009_s2 + $0x28] sm:$0xff]   ;;  %v14950_v9 = vld [vmem:[%s16009_s2 + $0x30] sm:$0xff]  }
 0x4cf   :  { %v14949_v62 = vld [vmem:[%s16009_s2 + $0xa8] sm:$0xff]   ;;  %v14954_v1 = vld [vmem:[%s16009_s2 + $0xb0] sm:$0xff]  }
 0x4d0   :  { %15421 = vrsqrt.f32 %v2623_v40  ;;  %v2622_v13 = vadd.f32 1e-05, %v2614_v3  ;;  %v14955_v40 = vld [vmem:[%s16009_s2 + $0xb8] sm:$0xff]   ;;  %v14952_v3 = vld [vmem:[%s16009_s2 + $0x40] sm:$0xff]  }
 0x4d2   :  { %15423 = vrsqrt.f32 %v2622_v13  ;;  %v14958_v13 = vld [vmem:[%s16009_s2 + $0xe0] sm:$0xff]  }
 0x4d3   :  { %15425 = vrsqrt.f32 %v2621_v15  ;;  %v14953_v15 = vld [vmem:[%s16009_s2 + $0x48] sm:$0xff]  }
 0x4db   :  { %v15420_v19 = vpop.eup %15419 }
 0x4dc   :  { %v2628_v52 = vmul.f32 %v15420_v19, %v2616_v18  ;;  %v14959_v18 = vld [vmem:[%s16009_s2 + $0xe8] sm:$0xff]   ;;  %v14956_v19 = vld [vmem:[%s16009_s2 + $0x50] sm:$0xff]  }
 0x4dd   :  { %v15422_v23 = vpop.eup %15421 }
 0x4de   :  { %2658 = vperm.xlu0 %14806, %v2628_v52   ;;  %v2631_v5 = vmul.f32 %v15422_v23, %v2619_v21  ;;  %v14966_v21 = vld [vmem:[%s16009_s2 + $0xf0] sm:$0xff]   ;;  %v14957_v52 = vld [vmem:[%s16009_s2 + $0x58] sm:$0xff]  }
 0x4df   :  { %v15424_v7 = vpop.eup %15423  ;;  %v14967_v23 = vld [vmem:[%s16009_s2 + $0xf8] sm:$0xff]  }
 0x4e0   :  { %2673 = vperm.xlu1 %14807, %v2631_v5   ;;  %v2630_v55 = vmul.f32 %v15424_v7, %v2618_v53  ;;  %v15426_v8 = vpop.eup %15425  ;;  %v14960_v5 = vld [vmem:[%s16009_s2 + $0x80] sm:$0xff]   ;;  %v14961_v7 = vld [vmem:[%s16009_s2 + $0x88] sm:$0xff]   ;;  %v14963_v53 = vld [vmem:[%s16009_s2 + $0x98] sm:$0xff]  }
 0x4e1   :  { %v2629_v27 = vmul.f32 %v15426_v8, %v2617_v26  ;;  %v14965_v8 = vld [vmem:[%s16009_s2 + $0xc8] sm:$0xff]   ;;  %v14968_v26 = vld [vmem:[%s16009_s2 + $0xd0] sm:$0xff]  }
 0x4e2   :  { %2686 = vperm.xlu0 %14806, %v2680_v24   ;;  %v14962_v24 = vld [vmem:[%s16009_s2 + $0x90] sm:$0xff]  }
 0x4e4   :  { %2668 = vperm.xlu1 %14807, %v2630_v55   ;;  %v14964_v55 = vld [vmem:[%s16009_s2 + $0xc0] sm:$0xff]  }
 0x4e8   :  { %2663 = vperm.xlu1 %14807, %v2629_v27   ;;  %v14969_v27 = vld [vmem:[%s16009_s2 + $0xd8] sm:$0xff]  }
 0x4ec   :  { %2691 = vperm.xlu1 %14807, %v2681_v14   ;;  %v14970_v14 = vld [vmem:[%s16009_s2 + $0x100] sm:$0xff]  }
 0x53b   :  { %v2640_v11 = vpop.permute.xlu1 %2639 }
 0x53c   :  { %v2653_v49 = vsub.f32 %v15950_v10, %v2640_v11 }
 0x53d   :  { %v2635_v6 = vpop.permute.xlu0 %2634 }
 0x53e   :  { %v2652_v47 = vsub.f32 %v15961_v4, %v2635_v6 }
 0x541   :  { %v2650_v17 = vpop.permute.xlu0 %2649  ;;  %v2645_v20 = vpop.permute.xlu1 %2644 }
 0x542   :  { %v2655_v28 = vsub.f32 %v15952_v16, %v2650_v17  ;;  %v2654_v38 = vsub.f32 %v15942_v50, %v2645_v20 }
 0x559   :  { %v2659_v35 = vpop.permute.xlu0 %2658 }
 0x55a   :  { %v2676_v42 = vmul.f32 %v2659_v35, %v2652_v47 }
 0x55b   :  { %v2674_v36 = vpop.permute.xlu1 %2673 }
 0x55c   :  { %v2679_v33 = vmul.f32 %v2674_v36, %v2655_v28 }
 0x55d   :  { %v2687_v41 = vpop.permute.xlu0 %2686 }
 0x55e   :  { %v2707_v45 = vadd.f32 %v2702_v32, %v2679_v33  ;;  %v2704_v16 = vadd.f32 %v2687_v41, %v2676_v42 }
 0x55f   :  { %v2669_v43 = vpop.permute.xlu1 %2668 }
 0x560   :  { %v2678_v46 = vmul.f32 %v2669_v43, %v2654_v38  ;;  %v2711_v44 = vmax.f32 %v2707_v45, 0.0  ;;  %v2708_v10 = vmax.f32 %v2704_v16, 0.0 }
 0x562   :  { %v2706_v34 = vadd.f32 %v2697_v30, %v2678_v46  ;;  %v14973_v30 = vld [vmem:[%s16009_s2 + $0x118] sm:$0xff]   ;;  %s15477_s2 = smov 18  }
 0x563   :  { %v2664_v48 = vpop.permute.xlu1 %2663  ;;  %s16343_s12 = sld [smem:[%s17674_s0 + %s15477_s2]]  }
 0x564   :  { %v2710_v31 = vmax.f32 %v2706_v34, 0.0  ;;  %v2677_v57 = vmul.f32 %v2664_v48, %v2653_v49 }
 0x566   :  { %v16019_v51 = vpack.c.bf16 %v2711_v44, %v2710_v31 }
 0x567   :  { %v2692_v50 = vpop.permute.xlu1 %2691 }
 0x568   :  { %v2705_v54 = vadd.f32 %v2692_v50, %v2677_v57  ;;  %13985 = vmatprep.subr.bf16.mxu1 %v16019_v51  ;;  %14021 = vmatprep.subr.bf16.mxu0 %v16019_v51  ;;  %v14974_v57 = vld [vmem:[%s16155_s15 + $0x78] sm:$0xff]  }
 0x569   :  { %13986 = vmatpush3.bf16.msra.mxu1 %v16019_v51  ;;  %14022 = vmatpush3.bf16.msra.mxu0 %v16019_v51  ;;  %v14975_v50 = vld [vmem:[%s16155_s15 + $0x38] sm:$0xff]  }
 0x56a   :  { %v2709_v4 = vmax.f32 %v2705_v54, 0.0 }
 0x56c   :  { %v16025_v29 = vpack.c.bf16 %v2709_v4, %v2708_v10  ;;  %v14976_v4 = vld [vmem:[%s16155_s15 + $0x70] sm:$0xff]  }
 0x56e   :  { %13987 = vmatprep.subr.bf16.mxu1 %v16025_v29  ;;  %14023 = vmatprep.subr.bf16.mxu0 %v16025_v29 }
 0x56f   :  { %13988 = vmatpush3.bf16.msra.mxu1 %v16025_v29  ;;  %14024 = vmatpush3.bf16.msra.mxu0 %v16025_v29 }
 0x570   :  { %13997 = vmatprep.subr.bf16.mxu1 %v16019_v51  ;;  %14045 = vmatprep.subr.bf16.mxu0 %v16019_v51 }
 0x572   :  { %13990 = vmatmul.mubr.msk.bf16.vlgmr.msra.gmra.mxu1 %vm17694_vm10, %v14940_v59  ;;  %14026 = vmatmul.mubr.msk.bf16.vlgmr.msra.gmra.mxu0 %vm17694_vm10, %v14941_v37 }
 0x573   :  { %13998 = vmatpush3.bf16.msra.mxu1 %v16019_v51  ;;  %14046 = vmatpush3.bf16.msra.mxu0 %v16019_v51 }
 0x574   :  { %13999 = vmatprep.subr.bf16.mxu1 %v16025_v29  ;;  %14047 = vmatprep.subr.bf16.mxu0 %v16025_v29 }
 0x575   :  { %13993 = vmatprep.mubr.msk.bf16.mxu1 %vm17694_vm10, %v14942_v22  ;;  %14029 = vmatprep.mubr.msk.bf16.mxu0 %vm17694_vm10, %v14943_v39  ;;  %v14978_v22 = vld [vmem:[%s16155_s15 + $0x68] sm:$0xff]  }
 0x577   :  { %14000 = vmatpush3.bf16.msra.mxu1 %v16025_v29  ;;  %14048 = vmatpush3.bf16.msra.mxu0 %v16025_v29 }
 0x578   :  { %14009 = vmatprep.subr.bf16.mxu1 %v16019_v51  ;;  %14069 = vmatprep.subr.bf16.mxu0 %v16019_v51 }
 0x57a   :  { %13994 = vmatmul.mubr.msk.bf16.gmra.mxu1 %vm17694_vm10, %v14944_v56  ;;  %14030 = vmatmul.mubr.msk.bf16.gmra.mxu0 %vm17694_vm10, %v14945_v58 }
 0x57b   :  { %14001 = vmatprep.mubr.msk.bf16.mxu1 %vm17694_vm10, %v14946_v61  ;;  %14049 = vmatprep.mubr.msk.bf16.mxu0 %vm17694_vm10, %v14947_v12 }
 0x582   :  { %14002 = vmatmul.mubr.msk.bf16.vlgmr.msra.gmra.mxu1 %vm17694_vm10, %v14948_v60  ;;  %14050 = vmatmul.mubr.msk.bf16.vlgmr.msra.gmra.mxu0 %vm17694_vm10, %v14949_v62 }
 0x583   :  { %14010 = vmatpush3.bf16.msra.mxu1 %v16019_v51  ;;  %14070 = vmatpush3.bf16.msra.mxu0 %v16019_v51 }
 0x584   :  { %14011 = vmatprep.subr.bf16.mxu1 %v16025_v29  ;;  %14071 = vmatprep.subr.bf16.mxu0 %v16025_v29 }
 0x585   :  { %14005 = vmatprep.mubr.msk.bf16.mxu1 %vm17694_vm10, %v14950_v9  ;;  %14053 = vmatprep.mubr.msk.bf16.mxu0 %vm17694_vm10, %v14954_v1  ;;  %v14979_v1 = vld [vmem:[%s16155_s15 + $0x28] sm:$0xff]  }
 0x587   :  { %14012 = vmatpush3.bf16.msra.mxu1 %v16025_v29  ;;  %14072 = vmatpush3.bf16.msra.mxu0 %v16025_v29 }
 0x588   :  { %14033 = vmatprep.subr.bf16.mxu1 %v16019_v51  ;;  %13601 = vmatprep.subr.bf16.mxu0 %v14974_v57 }
 0x58a   :  { %14006 = vmatmul.mubr.msk.bf16.gmra.mxu1 %vm17694_vm10, %v14951_v25  ;;  %14054 = vmatmul.mubr.msk.bf16.gmra.mxu0 %vm17694_vm10, %v14955_v40 }
 0x58b   :  { %14013 = vmatprep.mubr.msk.bf16.mxu1 %vm17694_vm10, %v14952_v3  ;;  %14073 = vmatprep.mubr.msk.bf16.mxu0 %vm17694_vm10, %v14958_v13 }
 0x592   :  { %14014 = vmatmul.mubr.msk.bf16.vlgmr.msra.gmra.mxu1 %vm17694_vm10, %v14953_v15  ;;  %14074 = vmatmul.mubr.msk.bf16.vlgmr.msra.gmra.mxu0 %vm17694_vm10, %v14959_v18  ;;  %v14980_v15 = vld [vmem:[%s16155_s15 + $0x60] sm:$0xff]  }
 0x593   :  { %14034 = vmatpush3.bf16.msra.mxu1 %v16019_v51  ;;  %14017 = vmatprep.mubr.msk.bf16.mxu1 %vm17694_vm10, %v14956_v19  ;;  %v14981_v18 = vld [vmem:[%s16155_s15 + $0x20] sm:$0xff]  }
 0x594   :  { %14035 = vmatprep.subr.bf16.mxu1 %v16025_v29  ;;  %14077 = vmatprep.mubr.msk.bf16.mxu0 %vm17694_vm10, %v14966_v21  ;;  %v14982_v21 = vld [vmem:[%s16155_s15 + $0x58] sm:$0xff]  }
 0x595   :  { %13602 = vmatpush3.bf16.msra.mxu0 %v14975_v50  ;;  %v14993_v50 = vld [vmem:[%s16155_s15] sm:$0xff]  }
 0x596   :  { %13603 = vmatprep.subr.bf16.mxu0 %v14976_v4 }
 0x597   :  { %14036 = vmatpush3.bf16.msra.mxu1 %v16025_v29 }
 0x598   :  { %14057 = vmatprep.subr.bf16.mxu1 %v16019_v51 }
 0x59a   :  { %14018 = vmatmul.mubr.msk.bf16.gmra.mxu1 %vm17694_vm10, %v14957_v52  ;;  %14078 = vmatmul.mubr.msk.bf16.gmra.mxu0 %vm17694_vm10, %v14967_v23  ;;  %v14983_v52 = vld [vmem:[%s16155_s15 + $0xb8] sm:$0xff]  }
 0x59b   :  { %14037 = vmatprep.mubr.msk.bf16.mxu1 %vm17694_vm10, %v14960_v5 }
 0x5a2   :  { %14038 = vmatmul.mubr.msk.bf16.vlgmr.msra.gmra.mxu1 %vm17694_vm10, %v14961_v7  ;;  %v14984_v7 = vld [vmem:[%s16155_s15 + $0x18] sm:$0xff]  }
 0x5a3   :  { %14058 = vmatpush3.bf16.msra.mxu1 %v16019_v51  ;;  %14041 = vmatprep.mubr.msk.bf16.mxu1 %vm17694_vm10, %v14962_v24 }
 0x5a4   :  { %14059 = vmatprep.subr.bf16.mxu1 %v16025_v29 }
 0x5a7   :  { %14060 = vmatpush3.bf16.msra.mxu1 %v16025_v29 }
 0x5a8   :  { %14081 = vmatprep.subr.bf16.mxu1 %v16019_v51 }
 0x5aa   :  { %14042 = vmatmul.mubr.msk.bf16.gmra.mxu1 %vm17694_vm10, %v14963_v53 }
 0x5ab   :  { %14061 = vmatprep.mubr.msk.bf16.mxu1 %vm17694_vm10, %v14964_v55 }
 0x5b2   :  { %14062 = vmatmul.mubr.msk.bf16.vlgmr.msra.gmra.mxu1 %vm17694_vm10, %v14965_v8 }
 0x5b3   :  { %14082 = vmatpush3.bf16.msra.mxu1 %v16019_v51  ;;  %14065 = vmatprep.mubr.msk.bf16.mxu1 %vm17694_vm10, %v14968_v26 }
 0x5b4   :  { %14083 = vmatprep.subr.bf16.mxu1 %v16025_v29 }
 0x5b7   :  { %14084 = vmatpush3.bf16.msra.mxu1 %v16025_v29  ;;  %v14977_v29 = vld [vmem:[%s16155_s15 + $0x30] sm:$0xff]  }
 0x5b8   :  { %4236 = vmatprep.subr.bf16.mxu1 %v17699_v0  ;;  %13604 = vmatpush3.bf16.msra.mxu0 %v14977_v29  ;;  %v14994_v29 = vld [vmem:[%s16155_s15 + $0x98] sm:$0xff]  }
 0x5b9   :  { %13605 = vmatprep.subr.bf16.mxu0 %v14978_v22 }
 0x5ba   :  { %14066 = vmatmul.mubr.msk.bf16.gmra.mxu1 %vm17694_vm10, %v14969_v27 }
 0x5bb   :  { %14085 = vmatprep.mubr.msk.bf16.mxu1 %vm17694_vm10, %v14970_v14  ;;  %v14985_v14 = vld [vmem:[%s16155_s15 + $0x50] sm:$0xff]  }
 0x5bc   :  { %13606 = vmatpush3.bf16.msra.mxu0 %v14979_v1 }
 0x5bd   :  { %13607 = vmatprep.subr.bf16.mxu0 %v14980_v15 }
 0x5c0   :  { %13608 = vmatpush3.bf16.msra.mxu0 %v14981_v18 }
 0x5c1   :  { %13609 = vmatprep.subr.bf16.mxu0 %v14982_v21  ;;  %v14997_v21 = vld [vmem:[%s16155_s15 + $0x80] sm:$0xff]  }
 0x5c2   :  { %14086 = vmatmul.mubr.msk.bf16.vlgmr.msra.gmra.mxu1 %vm17694_vm10, %v14971_v63  ;;  %v14986_v63 = vld [vmem:[%s16155_s15 + $0xb0] sm:$0xff]  }
 0x5c3   :  { %14089 = vmatprep.mubr.msk.bf16.mxu1 %vm17694_vm10, %v14972_v2  ;;  %4237 = vmatpush1.bf16.msra.mxu1 %v14983_v52  ;;  %v14987_v2 = vld [vmem:[%s16155_s15 + $0x10] sm:$0xff]  }
 0x5c4   :  { %4238 = vmatprep.subr.bf16.mxu1 %v17699_v0  ;;  %13610 = vmatpush3.bf16.msra.mxu0 %v14984_v7  ;;  %v15474_v7 = vmov 65535  }
 0x5c5   :  { %13611 = vmatprep.subr.bf16.mxu0 %v14985_v14 }
 0x5c7   :  { %4239 = vmatpush1.bf16.msra.mxu1 %v14986_v63  ;;  %v14999_v63 = vld [vmem:[%s16155_s15 + $0xd0] sm:$0xff]  }
 0x5c8   :  { %4240 = vmatprep.subr.bf16.mxu1 %v17699_v0  ;;  %13612 = vmatpush3.bf16.msra.mxu0 %v14987_v2 }
 0x5ca   :  { %14090 = vmatmul.mubr.msk.bf16.gmra.mxu1 %vm17694_vm10, %v14973_v30  ;;  %vm15491_vm10 = vmmov 0  }
 0x632   :  { %v16134_v32 = vpop.f32.mrf.mxu1  ;;  %v14027_v6 = vpop.f32.mrf.mxu0 }
 0x634   :  { %v16136_v11 = vpop.f32.mrf.mxu1  ;;  %v3118_v17 = vpop.f32.mrf.mxu0 }
 0x636   :  { %v16138_v20 = vpop.f32.mrf.mxu1  ;;  %v14028_v28 = vpop.f32.mrf.mxu0 }
 0x637   :  { %v2820_v36 = vpack.c.bf16 %v16138_v20, %v16134_v32  ;;  %v3150_v33 = vpack.c.bf16 %v14028_v28, %v14027_v6 }
 0x638   :  { %v16142_v35 = vpop.f32.mrf.mxu1  ;;  %v3121_v38 = vpop.f32.mrf.mxu0 }
 0x639   :  { %v3149_v43 = vpack.c.bf16 %v3121_v38, %v3118_v17  ;;  %3733 = vrot.lane.b32.xlu0 %v3150_v33, %s17679_s3  ;;  %v14988_v38 = vld [vmem:[%s16155_s15 + $0x48] sm:$0xff]  }
 0x63a   :  { %v16145_v45 = vpop.f32.mrf.mxu1  ;;  %v16147_v46 = vpop.f32.mrf.mxu0  ;;  %13613 = vmatprep.subr.bf16.mxu0 %v14988_v38  ;;  %v15000_v38 = vld [vmem:[%s16155_s15 + $0xc8] sm:$0xff]  }
 0x63b   :  { %3731 = vrot.lane.b32.xlu1 %v3149_v43, %s17679_s3  ;;  %v14989_v43 = vld [vmem:[%s16155_s15 + $0xa8] sm:$0xff]  }
 0x63c   :  { %v16150_v47 = vpop.f32.mrf.mxu1  ;;  %v3134_v34 = vpop.f32.mrf.mxu0  ;;  %4241 = vmatpush1.bf16.msra.mxu1 %v14989_v43 }
 0x63d   :  { %4242 = vmatprep.subr.bf16.mxu1 %v17699_v0 }
 0x63e   :  { %v16157_v41 = vpop.f32.mrf.mxu1  ;;  %v16159_v48 = vpop.f32.mrf.mxu0 }
 0x63f   :  { %v2822_v49 = vpack.c.bf16 %v16157_v41, %v16145_v45  ;;  %v3152_v43 = vpack.c.bf16 %v16159_v48, %v16147_v46 }
 0x640   :  { %v16163_v42 = vpop.f32.mrf.mxu1  ;;  %v3137_v44 = vpop.f32.mrf.mxu0 }
 0x641   :  { %v3151_v31 = vpack.c.bf16 %v3137_v44, %v3134_v34  ;;  %v14990_v44 = vld [vmem:[%s16155_s15 + $0x8] sm:$0xff]  }
 0x642   :  { %v14003_v16 = vpop.f32.mrf.mxu1  ;;  %v14051_v51 = vpop.f32.mrf.mxu0  ;;  %13614 = vmatpush3.bf16.msra.mxu0 %v14990_v44 }
 0x643   :  { %3735 = vrot.lane.b32.xlu0 %v3151_v31, %s17679_s3 }
 0x644   :  { %v2898_v54 = vpop.f32.mrf.mxu1  ;;  %v3338_v10 = vpop.f32.mrf.mxu0 }
 0x646   :  { %v14004_v59 = vpop.f32.mrf.mxu1  ;;  %v14052_v37 = vpop.f32.mrf.mxu0 }
 0x647   :  { %v2930_v39 = vpack.c.bf16 %v14004_v59, %v14003_v16  ;;  %v3370_v56 = vpack.c.bf16 %v14052_v37, %v14051_v51  ;;  %v14991_v16 = vld [vmem:[%s16155_s15 + $0x40] sm:$0xff]   ;;  %v14995_v37 = vld [vmem:[%s16155_s15 + $0x90] sm:$0xff]  }
 0x648   :  { %v2901_v58 = vpop.f32.mrf.mxu1  ;;  %v3341_v61 = vpop.f32.mrf.mxu0  ;;  %v14992_v51 = vld [vmem:[%s16155_s15 + $0xa0] sm:$0xff]   ;;  %13615 = vmatprep.subr.bf16.mxu0 %v14991_v16 }
 0x649   :  { %3709 = vrot.lane.b32.xlu1 %v2930_v39, %s15470_s16  ;;  %v3369_v12 = vpack.c.bf16 %v3341_v61, %v3338_v10  ;;  %3757 = vrot.lane.b32.xlu0 %v3370_v56, %s17697_s17  ;;  %v2929_v9 = vpack.c.bf16 %v2901_v58, %v2898_v54 }
 0x64a   :  { %v16173_v60 = vpop.f32.mrf.mxu1  ;;  %v16175_v62 = vpop.f32.mrf.mxu0  ;;  %4243 = vmatpush1.bf16.msra.mxu1 %v14992_v51  ;;  %13616 = vmatpush3.bf16.msra.mxu0 %v14993_v50 }
 0x64b   :  { %4244 = vmatprep.subr.bf16.mxu1 %v17699_v0 }
 0x64c   :  { %v16178_v25 = vpop.f32.mrf.mxu1  ;;  %v16180_v40 = vpop.f32.mrf.mxu0 }
 0x64d   :  { %3707 = vrot.lane.b32.xlu1 %v2929_v9, %s15470_s16  ;;  %3755 = vrot.lane.b32.xlu0 %v3369_v12, %s17697_s17  ;;  %v14996_v12 = vld [vmem:[%s16155_s15 + $0x88] sm:$0xff]  }
 0x64e   :  { %v16184_v3 = vpop.f32.mrf.mxu1  ;;  %v16186_v13 = vpop.f32.mrf.mxu0  ;;  %4245 = vmatpush1.bf16.msra.mxu1 %v14994_v29 }
 0x64f   :  { %v2932_v19 = vpack.c.bf16 %v16184_v3, %v16173_v60  ;;  %4246 = vmatprep.subr.bf16.mxu1 %v17699_v0  ;;  %v3372_v48 = vpack.c.bf16 %v16186_v13, %v16175_v62  ;;  %v3946_v13 = vld [vmem:[%s16262_s1 + $0x30] sm:$0xff]  ;;  %v3943_v60 = vld [vmem:[%s16262_s1 + $0x18] sm:$0xff] }
 0x650   :  { %v2917_v23 = vpop.f32.mrf.mxu1  ;;  %v16194_v5 = vpop.f32.mrf.mxu0 }
 0x651   :  { %v2931_v22 = vpack.c.bf16 %v2917_v23, %v16178_v25  ;;  %v14998_v23 = vld [vmem:[%s16155_s15 + $0xd8] sm:$0x1f]  }
 0x652   :  { %v14015_v24 = vpop.f32.mrf.mxu1  ;;  %v16197_v53 = vpop.f32.mrf.mxu0  ;;  %4247 = vmatpush1.bf16.msra.mxu1 %v14995_v37 }
 0x653   :  { %4248 = vmatprep.subr.bf16.mxu1 %v17699_v0 }
 0x654   :  { %v3008_v55 = vpop.f32.mrf.mxu1  ;;  %v3558_v8 = vpop.f32.mrf.mxu0 }
 0x656   :  { %v14016_v26 = vpop.f32.mrf.mxu1  ;;  %v16200_v27 = vpop.f32.mrf.mxu0  ;;  %4249 = vmatpush1.bf16.msra.mxu1 %v14996_v12 }
 0x657   :  { %v3040_v30 = vpack.c.bf16 %v14016_v26, %v14015_v24  ;;  %v3590_v25 = vpack.c.bf16 %v16200_v27, %v16197_v53  ;;  %4250 = vmatprep.subr.bf16.mxu1 %v17699_v0  ;;  %v4166_v24 = vsel %vm4164_vm13, 4294967295, %v15474_v7  ;;  %v3371_v27 = vpack.c.bf16 %v16194_v5, %v16180_v40 }
 0x658   :  { %v3011_v6 = vpop.f32.mrf.mxu1  ;;  %v3561_v17 = vpop.f32.mrf.mxu0  ;;  %v16238_v53 = vsel %vm4165_vm14, %v4166_v24, 0  ;;  %vm4370_vm13 = vcmask 72704   ;;  %vm4373_vm14 = vcmask 220160  }
 0x659   :  { %v3039_v28 = vpack.c.bf16 %v3011_v6, %v3008_v55  ;;  %3721 = vrot.lane.b32.xlu1 %v3040_v30, %s17678_s19  ;;  %v3589_v34 = vpack.c.bf16 %v3561_v17, %v3558_v8  ;;  %17705 = vst [vmem:[#allocation3_spill] sm:$0xff] %v16238_v53  ;;  %v4169_v26 = vand.u32 %v14998_v23, %v16238_v53 }
 0x65a   :  { %v16207_v33 = vpop.f32.mrf.mxu1  ;;  %v14079_v18 = vpop.f32.mrf.mxu0  ;;  %4251 = vmatpush1.bf16.msra.mxu1 %v14997_v21  ;;  %v3947_v21 = vld [vmem:[%s16262_s1 + $0x38] sm:$0xff] }
 0x65b   :  { %3719 = vrot.lane.b32.xlu0 %v3039_v28, %s17678_s19  ;;  %4260 = vmatprep.subr.bf16.mxu1 %v17699_v0 }
 0x65c   :  { %v3024_v31 = vpop.f32.mrf.mxu1  ;;  %v3574_v8 = vpop.f32.mrf.mxu0 }
 0x65e   :  { %v16216_v57 = vpop.f32.mrf.mxu1  ;;  %4261 = vmatpush2.bf16.msra.mxu1 %v4169_v26  ;;  %v14080_v30 = vpop.f32.mrf.mxu0 }
 0x65f   :  { %3779 = vrot.lane.b32.xlu0 %v3589_v34, %s17676_s20  ;;  %4262 = vmatprep.subr.bf16.mxu1 %v17699_v0  ;;  %v3592_v37 = vpack.c.bf16 %v14080_v30, %v14079_v18  ;;  %v3945_v18 = vld [vmem:[%s16262_s1 + $0x28] sm:$0xff] }
 0x660   :  { %v3027_v54 = vpop.f32.mrf.mxu1  ;;  %v3577_v5 = vpop.f32.mrf.mxu0 }
 0x661   :  { %v3041_v10 = vpack.c.bf16 %v3027_v54, %v3024_v31  ;;  %v15001_v31 = vld [vmem:[%s16155_s15 + $0xc0] sm:$0xff]   ;;  %v3591_v16 = vpack.c.bf16 %v3577_v5, %v3574_v8  ;;  %s15480_s15 = smov 54  }
 0x662   :  { %v14039_v4 = vpop.f32.mrf.mxu1  ;;  %4263 = vmatpush2.bf16.msra.mxu1 %v14999_v63 }
 0x663   :  { %3723 = vrot.lane.b32.xlu1 %v3041_v10, %s17678_s19  ;;  %4264 = vmatprep.subr.bf16.mxu1 %v17699_v0 }
 0x664   :  { %v3228_v59 = vpop.f32.mrf.mxu1 }
 0x666   :  { %v14040_v39 = vpop.f32.mrf.mxu1  ;;  %4265 = vmatpush2.bf16.msra.mxu1 %v15000_v38 }
 0x667   :  { %v3260_v56 = vpack.c.bf16 %v14040_v39, %v14039_v4  ;;  %3711 = vrot.lane.b32.xlu1 %v2931_v22, %s15470_s16  ;;  %4266 = vmatprep.subr.bf16.mxu1 %v17699_v0 }
 0x668   :  { %v3231_v58 = vpop.f32.mrf.mxu1 }
 0x669   :  { %3745 = vrot.lane.b32.xlu0 %v3260_v56, %s17677_s4  ;;  %v3259_v9 = vpack.c.bf16 %v3231_v58, %v3228_v59  ;;  %v3944_v56 = vld [vmem:[%s16262_s1 + $0x20] sm:$0xff]  ;;  %v3042_v58 = vpack.c.bf16 %v16216_v57, %v16207_v33  ;;  %v3942_v33 = vld [vmem:[%s16262_s1 + $0x10] sm:$0xff] }
 0x66a   :  { %v14043_v61 = vpop.f32.mrf.mxu1  ;;  %4267 = vmatpush2.bf16.msra.mxu1 %v15001_v31 }
 0x66c   :  { %v3244_v1 = vpop.f32.mrf.mxu1 }
 0x66d   :  { %3743 = vrot.lane.b32.xlu0 %v3259_v9, %s17677_s4  ;;  %v3940_v9 = vld [vmem:[%s16262_s1] sm:$0xff] }
 0x66e   :  { %v14044_v15 = vpop.f32.mrf.mxu1 }
 0x66f   :  { %v3262_v10 = vpack.c.bf16 %v14044_v15, %v14043_v61 }
 0x670   :  { %v3247_v52 = vpop.f32.mrf.mxu1 }
 0x671   :  { %3781 = vrot.lane.b32.xlu0 %v3590_v25, %s17676_s20  ;;  %v3261_v6 = vpack.c.bf16 %v3247_v52, %v3244_v1  ;;  %v3941_v52 = vld [vmem:[%s16262_s1 + $0x8] sm:$0xff]  ;;  %s15483_s1 = smov 63  }
 0x672   :  { %v14063_v55 = vpop.f32.mrf.mxu1 }
 0x674   :  { %v3448_v14 = vpop.f32.mrf.mxu1 }
 0x675   :  { %3759 = vrot.lane.b32.xlu0 %v3371_v27, %s17697_s17 }
 0x676   :  { %v14064_v2 = vpop.f32.mrf.mxu1 }
 0x677   :  { %v3480_v17 = vpack.c.bf16 %v14064_v2, %v14063_v55  ;;  %v2819_v2 = vpack.c.bf16 %v16142_v35, %v16136_v11 }
 0x678   :  { %v3451_v28 = vpop.f32.mrf.mxu1 }
 0x679   :  { %3747 = vrot.lane.b32.xlu0 %v3261_v6, %s17677_s4  ;;  %3769 = vrot.lane.b32.xlu1 %v3480_v17, %s15475_s24  ;;  %v3479_v34 = vpack.c.bf16 %v3451_v28, %v3448_v14 }
 0x67a   :  { %v14067_v40 = vpop.f32.mrf.mxu1 }
 0x67c   :  { %v3464_v44 = vpop.f32.mrf.mxu1 }
 0x67d   :  { %3737 = vrot.lane.b32.xlu0 %v3152_v43, %s17679_s3  ;;  %3767 = vrot.lane.b32.xlu1 %v3479_v34, %s15475_s24 }
 0x67e   :  { %v14068_v51 = vpop.f32.mrf.mxu1 }
 0x67f   :  { %v3482_v25 = vpack.c.bf16 %v14068_v51, %v14067_v40 }
 0x680   :  { %v3467_v50 = vpop.f32.mrf.mxu1 }
 0x681   :  { %3783 = vrot.lane.b32.xlu0 %v3591_v16, %s17676_s20  ;;  %v3481_v61 = vpack.c.bf16 %v3467_v50, %v3464_v44 }
 0x682   :  { %v14087_v54 = vpop.f32.mrf.mxu1 }
 0x684   :  { %v3668_v4 = vpop.f32.mrf.mxu1 }
 0x685   :  { %3749 = vrot.lane.b32.xlu0 %v3262_v10, %s17677_s4  ;;  %s15488_s4 = smov 126  }
 0x686   :  { %v14088_v46 = vpop.f32.mrf.mxu1 }
 0x687   :  { %v3700_v29 = vpack.c.bf16 %v14088_v46, %v14087_v54 }
 0x688   :  { %v3671_v59 = vpop.f32.mrf.mxu1 }
 0x689   :  { %3761 = vrot.lane.b32.xlu0 %v3372_v48, %s17697_s17  ;;  %3793 = vrot.lane.b32.xlu1 %v3700_v29, %s17675_s5  ;;  %v3699_v22 = vpack.c.bf16 %v3671_v59, %v3668_v4  ;;  %v2821_v4 = vpack.c.bf16 %v16163_v42, %v16150_v47 }
 0x68a   :  { %v14091_v39 = vpop.f32.mrf.mxu1 }
 0x68c   :  { %v3684_v62 = vpop.f32.mrf.mxu1 }
 0x68d   :  { %3785 = vrot.lane.b32.xlu0 %v3592_v37, %s17676_s20  ;;  %3791 = vrot.lane.b32.xlu1 %v3699_v22, %s17675_s5  ;;  %s15487_s20 = smov 99  }
 0x68e   :  { %v14092_v12 = vpop.f32.mrf.mxu1 }
 0x68f   :  { %v3702_v15 = vpack.c.bf16 %v14092_v12, %v14091_v39 }
 0x690   :  { %v3687_v1 = vpop.f32.mrf.mxu1 }
 0x691   :  { %3970 = vperm.xlu0 %14806, %v3944_v56   ;;  %3725 = vrot.lane.b32.xlu1 %v3042_v58, %s17678_s19  ;;  %v3701_v57 = vpack.c.bf16 %v3687_v1, %v3684_v62  ;;  %s15489_s19 = smov 12  }
 0x695   :  { %3980 = vperm.xlu0 %14806, %v3946_v13   ;;  %3771 = vrot.lane.b32.xlu1 %v3481_v61, %s15475_s24 }
 0x699   :  { %3950 = vperm.xlu0 %14806, %v3940_v9   ;;  %3713 = vrot.lane.b32.xlu1 %v2932_v19, %s15470_s16 }
 0x69d   :  { %3960 = vperm.xlu0 %14806, %v3942_v33   ;;  %3795 = vrot.lane.b32.xlu1 %v3701_v57, %s17675_s5 }
 0x6a1   :  { %3773 = vrot.lane.b32.xlu1 %v3482_v25, %s15475_s24 }
 0x6a5   :  { %3797 = vrot.lane.b32.xlu1 %v3702_v15, %s17675_s5  ;;  %s15486_s5 = smov 108  }
 0x6a9   :  { %3975 = vperm.xlu1 %14807, %v3945_v18  }
 0x6ab   :  { %v3734_v3 = vpop.permute.xlu0 %3733 }
 0x6ad   :  { %3985 = vperm.xlu1 %14807, %v3947_v21   ;;  %v3732_v24 = vpop.permute.xlu1 %3731 }
 0x6b1   :  { %3955 = vperm.xlu1 %14807, %v3941_v52  }
 0x6b5   :  { %3965 = vperm.xlu1 %14807, %v3943_v60   ;;  %v3736_v19 = vpop.permute.xlu0 %3735 }
 0x6bb   :  { %v16289_v23 = vpop.permute.xlu0 %3757  ;;  %v3710_v8 = vpop.permute.xlu1 %3709 }
 0x6bc   :  { %v3804_v31 = vsel %vm17692_vm12, %v2820_v36, %v3710_v8 }
 0x6bf   :  { %v3756_v7 = vpop.permute.xlu0 %3755  ;;  %v3708_v27 = vpop.permute.xlu1 %3707 }
 0x6c0   :  { %v3801_v40 = vsel %vm17692_vm12, %v2819_v2, %v3708_v27 }
 0x6cb   :  { %v3722_v63 = vpop.permute.xlu1 %3721 }
 0x6cc   :  { %v3828_v30 = vsel %vm17691_vm15, %v3722_v63, %v3734_v3  ;;  %v3816_v16 = vsel %vm17689_vm6, %v3804_v31, %v3722_v63 }
 0x6cd   :  { %v3720_v55 = vpop.permute.xlu0 %3719 }
 0x6ce   :  { %v3826_v6 = vsel %vm17691_vm15, %v3720_v55, %v3732_v24  ;;  %v3813_v43 = vsel %vm17689_vm6, %v3801_v40, %v3720_v55 }
 0x6d1   :  { %v3780_v26 = vpop.permute.xlu0 %3779 }
 0x6d5   :  { %v3724_v34 = vpop.permute.xlu1 %3723 }
 0x6d6   :  { %v3830_v51 = vsel %vm17691_vm15, %v3724_v34, %v3736_v19 }
 0x6d9   :  { %v3712_v54 = vpop.permute.xlu1 %3711 }
 0x6da   :  { %v3807_v48 = vsel %vm17692_vm12, %v2821_v4, %v3712_v54 }
 0x6db   :  { %v3746_v14 = vpop.permute.xlu0 %3745  ;;  %v3819_v20 = vsel %vm17689_vm6, %v3807_v48, %v3724_v34 }
 0x6dc   :  { %v3836_v28 = vsel %vm17690_vm3, %v3828_v30, %v3746_v14 }
 0x6dd   :  { %v3846_v35 = vsel %vm17698_vm4, %v3836_v28, %v16289_v23 }
 0x6df   :  { %v3744_v17 = vpop.permute.xlu0 %3743 }
 0x6e0   :  { %v3834_v38 = vsel %vm17690_vm3, %v3826_v6, %v3744_v17 }
 0x6e1   :  { %v3843_v5 = vsel %vm17698_vm4, %v3834_v38, %v3756_v7 }
 0x6e2   :  { %4203 = vmatprep.mubr.bf16.mxu0 %v3843_v5 }
 0x6e3   :  { %4204 = vmatmul.mubr.bf16.vlgmr.msra.gmra.mxu0 %v3813_v43  ;;  %v3782_v11 = vpop.permute.xlu0 %3781 }
 0x6e4   :  { %4211 = vmatprep.mubr.bf16.mxu0 %v3846_v35 }
 0x6e7   :  { %v3760_v44 = vpop.permute.xlu0 %3759 }
 0x6eb   :  { %4212 = vmatmul.mubr.bf16.gmra.mxu0 %v3816_v16  ;;  %v3748_v50 = vpop.permute.xlu0 %3747  ;;  %v3770_v32 = vpop.permute.xlu1 %3769 }
 0x6ec   :  { %v3838_v10 = vsel %vm17690_vm3, %v3830_v51, %v3748_v50  ;;  %v3858_v9 = vsel %vm17688_vm7, %v16289_v23, %v3770_v32 }
 0x6ed   :  { %v3849_v46 = vsel %vm17698_vm4, %v3838_v10, %v3760_v44  ;;  %v3868_v57 = vsel %vm17686_vm9, %v3858_v9, %v3782_v11 }
 0x6ee   :  { %4219 = vmatprep.mubr.bf16.mxu0 %v3849_v46 }
 0x6ef   :  { %v3738_v36 = vpop.permute.xlu0 %3737  ;;  %v3768_v29 = vpop.permute.xlu1 %3767 }
 0x6f0   :  { %v3856_v22 = vsel %vm17688_vm7, %v3756_v7, %v3768_v29 }
 0x6f1   :  { %v3865_v42 = vsel %vm17686_vm9, %v3856_v22, %v3780_v26 }
 0x6f3   :  { %4220 = vmatmul.mubr.bf16.gmra.mxu0 %v3819_v20  ;;  %v3784_v59 = vpop.permute.xlu0 %3783 }
 0x6f7   :  { %v3750_v39 = vpop.permute.xlu0 %3749 }
 0x6fb   :  { %v3794_v37 = vpop.permute.xlu1 %3793  ;;  %v3762_v61 = vpop.permute.xlu0 %3761 }
 0x6fc   :  { %v3879_v58 = vsel %vm17687_vm5, %v3782_v11, %v3794_v37 }
 0x6ff   :  { %v3792_v56 = vpop.permute.xlu1 %3791  ;;  %v3786_v7 = vpop.permute.xlu0 %3785 }
 0x700   :  { %v3877_v47 = vsel %vm17687_vm5, %v3780_v26, %v3792_v56 }
 0x701   :  { %12479 = vmatprep.mubr.msk.bf16.mxu1 %vm17685_vm8, %v3877_v47 }
 0x702   :  { %4269 = vmatmul.mubr.bf16.vlgmr.msra.gmra.mxu1 %v3865_v42 }
 0x703   :  { %12480 = vmatprep.mubr.msk.bf16.mxu1 %vm17685_vm8, %v3879_v58  ;;  %v3726_v62 = vpop.permute.xlu1 %3725 }
 0x704   :  { %v3832_v13 = vsel %vm17691_vm15, %v3726_v62, %v3738_v36  ;;  %vm4389_vm15 = vcmask 809984  }
 0x705   :  { %v3840_v12 = vsel %vm17690_vm3, %v3832_v13, %v3750_v39  ;;  %vm4387_vm3 = vcmask 736256  }
 0x706   :  { %v3852_v1 = vsel %vm17698_vm4, %v3840_v12, %v3762_v61 }
 0x707   :  { %v3772_v33 = vpop.permute.xlu1 %3771  ;;  %4227 = vmatprep.mubr.bf16.mxu0 %v3852_v1 }
 0x708   :  { %v3860_v21 = vsel %vm17688_vm7, %v3760_v44, %v3772_v33 }
 0x709   :  { %v3871_v3 = vsel %vm17686_vm9, %v3860_v21, %v3784_v59 }
 0x70a   :  { %4277 = vmatmul.mubr.bf16.gmra.mxu1 %v3868_v57 }
 0x70b   :  { %v3714_v25 = vpop.permute.xlu1 %3713 }
 0x70c   :  { %v3810_v15 = vsel %vm17692_vm12, %v2822_v49, %v3714_v25  ;;  %v3971_v31 = vpop.permute.xlu0 %3970  ;;  %vm4391_vm12 = vcmask 883712  }
 0x70d   :  { %v3822_v18 = vsel %vm17689_vm6, %v3810_v15, %v3726_v62  ;;  %vm17696_vm6 = vcmask 662528  }
 0x70e   :  { %4228 = vmatmul.mubr.bf16.gmra.mxu0 %v3822_v18 }
 0x70f   :  { %v3796_v52 = vpop.permute.xlu1 %3795 }
 0x710   :  { %v3881_v60 = vsel %vm17687_vm5, %v3784_v59, %v3796_v52  ;;  %v3981_v13 = vpop.permute.xlu0 %3980 }
 0x711   :  { %12481 = vmatprep.mubr.msk.bf16.mxu1 %vm17685_vm8, %v3881_v60 }
 0x712   :  { %4285 = vmatmul.mubr.bf16.gmra.mxu1 %v3871_v3 }
 0x713   :  { %v3774_v19 = vpop.permute.xlu1 %3773 }
 0x714   :  { %v3862_v23 = vsel %vm17688_vm7, %v3762_v61, %v3774_v19  ;;  %vm4383_vm7 = vcmask 588800  }
 0x715   :  { %v3874_v49 = vsel %vm17686_vm9, %v3862_v23, %v3786_v7  ;;  %vm4379_vm9 = vcmask 441344  }
 0x717   :  { %v3798_v45 = vpop.permute.xlu1 %3797 }
 0x718   :  { %v3883_v41 = vsel %vm17687_vm5, %v3786_v7, %v3798_v45  ;;  %vm4381_vm5 = vcmask 515072  }
 0x719   :  { %12482 = vmatprep.mubr.msk.bf16.mxu1 %vm17685_vm8, %v3883_v41  ;;  %v3951_v41 = vpop.permute.xlu0 %3950  ;;  %vm4377_vm8 = vcmask 367616  }
 0x71a   :  { %4293 = vmatmul.mubr.bf16.gmra.mxu1 %v3874_v49 }
 0x724   :  { %v3976_v46 = vpop.permute.xlu1 %3975 }
 0x728   :  { %v3986_v60 = vpop.permute.xlu1 %3985 }
 0x7a3   :  { %v16345_v24 = vpop.f32.mrf.mxu0 }
 0x7a5   :  { %v16347_v55 = vpop.f32.mrf.mxu0 }
 0x7a6   :  { %v13619_v3 = vadd.f32 %v16347_v55, %v16345_v24 }
 0x7a7   :  { %v16349_v8 = vpop.f32.mrf.mxu0 }
 0x7a8   :  { %v4206_v49 = vadd.f32 %v13619_v3, %v3951_v41 }
 0x7a9   :  { %v16351_v26 = vpop.f32.mrf.mxu0 }
 0x7ab   :  { %v16353_v27 = vpop.f32.mrf.mxu0 }
 0x7ad   :  { %v16355_v14 = vpop.f32.mrf.mxu0 }
 0x7af   :  { %v16357_v63 = vpop.f32.mrf.mxu0 }
 0x7b1   :  { %v16359_v2 = vpop.f32.mrf.mxu0 }
 0x7b3   :  { %v13629_v30 = vpop.f32.mrf.mxu0 }
 0x7b5   :  { %v13630_v28 = vpop.f32.mrf.mxu0 }
 0x7b6   :  { %v13631_v35 = vadd.f32 %v13630_v28, %v13629_v30 }
 0x7b7   :  { %v13632_v5 = vpop.f32.mrf.mxu0 }
 0x7b8   :  { %v4222_v50 = vadd.f32 %v13631_v35, %v3971_v31 }
 0x7b9   :  { %v13633_v34 = vpop.f32.mrf.mxu0 }
 0x7ba   :  { %v13634_v51 = vadd.f32 %v13633_v34, %v13632_v5  ;;  %v13625_v34 = vadd.f32 %v16355_v14, %v16353_v27  ;;  %v13628_v27 = vadd.f32 %v16359_v2, %v16357_v63 }
 0x7bc   :  { %v4225_v20 = vadd.f32 %v13634_v51, %v3976_v46 }
 0x7c2   :  { %v16361_v6 = vpop.f32.mrf.mxu1 }
 0x7c3   :  { %v4271_v24 = vadd.f32 %v16361_v6, %v4206_v49 }
 0x7c4   :  { %v4272_v17 = vpop.f32.mrf.mxu1 }
 0x7c5   :  { %v13622_v17 = vadd.f32 %v16351_v26, %v16349_v8  ;;  %v16391_v28 = vmax.f32 %v4271_v24, 0.0 }
 0x7c6   :  { %v16363_v38 = vpop.f32.mrf.mxu1 }
 0x7c7   :  { %v4310_v8 = vrot.slane %v16391_v28, 2  ;;  %v4314_v51 = vrot.slane %v16391_v28, 4 }
 0x7c8   :  { %v4275_v40 = vpop.f32.mrf.mxu1 }
 0x7ca   :  { %v16365_v43 = vpop.f32.mrf.mxu1 }
 0x7cc   :  { %v4280_v11 = vpop.f32.mrf.mxu1 }
 0x7cd   :  { %v3956_v11 = vpop.permute.xlu1 %3955 }
 0x7ce   :  { %v16367_v44 = vpop.f32.mrf.mxu1  ;;  %v13635_v54 = vpop.f32.mrf.mxu0  ;;  %v4209_v35 = vadd.f32 %v13622_v17, %v3956_v11 }
 0x7d0   :  { %v4283_v16 = vpop.f32.mrf.mxu1  ;;  %v13636_v36 = vpop.f32.mrf.mxu0  ;;  %v4274_v6 = vadd.f32 %v16363_v38, %v4209_v35  ;;  %v17701_v35 = vmov 0.0  }
 0x7d1   :  { %v13637_v56 = vadd.f32 %v13636_v36, %v13635_v54  ;;  %v4318_v16 = vrot.slane %v16391_v28, 6  ;;  %14101 = vmatprep.subr.bf16.mxu1 %v17701_v35  ;;  %14117 = vmatprep.mubr.msk.bf16.mxu1 %vm15491_vm10, %v17701_v35 }
 0x7d2   :  { %v4286_v10 = vpop.f32.mrf.mxu1  ;;  %v13638_v47 = vpop.f32.mrf.mxu0  ;;  %v4302_v31 = vmax.f32 %v4274_v6, 0.0 }
 0x7d3   :  { %v4287_v4 = vadd.f32 %v4286_v10, %v4222_v50  ;;  %v4230_v12 = vadd.f32 %v13637_v56, %v3981_v13  ;;  %v3961_v50 = vpop.permute.xlu0 %3960 }
 0x7d4   :  { %v4288_v48 = vpop.f32.mrf.mxu1  ;;  %v13639_v9 = vpop.f32.mrf.mxu0  ;;  %v4214_v54 = vadd.f32 %v13625_v34, %v3961_v50  ;;  %v4326_v10 = vrot.slane %v4302_v31, 2  ;;  %v4330_v46 = vrot.slane %v4302_v31, 4 }
 0x7d5   :  { %v16369_v32 = vmax.f32 %v4287_v4, 0.0  ;;  %v13640_v18 = vadd.f32 %v13639_v9, %v13638_v47  ;;  %v4334_v4 = vrot.slane %v4302_v31, 6  ;;  %v3966_v48 = vpop.permute.xlu1 %3965 }
 0x7d6   :  { %v4289_v29 = vpop.f32.mrf.mxu1  ;;  %v4279_v38 = vadd.f32 %v16365_v43, %v4214_v54 }
 0x7d7   :  { %v4290_v59 = vadd.f32 %v4289_v29, %v4225_v20  ;;  %v4403_v37 = vrot.slane %v16369_v32, 4  ;;  %v4399_v22 = vrot.slane %v16369_v32, 2  ;;  %v4407_v62 = vrot.slane %v16369_v32, 6 }
 0x7d8   :  { %v4291_v39 = vpop.f32.mrf.mxu1  ;;  %v4233_v19 = vadd.f32 %v13640_v18, %v3986_v60  ;;  %v4303_v14 = vmax.f32 %v4279_v38, 0.0  ;;  %v4217_v20 = vadd.f32 %v13628_v27, %v3966_v48 }
 0x7d9   :  { %4404 = vrot.lane.b32.xlu1 %v4403_v37, %s15477_s2  ;;  %4400 = vrot.lane.b32.xlu0 %v4399_v22, %s15467_s28  ;;  %v4306_v58 = vmax.f32 %v4290_v59, 0.0 }
 0x7da   :  { %v4294_v42 = vpop.f32.mrf.mxu1  ;;  %v4282_v36 = vadd.f32 %v16367_v44, %v4217_v20  ;;  %v4342_v43 = vrot.slane %v4303_v14, 2  ;;  %v4350_v2 = vrot.slane %v4303_v14, 6  ;;  %v4346_v29 = vrot.slane %v4303_v14, 4 }
 0x7db   :  { %v4295_v33 = vadd.f32 %v4294_v42, %v4230_v12  ;;  %v4419_v57 = vrot.slane %v4306_v58, 4  ;;  %v4415_v25 = vrot.slane %v4306_v58, 2  ;;  %v4423_v52 = vrot.slane %v4306_v58, 6 }
 0x7dc   :  { %v4296_v61 = vpop.f32.mrf.mxu1  ;;  %v4304_v63 = vmax.f32 %v4282_v36, 0.0 }
 0x7dd   :  { %4412 = vrot.lane.b32.xlu1 %v4306_v58, %s17682_s13  ;;  %4408 = vrot.lane.b32.xlu0 %v4407_v62, %s15479_s14  ;;  %v4307_v21 = vmax.f32 %v4295_v33, 0.0 }
 0x7de   :  { %v4297_v1 = vpop.f32.mrf.mxu1  ;;  %v4362_v44 = vrot.slane %v4304_v63, 4  ;;  %v4358_v59 = vrot.slane %v4304_v63, 2  ;;  %v4366_v22 = vrot.slane %v4304_v63, 6 }
 0x7df   :  { %v4298_v23 = vadd.f32 %v4297_v1, %v4233_v19  ;;  %v4435_v7 = vrot.slane %v4307_v21, 4  ;;  %v4431_v45 = vrot.slane %v4307_v21, 2  ;;  %v4439_v30 = vrot.slane %v4307_v21, 6 }
 0x7e0   :  { %v4299_v15 = vpop.f32.mrf.mxu1 }
 0x7e1   :  { %4420 = vrot.lane.b32.xlu1 %v4419_v57, %s15480_s15  ;;  %4416 = vrot.lane.b32.xlu0 %v4415_v25, %s17680_s27  ;;  %v4308_v55 = vmax.f32 %v4298_v23, 0.0 }
 0x7e3   :  { %v4451_v40 = vrot.slane %v4308_v55, 4  ;;  %v4447_v5 = vrot.slane %v4308_v55, 2  ;;  %v4455_v26 = vrot.slane %v4308_v55, 6 }
 0x7e5   :  { %4428 = vrot.lane.b32.xlu1 %v4307_v21, %s15482_s29  ;;  %4424 = vrot.lane.b32.xlu0 %v4423_v52, %s15483_s1 }
 0x7e9   :  { %4436 = vrot.lane.b32.xlu1 %v4435_v7, %s15484_s7  ;;  %4432 = vrot.lane.b32.xlu0 %v4431_v45, %s15485_s9 }
 0x7ed   :  { %4444 = vrot.lane.b32.xlu1 %v4308_v55, %s15486_s5  ;;  %4440 = vrot.lane.b32.xlu0 %v4439_v30, %s15487_s20 }
 0x7f1   :  { %4452 = vrot.lane.b32.xlu1 %v4451_v40, %s15488_s4  ;;  %4448 = vrot.lane.b32.xlu0 %v4447_v5, %s17697_s17 }
 0x7f5   :  { %4311 = vrot.lane.b32.xlu1 %v4310_v8, %s15467_s28  ;;  %4456 = vrot.lane.b32.xlu0 %v4455_v26, %s15466_s23 }
 0x7f9   :  { %4319 = vrot.lane.b32.xlu1 %v4318_v16, %s15479_s14  ;;  %4315 = vrot.lane.b32.xlu0 %v4314_v51, %s15477_s2 }
 0x7fd   :  { %4327 = vrot.lane.b32.xlu1 %v4326_v10, %s17680_s27  ;;  %4323 = vrot.lane.b32.xlu0 %v4302_v31, %s17682_s13  ;;  %s16418_s13 = sld [smem:[%s17674_s0 + %s15489_s19]]   ;;  %s15494_s27 = smov 15  }
 0x7fe   :  { %s15496_s19 = smov 31  }
 0x801   :  { %4335 = vrot.lane.b32.xlu1 %v4334_v4, %s15483_s1  ;;  %4331 = vrot.lane.b32.xlu0 %v4330_v46, %s15480_s15 }
 0x803   :  { %v15002_v37 = vld [vmem:[%s16418_s13 + $0x78] sm:$0xff]   ;;  %v15004_v56 = vld [vmem:[%s16418_s13 + $0x70] sm:$0xff]   ;;  %v15006_v42 = vld [vmem:[%s16418_s13 + $0x68] sm:$0xff]  }
 0x804   :  { %v15003_v39 = vld [vmem:[%s16418_s13 + $0x38] sm:$0xff]   ;;  %13641 = vmatprep.subr.bf16.mxu0 %v15002_v37  ;;  %v15005_v47 = vld [vmem:[%s16418_s13 + $0x30] sm:$0xff]   ;;  %v15007_v58 = vld [vmem:[%s16418_s13 + $0x28] sm:$0xff]  }
 0x805   :  { %4343 = vrot.lane.b32.xlu1 %v4342_v43, %s15485_s9  ;;  %4339 = vrot.lane.b32.xlu0 %v4303_v14, %s15482_s29  ;;  %v15008_v62 = vld [vmem:[%s16418_s13 + $0x60] sm:$0xff]   ;;  %v15010_v61 = vld [vmem:[%s16418_s13 + $0x58] sm:$0xff]   ;;  %s15504_s9 = smov 65  }
 0x806   :  { %13642 = vmatpush3.bf16.msra.mxu0 %v15003_v39  ;;  %v15009_v13 = vld [vmem:[%s16418_s13 + $0x20] sm:$0xff]   ;;  %v15011_v12 = vld [vmem:[%s16418_s13 + $0x18] sm:$0xff]   ;;  %v15012_v9 = vld [vmem:[%s16418_s13 + $0x50] sm:$0xff]  }
 0x807   :  { %13643 = vmatprep.subr.bf16.mxu0 %v15004_v56  ;;  %v15013_v1 = vld [vmem:[%s16418_s13 + $0x10] sm:$0xff]   ;;  %v15014_v33 = vld [vmem:[%s16418_s13 + $0x48] sm:$0xff]   ;;  %v15016_v55 = vld [vmem:[%s16418_s13 + $0x40] sm:$0xff]  }
 0x808   :  { %v15015_v57 = vld [vmem:[%s16418_s13 + $0x8] sm:$0xff]   ;;  %v15017_v30 = vld [vmem:[%s16418_s13] sm:$0xff]  }
 0x809   :  { %4351 = vrot.lane.b32.xlu1 %v4350_v2, %s15487_s20  ;;  %4347 = vrot.lane.b32.xlu0 %v4346_v29, %s15484_s7  ;;  %s15497_s7 = smov 17   ;;  %s15501_s20 = smov 74  }
 0x80a   :  { %13644 = vmatpush3.bf16.msra.mxu0 %v15005_v47 }
 0x80b   :  { %13645 = vmatprep.subr.bf16.mxu0 %v15006_v42 }
 0x80d   :  { %4363 = vrot.lane.b32.xlu1 %v4362_v44, %s15488_s4  ;;  %4355 = vrot.lane.b32.xlu0 %v4304_v63, %s15486_s5  ;;  %s15492_s4 = smov 14   ;;  %s15499_s5 = smov 119  }
 0x80e   :  { %13646 = vmatpush3.bf16.msra.mxu0 %v15007_v58  ;;  %s16465_s3 = sld [smem:[%s17674_s0 + %s15492_s4]]  }
 0x80f   :  { %13647 = vmatprep.subr.bf16.mxu0 %v15008_v62  ;;  %s12104_s4 = sld [smem:[%s17674_s0 + %s15494_s27]]  }
 0x810   :  { %s16560_s27 = sld [smem:[%s17674_s0 + %s15496_s19]]  }
 0x811   :  { %4359 = vrot.lane.b32.xlu1 %v4358_v59, %s17697_s17  ;;  %4367 = vrot.lane.b32.xlu0 %v4366_v22, %s15466_s23  ;;  %s12106_s17 = sld [smem:[%s17674_s0 + %s15497_s7]]   ;;  %s15500_s23 = smov 101  }
 0x812   :  { %13648 = vmatpush3.bf16.msra.mxu0 %v15009_v13  ;;  %s15503_s7 = smov 56  }
 0x813   :  { %13649 = vmatprep.subr.bf16.mxu0 %v15010_v61 }
 0x814   :  { %v15020_v20 = vld [vmem:[%s16465_s3 + $0x38] sm:$0xff]   ;;  %v15021_v36 = vld [vmem:[%s16465_s3 + $0x30] sm:$0xff]   ;;  %v15022_v44 = vld [vmem:[%s16465_s3 + $0x28] sm:$0xff]  }
 0x815   :  { %14102 = vmatpush3.bf16.msra.mxu1 %v15020_v20  ;;  %v15023_v39 = vld [vmem:[%s16465_s3 + $0x20] sm:$0xff]  }
 0x816   :  { %13650 = vmatpush3.bf16.msra.mxu0 %v15011_v12  ;;  %14103 = vmatprep.subr.bf16.mxu1 %v17701_v35 }
 0x817   :  { %13651 = vmatprep.subr.bf16.mxu0 %v15012_v9 }
 0x819   :  { %14104 = vmatpush3.bf16.msra.mxu1 %v15021_v36 }
 0x81a   :  { %13652 = vmatpush3.bf16.msra.mxu0 %v15013_v1  ;;  %14105 = vmatprep.subr.bf16.mxu1 %v17701_v35 }
 0x81b   :  { %13653 = vmatprep.subr.bf16.mxu0 %v15014_v33 }
 0x81d   :  { %14106 = vmatpush3.bf16.msra.mxu1 %v15022_v44 }
 0x81e   :  { %13654 = vmatpush3.bf16.msra.mxu0 %v15015_v57  ;;  %14107 = vmatprep.subr.bf16.mxu1 %v17701_v35 }
 0x81f   :  { %13655 = vmatprep.subr.bf16.mxu0 %v15016_v55  ;;  %v15025_v55 = vld [vmem:[%s16465_s3 + $0x10] sm:$0xff]  }
 0x821   :  { %14108 = vmatpush3.bf16.msra.mxu1 %v15023_v39  ;;  %v15039_v39 = vld [vmem:[%s15610_s21 + $0x80] ss:$12 sps:$4 sm:$0xff]  }
 0x822   :  { %13656 = vmatpush3.bf16.msra.mxu0 %v15017_v30  ;;  %14109 = vmatprep.subr.bf16.mxu1 %v17701_v35  ;;  %v15026_v30 = vld [vmem:[%s16465_s3 + $0x8] sm:$0xff]  }
 0x823   :  { %14093 = vmatprep.subr.bf16.mxu0 %v17701_v35 }
 0x84b   :  { %v4405_v25 = vpop.permute.xlu1 %4404  ;;  %v4401_v15 = vpop.permute.xlu0 %4400 }
 0x84c   :  { %v4459_v18 = vsel %vm4370_vm13, %v16369_v32, %v4401_v15 }
 0x84d   :  { %v4460_v52 = vsel %vm170_vm1, %v4459_v18, %v4405_v25 }
 0x84f   :  { %v4413_v21 = vpop.permute.xlu1 %4412  ;;  %v4409_v60 = vpop.permute.xlu0 %4408 }
 0x850   :  { %v4461_v3 = vsel %vm4373_vm14, %v4460_v52, %v4409_v60 }
 0x851   :  { %v4462_v23 = vsel %vm4375_vm11, %v4461_v3, %v4413_v21 }
 0x853   :  { %v4421_v19 = vpop.permute.xlu1 %4420  ;;  %v4417_v7 = vpop.permute.xlu0 %4416 }
 0x854   :  { %v4463_v45 = vsel %vm4377_vm8, %v4462_v23, %v4417_v7  ;;  %v15018_v23 = vld [vmem:[%s16418_s13 + $0x88] sm:$0xff]  }
 0x855   :  { %v4464_v41 = vsel %vm4379_vm9, %v4463_v45, %v4421_v19 }
 0x857   :  { %v4429_v32 = vpop.permute.xlu1 %4428  ;;  %v4425_v49 = vpop.permute.xlu0 %4424 }
 0x858   :  { %v4465_v24 = vsel %vm4381_vm5, %v4464_v41, %v4425_v49 }
 0x859   :  { %v4466_v40 = vsel %vm4383_vm7, %v4465_v24, %v4429_v32  ;;  %v15019_v32 = vld [vmem:[%s16418_s13 + $0x80] sm:$0xff]   ;;  %v15024_v24 = vld [vmem:[%s16465_s3 + $0x18] sm:$0xff]  }
 0x85a   :  { %14110 = vmatpush3.bf16.msra.mxu1 %v15024_v24 }
 0x85b   :  { %v4437_v17 = vpop.permute.xlu1 %4436  ;;  %v4433_v5 = vpop.permute.xlu0 %4432  ;;  %14111 = vmatprep.subr.bf16.mxu1 %v17701_v35 }
 0x85c   :  { %v4467_v11 = vsel %vm17696_vm6, %v4466_v40, %v4433_v5  ;;  %v15028_v40 = vld [vmem:[%s15610_s21 + $0xa8] ss:$12 sps:$4 sm:$0xff]   ;;  %v15030_v5 = vld [vmem:[%s15610_s21 + $0xac] ss:$12 sps:$4 sm:$0xff]  }
 0x85d   :  { %v4468_v8 = vsel %vm4387_vm3, %v4467_v11, %v4437_v17  ;;  %v15027_v17 = vld [vmem:[%s16465_s3] sm:$0xff]  }
 0x85e   :  { %14112 = vmatpush3.bf16.msra.mxu1 %v15025_v55  ;;  %v15034_v11 = vld [vmem:[%s15610_s21 + $0x94] ss:$12 sps:$4 sm:$0xff]  }
 0x85f   :  { %v4445_v6 = vpop.permute.xlu1 %4444  ;;  %v4441_v26 = vpop.permute.xlu0 %4440  ;;  %14113 = vmatprep.subr.bf16.mxu1 %v17701_v35 }
 0x860   :  { %v4469_v34 = vsel %vm4389_vm15, %v4468_v8, %v4441_v26  ;;  %v15038_v8 = vld [vmem:[%s15610_s21 + $0x7c] ss:$12 sps:$4 sm:$0xff]   ;;  %v15036_v26 = vld [vmem:[%s15610_s21 + $0x78] ss:$12 sps:$4 sm:$0xff]  }
 0x861   :  { %v4470_v16 = vsel %vm4391_vm12, %v4469_v34, %v4445_v6  ;;  %v15032_v6 = vld [vmem:[%s15610_s21 + $0x90] ss:$12 sps:$4 sm:$0xff]  }
 0x862   :  { %14114 = vmatpush3.bf16.msra.mxu1 %v15026_v30  ;;  %v15042_v34 = vld [vmem:[%s15610_s21 + $0x64] ss:$12 sps:$4 sm:$0xff]  }
 0x863   :  { %v4453_v31 = vpop.permute.xlu1 %4452  ;;  %v4449_v51 = vpop.permute.xlu0 %4448  ;;  %14115 = vmatprep.subr.bf16.mxu1 %v17701_v35 }
 0x864   :  { %v4471_v50 = vsel %vm17698_vm4, %v4470_v16, %v4449_v51  ;;  %v15046_v16 = vld [vmem:[%s15610_s21 + $0x4c] ss:$12 sps:$4 sm:$0xff]   ;;  %v15044_v51 = vld [vmem:[%s15610_s21 + $0x48] ss:$12 sps:$4 sm:$0xff]  }
 0x865   :  { %v4472_v54 = vsel %vm4394_vm0, %v4471_v50, %v4453_v31  ;;  %v15050_v50 = vld [vmem:[%s15610_s21 + $0x34] ss:$12 sps:$4 sm:$0xff]  }
 0x866   :  { %4476 = vrot.lane.b32.xlu0 %v4472_v54, %s15455_s18  ;;  %14116 = vmatpush3.bf16.msra.mxu1 %v15027_v17  ;;  %v15048_v54 = vld [vmem:[%s15610_s21 + $0x30] ss:$12 sps:$4 sm:$0xff]  }
 0x867   :  { %v4312_v38 = vpop.permute.xlu1 %4311  ;;  %v4457_v10 = vpop.permute.xlu0 %4456  ;;  %14121 = vmatprep.subr.bf16.mxu1 %v17701_v35 }
 0x868   :  { %v4473_v27 = vsel %vm4396_vm2, %v4453_v31, %v4457_v10  ;;  %v4371_v14 = vsel %vm4370_vm13, %v16391_v28, %v4312_v38  ;;  %v15040_v31 = vld [vmem:[%s15610_s21 + $0x60] ss:$12 sps:$4 sm:$0xff]   ;;  %v15054_v38 = vld [vmem:[%s15610_s21 + $0x1c] ss:$12 sps:$4 sm:$0xff]   ;;  %v15052_v10 = vld [vmem:[%s15610_s21 + $0x18] ss:$12 sps:$4 sm:$0xff]  }
 0x869   :  { %4478 = vrot.lane.b32.xlu1 %v4473_v27, %s15455_s18  ;;  %s15493_s18 = smov 13  }
 0x86a   :  { %s12102_s13 = sld [smem:[%s17674_s0 + %s15493_s18]]  }
 0x86b   :  { %v4320_v4 = vpop.permute.xlu1 %4319  ;;  %v4316_v46 = vpop.permute.xlu0 %4315 }
 0x86c   :  { %v4372_v48 = vsel %vm170_vm1, %v4371_v14, %v4316_v46 }
 0x86d   :  { %v4374_v63 = vsel %vm4373_vm14, %v4372_v48, %v4320_v4 }
 0x86f   :  { %v4328_v43 = vpop.permute.xlu1 %4327  ;;  %v4324_v2 = vpop.permute.xlu0 %4323 }
 0x870   :  { %v4376_v29 = vsel %vm4375_vm11, %v4374_v63, %v4324_v2  ;;  %v12483_v48 = vld [vmem:[%s12102_s13] ss:$0 sm:$0xff]  ;;  %s15502_s13 = smov 83  }
 0x871   :  { %v4378_v28 = vsel %vm4377_vm8, %v4376_v29, %v4328_v43 }
 0x873   :  { %v4336_v59 = vpop.permute.xlu1 %4335  ;;  %v4332_v37 = vpop.permute.xlu0 %4331 }
 0x874   :  { %v4380_v22 = vsel %vm4379_vm9, %v4378_v28, %v4332_v37 }
 0x875   :  { %v4382_v47 = vsel %vm4381_vm5, %v4380_v22, %v4336_v59  ;;  %v15031_v59 = vld [vmem:[%s15610_s21 + $0xb0] ss:$12 sps:$4 sm:$0xff]   ;;  %v15035_v22 = vld [vmem:[%s15610_s21 + $0x98] ss:$12 sps:$4 sm:$0xff]  }
 0x877   :  { %v4344_v56 = vpop.permute.xlu1 %4343  ;;  %v4340_v42 = vpop.permute.xlu0 %4339 }
 0x878   :  { %v4384_v58 = vsel %vm4383_vm7, %v4382_v47, %v4340_v42  ;;  %v15047_v47 = vld [vmem:[%s15610_s21 + $0x50] ss:$12 sps:$4 sm:$0xff]   ;;  %v15051_v42 = vld [vmem:[%s15610_s21 + $0x38] ss:$12 sps:$4 sm:$0xff]  }
 0x879   :  { %v4386_v13 = vsel %vm17696_vm6, %v4384_v58, %v4344_v56  ;;  %vm17706_vm6 = vcmask 130048   ;;  %v15043_v56 = vld [vmem:[%s15610_s21 + $0x68] ss:$12 sps:$4 sm:$0xff]   ;;  %v15055_v58 = vld [vmem:[%s15610_s21 + $0x20] ss:$12 sps:$4 sm:$0xff]  }
 0x87b   :  { %v4352_v62 = vpop.permute.xlu1 %4351  ;;  %v4348_v61 = vpop.permute.xlu0 %4347 }
 0x87c   :  { %v4388_v12 = vsel %vm4387_vm3, %v4386_v13, %v4348_v61  ;;  %v15056_v13 = vld [vmem:[%s15610_s21] ss:$12 sps:$4 sm:$0xff]   ;;  %v15059_v61 = vld [vmem:[%s15610_s21 + $0x8] ss:$12 sps:$4 sm:$0xff]   ;;  %vm5140_vm3 = vcmask 15360  }
 0x87d   :  { %v4390_v9 = vsel %vm4389_vm15, %v4388_v12, %v4352_v62  ;;  %v15058_v62 = vld [vmem:[%s15610_s21 + $0x4] ss:$12 sps:$4 sm:$0xff]   ;;  %v12503_v12 = vld [vmem:[%s12104_s4] ss:$0 sm:$0xff]  ;;  %s15495_s21 = smov 20   ;;  %s15506_s4 = smov 29  }
 0x87e   :  { %s16554_s3 = sld [smem:[%s17674_s0 + %s15495_s21]]  }
 0x87f   :  { %v4364_v1 = vpop.permute.xlu1 %4363  ;;  %v4356_v33 = vpop.permute.xlu0 %4355 }
 0x880   :  { %v4392_v57 = vsel %vm4391_vm12, %v4390_v9, %v4356_v33  ;;  %vm17709_vm12 = vcmask 1040384  }
 0x881   :  { %vm17710_vm15 = vmmov %vm17709_vm12 }
 0x883   :  { %v4360_v25 = vpop.permute.xlu1 %4359  ;;  %v4368_v21 = vpop.permute.xlu0 %4367 }
 0x884   :  { %v4393_v15 = vsel %vm17698_vm4, %v4392_v57, %v4360_v25  ;;  %v4397_v52 = vsel %vm4396_vm2, %v4364_v1, %v4368_v21  ;;  %vm17708_vm2 = vcmask 261120   ;;  %v4870_v21 = vlaneseq }
 0x885   :  { %v4395_v18 = vsel %vm4394_vm0, %v4393_v15, %v4364_v1  ;;  %vm17707_vm0 = vmmov %vm17706_vm6 }
 0x886   :  { %v4484_v7 = vpack.c.bf16 %v4395_v18, %v4395_v18 }
 0x8d8   :  { %v4477_v60 = vpop.permute.xlu0 %4476 }
 0x8d9   :  { %v4483_v3 = vsel %vm17706_vm6, %v4397_v52, %v4477_v60  ;;  %v16565_v52 = vshrl.u32 %v4870_v21, 7  ;;  %vm17711_vm6 = vmmov %vm17709_vm12 }
 0x8da   :  { %v4485_v19 = vpack.c.bf16 %v4483_v3, %v4483_v3  ;;  %v4868_v3 = vld [vmem:[%s12106_s17] sm:$0x7]  ;;  %s15498_s17 = smov 110  }
 0x8db   :  { %v4479_v45 = vpop.permute.xlu1 %4478 }
 0x8dc   :  { %4673 = vmatprep.mubr.bf16.mxu0 %v4485_v19  ;;  %v4480_v41 = vsel %vm17707_vm0, %v4477_v60, %v4479_v45  ;;  %v4872_v60 = vsub.s32 0, %v16565_v52  ;;  %v15060_v19 = vld [vmem:[%s16343_s12 + $0x20] sm:$0xff]   ;;  %vm17712_vm0 = vmmov %vm17711_vm6 }
 0x8dd   :  { %4674 = vmatmul.mubr.bf16.vlgmr.msra.gmra.mxu0 %v4484_v7  ;;  %v4486_v49 = vpack.c.bf16 %v4480_v41, %v4480_v41  ;;  %vm17714_vm4 = vmmov %vm17712_vm0 }
 0x8de   :  { %14094 = vmatpush3.bf16.msra.mxu0 %v15018_v23  ;;  %14097 = vmatprep.mubr.msk.bf16.mxu0 %vm15491_vm10, %v17701_v35  ;;  %v15061_v23 = vld [vmem:[%s16343_s12 + $0x40] sm:$0xff]   ;;  %v4873_v7 = vrot.slane %v4868_v3, %v4872_v60 }
 0x8df   :  { %14095 = vmatprep.subr.bf16.mxu0 %v17701_v35 }
 0x8e2   :  { %14096 = vmatpush3.bf16.msra.mxu0 %v15019_v32 }
 0x8e3   :  { %5013 = vmatprep.subr.bf16.mxu0 %v15030_v5 }
 0x8e5   :  { %14098 = vmatmul.mubr.msk.bf16.vlgmr.msra.gmra.mxu0 %vm17708_vm2, %v4486_v49  ;;  %vm17713_vm2 = vmmov %vm17712_vm0 }
 0x8e6   :  { %5045 = vmatprep.mubr.bf16.mxu0 %v17699_v0  ;;  %5014 = vmatpush1.bf16.msra.mxu0 %v15028_v40 }
 0x8e7   :  { %5015 = vmatprep.subr.bf16.mxu0 %v15034_v11 }
 0x8ea   :  { %5016 = vmatpush1.bf16.msra.mxu0 %v15032_v6  ;;  %v4876_v6 = vsub.s32 1, %v16565_v52 }
 0x8eb   :  { %5017 = vmatprep.subr.bf16.mxu0 %v15038_v8 }
 0x8ec   :  { %v4877_v8 = vrot.slane %v4868_v3, %v4876_v6  ;;  %v15091_v6 = vld [vmem:[%s16343_s12 + $0x118] sm:$0xff]  }
 0x8ee   :  { %5018 = vmatpush1.bf16.msra.mxu0 %v15036_v26 }
 0x8ef   :  { %5019 = vmatprep.subr.bf16.mxu0 %v15042_v34 }
 0x8f2   :  { %5020 = vmatpush1.bf16.msra.mxu0 %v15040_v31 }
 0x8f3   :  { %5021 = vmatprep.subr.bf16.mxu0 %v15046_v16  ;;  %v4880_v16 = vsub.s32 2, %v16565_v52 }
 0x8f6   :  { %5022 = vmatpush1.bf16.msra.mxu0 %v15044_v51  ;;  %v4881_v51 = vrot.slane %v4868_v3, %v4880_v16  ;;  %v15095_v16 = vld [vmem:[%s16343_s12 + $0x148] sm:$0xff]  }
 0x8f7   :  { %5023 = vmatprep.subr.bf16.mxu0 %v15050_v50 }
 0x8fa   :  { %5024 = vmatpush1.bf16.msra.mxu0 %v15048_v54 }
 0x8fb   :  { %5025 = vmatprep.subr.bf16.mxu0 %v15054_v38 }
 0x8fe   :  { %5026 = vmatpush1.bf16.msra.mxu0 %v15052_v10 }
 0x8ff   :  { %5027 = vmatprep.subr.bf16.mxu0 %v15058_v62 }
 0x902   :  { %5028 = vmatpush1.bf16.msra.mxu0 %v15056_v13 }
 0x99d   :  { %v13657_v27 = vpop.f32.mrf.mxu0 }
 0x99f   :  { %v13658_v14 = vpop.f32.mrf.mxu0 }
 0x9a0   :  { %v13659_v4 = vadd.f32 %v13658_v14, %v13657_v27 }
 0x9a1   :  { %v13660_v46 = vpop.f32.mrf.mxu0 }
 0x9a2   :  { %v4676_v36 = vadd.f32 %v13659_v4, %v12483_v48  ;;  %v15062_v46 = vld [vmem:[%s16343_s12 + $0x28] sm:$0xff]  }
 0x9a3   :  { %v13661_v20 = vpop.f32.mrf.mxu0  ;;  %v15063_v48 = vld [vmem:[%s16343_s12 + $0x48] sm:$0xff]  }
 0x9a5   :  { %v4715_v43 = vpop.f32.mrf.mxu0 }
 0x9a6   :  { %v4716_v63 = vadd.f32 %v4715_v43, %v4676_v36  ;;  %v15064_v36 = vld [vmem:[%s16343_s12 + $0x50] sm:$0xff]  }
 0x9a7   :  { %v14099_v2 = vpop.f32.mrf.mxu0  ;;  %v15065_v43 = vld [vmem:[%s16343_s12 + $0x30] sm:$0xff]  }
 0x9a8   :  { %v4721_v29 = vmax.f32 %v4716_v63, 0.0 }
 0x9a9   :  { %v4718_v44 = vpop.f32.mrf.mxu0 }
 0x9aa   :  { %v4722_v28 = vpack.c.bf16 %v4721_v29, %v4721_v29 }
 0x9ab   :  { %v14100_v37 = vpop.f32.mrf.mxu0 }
 0x9ac   :  { %14118 = vmatmul.mubr.bf16.vlgmr.msra.gmra.mxu1 %v4722_v28  ;;  %v15067_v28 = vld [vmem:[%s16343_s12 + $0x58] sm:$0xff]   ;;  %v15068_v37 = vld [vmem:[%s16343_s12 + $0x80] sm:$0xff]  }
 0x9ad   :  { %14122 = vmatpush3.bf16.msra.mxu1 %v15031_v59  ;;  %14137 = vmatprep.mubr.msk.bf16.mxu1 %vm15491_vm10, %v17701_v35  ;;  %v15066_v59 = vld [vmem:[%s16343_s12 + $0x38] sm:$0xff]  }
 0x9ae   :  { %14123 = vmatprep.subr.bf16.mxu1 %v17701_v35 }
 0x9b1   :  { %14124 = vmatpush3.bf16.msra.mxu1 %v15035_v22  ;;  %v15069_v22 = vld [vmem:[%s16343_s12] sm:$0xff]  }
 0x9b2   :  { %14125 = vmatprep.subr.bf16.mxu1 %v17701_v35 }
 0x9b5   :  { %14126 = vmatpush3.bf16.msra.mxu1 %v15039_v39  ;;  %v15070_v39 = vld [vmem:[%s16343_s12 + $0x8] sm:$0xff]  }
 0x9b6   :  { %14127 = vmatprep.subr.bf16.mxu1 %v17701_v35 }
 0x9b9   :  { %14128 = vmatpush3.bf16.msra.mxu1 %v15043_v56  ;;  %v15071_v56 = vld [vmem:[%s16343_s12 + $0x88] sm:$0xff]  }
 0x9ba   :  { %14129 = vmatprep.subr.bf16.mxu1 %v17701_v35 }
 0x9bd   :  { %14130 = vmatpush3.bf16.msra.mxu1 %v15047_v47  ;;  %v15072_v47 = vld [vmem:[%s16343_s12 + $0x90] sm:$0xff]  }
 0x9be   :  { %14131 = vmatprep.subr.bf16.mxu1 %v17701_v35 }
 0x9c1   :  { %14132 = vmatpush3.bf16.msra.mxu1 %v15051_v42  ;;  %v15073_v42 = vld [vmem:[%s16343_s12 + $0x10] sm:$0xff]  }
 0x9c2   :  { %14133 = vmatprep.subr.bf16.mxu1 %v17701_v35 }
 0x9c5   :  { %14134 = vmatpush3.bf16.msra.mxu1 %v15055_v58 }
 0x9c6   :  { %14135 = vmatprep.subr.bf16.mxu1 %v17701_v35 }
 0x9c9   :  { %14136 = vmatpush3.bf16.msra.mxu1 %v15059_v61 }
 0xa6c   :  { %v4828_v9 = vpop.f32.mrf.mxu1 }
 0xa6d   :  { %v4829_v1 = vadd.f32 %v12503_v12, %v4828_v9  ;;  %v15074_v12 = vld [vmem:[%s16343_s12 + $0x18] sm:$0xff]  }
 0xa6e   :  { %v14119_v33 = vpop.f32.mrf.mxu1  ;;  %v15075_v9 = vld [vmem:[%s16343_s12 + $0x98] sm:$0xff]  }
 0xa6f   :  { %v4834_v57 = vmax.f32 %v4829_v1, 0.0  ;;  %v15076_v1 = vld [vmem:[%s16343_s12 + $0xc0] sm:$0xff]  }
 0xa70   :  { %v4831_v25 = vpop.f32.mrf.mxu1  ;;  %v15077_v33 = vld [vmem:[%s16343_s12 + $0x60] sm:$0xff]  }
 0xa71   :  { %v4835_v15 = vpack.c.bf16 %v4834_v57, %v4834_v57  ;;  %v15078_v57 = vld [vmem:[%s16343_s12 + $0x68] sm:$0xff]  }
 0xa72   :  { %v14120_v18 = vpop.f32.mrf.mxu1  ;;  %v15079_v25 = vld [vmem:[%s16343_s12 + $0xc8] sm:$0xff]  }
 0xa73   :  { %5046 = vmatmul.mubr.bf16.vlgmr.msra.gmra.mxu0 %v4835_v15  ;;  %14138 = vmatmul.mubr.bf16.vlgmr.msra.gmra.mxu1 %v4835_v15  ;;  %v15080_v15 = vld [vmem:[%s16343_s12 + $0xd0] sm:$0xff]  }
 0xa74   :  { %14143 = vmatprep.mubr.msk.bf16.mxu0 %vm5140_vm3, %v15060_v19  ;;  %14163 = vmatprep.mubr.msk.bf16.mxu1 %vm5140_vm3, %v15061_v23  ;;  %v15081_v18 = vld [vmem:[%s16343_s12 + $0x70] sm:$0xff]   ;;  %v15082_v19 = vld [vmem:[%s16343_s12 + $0x78] sm:$0xff]  }
 0xa75   :  { %v15083_v23 = vld [vmem:[%s16343_s12 + $0xd8] sm:$0xff]  }
 0xb33   :  { %v5047_v45 = vpop.f32.mrf.mxu0  ;;  %v5088_v32 = vpop.f32.mrf.mxu1 }
 0xb34   :  { %v5048_v41 = vadd.f32 %v5047_v45, %v4873_v7  ;;  %v5089_v50 = vadd.f32 %v5088_v32, %v4881_v51  ;;  %v15084_v7 = vld [vmem:[%s16343_s12 + $0x100] sm:$0xff]  }
 0xb35   :  { %v5049_v49 = vpop.f32.mrf.mxu0  ;;  %v14139_v24 = vpop.f32.mrf.mxu1  ;;  %v15085_v45 = vld [vmem:[%s16343_s12 + $0xa0] sm:$0xff]  }
 0xb36   :  { %v5094_v55 = vmax.f32 %v5048_v41, 0.0  ;;  %v5050_v26 = vadd.f32 %v5049_v49, %v4877_v8  ;;  %v5096_v54 = vmax.f32 %v5089_v50, 0.0  ;;  %v15086_v41 = vld [vmem:[%s16343_s12 + $0xa8] sm:$0xff]   ;;  %v15088_v24 = vld [vmem:[%s16343_s12 + $0x110] sm:$0xff]   ;;  %v15092_v8 = vld [vmem:[%s16343_s12 + $0xe0] sm:$0xff]  }
 0xb37   :  { %v5051_v30 = vpop.f32.mrf.mxu0  ;;  %v5091_v17 = vpop.f32.mrf.mxu1  ;;  %v15087_v49 = vld [vmem:[%s16343_s12 + $0x108] sm:$0xff]   ;;  %v15096_v50 = vld [vmem:[%s16343_s12 + $0xf0] sm:$0xff]  }
 0xb38   :  { %v16572_v40 = vpack.c.bf16 %v5094_v55, %v5094_v55  ;;  %v5095_v34 = vmax.f32 %v5050_v26, 0.0  ;;  %v5099_v38 = vpack.c.bf16 %v5096_v54, %v5096_v54  ;;  %v15089_v55 = vld [vmem:[%s16343_s12 + $0xb0] sm:$0xff]   ;;  %v15093_v26 = vld [vmem:[%s16343_s12 + $0x140] sm:$0xff]  }
 0xb39   :  { %v5052_v5 = vpop.f32.mrf.mxu0  ;;  %v14140_v11 = vpop.f32.mrf.mxu1  ;;  %v15097_v54 = vld [vmem:[%s16343_s12 + $0x150] sm:$0xff]  }
 0xb3a   :  { %5350 = vrot.lane.b32.xlu1 %v16572_v40, %s15498_s17  ;;  %5138 = vrot.lane.b32.xlu0 %v16572_v40, %s15499_s5  ;;  %v5098_v31 = vpack.c.bf16 %v5095_v34, %v5095_v34  ;;  %s15507_s17 = smov 121   ;;  %s15508_s5 = smov 103   ;;  %v15090_v11 = vld [vmem:[%s16343_s12 + $0xb8] sm:$0xff]  }
 0xb3e   :  { %5588 = vrot.lane.b32.xlu1 %v16572_v40, %s15463_s8  ;;  %5469 = vrot.lane.b32.xlu0 %v16572_v40, %s15500_s23  ;;  %s15505_s8 = smov 47   ;;  %s15509_s23 = smov 112  }
 0xb42   :  { %5826 = vrot.lane.b32.xlu1 %v16572_v40, %s15501_s20  ;;  %5707 = vrot.lane.b32.xlu0 %v16572_v40, %s15502_s13  ;;  %s15511_s20 = smov 94   ;;  %s15512_s13 = smov 67  }
 0xb46   :  { %6064 = vrot.lane.b32.xlu1 %v16572_v40, %s15503_s7  ;;  %5945 = vrot.lane.b32.xlu0 %v16572_v40, %s15504_s9  ;;  %s15515_s7 = smov 22   ;;  %s15517_s9 = smov 123  }
 0xb4a   :  { %6302 = vrot.lane.b32.xlu1 %v16572_v40, %s15475_s24  ;;  %6183 = vrot.lane.b32.xlu0 %v16572_v40, %s15505_s8 }
 0xb4e   :  { %6540 = vrot.lane.b32.xlu1 %v16572_v40, %s15495_s21  ;;  %6421 = vrot.lane.b32.xlu0 %v16572_v40, %s15506_s4  ;;  %s15510_s21 = smov 85  }
 0xb52   :  { %6779 = vrot.lane.b32.xlu1 %v16572_v40, %s15453_s10  ;;  %6659 = vrot.lane.b32.xlu0 %v16572_v40, %s15476_s26  ;;  %s15513_s26 = smov 58  }
 0xb56   :  { %6902 = vrot.lane.b32.xlu1 %v5098_v31, %s15507_s17  ;;  %6781 = vrot.lane.b32.xlu0 %v5098_v31, %s15453_s10  ;;  %s15514_s10 = smov 40   ;;  %s12111_s17 = sld [smem:[%s17674_s0 + %s15515_s7]]  }
 0xb5a   :  { %7140 = vrot.lane.b32.xlu1 %v5098_v31, %s15508_s5  ;;  %7021 = vrot.lane.b32.xlu0 %v5098_v31, %s15509_s23  ;;  %s15521_s5 = smov 25  }
 0xb5e   :  { %7378 = vrot.lane.b32.xlu1 %v5098_v31, %s15510_s21  ;;  %7259 = vrot.lane.b32.xlu0 %v5098_v31, %s15511_s20  ;;  %s17425_s20 = sld [smem:[%s17674_s0 + %s15521_s5]]  }
 0xb62   :  { %7616 = vrot.lane.b32.xlu1 %v5098_v31, %s15512_s13  ;;  %7497 = vrot.lane.b32.xlu0 %v5098_v31, %s15461_s6  ;;  %s15516_s6 = smov 114   ;;  %s17814_s13 = smov 68  }
 0xb66   :  { %7854 = vrot.lane.b32.xlu1 %v5098_v31, %s15470_s16  ;;  %7735 = vrot.lane.b32.xlu0 %v5098_v31, %s15513_s26  ;;  %s15522_s26 = smov 26  }
 0xb6a   :  { %8092 = vrot.lane.b32.xlu1 %v5098_v31, %s15496_s19  ;;  %7973 = vrot.lane.b32.xlu0 %v5098_v31, %s15514_s10  ;;  %s15518_s19 = smov 105  }
 0xb6e   :  { %8330 = vrot.lane.b32.xlu1 %v5098_v31, %s15493_s18  ;;  %8211 = vrot.lane.b32.xlu0 %v5098_v31, %s15515_s7 }
 0xb72   :  { %8452 = vrot.lane.b32.xlu1 %v5099_v38, %s15458_s30  ;;  %8450 = vrot.lane.b32.xlu0 %v5098_v31, %s15458_s30  ;;  %v15094_v31 = vld [vmem:[%s16343_s12 + $0xe8] sm:$0xff]   ;;  %s17782_s30 = smov 36  }
 0xb76   :  { %8692 = vrot.lane.b32.xlu1 %v5099_v38, %s15516_s6  ;;  %8573 = vrot.lane.b32.xlu0 %v5099_v38, %s15517_s9  ;;  %s12115_s6 = sld [smem:[%s17674_s0 + %s15522_s26]]   ;;  %s17815_s9 = smov 117  }
 0xb7a   :  { %8811 = vrot.lane.b32.xlu0 %v5099_v38, %s15518_s19  ;;  %s17816_s19 = smov 87  }
 0xbac   :  { %v5351_v10 = vpop.permute.xlu1 %5350  ;;  %v5139_v27 = vpop.permute.xlu0 %5138 }
 0xbad   :  { %v5365_v14 = vsel %vm17709_vm12, %v5351_v10, 0  ;;  %v5154_v4 = vsel %vm17710_vm15, %v5139_v27, 0  ;;  %14699 = vmatprep.subr.msk.bf16.mxu0 %vm17711_vm6, %v5139_v27  ;;  %14701 = vmatprep.subr.msk.bf16.mxu1 %vm17712_vm0, %v5351_v10  ;;  %vm17715_vm12 = vmmov %vm17712_vm0 }
 0xbae   :  { %14142 = vmatpush3.bf16.msra.mxu0 %v5154_v4  ;;  %14162 = vmatpush3.bf16.msra.mxu1 %v5365_v14  ;;  %v5254_v2 = vsel %vm17715_vm12, %v16572_v40, 0  ;;  %vm17716_vm15 = vmmov %vm17712_vm0  ;;  %v15098_v4 = vld [vmem:[%s16343_s12 + $0xf8] sm:$0xff]  }
 0xbaf   :  { %14700 = vmatprep.subr.msk.bf16.mxu0 %vm17713_vm2, %v16572_v40  ;;  %vm17717_vm6 = vmmov %vm17712_vm0 }
 0xbb0   :  { %v5589_v20 = vpop.permute.xlu1 %5588  ;;  %v5470_v29 = vpop.permute.xlu0 %5469  ;;  %vm17719_vm2 = vmmov %vm17712_vm0 }
 0xbb1   :  { %v5603_v63 = vsel %vm17714_vm4, %v5589_v20, 0  ;;  %14144 = vmatmul.mubr.msk.bf16.vlgmr.msra.gmra.mxu0 %vm5140_vm3, %v15062_v46  ;;  %14164 = vmatmul.mubr.msk.bf16.vlgmr.msra.gmra.mxu1 %vm5140_vm3, %v15063_v48  ;;  %vm17718_vm4 = vmmov %vm17712_vm0  ;;  %v5484_v58 = vsel %vm17712_vm0, %v5470_v29, 0  ;;  %v15099_v46 = vld [vmem:[%s16343_s12 + $0x158] sm:$0xff]   ;;  %v15100_v48 = vld [vmem:[%s16343_s12 + $0x120] sm:$0xff]  }
 0xbb2   :  { %14703 = vmatprep.subr.msk.bf16.mxu1 %vm17716_vm15, %v5589_v20  ;;  %14152 = vmatpush3.bf16.msra.mxu0 %v5254_v2  ;;  %vm17720_vm12 = vmmov %vm17712_vm0  ;;  %v15101_v20 = vld [vmem:[%s16343_s12 + $0x180] sm:$0xff]   ;;  %v15105_v2 = vld [vmem:[%s16343_s12 + $0x190] sm:$0xff]  }
 0xbb3   :  { %14182 = vmatpush3.bf16.msra.mxu1 %v5603_v63  ;;  %14702 = vmatprep.subr.msk.bf16.mxu0 %vm17717_vm6, %v5470_v29  ;;  %vm17721_vm15 = vmmov %vm17712_vm0  ;;  %v15104_v63 = vld [vmem:[%s16343_s12 + $0x130] sm:$0xff]  }
 0xbb4   :  { %v5827_v44 = vpop.permute.xlu1 %5826  ;;  %14167 = vmatprep.mubr.msk.bf16.mxu1 %vm5140_vm3, %v15064_v36  ;;  %14147 = vmatprep.mubr.msk.bf16.mxu0 %vm5140_vm3, %v15065_v43  ;;  %v5708_v13 = vpop.permute.xlu0 %5707  ;;  %vm17722_vm6 = vmmov %vm17712_vm0  ;;  %v15102_v36 = vld [vmem:[%s16343_s12 + $0x128] sm:$0xff]  }
 0xbb5   :  { %14705 = vmatprep.subr.msk.bf16.mxu1 %vm17718_vm4, %v5827_v44  ;;  %v5841_v62 = vsel %vm17719_vm2, %v5827_v44, 0  ;;  %v5722_v21 = vsel %vm17722_vm6, %v5708_v13, 0  ;;  %vm17723_vm4 = vmmov %vm17712_vm0  ;;  %v15103_v43 = vld [vmem:[%s16343_s12 + $0x188] sm:$0xff]  }
 0xbb6   :  { %vm17724_vm2 = vmmov %vm17712_vm0 }
 0xbb7   :  { %vm17727_vm6 = vmmov %vm17712_vm0 }
 0xbb8   :  { %v6065_v61 = vpop.permute.xlu1 %6064  ;;  %v5946_v60 = vpop.permute.xlu0 %5945 }
 0xbb9   :  { %14148 = vmatmul.mubr.msk.bf16.gmra.mxu0 %vm5140_vm3, %v15066_v59  ;;  %14168 = vmatmul.mubr.msk.bf16.gmra.mxu1 %vm5140_vm3, %v15067_v28  ;;  %v6079_v52 = vsel %vm17723_vm4, %v6065_v61, 0  ;;  %vm17728_vm4 = vmmov %vm17712_vm0  ;;  %v15106_v28 = vld [vmem:[%s16343_s12 + $0x138] sm:$0xff]  }
 0xbba   :  { %14183 = vmatprep.mubr.msk.bf16.mxu1 %vm5140_vm3, %v15068_v37  ;;  %14153 = vmatprep.mubr.msk.bf16.mxu0 %vm5140_vm3, %v15069_v22  ;;  %v15107_v37 = vld [vmem:[%s16343_s12 + $0x198] sm:$0xff]   ;;  %v15108_v22 = vld [vmem:[%s16343_s12 + $0x160] sm:$0xff]  }
 0xbbc   :  { %v6303_v3 = vpop.permute.xlu1 %6302  ;;  %v6184_v32 = vpop.permute.xlu0 %6183 }
 0xbbd   :  { %v6198_v38 = vsel %vm17712_vm0, %v6184_v32, 0 }
 0xbc0   :  { %v6541_v40 = vpop.permute.xlu1 %6540  ;;  %v6422_v5 = vpop.permute.xlu0 %6421 }
 0xbc1   :  { %14154 = vmatmul.mubr.msk.bf16.vlgmr.msra.gmra.mxu0 %vm5140_vm3, %v15070_v39  ;;  %14184 = vmatmul.mubr.msk.bf16.vlgmr.msra.gmra.mxu1 %vm5140_vm3, %v15071_v56  ;;  %v15109_v39 = vld [vmem:[%s16343_s12 + $0x1c0] sm:$0xff]   ;;  %v15110_v56 = vld [vmem:[%s16343_s12 + $0x168] sm:$0xff]  }
 0xbc2   :  { %14172 = vmatpush3.bf16.msra.mxu0 %v5484_v58  ;;  %14202 = vmatpush3.bf16.msra.mxu1 %v5841_v62  ;;  %v15113_v58 = vld [vmem:[%s16343_s12 + $0x1d0] sm:$0xff]  }
 0xbc3   :  { %14704 = vmatprep.subr.msk.bf16.mxu0 %vm17720_vm12, %v5708_v13  ;;  %14707 = vmatprep.subr.msk.bf16.mxu1 %vm17721_vm15, %v6065_v61  ;;  %vm17725_vm12 = vmmov %vm17712_vm0 }
 0xbc4   :  { %14187 = vmatprep.mubr.msk.bf16.mxu1 %vm5140_vm3, %v15072_v47  ;;  %14157 = vmatprep.mubr.msk.bf16.mxu0 %vm5140_vm3, %v15073_v42  ;;  %v5960_v30 = vsel %vm17725_vm12, %v5946_v60, 0  ;;  %vm17726_vm15 = vmmov %vm17712_vm0  ;;  %v6660_v34 = vpop.permute.xlu0 %6659  ;;  %v6780_v27 = vpop.permute.xlu1 %6779  ;;  %v15111_v47 = vld [vmem:[%s16343_s12 + $0x1c8] sm:$0xff]   ;;  %v15112_v42 = vld [vmem:[%s16343_s12 + $0x170] sm:$0xff]  }
 0xbc5   :  { %v6317_v17 = vsel %vm17726_vm15, %v6303_v3, 0  ;;  %vm17730_vm12 = vmmov %vm17712_vm0 }
 0xbc6   :  { %vm17731_vm15 = vmmov %vm17712_vm0 }
 0xbc8   :  { %v6782_v51 = vpop.permute.xlu0 %6781  ;;  %v6903_v61 = vpop.permute.xlu1 %6902 }
 0xbc9   :  { %14158 = vmatmul.mubr.msk.bf16.gmra.mxu0 %vm5140_vm3, %v15074_v12  ;;  %14188 = vmatmul.mubr.msk.bf16.gmra.mxu1 %vm5140_vm3, %v15075_v9  ;;  %v6784_v14 = vsel %vm5140_vm3, %v6780_v27, %v6782_v51  ;;  %v15114_v9 = vld [vmem:[%s16343_s12 + $0x178] sm:$0xff]   ;;  %v15137_v51 = vld [vmem:[%s16343_s12 + $0x290] sm:$0xff]  }
 0xbca   :  { %14203 = vmatprep.mubr.msk.bf16.mxu1 %vm5140_vm3, %v15076_v1  ;;  %14173 = vmatprep.mubr.msk.bf16.mxu0 %vm5140_vm3, %v15077_v33  ;;  %v15115_v1 = vld [vmem:[%s16343_s12 + $0x1d8] sm:$0xff]   ;;  %v15116_v33 = vld [vmem:[%s16343_s12 + $0x1a0] sm:$0xff]  }
 0xbcb   :  { %v15138_v27 = vld [vmem:[%s16343_s12 + $0x238] sm:$0xff]  }
 0xbcc   :  { %v7022_v59 = vpop.permute.xlu0 %7021 }
 0xbd0   :  { %v7260_v12 = vpop.permute.xlu0 %7259 }
 0xbd1   :  { %14174 = vmatmul.mubr.msk.bf16.vlgmr.msra.gmra.mxu0 %vm5140_vm3, %v15078_v57  ;;  %14204 = vmatmul.mubr.msk.bf16.vlgmr.msra.gmra.mxu1 %vm5140_vm3, %v15079_v25  ;;  %v15117_v57 = vld [vmem:[%s16343_s12 + $0x200] sm:$0xff]   ;;  %v15118_v25 = vld [vmem:[%s16343_s12 + $0x1a8] sm:$0xff]  }
 0xbd2   :  { %14192 = vmatpush3.bf16.msra.mxu0 %v5722_v21  ;;  %14222 = vmatpush3.bf16.msra.mxu1 %v6079_v52  ;;  %v15121_v21 = vld [vmem:[%s16343_s12 + $0x210] sm:$0xff]   ;;  %v6917_v52 = vsel %vm17712_vm0, %v6903_v61, 0 }
 0xbd3   :  { %14706 = vmatprep.subr.msk.bf16.mxu0 %vm17712_vm0, %v5946_v60  ;;  %14709 = vmatprep.subr.msk.bf16.mxu1 %vm17724_vm2, %v6303_v3  ;;  %vm17729_vm2 = vmmov %vm17712_vm0  ;;  %v7141_v3 = vpop.permute.xlu1 %7140 }
 0xbd4   :  { %14207 = vmatprep.mubr.msk.bf16.mxu1 %vm5140_vm3, %v15080_v15  ;;  %14177 = vmatprep.mubr.msk.bf16.mxu0 %vm5140_vm3, %v15081_v18  ;;  %v6555_v10 = vsel %vm17729_vm2, %v6541_v40, 0  ;;  %vm17734_vm2 = vmmov %vm17712_vm0  ;;  %v15119_v15 = vld [vmem:[%s16343_s12 + $0x208] sm:$0xff]   ;;  %v15120_v18 = vld [vmem:[%s16343_s12 + $0x1b0] sm:$0xff]  }
 0xbd9   :  { %14178 = vmatmul.mubr.msk.bf16.gmra.mxu0 %vm5140_vm3, %v15082_v19  ;;  %14208 = vmatmul.mubr.msk.bf16.gmra.mxu1 %vm5140_vm3, %v15083_v23  ;;  %v7498_v19 = vpop.permute.xlu0 %7497  ;;  %v15122_v23 = vld [vmem:[%s16343_s12 + $0x1b8] sm:$0xff]  }
 0xbda   :  { %14223 = vmatprep.mubr.msk.bf16.mxu1 %vm5140_vm3, %v15084_v7  ;;  %14193 = vmatprep.mubr.msk.bf16.mxu0 %vm5140_vm3, %v15085_v45  ;;  %v15123_v7 = vld [vmem:[%s16343_s12 + $0x218] sm:$0xff]   ;;  %v15124_v45 = vld [vmem:[%s16343_s12 + $0x1e0] sm:$0xff]  }
 0xbe1   :  { %14194 = vmatmul.mubr.msk.bf16.vlgmr.msra.gmra.mxu0 %vm5140_vm3, %v15086_v41  ;;  %14224 = vmatmul.mubr.msk.bf16.vlgmr.msra.gmra.mxu1 %vm5140_vm3, %v15087_v49  ;;  %v15126_v41 = vld [vmem:[%s16343_s12 + $0x1e8] sm:$0xff]  }
 0xbe2   :  { %14212 = vmatpush3.bf16.msra.mxu0 %v5960_v30  ;;  %14242 = vmatpush3.bf16.msra.mxu1 %v6317_v17  ;;  %v15127_v49 = vld [vmem:[%s16343_s12 + $0x248] sm:$0xff]  }
 0xbe3   :  { %14708 = vmatprep.subr.msk.bf16.mxu0 %vm17727_vm6, %v6184_v32  ;;  %14711 = vmatprep.subr.msk.bf16.mxu1 %vm17728_vm4, %v6541_v40  ;;  %vm17732_vm6 = vmmov %vm17712_vm0  ;;  %v15125_v32 = vld [vmem:[%s16343_s12 + $0x240] sm:$0xff]   ;;  %v7379_v40 = vpop.permute.xlu1 %7378 }
 0xbe4   :  { %14227 = vmatprep.mubr.msk.bf16.mxu1 %vm5140_vm3, %v15088_v24  ;;  %14197 = vmatprep.mubr.msk.bf16.mxu0 %vm5140_vm3, %v15089_v55  ;;  %v6436_v29 = vsel %vm17732_vm6, %v6422_v5, 0  ;;  %vm17733_vm4 = vmmov %vm17712_vm0  ;;  %v15128_v24 = vld [vmem:[%s16343_s12 + $0x1f0] sm:$0xff]  }
 0xbe5   :  { %v6798_v44 = vsel %vm17733_vm4, %v6784_v14, 0  ;;  %vm17737_vm6 = vmmov %vm17712_vm0  ;;  %v15129_v55 = vld [vmem:[%s16343_s12 + $0x250] sm:$0xff]  }
 0xbe6   :  { %vm17738_vm4 = vmmov %vm17712_vm0 }
 0xbe9   :  { %14198 = vmatmul.mubr.msk.bf16.gmra.mxu0 %vm5140_vm3, %v15090_v11  ;;  %14228 = vmatmul.mubr.msk.bf16.gmra.mxu1 %vm5140_vm3, %v15091_v6  ;;  %v15130_v11 = vld [vmem:[%s16343_s12 + $0x1f8] sm:$0xff]  }
 0xbea   :  { %14213 = vmatprep.mubr.msk.bf16.mxu0 %vm5140_vm3, %v15092_v8  ;;  %14243 = vmatprep.mubr.msk.bf16.mxu1 %vm5140_vm3, %v15093_v26  ;;  %v15131_v6 = vld [vmem:[%s16343_s12 + $0x258] sm:$0xff]   ;;  %v15132_v8 = vld [vmem:[%s16343_s12 + $0x220] sm:$0xff]  }
 0xbeb   :  { %v15133_v26 = vld [vmem:[%s16343_s12 + $0x280] sm:$0xff]  }
 0xbf1   :  { %14214 = vmatmul.mubr.msk.bf16.vlgmr.msra.gmra.mxu0 %vm5140_vm3, %v15094_v31  ;;  %14244 = vmatmul.mubr.msk.bf16.vlgmr.msra.gmra.mxu1 %vm5140_vm3, %v15095_v16  ;;  %v15135_v31 = vld [vmem:[%s16343_s12 + $0x288] sm:$0xff]   ;;  %v15136_v16 = vld [vmem:[%s16343_s12 + $0x230] sm:$0xff]  }
 0xbf2   :  { %14232 = vmatpush3.bf16.msra.mxu0 %v6198_v38  ;;  %14262 = vmatpush3.bf16.msra.mxu1 %v6555_v10  ;;  %v7617_v38 = vpop.permute.xlu1 %7616 }
 0xbf3   :  { %14710 = vmatprep.subr.msk.bf16.mxu0 %vm17730_vm12, %v6422_v5  ;;  %14713 = vmatprep.subr.msk.bf16.mxu1 %vm17731_vm15, %v6784_v14  ;;  %vm17735_vm12 = vmmov %vm17712_vm0  ;;  %v7736_v5 = vpop.permute.xlu0 %7735  ;;  %v15139_v14 = vld [vmem:[%s16343_s12 + $0x298] sm:$0xff]  }
 0xbf4   :  { %14217 = vmatprep.mubr.msk.bf16.mxu0 %vm5140_vm3, %v15096_v50  ;;  %14247 = vmatprep.mubr.msk.bf16.mxu1 %vm5140_vm3, %v15097_v54  ;;  %v6674_v62 = vsel %vm17735_vm12, %v6660_v34, 0  ;;  %vm17736_vm15 = vmmov %vm17712_vm0 }
 0xbf5   :  { %v7036_v13 = vsel %vm17736_vm15, %v7022_v59, 0  ;;  %vm17740_vm12 = vmmov %vm17712_vm0 }
 0xbf6   :  { %vm17741_vm15 = vmmov %vm17712_vm0 }
 0xbf7   :  { %v7974_v10 = vpop.permute.xlu0 %7973 }
 0xbf9   :  { %14218 = vmatmul.mubr.msk.bf16.gmra.mxu0 %vm5140_vm3, %v15098_v4  ;;  %14248 = vmatmul.mubr.msk.bf16.gmra.mxu1 %vm5140_vm3, %v15099_v46  ;;  %v15140_v4 = vld [vmem:[%s16343_s12 + $0x260] sm:$0xff]  }
 0xbfa   :  { %14233 = vmatprep.mubr.msk.bf16.mxu0 %vm5140_vm3, %v15100_v48  ;;  %14263 = vmatprep.mubr.msk.bf16.mxu1 %vm5140_vm3, %v15101_v20  ;;  %v15141_v46 = vld [vmem:[%s16343_s12 + $0x2c0] sm:$0xff]   ;;  %v7855_v48 = vpop.permute.xlu1 %7854  ;;  %v15142_v20 = vld [vmem:[%s16343_s12 + $0x268] sm:$0xff]  }
 0xc01   :  { %14234 = vmatmul.mubr.msk.bf16.vlgmr.msra.gmra.mxu0 %vm5140_vm3, %v15102_v36  ;;  %14264 = vmatmul.mubr.msk.bf16.vlgmr.msra.gmra.mxu1 %vm5140_vm3, %v15103_v43  ;;  %v15143_v36 = vld [vmem:[%s16343_s12 + $0x2c8] sm:$0xff]   ;;  %v15144_v43 = vld [vmem:[%s16343_s12 + $0x270] sm:$0xff]  }
 0xc02   :  { %14252 = vmatpush3.bf16.msra.mxu0 %v6436_v29  ;;  %14282 = vmatpush3.bf16.msra.mxu1 %v6798_v44  ;;  %v8212_v44 = vpop.permute.xlu0 %8211 }
 0xc03   :  { %14712 = vmatprep.subr.msk.bf16.mxu0 %vm17712_vm0, %v6660_v34  ;;  %14715 = vmatprep.subr.msk.bf16.mxu1 %vm17734_vm2, %v7022_v59  ;;  %vm17739_vm2 = vmmov %vm17712_vm0  ;;  %v15134_v34 = vld [vmem:[%s16343_s12 + $0x228] sm:$0xff]   ;;  %v8093_v59 = vpop.permute.xlu1 %8092 }
 0xc04   :  { %14237 = vmatprep.mubr.msk.bf16.mxu0 %vm5140_vm3, %v15104_v63  ;;  %14267 = vmatprep.mubr.msk.bf16.mxu1 %vm5140_vm3, %v15105_v2  ;;  %v7274_v60 = vsel %vm17739_vm2, %v7260_v12, 0  ;;  %vm17744_vm2 = vmmov %vm17712_vm0  ;;  %v15145_v63 = vld [vmem:[%s16343_s12 + $0x2d0] sm:$0xff]   ;;  %v7631_v2 = vsel %vm17712_vm0, %v7617_v38, 0 }
 0xc09   :  { %14238 = vmatmul.mubr.msk.bf16.gmra.mxu0 %vm5140_vm3, %v15106_v28  ;;  %14268 = vmatmul.mubr.msk.bf16.gmra.mxu1 %vm5140_vm3, %v15107_v37  ;;  %v15146_v28 = vld [vmem:[%s16343_s12 + $0x278] sm:$0xff]  }
 0xc0a   :  { %14253 = vmatprep.mubr.msk.bf16.mxu0 %vm5140_vm3, %v15108_v22  ;;  %14283 = vmatprep.mubr.msk.bf16.mxu1 %vm5140_vm3, %v15109_v39  ;;  %v15147_v37 = vld [vmem:[%s16343_s12 + $0x2d8] sm:$0xff]   ;;  %v15148_v22 = vld [vmem:[%s16343_s12 + $0x2a0] sm:$0xff]  }
 0xc0b   :  { %v15149_v39 = vld [vmem:[%s16343_s12 + $0x300] sm:$0xff]  }
 0xc11   :  { %14254 = vmatmul.mubr.msk.bf16.vlgmr.msra.gmra.mxu0 %vm5140_vm3, %v15110_v56  ;;  %14284 = vmatmul.mubr.msk.bf16.vlgmr.msra.gmra.mxu1 %vm5140_vm3, %v15111_v47  ;;  %v16829_v56 = vpop.permute.xlu1 %8330  ;;  %v15150_v47 = vld [vmem:[%s16343_s12 + $0x2a8] sm:$0xff]  }
 0xc12   :  { %14272 = vmatpush3.bf16.msra.mxu0 %v6674_v62  ;;  %14302 = vmatpush3.bf16.msra.mxu1 %v7036_v13  ;;  %v8451_v62 = vpop.permute.xlu0 %8450  ;;  %v15152_v13 = vld [vmem:[%s16343_s12 + $0x2b0] sm:$0xff]  }
 0xc13   :  { %14714 = vmatprep.subr.msk.bf16.mxu0 %vm17737_vm6, %v6903_v61  ;;  %14717 = vmatprep.subr.msk.bf16.mxu1 %vm17738_vm4, %v7260_v12  ;;  %vm17742_vm6 = vmmov %vm17712_vm0  ;;  %v15153_v61 = vld [vmem:[%s16343_s12 + $0x310] sm:$0xff]  }
 0xc14   :  { %14257 = vmatprep.mubr.msk.bf16.mxu0 %vm5140_vm3, %v15112_v42  ;;  %14287 = vmatprep.mubr.msk.bf16.mxu1 %vm5140_vm3, %v15113_v58  ;;  %v7155_v30 = vsel %vm17742_vm6, %v7141_v3, 0  ;;  %vm17743_vm4 = vmmov %vm17712_vm0  ;;  %v15151_v42 = vld [vmem:[%s16343_s12 + $0x308] sm:$0xff]  }
 0xc15   :  { %v7512_v17 = vsel %vm17743_vm4, %v7498_v19, 0  ;;  %vm17747_vm6 = vmmov %vm17712_vm0  ;;  %v8453_v58 = vpop.permute.xlu1 %8452 }
 0xc16   :  { %vm17748_vm4 = vmmov %vm17712_vm0 }
 0xc19   :  { %14258 = vmatmul.mubr.msk.bf16.gmra.mxu0 %vm5140_vm3, %v15114_v9  ;;  %14288 = vmatmul.mubr.msk.bf16.gmra.mxu1 %vm5140_vm3, %v15115_v1  ;;  %v8226_v9 = vsel %vm17712_vm0, %v8212_v44, 0 }
 0xc1a   :  { %14273 = vmatprep.mubr.msk.bf16.mxu0 %vm5140_vm3, %v15116_v33  ;;  %14303 = vmatprep.mubr.msk.bf16.mxu1 %vm5140_vm3, %v15117_v57  ;;  %v15154_v33 = vld [vmem:[%s16343_s12 + $0x2b8] sm:$0xff]  }
 0xc1b   :  { %v15155_v57 = vld [vmem:[%s16343_s12 + $0x318] sm:$0xff]  }
 0xc21   :  { %14274 = vmatmul.mubr.msk.bf16.vlgmr.msra.gmra.mxu0 %vm5140_vm3, %v15118_v25  ;;  %14304 = vmatmul.mubr.msk.bf16.vlgmr.msra.gmra.mxu1 %vm5140_vm3, %v15119_v15  ;;  %v15156_v25 = vld [vmem:[%s16343_s12 + $0x2e0] sm:$0xff]  }
 0xc22   :  { %14292 = vmatpush3.bf16.msra.mxu0 %v6917_v52  ;;  %14322 = vmatpush3.bf16.msra.mxu1 %v7274_v60  ;;  %v15157_v15 = vld [vmem:[%s16343_s12 + $0x340] sm:$0xff]   ;;  %v15160_v52 = vld [vmem:[%s16343_s12 + $0x2f0] sm:$0xff]  }
 0xc23   :  { %14716 = vmatprep.subr.msk.bf16.mxu0 %vm17740_vm12, %v7141_v3  ;;  %14719 = vmatprep.subr.msk.bf16.mxu1 %vm17741_vm15, %v7498_v19  ;;  %vm17745_vm12 = vmmov %vm17712_vm0  ;;  %v15161_v60 = vld [vmem:[%s16343_s12 + $0x350] sm:$0xff]  }
 0xc24   :  { %14277 = vmatprep.mubr.msk.bf16.mxu0 %vm5140_vm3, %v15120_v18  ;;  %14307 = vmatprep.mubr.msk.bf16.mxu1 %vm5140_vm3, %v15121_v21  ;;  %v7393_v50 = vsel %vm17745_vm12, %v7379_v40, 0  ;;  %vm17746_vm15 = vmmov %vm17712_vm0  ;;  %v15158_v18 = vld [vmem:[%s16343_s12 + $0x2e8] sm:$0xff]  }
 0xc25   :  { %v7750_v54 = vsel %vm17746_vm15, %v7736_v5, 0  ;;  %vm17750_vm12 = vmmov %vm17712_vm0  ;;  %v15159_v21 = vld [vmem:[%s16343_s12 + $0x348] sm:$0xff]  }
 0xc26   :  { %vm17751_vm15 = vmmov %vm17712_vm0 }
 0xc29   :  { %14278 = vmatmul.mubr.msk.bf16.gmra.mxu0 %vm5140_vm3, %v15122_v23  ;;  %14308 = vmatmul.mubr.msk.bf16.gmra.mxu1 %vm5140_vm3, %v15123_v7 }
 0xc2a   :  { %14293 = vmatprep.mubr.msk.bf16.mxu0 %vm5140_vm3, %v15124_v45  ;;  %14323 = vmatprep.mubr.msk.bf16.mxu1 %vm5140_vm3, %v15125_v32  ;;  %v8693_v45 = vpop.permute.xlu1 %8692 }
 0xc31   :  { %14294 = vmatmul.mubr.msk.bf16.vlgmr.msra.gmra.mxu0 %vm5140_vm3, %v15126_v41  ;;  %14324 = vmatmul.mubr.msk.bf16.vlgmr.msra.gmra.mxu1 %vm5140_vm3, %v15127_v49 }
 0xc32   :  { %14312 = vmatpush3.bf16.msra.mxu0 %v7155_v30  ;;  %14342 = vmatpush3.bf16.msra.mxu1 %v7512_v17  ;;  %v15164_v17 = vld [vmem:[%s16343_s12 + $0x320] sm:$0xff]  }
 0xc33   :  { %14718 = vmatprep.subr.msk.bf16.mxu0 %vm17712_vm0, %v7379_v40  ;;  %14721 = vmatprep.subr.msk.bf16.mxu1 %vm17744_vm2, %v7736_v5  ;;  %vm17749_vm2 = vmmov %vm17712_vm0  ;;  %v15165_v40 = vld [vmem:[%s16343_s12 + $0x380] sm:$0xff]  }
 0xc34   :  { %14297 = vmatprep.mubr.msk.bf16.mxu0 %vm5140_vm3, %v15128_v24  ;;  %14327 = vmatprep.mubr.msk.bf16.mxu1 %vm5140_vm3, %v15129_v55  ;;  %v7988_v29 = vsel %vm17749_vm2, %v7974_v10, 0  ;;  %vm17753_vm2 = vmmov %vm17712_vm0  ;;  %v15162_v24 = vld [vmem:[%s16343_s12 + $0x2f8] sm:$0xff]  }
 0xc35   :  { %v15163_v55 = vld [vmem:[%s16343_s12 + $0x358] sm:$0xff]  }
 0xc39   :  { %14298 = vmatmul.mubr.msk.bf16.gmra.mxu0 %vm5140_vm3, %v15130_v11  ;;  %14328 = vmatmul.mubr.msk.bf16.gmra.mxu1 %vm5140_vm3, %v15131_v6 }
 0xc3a   :  { %14313 = vmatprep.mubr.msk.bf16.mxu0 %vm5140_vm3, %v15132_v8  ;;  %14343 = vmatprep.mubr.msk.bf16.mxu1 %vm5140_vm3, %v15133_v26 }
 0xc41   :  { %14314 = vmatmul.mubr.msk.bf16.vlgmr.msra.gmra.mxu0 %vm5140_vm3, %v15134_v34  ;;  %14344 = vmatmul.mubr.msk.bf16.vlgmr.msra.gmra.mxu1 %vm5140_vm3, %v15135_v31 }
 0xc42   :  { %14332 = vmatpush3.bf16.msra.mxu0 %v7393_v50  ;;  %14362 = vmatpush3.bf16.msra.mxu1 %v7750_v54 }
 0xc43   :  { %14720 = vmatprep.subr.msk.bf16.mxu0 %vm17747_vm6, %v7617_v38  ;;  %14723 = vmatprep.subr.msk.bf16.mxu1 %vm17748_vm4, %v7974_v10  ;;  %vm8454_vm6 = vcmask 31744   ;;  %vm17752_vm4 = vmmov %vm17712_vm0  ;;  %v15168_v38 = vld [vmem:[%s16343_s12 + $0x330] sm:$0xff]  }
 0xc44   :  { %14317 = vmatprep.mubr.msk.bf16.mxu0 %vm5140_vm3, %v15136_v16  ;;  %14347 = vmatprep.mubr.msk.bf16.mxu1 %vm5140_vm3, %v15137_v51  ;;  %v7869_v12 = vsel %vm17752_vm4, %v7855_v48, 0  ;;  %v8455_v1 = vsel %vm8454_vm6, %v8451_v62, %v8453_v58  ;;  %vm17756_vm6 = vmmov %vm17712_vm0  ;;  %v15166_v16 = vld [vmem:[%s16343_s12 + $0x328] sm:$0xff]  }
 0xc45   :  { %v8469_v19 = vsel %vm17756_vm6, %v8455_v1, 0  ;;  %vm17757_vm4 = vmmov %vm17712_vm0  ;;  %v15167_v51 = vld [vmem:[%s16343_s12 + $0x388] sm:$0xff]  }
 0xc46   :  { %vm17761_vm6 = vmmov %vm17712_vm0 }
 0xc49   :  { %14318 = vmatmul.mubr.msk.bf16.gmra.mxu0 %vm5140_vm3, %v15138_v27  ;;  %14348 = vmatmul.mubr.msk.bf16.gmra.mxu1 %vm5140_vm3, %v15139_v14  ;;  %v15174_v27 = vld [vmem:[%s16343_s12 + $0x390] sm:$0xff]  }
 0xc4a   :  { %14333 = vmatprep.mubr.msk.bf16.mxu0 %vm5140_vm3, %v15140_v4  ;;  %14363 = vmatprep.mubr.msk.bf16.mxu1 %vm5140_vm3, %v15141_v46 }
 0xc51   :  { %14334 = vmatmul.mubr.msk.bf16.vlgmr.msra.gmra.mxu0 %vm5140_vm3, %v15142_v20  ;;  %14364 = vmatmul.mubr.msk.bf16.vlgmr.msra.gmra.mxu1 %vm5140_vm3, %v15143_v36  ;;  %v8574_v20 = vpop.permute.xlu0 %8573 }
 0xc52   :  { %14352 = vmatpush3.bf16.msra.mxu0 %v7631_v2  ;;  %14382 = vmatpush3.bf16.msra.mxu1 %v7988_v29 }
 0xc53   :  { %14722 = vmatprep.subr.msk.bf16.mxu0 %vm17750_vm12, %v7855_v48  ;;  %14725 = vmatprep.subr.msk.bf16.mxu1 %vm17751_vm15, %v8212_v44  ;;  %vm17754_vm12 = vmmov %vm17712_vm0 }
 0xc54   :  { %14337 = vmatprep.mubr.msk.bf16.mxu0 %vm5140_vm3, %v15144_v43  ;;  %14367 = vmatprep.mubr.msk.bf16.mxu1 %vm5140_vm3, %v15145_v63  ;;  %vm17755_vm15 = vmmov %vm17712_vm0 }
 0xc55   :  { %v8107_v3 = vsel %vm17755_vm15, %v8093_v59, 0  ;;  %vm17760_vm15 = vmmov %vm17712_vm0 }
 0xc59   :  { %14338 = vmatmul.mubr.msk.bf16.gmra.mxu0 %vm5140_vm3, %v15146_v28  ;;  %14368 = vmatmul.mubr.msk.bf16.gmra.mxu1 %vm5140_vm3, %v15147_v37  ;;  %v15175_v37 = vld [vmem:[%s16343_s12 + $0x398] sm:$0xff]  }
 0xc5a   :  { %14353 = vmatprep.mubr.msk.bf16.mxu0 %vm5140_vm3, %v15148_v22  ;;  %14383 = vmatprep.mubr.msk.bf16.mxu1 %vm5140_vm3, %v15149_v39 }
 0xc61   :  { %14354 = vmatmul.mubr.msk.bf16.vlgmr.msra.gmra.mxu0 %vm5140_vm3, %v15150_v47  ;;  %14384 = vmatmul.mubr.msk.bf16.vlgmr.msra.gmra.mxu1 %vm5140_vm3, %v15151_v42  ;;  %v15178_v47 = vld [vmem:[%s16343_s12 + $0x3c0] sm:$0xff]  }
 0xc62   :  { %14372 = vmatpush3.bf16.msra.mxu0 %v7869_v12  ;;  %14402 = vmatpush3.bf16.msra.mxu1 %v8226_v9 }
 0xc63   :  { %14724 = vmatprep.subr.msk.bf16.mxu0 %vm17753_vm2, %v8093_v59  ;;  %14727 = vmatprep.subr.msk.bf16.mxu1 %vm17754_vm12, %v8455_v1  ;;  %vm17758_vm2 = vmmov %vm17712_vm0  ;;  %v15169_v59 = vld [vmem:[%s16343_s12 + $0x338] sm:$0xff]  }
 0xc64   :  { %14357 = vmatprep.mubr.msk.bf16.mxu0 %vm5140_vm3, %v15152_v13  ;;  %14387 = vmatprep.mubr.msk.bf16.mxu1 %vm5140_vm3, %v15153_v61  ;;  %v8345_v14 = vsel %vm17758_vm2, %v16829_v56, 0  ;;  %vm17759_vm12 = vmmov %vm17712_vm0 }
 0xc65   :  { %v8707_v4 = vsel %vm17759_vm12, %v8693_v45, 0  ;;  %vm17781_vm2 = vmmov %vm17712_vm0 }
 0xc69   :  { %14358 = vmatmul.mubr.msk.bf16.gmra.mxu0 %vm5140_vm3, %v15154_v33  ;;  %14388 = vmatmul.mubr.msk.bf16.gmra.mxu1 %vm5140_vm3, %v15155_v57 }
 0xc6a   :  { %14373 = vmatprep.mubr.msk.bf16.mxu0 %vm5140_vm3, %v15156_v25  ;;  %14403 = vmatprep.mubr.msk.bf16.mxu1 %vm5140_vm3, %v15157_v15 }
 0xc71   :  { %v14145_v23 = vpop.f32.mrf.mxu0  ;;  %14374 = vmatmul.mubr.msk.bf16.vlgmr.msra.gmra.mxu0 %vm5140_vm3, %v15158_v18  ;;  %14404 = vmatmul.mubr.msk.bf16.vlgmr.msra.gmra.mxu1 %vm5140_vm3, %v15159_v21  ;;  %v14165_v7 = vpop.f32.mrf.mxu1  ;;  %v15171_v21 = vld [vmem:[%s16343_s12 + $0x368] sm:$0xff]  }
 0xc72   :  { %14392 = vmatpush3.bf16.msra.mxu0 %v8107_v3  ;;  %14422 = vmatpush3.bf16.msra.mxu1 %v8469_v19 }
 0xc73   :  { %14726 = vmatprep.subr.msk.bf16.mxu0 %vm17757_vm4, %v16829_v56  ;;  %14729 = vmatprep.subr.msk.bf16.mxu1 %vm17712_vm0, %v8693_v45  ;;  %v5190_v32 = vpop.f32.mrf.mxu0  ;;  %v5401_v41 = vpop.f32.mrf.mxu1  ;;  %v15170_v56 = vld [vmem:[%s16343_s12 + $0x360] sm:$0xff]   ;;  %vm17762_vm4 = vmmov %vm17712_vm0 }
 0xc74   :  { %14377 = vmatprep.mubr.msk.bf16.mxu0 %vm5140_vm3, %v15160_v52  ;;  %14407 = vmatprep.mubr.msk.bf16.mxu1 %vm5140_vm3, %v15161_v60  ;;  %v15179_v60 = vld [vmem:[%s16343_s12 + $0x3c8] sm:$0xff]  }
 0xc75   :  { %v14146_v49 = vpop.f32.mrf.mxu0  ;;  %v14166_v30 = vpop.f32.mrf.mxu1 }
 0xc77   :  { %v5193_v5 = vpop.f32.mrf.mxu0  ;;  %v5404_v11 = vpop.f32.mrf.mxu1 }
 0xc79   :  { %v14149_v6 = vpop.f32.mrf.mxu0  ;;  %14378 = vmatmul.mubr.msk.bf16.gmra.mxu0 %vm5140_vm3, %v15162_v24  ;;  %14408 = vmatmul.mubr.msk.bf16.gmra.mxu1 %vm5140_vm3, %v15163_v55  ;;  %v14169_v8 = vpop.f32.mrf.mxu1  ;;  %v8588_v24 = vsel %vm17761_vm6, %v8574_v20, 0 }
 0xc7a   :  { %14393 = vmatprep.mubr.msk.bf16.mxu0 %vm5140_vm3, %v15164_v17  ;;  %14423 = vmatprep.mubr.msk.bf16.mxu1 %vm5140_vm3, %v15165_v40  ;;  %v8812_v17 = vpop.permute.xlu0 %8811 }
 0xc7b   :  { %v5206_v26 = vpop.f32.mrf.mxu0  ;;  %v5417_v34 = vpop.f32.mrf.mxu1 }
 0xc7d   :  { %v14150_v31 = vpop.f32.mrf.mxu0  ;;  %v14170_v50 = vpop.f32.mrf.mxu1 }
 0xc7f   :  { %v5209_v54 = vpop.f32.mrf.mxu0  ;;  %v5420_v10 = vpop.f32.mrf.mxu1 }
 0xc81   :  { %v14155_v46 = vpop.f32.mrf.mxu0  ;;  %14394 = vmatmul.mubr.msk.bf16.vlgmr.msra.gmra.mxu0 %vm5140_vm3, %v15166_v16  ;;  %14424 = vmatmul.mubr.msk.bf16.vlgmr.msra.gmra.mxu1 %vm5140_vm3, %v15167_v51  ;;  %v16885_v48 = vpop.f32.mrf.mxu1  ;;  %v15183_v51 = vld [vmem:[%s16343_s12 + $0x3d8] sm:$0xff]  }
 0xc82   :  { %v5299_v36 = vadd.f32 %v14155_v46, %v14145_v23  ;;  %14412 = vmatpush3.bf16.msra.mxu0 %v8345_v14  ;;  %14442 = vmatpush3.bf16.msra.mxu1 %v8707_v4  ;;  %v15172_v23 = vld [vmem:[%s16343_s12 + $0x370] sm:$0xff]  }
 0xc83   :  { %14728 = vmatprep.subr.msk.bf16.mxu0 %vm17760_vm15, %v8574_v20  ;;  %v5290_v43 = vpop.f32.mrf.mxu0  ;;  %14397 = vmatprep.mubr.msk.bf16.mxu0 %vm5140_vm3, %v15168_v38  ;;  %v5639_v63 = vpop.f32.mrf.mxu1  ;;  %v15176_v38 = vld [vmem:[%s16343_s12 + $0x3a0] sm:$0xff]  }
 0xc84   :  { %v5291_v2 = vadd.f32 %v5290_v43, %v5190_v32  ;;  %v5434_v29 = vadd.f32 %v14165_v7, %v5299_v36  ;;  %14427 = vmatprep.mubr.msk.bf16.mxu1 %vm5140_vm3, %v15174_v27  ;;  %v15182_v32 = vld [vmem:[%s16343_s12 + $0x3d0] sm:$0xff]  }
 0xc85   :  { %v14156_v44 = vpop.f32.mrf.mxu0  ;;  %v14186_v28 = vpop.f32.mrf.mxu1 }
 0xc86   :  { %v5302_v22 = vadd.f32 %v14156_v44, %v14146_v49  ;;  %v5432_v39 = vadd.f32 %v5401_v41, %v5291_v2  ;;  %v15177_v44 = vld [vmem:[%s16343_s12 + $0x3a8] sm:$0xff]  }
 0xc87   :  { %v5293_v42 = vpop.f32.mrf.mxu0  ;;  %v16894_v58 = vpop.f32.mrf.mxu1 }
 0xc88   :  { %v5294_v62 = vadd.f32 %v5293_v42, %v5193_v5  ;;  %v5435_v13 = vadd.f32 %v14166_v30, %v5302_v22 }
 0xc89   :  { %v14159_v61 = vpop.f32.mrf.mxu0  ;;  %14398 = vmatmul.mubr.msk.bf16.gmra.mxu0 %vm5140_vm3, %v15169_v59  ;;  %v14189_v12 = vpop.f32.mrf.mxu1  ;;  %14428 = vmatmul.mubr.msk.bf16.gmra.mxu1 %vm5140_vm3, %v15175_v37 }
 0xc8a   :  { %v5315_v9 = vadd.f32 %v14159_v61, %v14149_v6  ;;  %v5433_v1 = vadd.f32 %v5404_v11, %v5294_v62  ;;  %14413 = vmatprep.mubr.msk.bf16.mxu0 %vm5140_vm3, %v15170_v56  ;;  %14443 = vmatprep.mubr.msk.bf16.mxu1 %vm5140_vm3, %v15178_v47  ;;  %v8826_v62 = vsel %vm17712_vm0, %v8812_v17, 0 }
 0xc8b   :  { %v5306_v33 = vpop.f32.mrf.mxu0  ;;  %v5655_v57 = vpop.f32.mrf.mxu1 }
 0xc8c   :  { %v5307_v25 = vadd.f32 %v5306_v33, %v5206_v26  ;;  %v5438_v15 = vadd.f32 %v14169_v8, %v5315_v9 }
 0xc8d   :  { %v14160_v18 = vpop.f32.mrf.mxu0  ;;  %v14190_v52 = vpop.f32.mrf.mxu1 }
 0xc8e   :  { %v5318_v3 = vadd.f32 %v14160_v18, %v14150_v31  ;;  %v5436_v19 = vadd.f32 %v5417_v34, %v5307_v25  ;;  %v15173_v31 = vld [vmem:[%s16343_s12 + $0x378] sm:$0xff]  }
 0xc8f   :  { %v5309_v7 = vpop.f32.mrf.mxu0  ;;  %v16903_v45 = vpop.f32.mrf.mxu1 }
 0xc90   :  { %v5310_v41 = vadd.f32 %v5309_v7, %v5209_v54  ;;  %v5439_v49 = vadd.f32 %v14170_v50, %v5318_v3 }
 0xc91   :  { %v14175_v55 = vpop.f32.mrf.mxu0  ;;  %14414 = vmatmul.mubr.msk.bf16.vlgmr.msra.gmra.mxu0 %vm5140_vm3, %v15171_v21  ;;  %v14205_v30 = vpop.f32.mrf.mxu1  ;;  %14444 = vmatmul.mubr.msk.bf16.vlgmr.msra.gmra.mxu1 %vm5140_vm3, %v15179_v60  ;;  %v15184_v60 = vld [vmem:[%s16343_s12 + $0x3e0] sm:$0xff]  }
 0xc92   :  { %v5437_v40 = vadd.f32 %v5420_v10, %v5310_v41  ;;  %v5553_v5 = vadd.f32 %v14175_v55, %v5434_v29  ;;  %14432 = vmatpush3.bf16.msra.mxu0 %v8588_v24  ;;  %14417 = vmatprep.mubr.msk.bf16.mxu0 %vm5140_vm3, %v15172_v23 }
 0xc93   :  { %14730 = vmatprep.subr.msk.bf16.mxu0 %vm17762_vm4, %v8812_v17  ;;  %v5520_v11 = vpop.f32.mrf.mxu0  ;;  %v5877_v6 = vpop.f32.mrf.mxu1  ;;  %14447 = vmatprep.mubr.msk.bf16.mxu1 %vm5140_vm3, %v15182_v32 }
 0xc94   :  { %v5551_v8 = vadd.f32 %v5520_v11, %v5432_v39  ;;  %v5672_v26 = vadd.f32 %v16885_v48, %v5553_v5 }
 0xc95   :  { %v14176_v34 = vpop.f32.mrf.mxu0  ;;  %v14206_v16 = vpop.f32.mrf.mxu1 }
 0xc96   :  { %v5554_v50 = vadd.f32 %v14176_v34, %v5435_v13  ;;  %v5670_v54 = vadd.f32 %v5639_v63, %v5551_v8  ;;  %v15186_v8 = vld [vmem:[%s16343_s12 + $0x3f0] sm:$0xff]  }
 0xc97   :  { %v5523_v10 = vpop.f32.mrf.mxu0  ;;  %v16916_v27 = vpop.f32.mrf.mxu1 }
 0xc98   :  { %v16918_v14 = vadd.f32 %v5523_v10, %v5433_v1  ;;  %v5673_v4 = vadd.f32 %v14186_v28, %v5554_v50  ;;  %v15180_v28 = vld [vmem:[%s16343_s12 + $0x3b0] sm:$0xff]  }
 0xc99   :  { %v14179_v46 = vpop.f32.mrf.mxu0  ;;  %14418 = vmatmul.mubr.msk.bf16.gmra.mxu0 %vm5140_vm3, %v15173_v31  ;;  %v14209_v20 = vpop.f32.mrf.mxu1  ;;  %14448 = vmatmul.mubr.msk.bf16.gmra.mxu1 %vm5140_vm3, %v15183_v51 }
 0xc9a   :  { %v5557_v48 = vadd.f32 %v14179_v46, %v5438_v15  ;;  %14433 = vmatprep.mubr.msk.bf16.mxu0 %vm5140_vm3, %v15176_v38  ;;  %v15181_v15 = vld [vmem:[%s16343_s12 + $0x3b8] sm:$0xff]  }
 0xc9b   :  { %v5536_v36 = vpop.f32.mrf.mxu0  ;;  %v5893_v43 = vpop.f32.mrf.mxu1 }
 0xc9c   :  { %v5555_v63 = vadd.f32 %v5536_v36, %v5436_v19  ;;  %v5676_v2 = vadd.f32 %v14189_v12, %v5557_v48 }
 0xc9d   :  { %v14180_v29 = vpop.f32.mrf.mxu0  ;;  %v14210_v59 = vpop.f32.mrf.mxu1 }
 0xc9e   :  { %v5558_v37 = vadd.f32 %v14180_v29, %v5439_v49  ;;  %v5674_v22 = vadd.f32 %v5655_v57, %v5555_v63 }
 0xc9f   :  { %v5539_v39 = vpop.f32.mrf.mxu0  ;;  %v16925_v56 = vpop.f32.mrf.mxu1 }
 0xca0   :  { %v16927_v47 = vadd.f32 %v5539_v39, %v5437_v40  ;;  %v5677_v42 = vadd.f32 %v14190_v52, %v5558_v37  ;;  %v15185_v40 = vld [vmem:[%s16343_s12 + $0x3e8] sm:$0xff]  }
 0xca1   :  { %v14195_v13 = vpop.f32.mrf.mxu0  ;;  %14434 = vmatmul.mubr.msk.bf16.vlgmr.msra.gmra.mxu0 %vm5140_vm3, %v15177_v44  ;;  %v14225_v61 = vpop.f32.mrf.mxu1 }
 0xca2   :  { %v5791_v12 = vadd.f32 %v14195_v13, %v5672_v26  ;;  %14452 = vmatpush3.bf16.msra.mxu0 %v8826_v62  ;;  %14437 = vmatprep.mubr.msk.bf16.mxu0 %vm5140_vm3, %v15180_v28 }
 0xca3   :  { %v5758_v9 = vpop.f32.mrf.mxu0  ;;  %v6115_v1 = vpop.f32.mrf.mxu1 }
 0xca4   :  { %v5789_v33 = vadd.f32 %v5758_v9, %v5670_v54  ;;  %v5910_v57 = vadd.f32 %v14205_v30, %v5791_v12 }
 0xca5   :  { %v14196_v25 = vpop.f32.mrf.mxu0  ;;  %v14226_v18 = vpop.f32.mrf.mxu1 }
 0xca6   :  { %v5792_v21 = vadd.f32 %v14196_v25, %v5673_v4  ;;  %v5908_v52 = vadd.f32 %v5877_v6, %v5789_v33 }
 0xca7   :  { %v16934_v3 = vpop.f32.mrf.mxu0  ;;  %v16936_v19 = vpop.f32.mrf.mxu1 }
 0xca8   :  { %v5911_v23 = vadd.f32 %v14206_v16, %v5792_v21 }
 0xca9   :  { %v14199_v7 = vpop.f32.mrf.mxu0  ;;  %14438 = vmatmul.mubr.msk.bf16.gmra.mxu0 %vm5140_vm3, %v15181_v15  ;;  %v14229_v32 = vpop.f32.mrf.mxu1 }
 0xcaa   :  { %v5795_v41 = vadd.f32 %v14199_v7, %v5676_v2  ;;  %14453 = vmatprep.mubr.msk.bf16.mxu0 %vm5140_vm3, %v15184_v60 }
 0xcab   :  { %v5774_v49 = vpop.f32.mrf.mxu0  ;;  %v6131_v24 = vpop.f32.mrf.mxu1 }
 0xcac   :  { %v5793_v55 = vadd.f32 %v5774_v49, %v5674_v22  ;;  %v5914_v30 = vadd.f32 %v14209_v20, %v5795_v41  ;;  %v15187_v20 = vld [vmem:[%s16343_s12 + $0x3f8] sm:$0xff]  }
 0xcad   :  { %v14200_v17 = vpop.f32.mrf.mxu0  ;;  %v14230_v5 = vpop.f32.mrf.mxu1 }
 0xcae   :  { %v5796_v11 = vadd.f32 %v14200_v17, %v5677_v42  ;;  %v5912_v6 = vadd.f32 %v5893_v43, %v5793_v55 }
 0xcaf   :  { %v16942_v26 = vpop.f32.mrf.mxu0  ;;  %v16944_v34 = vpop.f32.mrf.mxu1 }
 0xcb0   :  { %v5915_v31 = vadd.f32 %v14210_v59, %v5796_v11 }
 0xcb1   :  { %v14215_v16 = vpop.f32.mrf.mxu0  ;;  %14454 = vmatmul.mubr.msk.bf16.vlgmr.msra.gmra.mxu0 %vm5140_vm3, %v15185_v40  ;;  %v14245_v51 = vpop.f32.mrf.mxu1 }
 0xcb2   :  { %v6029_v50 = vadd.f32 %v14215_v16, %v5910_v57  ;;  %14457 = vmatprep.mubr.msk.bf16.mxu0 %vm5140_vm3, %v15186_v8 }
 0xcb3   :  { %v5996_v54 = vpop.f32.mrf.mxu0  ;;  %v6353_v38 = vpop.f32.mrf.mxu1 }
 0xcb4   :  { %v6027_v10 = vadd.f32 %v5996_v54, %v5908_v52  ;;  %v6148_v4 = vadd.f32 %v14225_v61, %v6029_v50 }
 0xcb5   :  { %v14216_v46 = vpop.f32.mrf.mxu0  ;;  %v14246_v48 = vpop.f32.mrf.mxu1 }
 0xcb6   :  { %v6030_v36 = vadd.f32 %v14216_v46, %v5911_v23  ;;  %v6146_v43 = vadd.f32 %v6115_v1, %v6027_v10 }
 0xcb7   :  { %v16949_v63 = vpop.f32.mrf.mxu0  ;;  %v16951_v2 = vpop.f32.mrf.mxu1 }
 0xcb8   :  { %v6149_v29 = vadd.f32 %v14226_v18, %v6030_v36 }
 0xcb9   :  { %v14219_v44 = vpop.f32.mrf.mxu0  ;;  %14458 = vmatmul.mubr.msk.bf16.gmra.mxu0 %vm5140_vm3, %v15187_v20  ;;  %v14249_v59 = vpop.f32.mrf.mxu1  ;;  %vm8919_vm3 = vcmask 523264  }
 0xcba   :  { %v6033_v37 = vadd.f32 %v14219_v44, %v5914_v30 }
 0xcbb   :  { %v6012_v22 = vpop.f32.mrf.mxu0  ;;  %v6369_v28 = vpop.f32.mrf.mxu1 }
 0xcbc   :  { %v6031_v39 = vadd.f32 %v6012_v22, %v5912_v6  ;;  %v6152_v42 = vadd.f32 %v14229_v32, %v6033_v37 }
 0xcbd   :  { %v14220_v62 = vpop.f32.mrf.mxu0  ;;  %v14250_v13 = vpop.f32.mrf.mxu1 }
 0xcbe   :  { %v6034_v61 = vadd.f32 %v14220_v62, %v5915_v31  ;;  %v6150_v12 = vadd.f32 %v6131_v24, %v6031_v39 }
 0xcbf   :  { %v16954_v9 = vpop.f32.mrf.mxu0  ;;  %v16956_v1 = vpop.f32.mrf.mxu1 }
 0xcc0   :  { %v6153_v33 = vadd.f32 %v14230_v5, %v6034_v61 }
 0xcc1   :  { %v14235_v57 = vpop.f32.mrf.mxu0  ;;  %v14265_v25 = vpop.f32.mrf.mxu1 }
 0xcc2   :  { %v6267_v15 = vadd.f32 %v14235_v57, %v6148_v4 }
 0xcc3   :  { %v6234_v18 = vpop.f32.mrf.mxu0  ;;  %v6591_v21 = vpop.f32.mrf.mxu1 }
 0xcc4   :  { %v6265_v52 = vadd.f32 %v6234_v18, %v6146_v43  ;;  %v6386_v60 = vadd.f32 %v14245_v51, %v6267_v15 }
 0xcc5   :  { %v14236_v23 = vpop.f32.mrf.mxu0  ;;  %v14266_v7 = vpop.f32.mrf.mxu1 }
 0xcc6   :  { %v6268_v41 = vadd.f32 %v14236_v23, %v6149_v29  ;;  %v6384_v46 = vadd.f32 %v6353_v38, %v6265_v52 }
 0xcc7   :  { %v16958_v32 = vpop.f32.mrf.mxu0  ;;  %v16960_v49 = vpop.f32.mrf.mxu1 }
 0xcc8   :  { %v6387_v24 = vadd.f32 %v14246_v48, %v6268_v41 }
 0xcc9   :  { %v14239_v55 = vpop.f32.mrf.mxu0  ;;  %v14269_v30 = vpop.f32.mrf.mxu1 }
 0xcca   :  { %v6271_v17 = vadd.f32 %v14239_v55, %v6152_v42 }
 0xccb   :  { %v6250_v40 = vpop.f32.mrf.mxu0  ;;  %v6607_v5 = vpop.f32.mrf.mxu1 }
 0xccc   :  { %v6269_v11 = vadd.f32 %v6250_v40, %v6150_v12  ;;  %v6390_v6 = vadd.f32 %v14249_v59, %v6271_v17 }
 0xccd   :  { %v14240_v8 = vpop.f32.mrf.mxu0  ;;  %v14270_v31 = vpop.f32.mrf.mxu1 }
 0xcce   :  { %v6272_v16 = vadd.f32 %v14240_v8, %v6153_v33 }
 0xccf   :  { %v16962_v50 = vpop.f32.mrf.mxu0  ;;  %v16964_v51 = vpop.f32.mrf.mxu1 }
 0xcd0   :  { %v6391_v54 = vadd.f32 %v14250_v13, %v6272_v16  ;;  %v6388_v13 = vadd.f32 %v6369_v28, %v6269_v11 }
 0xcd1   :  { %v14255_v10 = vpop.f32.mrf.mxu0  ;;  %v14285_v4 = vpop.f32.mrf.mxu1 }
 0xcd2   :  { %v6505_v20 = vadd.f32 %v14255_v10, %v6386_v60 }
 0xcd3   :  { %v6472_v48 = vpop.f32.mrf.mxu0  ;;  %v6834_v36 = vpop.f32.mrf.mxu1 }
 0xcd4   :  { %v6503_v43 = vadd.f32 %v6472_v48, %v6384_v46  ;;  %v6624_v29 = vadd.f32 %v14265_v25, %v6505_v20 }
 0xcd5   :  { %v14256_v44 = vpop.f32.mrf.mxu0  ;;  %v14286_v37 = vpop.f32.mrf.mxu1 }
 0xcd6   :  { %v6506_v22 = vadd.f32 %v14256_v44, %v6387_v24  ;;  %v6622_v59 = vadd.f32 %v6591_v21, %v6503_v43 }
 0xcd7   :  { %v16966_v39 = vpop.f32.mrf.mxu0  ;;  %v16968_v42 = vpop.f32.mrf.mxu1 }
 0xcd8   :  { %v6625_v62 = vadd.f32 %v14266_v7, %v6506_v22  ;;  %v5671_v7 = vadd.f32 %v16894_v58, %v16918_v14  ;;  %v5675_v58 = vadd.f32 %v16903_v45, %v16927_v47 }
 0xcd9   :  { %v14259_v61 = vpop.f32.mrf.mxu0  ;;  %v14289_v12 = vpop.f32.mrf.mxu1 }
 0xcda   :  { %v6509_v33 = vadd.f32 %v14259_v61, %v6390_v6  ;;  %v5790_v6 = vadd.f32 %v16934_v3, %v5671_v7  ;;  %v5794_v22 = vadd.f32 %v16942_v26, %v5675_v58 }
 0xcdb   :  { %v6488_v57 = vpop.f32.mrf.mxu0  ;;  %v6850_v38 = vpop.f32.mrf.mxu1 }
 0xcdc   :  { %v6507_v15 = vadd.f32 %v6488_v57, %v6388_v13  ;;  %v6628_v18 = vadd.f32 %v14269_v30, %v6509_v33  ;;  %v5913_v45 = vadd.f32 %v16925_v56, %v5794_v22 }
 0xcdd   :  { %v14260_v52 = vpop.f32.mrf.mxu0  ;;  %v14290_v60 = vpop.f32.mrf.mxu1 }
 0xcde   :  { %v6510_v25 = vadd.f32 %v14260_v52, %v6391_v54  ;;  %v6626_v23 = vadd.f32 %v6607_v5, %v6507_v15  ;;  %v6032_v26 = vadd.f32 %v16954_v9, %v5913_v45 }
 0xcdf   :  { %v16970_v41 = vpop.f32.mrf.mxu0  ;;  %v16972_v21 = vpop.f32.mrf.mxu1 }
 0xce0   :  { %v6629_v24 = vadd.f32 %v14270_v31, %v6510_v25  ;;  %v5909_v31 = vadd.f32 %v16916_v27, %v5790_v6  ;;  %v6151_v7 = vadd.f32 %v16944_v34, %v6032_v26 }
 0xce1   :  { %v14275_v55 = vpop.f32.mrf.mxu0  ;;  %v14305_v17 = vpop.f32.mrf.mxu1 }
 0xce2   :  { %v6743_v28 = vadd.f32 %v14275_v55, %v6624_v29  ;;  %v6028_v14 = vadd.f32 %v16949_v63, %v5909_v31  ;;  %v6270_v9 = vadd.f32 %v16962_v50, %v6151_v7 }
 0xce3   :  { %v6710_v40 = vpop.f32.mrf.mxu0  ;;  %v7072_v11 = vpop.f32.mrf.mxu1 }
 0xce4   :  { %v6741_v30 = vadd.f32 %v6710_v40, %v6622_v59  ;;  %v6867_v8 = vadd.f32 %v14285_v4, %v6743_v28  ;;  %v6147_v13 = vadd.f32 %v16936_v19, %v6028_v14 }
 0xce5   :  { %v14276_v16 = vpop.f32.mrf.mxu0  ;;  %v14306_v54 = vpop.f32.mrf.mxu1 }
 0xce6   :  { %v6744_v5 = vadd.f32 %v14276_v16, %v6625_v62  ;;  %v6865_v10 = vadd.f32 %v6834_v36, %v6741_v30  ;;  %v6266_v47 = vadd.f32 %v16958_v32, %v6147_v13 }
 0xce7   :  { %v6713_v46 = vpop.f32.mrf.mxu0  ;;  %v16977_v20 = vpop.f32.mrf.mxu1 }
 0xce8   :  { %v6868_v48 = vadd.f32 %v14286_v37, %v6744_v5  ;;  %v6385_v19 = vadd.f32 %v16951_v2, %v6266_v47 }
 0xce9   :  { %v14279_v43 = vpop.f32.mrf.mxu0  ;;  %v14309_v44 = vpop.f32.mrf.mxu1 }
 0xcea   :  { %v6747_v3 = vadd.f32 %v14279_v43, %v6628_v18  ;;  %v6504_v56 = vadd.f32 %v16966_v39, %v6385_v19 }
 0xceb   :  { %v6726_v29 = vpop.f32.mrf.mxu0  ;;  %v7088_v4 = vpop.f32.mrf.mxu1 }
 0xcec   :  { %v6745_v59 = vadd.f32 %v6726_v29, %v6626_v23  ;;  %v6871_v36 = vadd.f32 %v14289_v12, %v6747_v3  ;;  %v6623_v2 = vadd.f32 %v16960_v49, %v6504_v56 }
 0xced   :  { %v14280_v62 = vpop.f32.mrf.mxu0  ;;  %v14310_v61 = vpop.f32.mrf.mxu1 }
 0xcee   :  { %v6748_v27 = vadd.f32 %v14280_v62, %v6629_v24  ;;  %v6869_v37 = vadd.f32 %v6850_v38, %v6745_v59  ;;  %v6742_v34 = vadd.f32 %v6713_v46, %v6623_v2 }
 0xcef   :  { %v6729_v33 = vpop.f32.mrf.mxu0  ;;  %v16985_v57 = vpop.f32.mrf.mxu1 }
 0xcf0   :  { %v6872_v63 = vadd.f32 %v14290_v60, %v6748_v27  ;;  %v6866_v3 = vadd.f32 %v16968_v42, %v6742_v34 }
 0xcf1   :  { %v14295_v15 = vpop.f32.mrf.mxu0  ;;  %v14325_v18 = vpop.f32.mrf.mxu1 }
 0xcf2   :  { %v6986_v52 = vadd.f32 %v14295_v15, %v6867_v8 }
 0xcf3   :  { %v6953_v12 = vpop.f32.mrf.mxu0  ;;  %v16990_v25 = vpop.f32.mrf.mxu1 }
 0xcf4   :  { %v6984_v23 = vadd.f32 %v6953_v12, %v6865_v10  ;;  %v7105_v38 = vadd.f32 %v14305_v17, %v6986_v52  ;;  %v6389_v10 = vadd.f32 %v16956_v1, %v6270_v9  ;;  %v15189_v9 = vld [vmem:[%s16130_s11 + $0x10] sm:$0xff]  }
 0xcf5   :  { %v14296_v24 = vpop.f32.mrf.mxu0  ;;  %v14326_v55 = vpop.f32.mrf.mxu1  ;;  %14481 = vmatprep.mubr.msk.bf16.mxu0 %vm8919_vm3, %v15189_v9 }
 0xcf6   :  { %v6987_v32 = vadd.f32 %v14296_v24, %v6868_v48  ;;  %v7103_v60 = vadd.f32 %v7072_v11, %v6984_v23  ;;  %v6508_v43 = vadd.f32 %v16970_v41, %v6389_v10 }
 0xcf7   :  { %v6956_v28 = vpop.f32.mrf.mxu0  ;;  %v16995_v40 = vpop.f32.mrf.mxu1 }
 0xcf8   :  { %v7106_v6 = vadd.f32 %v14306_v54, %v6987_v32  ;;  %v6627_v59 = vadd.f32 %v16964_v51, %v6508_v43  ;;  %v6985_v1 = vadd.f32 %v6956_v28, %v6866_v3  ;;  %v15188_v28 = vld [vmem:[%s16130_s11] sm:$0xff]  }
 0xcf9   :  { %v14299_v30 = vpop.f32.mrf.mxu0  ;;  %v14329_v8 = vpop.f32.mrf.mxu1  ;;  %14469 = vmatprep.mubr.msk.bf16.mxu1 %vm8919_vm3, %v15188_v28 }
 0xcfa   :  { %v6990_v16 = vadd.f32 %v14299_v30, %v6871_v36  ;;  %v6746_v62 = vadd.f32 %v6729_v33, %v6627_v59 }
 0xcfb   :  { %v6969_v17 = vpop.f32.mrf.mxu0  ;;  %v7326_v5 = vpop.f32.mrf.mxu1 }
 0xcfc   :  { %v6988_v31 = vadd.f32 %v6969_v17, %v6869_v37  ;;  %v7109_v39 = vadd.f32 %v14309_v44, %v6990_v16  ;;  %v6870_v42 = vadd.f32 %v16972_v21, %v6746_v62 }
 0xcfd   :  { %v14300_v48 = vpop.f32.mrf.mxu0  ;;  %v14330_v11 = vpop.f32.mrf.mxu1 }
 0xcfe   :  { %v6991_v58 = vadd.f32 %v14300_v48, %v6872_v63  ;;  %v7107_v14 = vadd.f32 %v7088_v4, %v6988_v31  ;;  %v7104_v4 = vadd.f32 %v16977_v20, %v6985_v1 }
 0xcff   :  { %v6972_v50 = vpop.f32.mrf.mxu0  ;;  %v17001_v54 = vpop.f32.mrf.mxu1 }
 0xd00   :  { %v7110_v49 = vadd.f32 %v14310_v61, %v6991_v58  ;;  %v6989_v52 = vadd.f32 %v6972_v50, %v6870_v42 }
 0xd01   :  { %v14315_v29 = vpop.f32.mrf.mxu0  ;;  %v14345_v22 = vpop.f32.mrf.mxu1 }
 0xd02   :  { %v7224_v46 = vadd.f32 %v14315_v29, %v7105_v38  ;;  %v7108_v24 = vadd.f32 %v16985_v57, %v6989_v52 }
 0xd03   :  { %v7191_v36 = vpop.f32.mrf.mxu0  ;;  %v7548_v44 = vpop.f32.mrf.mxu1 }
 0xd04   :  { %v7222_v13 = vadd.f32 %v7191_v36, %v7103_v60  ;;  %v7343_v27 = vadd.f32 %v14325_v18, %v7224_v46 }
 0xd05   :  { %v14316_v41 = vpop.f32.mrf.mxu0  ;;  %v14346_v37 = vpop.f32.mrf.mxu1 }
 0xd06   :  { %v7225_v45 = vadd.f32 %v14316_v41, %v7106_v6  ;;  %v7341_v2 = vadd.f32 %v16990_v25, %v7222_v13 }
 0xd07   :  { %v7194_v47 = vpop.f32.mrf.mxu0  ;;  %v17006_v63 = vpop.f32.mrf.mxu1 }
 0xd08   :  { %v7223_v61 = vadd.f32 %v7194_v47, %v7104_v4  ;;  %v7344_v15 = vadd.f32 %v14326_v55, %v7225_v45 }
 0xd09   :  { %v14319_v51 = vpop.f32.mrf.mxu0  ;;  %v14349_v26 = vpop.f32.mrf.mxu1 }
 0xd0a   :  { %v7228_v12 = vadd.f32 %v14319_v51, %v7109_v39  ;;  %v7342_v31 = vadd.f32 %v16995_v40, %v7223_v61 }
 0xd0b   :  { %v7207_v33 = vpop.f32.mrf.mxu0  ;;  %v7564_v18 = vpop.f32.mrf.mxu1 }
 0xd0c   :  { %v7226_v19 = vadd.f32 %v7207_v33, %v7107_v14  ;;  %v7347_v23 = vadd.f32 %v14329_v8, %v7228_v12 }
 0xd0d   :  { %v14320_v38 = vpop.f32.mrf.mxu0  ;;  %v17009_v20 = vpop.f32.mrf.mxu1 }
 0xd0e   :  { %v7229_v7 = vadd.f32 %v14320_v38, %v7110_v49  ;;  %v7345_v56 = vadd.f32 %v7326_v5, %v7226_v19 }
 0xd0f   :  { %v7210_v21 = vpop.f32.mrf.mxu0  ;;  %v17012_v32 = vpop.f32.mrf.mxu1 }
 0xd10   :  { %v7227_v55 = vadd.f32 %v7210_v21, %v7108_v24  ;;  %v7348_v60 = vadd.f32 %v14330_v11, %v7229_v7 }
 0xd11   :  { %v14335_v6 = vpop.f32.mrf.mxu0  ;;  %v14365_v30 = vpop.f32.mrf.mxu1 }
 0xd12   :  { %v7462_v8 = vadd.f32 %v14335_v6, %v7343_v27  ;;  %v7346_v40 = vadd.f32 %v17001_v54, %v7227_v55 }
 0xd13   :  { %v7429_v57 = vpop.f32.mrf.mxu0  ;;  %v7786_v16 = vpop.f32.mrf.mxu1 }
 0xd14   :  { %v7460_v17 = vadd.f32 %v7429_v57, %v7341_v2  ;;  %v7581_v5 = vadd.f32 %v14345_v22, %v7462_v8 }
 0xd15   :  { %v14336_v10 = vpop.f32.mrf.mxu0  ;;  %v17019_v34 = vpop.f32.mrf.mxu1 }
 0xd16   :  { %v7463_v39 = vadd.f32 %v14336_v10, %v7344_v15  ;;  %v7579_v48 = vadd.f32 %v7548_v44, %v7460_v17 }
 0xd17   :  { %v7432_v11 = vpop.f32.mrf.mxu0  ;;  %v7789_v43 = vpop.f32.mrf.mxu1 }
 0xd18   :  { %v7461_v58 = vadd.f32 %v7432_v11, %v7342_v31  ;;  %v7582_v25 = vadd.f32 %v14346_v37, %v7463_v39 }
 0xd19   :  { %v14339_v14 = vpop.f32.mrf.mxu0  ;;  %v17022_v50 = vpop.f32.mrf.mxu1 }
 0xd1a   :  { %v7466_v3 = vadd.f32 %v14339_v14, %v7347_v23  ;;  %v7580_v54 = vadd.f32 %v17006_v63, %v7461_v58 }
 0xd1b   :  { %v7445_v49 = vpop.f32.mrf.mxu0  ;;  %v17024_v29 = vpop.f32.mrf.mxu1 }
 0xd1c   :  { %v7464_v59 = vadd.f32 %v7445_v49, %v7345_v56  ;;  %v7585_v22 = vadd.f32 %v14349_v26, %v7466_v3 }
 0xd1d   :  { %v14340_v1 = vpop.f32.mrf.mxu0  ;;  %v17026_v46 = vpop.f32.mrf.mxu1 }
 0xd1e   :  { %v17029_v36 = vadd.f32 %v14340_v1, %v7348_v60  ;;  %v7583_v44 = vadd.f32 %v7564_v18, %v7464_v59 }
 0xd1f   :  { %v7448_v62 = vpop.f32.mrf.mxu0  ;;  %v17031_v13 = vpop.f32.mrf.mxu1 }
 0xd20   :  { %v17033_v27 = vadd.f32 %v7448_v62, %v7346_v40  ;;  %v7586_v0 = vadd.f32 %v17009_v20, %v17029_v36 }
 0xd21   :  { %v14355_v41 = vpop.f32.mrf.mxu0  ;;  %v17035_v37 = vpop.f32.mrf.mxu1 }
 0xd22   :  { %v7700_v4 = vadd.f32 %v14355_v41, %v7581_v5 }
 0xd23   :  { %v7667_v45 = vpop.f32.mrf.mxu0  ;;  %v17037_v47 = vpop.f32.mrf.mxu1 }
 0xd24   :  { %v7698_v42 = vadd.f32 %v7667_v45, %v7579_v48  ;;  %v7819_v61 = vadd.f32 %v14365_v30, %v7700_v4 }
 0xd25   :  { %v14356_v15 = vpop.f32.mrf.mxu0  ;;  %v17039_v51 = vpop.f32.mrf.mxu1 }
 0xd26   :  { %v7701_v26 = vadd.f32 %v14356_v15, %v7582_v25  ;;  %v7817_v52 = vadd.f32 %v7786_v16, %v7698_v42 }
 0xd27   :  { %v7670_v12 = vpop.f32.mrf.mxu0  ;;  %v17042_v33 = vpop.f32.mrf.mxu1 }
 0xd28   :  { %v7699_v18 = vadd.f32 %v7670_v12, %v7580_v54 }
 0xd29   :  { %v14359_v19 = vpop.f32.mrf.mxu0  ;;  %v17044_v23 = vpop.f32.mrf.mxu1 }
 0xd2a   :  { %v7704_v38 = vadd.f32 %v14359_v19, %v7585_v22  ;;  %v7818_v17 = vadd.f32 %v7789_v43, %v7699_v18 }
 0xd2b   :  { %v7683_v24 = vpop.f32.mrf.mxu0  ;;  %v17046_v7 = vpop.f32.mrf.mxu1 }
 0xd2c   :  { %v17048_v56 = vadd.f32 %v7683_v24, %v7583_v44 }
 0xd2d   :  { %v14360_v21 = vpop.f32.mrf.mxu0  ;;  %v17050_v55 = vpop.f32.mrf.mxu1 }
 0xd2f   :  { %v7686_v60 = vpop.f32.mrf.mxu0  ;;  %v17052_v63 = vpop.f32.mrf.mxu1 }
 0xd31   :  { %v14375_v28 = vpop.f32.mrf.mxu0  ;;  %v17054_v9 = vpop.f32.mrf.mxu1 }
 0xd32   :  { %v7938_v6 = vadd.f32 %v14375_v28, %v7819_v61 }
 0xd33   :  { %v7905_v30 = vpop.f32.mrf.mxu0  ;;  %v17056_v2 = vpop.f32.mrf.mxu1 }
 0xd34   :  { %v7936_v8 = vadd.f32 %v7905_v30, %v7817_v52 }
 0xd35   :  { %v14376_v57 = vpop.f32.mrf.mxu0  ;;  %v17058_v16 = vpop.f32.mrf.mxu1 }
 0xd37   :  { %v7908_v5 = vpop.f32.mrf.mxu0  ;;  %v17060_v10 = vpop.f32.mrf.mxu1 }
 0xd38   :  { %v7937_v31 = vadd.f32 %v7908_v5, %v7818_v17  ;;  %v7820_v5 = vadd.f32 %v17019_v34, %v7701_v26  ;;  %v7823_v34 = vadd.f32 %v17022_v50, %v7704_v38 }
 0xd39   :  { %v14379_v39 = vpop.f32.mrf.mxu0  ;;  %v17062_v48 = vpop.f32.mrf.mxu1 }
 0xd3a   :  { %v7939_v53 = vadd.f32 %v14376_v57, %v7820_v5  ;;  %v8055_v57 = vadd.f32 %v17037_v47, %v7936_v8 }
 0xd3b   :  { %v7921_v11 = vpop.f32.mrf.mxu0  ;;  %v17064_v58 = vpop.f32.mrf.mxu1 }
 0xd3c   :  { %17763 = vst [vmem:[#allocation4_spill] sm:$0xff] %v17064_v58 }
 0xd3d   :  { %v14380_v25 = vpop.f32.mrf.mxu0  ;;  %v17066_v14 = vpop.f32.mrf.mxu1 }
 0xd3f   :  { %v7924_v3 = vpop.f32.mrf.mxu0  ;;  %v17068_v49 = vpop.f32.mrf.mxu1 }
 0xd40   :  { %17764 = vst [vmem:[#allocation5_spill] sm:$0xff] %v17068_v49 }
 0xd41   :  { %v14395_v59 = vpop.f32.mrf.mxu0  ;;  %v17070_v22 = vpop.f32.mrf.mxu1 }
 0xd43   :  { %v8143_v43 = vpop.f32.mrf.mxu0  ;;  %v17072_v1 = vpop.f32.mrf.mxu1 }
 0xd45   :  { %v14396_v40 = vpop.f32.mrf.mxu0  ;;  %v17074_v62 = vpop.f32.mrf.mxu1 }
 0xd47   :  { %v8146_v44 = vpop.f32.mrf.mxu0  ;;  %v17076_v45 = vpop.f32.mrf.mxu1 }
 0xd49   :  { %v14399_v41 = vpop.f32.mrf.mxu0  ;;  %v17078_v15 = vpop.f32.mrf.mxu1 }
 0xd4a   :  { %17765 = vst [vmem:[#allocation6_spill] sm:$0xff] %v17078_v15  ;;  %v7705_v15 = vadd.f32 %v14360_v21, %v7586_v0  ;;  %v8056_v0 = vadd.f32 %v17042_v33, %v7937_v31  ;;  %v7821_v21 = vadd.f32 %v17024_v29, %v17048_v56 }
 0xd4b   :  { %v8159_v4 = vpop.f32.mrf.mxu0  ;;  %v17080_v12 = vpop.f32.mrf.mxu1 }
 0xd4c   :  { %17766 = vst [vmem:[#allocation7_spill] sm:$0xff] %v17080_v12  ;;  %v7584_v12 = vadd.f32 %v17012_v32, %v17033_v27  ;;  %v7824_v20 = vadd.f32 %v17026_v46, %v7705_v15  ;;  %v8175_v50 = vadd.f32 %v8146_v44, %v8056_v0  ;;  %v7940_v38 = vadd.f32 %v7921_v11, %v7821_v21 }
 0xd4d   :  { %v14400_v42 = vpop.f32.mrf.mxu0  ;;  %v17082_v24 = vpop.f32.mrf.mxu1 }
 0xd4e   :  { %17767 = vst [vmem:[#allocation8_spill] sm:$0xff] %v17082_v24  ;;  %v8294_v56 = vadd.f32 %v17060_v10, %v8175_v50  ;;  %v8059_v11 = vadd.f32 %v17046_v7, %v7940_v38 }
 0xd4f   :  { %v8162_v61 = vpop.f32.mrf.mxu0  ;;  %v17088_v17 = vpop.f32.mrf.mxu1 }
 0xd50   :  { %17770 = vst [vmem:[#allocation11_spill] sm:$0xff] %v17088_v17  ;;  %v8058_v17 = vadd.f32 %v17039_v51, %v7939_v53  ;;  %v8174_v51 = vadd.f32 %v8143_v43, %v8055_v57 }
 0xd51   :  { %v14415_v54 = vpop.f32.mrf.mxu0  ;;  %v17097_v24 = vpop.f32.mrf.mxu1 }
 0xd52   :  { %v8177_v27 = vadd.f32 %v14396_v40, %v8058_v17 }
 0xd53   :  { %v8381_v52 = vpop.f32.mrf.mxu0  ;;  %v8743_v26 = vpop.f32.mrf.mxu1 }
 0xd54   :  { %v8296_v33 = vadd.f32 %v17058_v16, %v8177_v27  ;;  %v17775_v27 = vld [vmem:[#allocation6_spill] sm:$0xff] }
 0xd55   :  { %v14416_v18 = vpop.f32.mrf.mxu0 }
 0xd57   :  { %v8384_v19 = vpop.f32.mrf.mxu0 }
 0xd58   :  { %v8413_v44 = vadd.f32 %v8384_v19, %v8294_v56  ;;  %v17771_v19 = vld [vmem:[#allocation4_spill] sm:$0xff] }
 0xd59   :  { %v17084_v28 = vpop.f32.mrf.mxu0 }
 0xd5a   :  { %17768 = vst [vmem:[#allocation9_spill] sm:$0xff] %v17084_v28  ;;  %v7703_v28 = vadd.f32 %v7686_v60, %v7584_v12  ;;  %v14446_v12 = vpop.f32.mrf.mxu1 }
 0xd5b   :  { %v17086_v30 = vpop.f32.mrf.mxu0 }
 0xd5c   :  { %17769 = vst [vmem:[#allocation10_spill] sm:$0xff] %v17086_v30  ;;  %v8057_v30 = vadd.f32 %v17035_v37, %v7938_v6  ;;  %v7822_v60 = vadd.f32 %v17031_v13, %v7703_v28  ;;  %v7942_v37 = vadd.f32 %v14379_v39, %v7823_v34  ;;  %v7943_v6 = vadd.f32 %v14380_v25, %v7824_v20 }
 0xd5d   :  { %v14420_v35 = vpop.f32.mrf.mxu0  ;;  %v8293_v13 = vadd.f32 %v17056_v2, %v8174_v51  ;;  %v8415_v25 = vadd.f32 %v14416_v18, %v8296_v33 }
 0xd5e   :  { %v8176_v32 = vadd.f32 %v14395_v59, %v8057_v30  ;;  %v7941_v46 = vadd.f32 %v7924_v3, %v7822_v60  ;;  %v8061_v8 = vadd.f32 %v17044_v23, %v7942_v37  ;;  %v8062_v31 = vadd.f32 %v17050_v55, %v7943_v6  ;;  %v17776_v60 = vld [vmem:[#allocation8_spill] sm:$0xff] }
 0xd5f   :  { %v17095_v49 = vpop.f32.mrf.mxu0  ;;  %v8412_v16 = vadd.f32 %v8381_v52, %v8293_v13  ;;  %v8178_v23 = vadd.f32 %v8159_v4, %v8059_v11  ;;  %v8539_v2 = vadd.f32 %v17074_v62, %v8415_v25 }
 0xd60   :  { %v8295_v47 = vadd.f32 %v17054_v9, %v8176_v32  ;;  %v8060_v3 = vadd.f32 %v17052_v63, %v7941_v46  ;;  %v8180_v59 = vadd.f32 %v14399_v41, %v8061_v8  ;;  %v8181_v43 = vadd.f32 %v14400_v42, %v8062_v31  ;;  %v8746_v9 = vpop.f32.mrf.mxu1  ;;  %v17778_v46 = vld [vmem:[#allocation11_spill] sm:$0xff] }
 0xd61   :  { %v14435_v58 = vpop.f32.mrf.mxu0  ;;  %v8536_v63 = vadd.f32 %v17072_v1, %v8412_v16  ;;  %v8537_v41 = vadd.f32 %v17076_v45, %v8413_v44  ;;  %v8297_v4 = vadd.f32 %v17771_v19, %v8178_v23  ;;  %v17773_v5 = vld [vmem:[#allocation9_spill] sm:$0xff] }
 0xd62   :  { %v8414_v39 = vadd.f32 %v14415_v54, %v8295_v47  ;;  %v8179_v28 = vadd.f32 %v8162_v61, %v8060_v3  ;;  %v8299_v10 = vadd.f32 %v17062_v48, %v8180_v59  ;;  %v8300_v54 = vadd.f32 %v17066_v14, %v8181_v43  ;;  %v14449_v7 = vpop.f32.mrf.mxu1  ;;  %v17772_v61 = vld [vmem:[#allocation5_spill] sm:$0xff] }
 0xd63   :  { %v8624_v36 = vpop.f32.mrf.mxu0  ;;  %v17774_v57 = vld [vmem:[#allocation10_spill] sm:$0xff] }
 0xd64   :  { %v8538_v30 = vadd.f32 %v17070_v22, %v8414_v39  ;;  %v8298_v17 = vadd.f32 %v17772_v61, %v8179_v28  ;;  %v8418_v22 = vadd.f32 %v17773_v5, %v8299_v10  ;;  %v8419_v34 = vadd.f32 %v14420_v35, %v8300_v54  ;;  %v8759_v32 = vpop.f32.mrf.mxu1  ;;  %v15191_v10 = vld [vmem:[%s16130_s11 + $0x18] sm:$0xff]   ;;  %v15192_v54 = vld [vmem:[%s16130_s11 + $0x20] sm:$0xff]   ;;  %v15202_v61 = vld [vmem:[%s16130_s11 + $0x70] sm:$0xff]  }
 0xd65   :  { %v14436_v53 = vpop.f32.mrf.mxu0  ;;  %v8655_v20 = vadd.f32 %v8624_v36, %v8536_v63  ;;  %v8416_v14 = vadd.f32 %v17774_v57, %v8297_v4  ;;  %v17777_v36 = vld [vmem:[#allocation7_spill] sm:$0xff]  ;;  %v15195_v63 = vld [vmem:[%s16130_s11 + $0x38] sm:$0xff]  }
 0xd66   :  { %v8657_v42 = vadd.f32 %v14435_v58, %v8538_v30  ;;  %v8658_v52 = vadd.f32 %v14436_v53, %v8539_v2  ;;  %v8417_v0 = vadd.f32 %v17095_v49, %v8298_v17  ;;  %v8542_v21 = vadd.f32 %v17775_v27, %v8418_v22  ;;  %v14450_v49 = vpop.f32.mrf.mxu1  ;;  %v15199_v19 = vld [vmem:[%s16130_s11 + $0x58] sm:$0xff]   ;;  %v15200_v4 = vld [vmem:[%s16130_s11 + $0x60] sm:$0xff]   ;;  %v15201_v17 = vld [vmem:[%s16130_s11 + $0x68] sm:$0xff]  }
 0xd67   :  { %v8627_v15 = vpop.f32.mrf.mxu0  ;;  %v8543_v37 = vadd.f32 %v17776_v60, %v8419_v34  ;;  %v8774_v53 = vadd.f32 %v8743_v26, %v8655_v20  ;;  %v8540_v38 = vadd.f32 %v17777_v36, %v8416_v14  ;;  %v15203_v5 = vld [vmem:[%s16130_s11 + $0x78] sm:$0xff]   ;;  %v15204_v22 = vld [vmem:[%s16130_s11 + $0x80] sm:$0xff]   ;;  %v17779_v34 = vmov 0.0  }
 0xd68   :  { %v8656_v48 = vadd.f32 %v8627_v15, %v8537_v41  ;;  %v8776_v45 = vadd.f32 %v17097_v24, %v8657_v42  ;;  %v8777_v58 = vadd.f32 %v14446_v12, %v8658_v52  ;;  %v8541_v15 = vadd.f32 %v17778_v46, %v8417_v0  ;;  %v8762_v26 = vpop.f32.mrf.mxu1  ;;  %v15196_v41 = vld [vmem:[%s16130_s11 + $0x40] sm:$0xff]   ;;  %v15198_v42 = vld [vmem:[%s16130_s11 + $0x50] sm:$0xff]   ;;  %v15197_v52 = vld [vmem:[%s16130_s11 + $0x48] sm:$0xff]  }
 0xd69   :  { %v14439_v29 = vpop.f32.mrf.mxu0 }
 0xd6a   :  { %v8775_v51 = vadd.f32 %v8746_v9, %v8656_v48  ;;  %v8661_v47 = vadd.f32 %v14439_v29, %v8542_v21 }
 0xd6b   :  { %v8640_v40 = vpop.f32.mrf.mxu0 }
 0xd6c   :  { %v8659_v56 = vadd.f32 %v8640_v40, %v8540_v38  ;;  %v8780_v3 = vadd.f32 %v14449_v7, %v8661_v47  ;;  %v15190_v40 = vld [vmem:[%s16130_s11 + $0x8] sm:$0xff]   ;;  %v15194_v7 = vld [vmem:[%s16130_s11 + $0x30] sm:$0xff]  }
 0xd6d   :  { %v14440_v55 = vpop.f32.mrf.mxu0 }
 0xd6e   :  { %v8662_v8 = vadd.f32 %v14440_v55, %v8543_v37  ;;  %v8778_v9 = vadd.f32 %v8759_v32, %v8659_v56 }
 0xd6f   :  { %v8643_v18 = vpop.f32.mrf.mxu0 }
 0xd70   :  { %v8660_v39 = vadd.f32 %v8643_v18, %v8541_v15  ;;  %v8781_v59 = vadd.f32 %v14450_v49, %v8662_v8  ;;  %v15193_v18 = vld [vmem:[%s16130_s11 + $0x28] sm:$0xff]  }
 0xd71   :  { %v14455_v62 = vpop.f32.mrf.mxu0 }
 0xd72   :  { %v8895_v35 = vadd.f32 %v14455_v62, %v8776_v45  ;;  %v8779_v16 = vadd.f32 %v8762_v26, %v8660_v39  ;;  %v15205_v62 = vld [vmem:[%s16130_s11 + $0x88] sm:$0xff]   ;;  %s15519_s11 = smov 21  }
 0xd73   :  { %v8862_v1 = vpop.f32.mrf.mxu0  ;;  %s12110_s18 = sld [smem:[%s17674_s0 + %s15519_s11]]  }
 0xd74   :  { %v8893_v31 = vadd.f32 %v8862_v1, %v8774_v53  ;;  %s12116_s11 = sld [smem:[%s17674_s0 + %s15479_s14]]  }
 0xd75   :  { %v14456_v6 = vpop.f32.mrf.mxu0 }
 0xd76   :  { %v8896_v50 = vadd.f32 %v14456_v6, %v8777_v58 }
 0xd77   :  { %v8865_v33 = vpop.f32.mrf.mxu0 }
 0xd78   :  { %v17132_v24 = vpack.c.bf16 %v8896_v50, %v8895_v35  ;;  %v8894_v12 = vadd.f32 %v8865_v33, %v8775_v51 }
 0xd79   :  { %v14459_v13 = vpop.f32.mrf.mxu0 }
 0xd7a   :  { %v17134_v25 = vpack.c.bf16 %v8894_v12, %v8893_v31  ;;  %v8899_v29 = vadd.f32 %v14459_v13, %v8780_v3  ;;  %v15206_v31 = vld [vmem:[%s16554_s3 + $0x28] ss:$0 sps:$4 sm:$0x11]  }
 0xd7b   :  { %v8878_v11 = vpop.f32.mrf.mxu0 }
 0xd7c   :  { %v8897_v28 = vadd.f32 %v8878_v11, %v8778_v9 }
 0xd7d   :  { %v14460_v43 = vpop.f32.mrf.mxu0 }
 0xd7e   :  { %v8900_v44 = vadd.f32 %v14460_v43, %v8781_v59 }
 0xd7f   :  { %v8881_v23 = vpop.f32.mrf.mxu0 }
 0xd80   :  { %v17136_v55 = vpack.c.bf16 %v8900_v44, %v8899_v29  ;;  %v8898_v30 = vadd.f32 %v8881_v23, %v8779_v16  ;;  %v15207_v29 = vld [vmem:[%s16554_s3 + $0x20] sm:$0xff]   ;;  %v15208_v44 = vld [vmem:[%s16554_s3 + $0x18] sm:$0xff]  }
 0xd82   :  { %v17138_v2 = vpack.c.bf16 %v8898_v30, %v8897_v28  ;;  %14461 = vmatprep.subr.bf16.mxu1 %v17136_v55  ;;  %14473 = vmatprep.subr.bf16.mxu0 %v17136_v55  ;;  %v15210_v30 = vld [vmem:[%s16554_s3 + $0x8] sm:$0xff]  }
 0xd83   :  { %14462 = vmatpush3.bf16.msra.mxu1 %v17136_v55  ;;  %14474 = vmatpush3.bf16.msra.mxu0 %v17136_v55 }
 0xd84   :  { %14463 = vmatprep.subr.bf16.mxu1 %v17138_v2  ;;  %14475 = vmatprep.subr.bf16.mxu0 %v17138_v2 }
 0xd87   :  { %14464 = vmatpush3.bf16.msra.mxu1 %v17138_v2  ;;  %14476 = vmatpush3.bf16.msra.mxu0 %v17138_v2 }
 0xd88   :  { %14465 = vmatprep.subr.bf16.mxu1 %v17132_v24  ;;  %14477 = vmatprep.subr.bf16.mxu0 %v17132_v24 }
 0xd8b   :  { %14466 = vmatpush3.bf16.msra.mxu1 %v17132_v24  ;;  %14478 = vmatpush3.bf16.msra.mxu0 %v17132_v24 }
 0xd8c   :  { %14467 = vmatprep.subr.bf16.mxu1 %v17134_v25  ;;  %14479 = vmatprep.subr.bf16.mxu0 %v17134_v25 }
 0xd8f   :  { %14468 = vmatpush3.bf16.msra.mxu1 %v17134_v25  ;;  %14480 = vmatpush3.bf16.msra.mxu0 %v17134_v25 }
 0xd90   :  { %14485 = vmatprep.subr.bf16.mxu1 %v17136_v55  ;;  %14497 = vmatprep.subr.bf16.mxu0 %v17136_v55 }
 0xd92   :  { %14470 = vmatmul.mubr.msk.bf16.vlgmr.msra.gmra.mxu1 %vm8919_vm3, %v15190_v40  ;;  %14482 = vmatmul.mubr.msk.bf16.vlgmr.msra.gmra.mxu0 %vm8919_vm3, %v15191_v10 }
 0xd93   :  { %14486 = vmatpush3.bf16.msra.mxu1 %v17136_v55  ;;  %14498 = vmatpush3.bf16.msra.mxu0 %v17136_v55 }
 0xd94   :  { %14487 = vmatprep.subr.bf16.mxu1 %v17138_v2  ;;  %14499 = vmatprep.subr.bf16.mxu0 %v17138_v2 }
 0xd95   :  { %14493 = vmatprep.mubr.msk.bf16.mxu1 %vm8919_vm3, %v15192_v54  ;;  %14505 = vmatprep.mubr.msk.bf16.mxu0 %vm8919_vm3, %v15194_v7 }
 0xd97   :  { %14488 = vmatpush3.bf16.msra.mxu1 %v17138_v2  ;;  %14500 = vmatpush3.bf16.msra.mxu0 %v17138_v2 }
 0xd98   :  { %14489 = vmatprep.subr.bf16.mxu1 %v17132_v24  ;;  %14501 = vmatprep.subr.bf16.mxu0 %v17132_v24 }
 0xd9b   :  { %14490 = vmatpush3.bf16.msra.mxu1 %v17132_v24  ;;  %14502 = vmatpush3.bf16.msra.mxu0 %v17132_v24 }
 0xd9c   :  { %14491 = vmatprep.subr.bf16.mxu1 %v17134_v25  ;;  %14503 = vmatprep.subr.bf16.mxu0 %v17134_v25 }
 0xd9f   :  { %14492 = vmatpush3.bf16.msra.mxu1 %v17134_v25  ;;  %14504 = vmatpush3.bf16.msra.mxu0 %v17134_v25 }
 0xda0   :  { %14509 = vmatprep.subr.bf16.mxu1 %v17136_v55  ;;  %14521 = vmatprep.subr.bf16.mxu0 %v17136_v55 }
 0xda2   :  { %14494 = vmatmul.mubr.msk.bf16.vlgmr.msra.gmra.mxu1 %vm8919_vm3, %v15193_v18  ;;  %14506 = vmatmul.mubr.msk.bf16.vlgmr.msra.gmra.mxu0 %vm8919_vm3, %v15195_v63 }
 0xda3   :  { %14510 = vmatpush3.bf16.msra.mxu1 %v17136_v55  ;;  %14522 = vmatpush3.bf16.msra.mxu0 %v17136_v55 }
 0xda4   :  { %14511 = vmatprep.subr.bf16.mxu1 %v17138_v2  ;;  %14523 = vmatprep.subr.bf16.mxu0 %v17138_v2 }
 0xda5   :  { %14517 = vmatprep.mubr.msk.bf16.mxu1 %vm8919_vm3, %v15196_v41  ;;  %14529 = vmatprep.mubr.msk.bf16.mxu0 %vm8919_vm3, %v15198_v42 }
 0xda7   :  { %14512 = vmatpush3.bf16.msra.mxu1 %v17138_v2  ;;  %14524 = vmatpush3.bf16.msra.mxu0 %v17138_v2 }
 0xda8   :  { %14513 = vmatprep.subr.bf16.mxu1 %v17132_v24  ;;  %14525 = vmatprep.subr.bf16.mxu0 %v17132_v24 }
 0xdab   :  { %14514 = vmatpush3.bf16.msra.mxu1 %v17132_v24  ;;  %14526 = vmatpush3.bf16.msra.mxu0 %v17132_v24 }
 0xdac   :  { %14515 = vmatprep.subr.bf16.mxu1 %v17134_v25  ;;  %14527 = vmatprep.subr.bf16.mxu0 %v17134_v25 }
 0xdaf   :  { %14516 = vmatpush3.bf16.msra.mxu1 %v17134_v25  ;;  %14528 = vmatpush3.bf16.msra.mxu0 %v17134_v25 }
 0xdb0   :  { %14533 = vmatprep.subr.bf16.mxu1 %v17136_v55  ;;  %14545 = vmatprep.subr.bf16.mxu0 %v17136_v55 }
 0xdb2   :  { %14518 = vmatmul.mubr.msk.bf16.vlgmr.msra.gmra.mxu1 %vm8919_vm3, %v15197_v52  ;;  %14530 = vmatmul.mubr.msk.bf16.vlgmr.msra.gmra.mxu0 %vm8919_vm3, %v15199_v19  ;;  %v15211_v19 = vld [vmem:[%s16554_s3] sm:$0xff]  }
 0xdb3   :  { %14534 = vmatpush3.bf16.msra.mxu1 %v17136_v55  ;;  %14546 = vmatpush3.bf16.msra.mxu0 %v17136_v55 }
 0xdb4   :  { %14535 = vmatprep.subr.bf16.mxu1 %v17138_v2  ;;  %14547 = vmatprep.subr.bf16.mxu0 %v17138_v2 }
 0xdb5   :  { %14541 = vmatprep.mubr.msk.bf16.mxu1 %vm8919_vm3, %v15200_v4  ;;  %14553 = vmatprep.mubr.msk.bf16.mxu0 %vm8919_vm3, %v15202_v61 }
 0xdb7   :  { %14536 = vmatpush3.bf16.msra.mxu1 %v17138_v2  ;;  %14548 = vmatpush3.bf16.msra.mxu0 %v17138_v2 }
 0xdb8   :  { %14537 = vmatprep.subr.bf16.mxu1 %v17132_v24  ;;  %14549 = vmatprep.subr.bf16.mxu0 %v17132_v24 }
 0xdbb   :  { %14538 = vmatpush3.bf16.msra.mxu1 %v17132_v24  ;;  %14550 = vmatpush3.bf16.msra.mxu0 %v17132_v24 }
 0xdbc   :  { %14539 = vmatprep.subr.bf16.mxu1 %v17134_v25  ;;  %14551 = vmatprep.subr.bf16.mxu0 %v17134_v25 }
 0xdbf   :  { %14540 = vmatpush3.bf16.msra.mxu1 %v17134_v25  ;;  %14552 = vmatpush3.bf16.msra.mxu0 %v17134_v25 }
 0xdc0   :  { %14557 = vmatprep.subr.bf16.mxu1 %v17136_v55  ;;  %14621 = vmatprep.subr.bf16.mxu0 %v17779_v34 }
 0xdc2   :  { %14542 = vmatmul.mubr.msk.bf16.vlgmr.msra.gmra.mxu1 %vm8919_vm3, %v15201_v17  ;;  %14554 = vmatmul.mubr.msk.bf16.vlgmr.msra.gmra.mxu0 %vm8919_vm3, %v15203_v5 }
 0xdc3   :  { %14558 = vmatpush3.bf16.msra.mxu1 %v17136_v55  ;;  %14565 = vmatprep.mubr.msk.bf16.mxu1 %vm8919_vm3, %v15204_v22  ;;  %v15209_v55 = vld [vmem:[%s16554_s3 + $0x10] sm:$0xff]  }
 0xdc4   :  { %14559 = vmatprep.subr.bf16.mxu1 %v17138_v2  ;;  %14625 = vmatprep.mubr.msk.bf16.mxu0 %vm15491_vm10, %v17779_v34 }
 0xdc7   :  { %14560 = vmatpush3.bf16.msra.mxu1 %v17138_v2 }
 0xdc8   :  { %14561 = vmatprep.subr.bf16.mxu1 %v17132_v24 }
 0xdcb   :  { %14562 = vmatpush3.bf16.msra.mxu1 %v17132_v24  ;;  %v17780_v24 = vmov 0  }
 0xdcc   :  { %14563 = vmatprep.subr.bf16.mxu1 %v17134_v25  ;;  %v9708_v12 = vsel %vm17781_vm2, 65535, %v17780_v24 }
 0xdcd   :  { %v9710_v39 = vand.u32 %v15206_v31, %v9708_v12 }
 0xdcf   :  { %14564 = vmatpush3.bf16.msra.mxu1 %v17134_v25 }
 0xdd0   :  { %14569 = vmatprep.subr.bf16.mxu1 %v9710_v39 }
 0xdd2   :  { %14566 = vmatmul.mubr.msk.bf16.vlgmr.msra.gmra.mxu1 %vm8919_vm3, %v15205_v62 }
 0xdd3   :  { %14570 = vmatpush3.bf16.msra.mxu1 %v9710_v39 }
 0xdd4   :  { %14571 = vmatprep.subr.bf16.mxu1 %v15207_v29 }
 0xdd7   :  { %14572 = vmatpush3.bf16.msra.mxu1 %v15207_v29 }
 0xdd8   :  { %14573 = vmatprep.subr.bf16.mxu1 %v15208_v44 }
 0xddb   :  { %14574 = vmatpush3.bf16.msra.mxu1 %v15208_v44 }
 0xddc   :  { %14575 = vmatprep.subr.bf16.mxu1 %v15209_v55 }
 0xddf   :  { %14576 = vmatpush3.bf16.msra.mxu1 %v15209_v55 }
 0xde0   :  { %14577 = vmatprep.subr.bf16.mxu1 %v15210_v30 }
 0xde3   :  { %14578 = vmatpush3.bf16.msra.mxu1 %v15210_v30 }
 0xde4   :  { %14579 = vmatprep.subr.bf16.mxu1 %v15211_v19 }
 0xde7   :  { %14580 = vmatpush3.bf16.msra.mxu1 %v15211_v19 }
 0xe52   :  { %v17247_v20 = vpop.f32.mrf.mxu1  ;;  %v14483_v48 = vpop.f32.mrf.mxu0 }
 0xe54   :  { %v17249_v57 = vpop.f32.mrf.mxu1  ;;  %v9032_v14 = vpop.f32.mrf.mxu0 }
 0xe56   :  { %v17251_v0 = vpop.f32.mrf.mxu1  ;;  %v14484_v32 = vpop.f32.mrf.mxu0 }
 0xe57   :  { %v8976_v1 = vpack.c.bf16 %v17251_v0, %v17247_v20  ;;  %v9048_v45 = vpack.c.bf16 %v14484_v32, %v14483_v48  ;;  %v9648_v48 = vld [vmem:[%s12110_s18 + $0x10] sm:$0xff]  ;;  %v9646_v32 = vld [vmem:[%s12110_s18] sm:$0xff] }
 0xe58   :  { %v17255_v58 = vpop.f32.mrf.mxu1  ;;  %v9035_v27 = vpop.f32.mrf.mxu0 }
 0xe59   :  { %v8975_v21 = vpack.c.bf16 %v17255_v58, %v17249_v57  ;;  %v9047_v60 = vpack.c.bf16 %v9035_v27, %v9032_v14  ;;  %9557 = vrot.lane.b32.xlu0 %v9048_v45, %s15467_s28  ;;  %v9649_v14 = vld [vmem:[%s12110_s18 + $0x18] sm:$0xff]  ;;  %v9647_v45 = vld [vmem:[%s12110_s18 + $0x8] sm:$0xff] }
 0xe5b   :  { %9555 = vrot.lane.b32.xlu1 %v9047_v60, %s15467_s28  ;;  %s17783_s28 = smov 45  }
 0xe62   :  { %v14495_v37 = vpop.f32.mrf.mxu1  ;;  %v14507_v6 = vpop.f32.mrf.mxu0 }
 0xe64   :  { %v9104_v53 = vpop.f32.mrf.mxu1  ;;  %v9176_v51 = vpop.f32.mrf.mxu0 }
 0xe66   :  { %v14496_v35 = vpop.f32.mrf.mxu1  ;;  %v14508_v50 = vpop.f32.mrf.mxu0 }
 0xe67   :  { %v9120_v36 = vpack.c.bf16 %v14496_v35, %v14495_v37  ;;  %v9192_v47 = vpack.c.bf16 %v14508_v50, %v14507_v6 }
 0xe68   :  { %v9107_v38 = vpop.f32.mrf.mxu1  ;;  %v9179_v46 = vpop.f32.mrf.mxu0 }
 0xe69   :  { %v9119_v15 = vpack.c.bf16 %v9107_v38, %v9104_v53  ;;  %9563 = vrot.lane.b32.xlu0 %v9120_v36, %s15477_s2  ;;  %v9191_v49 = vpack.c.bf16 %v9179_v46, %v9176_v51 }
 0xe6b   :  { %9561 = vrot.lane.b32.xlu1 %v9119_v15, %s15477_s2 }
 0xe6d   :  { %9569 = vrot.lane.b32.xlu0 %v9192_v47, %s15479_s14 }
 0xe6f   :  { %9567 = vrot.lane.b32.xlu1 %v9191_v49, %s15479_s14  ;;  %s15523_s14 = smov 28  }
 0xe70   :  { %s12117_s18 = sld [smem:[%s17674_s0 + %s15523_s14]]  }
 0xe72   :  { %v14519_v33 = vpop.f32.mrf.mxu1  ;;  %v14531_v8 = vpop.f32.mrf.mxu0 }
 0xe74   :  { %v9248_v13 = vpop.f32.mrf.mxu1  ;;  %v9320_v56 = vpop.f32.mrf.mxu0 }
 0xe76   :  { %v14520_v25 = vpop.f32.mrf.mxu1  ;;  %v14532_v26 = vpop.f32.mrf.mxu0 }
 0xe77   :  { %v9264_v11 = vpack.c.bf16 %v14520_v25, %v14519_v33  ;;  %v9336_v9 = vpack.c.bf16 %v14532_v26, %v14531_v8 }
 0xe78   :  { %v9251_v3 = vpop.f32.mrf.mxu1  ;;  %v9323_v59 = vpop.f32.mrf.mxu0 }
 0xe79   :  { %v9263_v43 = vpack.c.bf16 %v9251_v3, %v9248_v13  ;;  %9575 = vrot.lane.b32.xlu0 %v9264_v11, %s17782_s30  ;;  %v9335_v16 = vpack.c.bf16 %v9323_v59, %v9320_v56 }
 0xe7b   :  { %9573 = vrot.lane.b32.xlu1 %v9263_v43, %s17782_s30  ;;  %v17311_v43 = vld [vmem:[%s15982_s22] sm:$0xff]  ;;  %s17817_s30 = smov 8  }
 0xe7d   :  { %9581 = vrot.lane.b32.xlu0 %v9336_v9, %s17783_s28 }
 0xe7f   :  { %9579 = vrot.lane.b32.xlu1 %v9335_v16, %s17783_s28 }
 0xe82   :  { %v14543_v23 = vpop.f32.mrf.mxu1  ;;  %v14555_v28 = vpop.f32.mrf.mxu0 }
 0xe84   :  { %v9392_v2 = vpop.f32.mrf.mxu1  ;;  %v9464_v40 = vpop.f32.mrf.mxu0 }
 0xe86   :  { %v14544_v10 = vpop.f32.mrf.mxu1  ;;  %v14556_v54 = vpop.f32.mrf.mxu0 }
 0xe87   :  { %v9408_v7 = vpack.c.bf16 %v14544_v10, %v14543_v23  ;;  %v9480_v42 = vpack.c.bf16 %v14556_v54, %v14555_v28 }
 0xe88   :  { %v9395_v18 = vpop.f32.mrf.mxu1  ;;  %v9467_v63 = vpop.f32.mrf.mxu0 }
 0xe89   :  { %v9407_v41 = vpack.c.bf16 %v9395_v18, %v9392_v2  ;;  %9587 = vrot.lane.b32.xlu0 %v9408_v7, %s15480_s15  ;;  %v9479_v52 = vpack.c.bf16 %v9467_v63, %v9464_v40 }
 0xe8b   :  { %9585 = vrot.lane.b32.xlu1 %v9407_v41, %s15480_s15  ;;  %s15520_s15 = smov 23  }
 0xe8c   :  { %s17346_s3 = sld [smem:[%s17674_s0 + %s15520_s15]]  }
 0xe8d   :  { %9593 = vrot.lane.b32.xlu0 %v9480_v42, %s15483_s1 }
 0xe8f   :  { %9591 = vrot.lane.b32.xlu1 %v9479_v52, %s15483_s1  ;;  %s12118_s1 = sld [smem:[%s17674_s0 + %s15506_s4]]   ;;  %s15524_s4 = smov 30  }
 0xe90   :  { %s17588_s8 = sld [smem:[%s17674_s0 + %s15524_s4]]  }
 0xe92   :  { %v14567_v4 = vpop.f32.mrf.mxu1 }
 0xe94   :  { %v9536_v61 = vpop.f32.mrf.mxu1 }
 0xe96   :  { %v14568_v17 = vpop.f32.mrf.mxu1 }
 0xe97   :  { %v9552_v5 = vpack.c.bf16 %v14568_v17, %v14567_v4 }
 0xe98   :  { %v9539_v22 = vpop.f32.mrf.mxu1 }
 0xe99   :  { %v9551_v62 = vpack.c.bf16 %v9539_v22, %v9536_v61  ;;  %9599 = vrot.lane.b32.xlu0 %v9552_v5, %s15482_s29 }
 0xe9b   :  { %9597 = vrot.lane.b32.xlu1 %v9551_v62, %s15482_s29  ;;  %v10033_v62 = vld [vmem:[%s17346_s3 + $0x10] sm:$0xff] }
 0xe9d   :  { %9662 = vperm.xlu0 %14806, %v9648_v48   ;;  %v10034_v48 = vld [vmem:[%s17346_s3 + $0x18] sm:$0xff] }
 0xe9f   :  { %9667 = vperm.xlu1 %14807, %v9649_v14  }
 0xea1   :  { %9652 = vperm.xlu0 %14806, %v9646_v32  }
 0xea3   :  { %9657 = vperm.xlu1 %14807, %v9647_v45  }
 0xecb   :  { %v9558_v27 = vpop.permute.xlu0 %9557 }
 0xecc   :  { %v9606_v49 = vsel %vm4370_vm13, %v8976_v1, %v9558_v27 }
 0xecd   :  { %v9556_v60 = vpop.permute.xlu1 %9555 }
 0xece   :  { %v9603_v47 = vsel %vm4370_vm13, %v8975_v21, %v9556_v60 }
 0xedb   :  { %v9564_v37 = vpop.permute.xlu0 %9563 }
 0xedc   :  { %v9610_v31 = vsel %vm170_vm1, %v9606_v49, %v9564_v37 }
 0xedd   :  { %v9562_v6 = vpop.permute.xlu1 %9561 }
 0xede   :  { %v9608_v33 = vsel %vm170_vm1, %v9603_v47, %v9562_v6  ;;  %vm17784_vm1 = vcmask 662528   ;;  %v15448_v6 = vld [vmem:[%s15982_s22 + $0x8] sm:$0xff] }
 0xedf   :  { %v9570_v53 = vpop.permute.xlu0 %9569 }
 0xee0   :  { %v9614_v56 = vsel %vm4373_vm14, %v9610_v31, %v9570_v53  ;;  %v15449_v53 = vld [vmem:[%s15982_s22 + $0x10] sm:$0xff] }
 0xee1   :  { %v9568_v51 = vpop.permute.xlu1 %9567 }
 0xee2   :  { %v9612_v12 = vsel %vm4373_vm14, %v9608_v33, %v9568_v51 }
 0xeeb   :  { %v9576_v35 = vpop.permute.xlu0 %9575 }
 0xeec   :  { %v9618_v58 = vsel %vm4375_vm11, %v9614_v56, %v9576_v35  ;;  %v15450_v35 = vld [vmem:[%s15982_s22 + $0x18] sm:$0xff] }
 0xeed   :  { %v9574_v50 = vpop.permute.xlu1 %9573 }
 0xeee   :  { %v9616_v57 = vsel %vm4375_vm11, %v9612_v12, %v9574_v50  ;;  %vm17785_vm11 = vmmov %vm17784_vm1 }
 0xeef   :  { %v9582_v36 = vpop.permute.xlu0 %9581 }
 0xef0   :  { %v9622_v20 = vsel %vm4377_vm8, %v9618_v58, %v9582_v36 }
 0xef1   :  { %v9580_v38 = vpop.permute.xlu1 %9579 }
 0xef2   :  { %v9620_v21 = vsel %vm4377_vm8, %v9616_v57, %v9580_v38  ;;  %vm17786_vm8 = vcmask 261120  }
 0xef3   :  { %vm17795_vm4 = vmmov %vm17786_vm8 }
 0xef4   :  { %vm17796_vm0 = vmmov %vm17795_vm4 }
 0xef5   :  { %vm17797_vm3 = vmmov %vm17796_vm0 }
 0xef6   :  { %vm17798_vm2 = vmmov %vm17796_vm0 }
 0xefb   :  { %v9588_v46 = vpop.permute.xlu0 %9587 }
 0xefc   :  { %v9626_v39 = vsel %vm4379_vm9, %v9622_v20, %v9588_v46 }
 0xefd   :  { %v9586_v15 = vpop.permute.xlu1 %9585 }
 0xefe   :  { %v9624_v0 = vsel %vm4379_vm9, %v9620_v21, %v9586_v15 }
 0xeff   :  { %v9594_v8 = vpop.permute.xlu0 %9593 }
 0xf00   :  { %v9630_v11 = vsel %vm4381_vm5, %v9626_v39, %v9594_v8 }
 0xf01   :  { %v9592_v13 = vpop.permute.xlu1 %9591 }
 0xf02   :  { %v9628_v25 = vsel %vm4381_vm5, %v9624_v0, %v9592_v13  ;;  %vm17787_vm5 = vcmask 400384  }
 0xf03   :  { %vm17789_vm9 = vmmov %vm17787_vm5 }
 0xf04   :  { %vm17790_vm13 = vmmov %vm17787_vm5 }
 0xf05   :  { %vm17791_vm14 = vmmov %vm17787_vm5 }
 0xf06   :  { %vm17792_vm12 = vmmov %vm17787_vm5 }
 0xf07   :  { %vm17793_vm15 = vmmov %vm17787_vm5 }
 0xf08   :  { %vm17794_vm6 = vmmov %vm17787_vm5 }
 0xf0b   :  { %v9600_v1 = vpop.permute.xlu0 %9599 }
 0xf0c   :  { %v9634_v59 = vsel %vm4383_vm7, %v9630_v11, %v9600_v1 }
 0xf0d   :  { %v9598_v26 = vpop.permute.xlu1 %9597 }
 0xf0e   :  { %v9632_v3 = vsel %vm4383_vm7, %v9628_v25, %v9598_v26  ;;  %vm17788_vm7 = vmmov %vm17787_vm5  ;;  %v9970_v26 = vld [vmem:[%s12111_s17 + $0x18] sm:$0xff] }
 0xf0f   :  { %14581 = vmatprep.mubr.msk.bf16.mxu1 %vm17784_vm1, %v9632_v3  ;;  %vm17799_vm1 = vmmov %vm17796_vm0  ;;  %v9969_v3 = vld [vmem:[%s12111_s17 + $0x10] sm:$0xff] }
 0xf10   :  { %14582 = vmatmul.mubr.msk.bf16.vlgmr.msra.gmra.mxu1 %vm17785_vm11, %v9634_v59  ;;  %vm17800_vm11 = vmmov %vm17796_vm0 }
 0xf11   :  { %14593 = vmatprep.mubr.msk.f32.mxu1 %vm17786_vm8, %v17311_v43  ;;  %vm17801_vm8 = vmmov %vm17796_vm0 }
 0xf18   :  { %v9663_v9 = vpop.permute.xlu0 %9662 }
 0xf1a   :  { %v9668_v16 = vpop.permute.xlu1 %9667 }
 0xf1c   :  { %v9653_v30 = vpop.permute.xlu0 %9652 }
 0xf1e   :  { %v9658_v40 = vpop.permute.xlu1 %9657 }
 0xfd0   :  { %v14583_v29 = vpop.f32.mrf.mxu1 }
 0xfd1   :  { %v17315_v44 = vadd.f32 %v14583_v29, %v9663_v9 }
 0xfd2   :  { %v9746_v23 = vpop.f32.mrf.mxu1 }
 0xfd3   :  { %v9767_v28 = vsel %vm17787_vm5, %v17315_v44, 0.0  ;;  %v17321_v54 = vadd.f32 %v9746_v23, %v9653_v30  ;;  %v9775_v52 = vmul.f32 %v17315_v44, %v17315_v44  ;;  %vm17802_vm5 = vmmov %vm17796_vm0 }
 0xfd4   :  { %9768 = vadd.xlane.f32.xlu0 %v9767_v28  ;;  %v14584_v55 = vpop.f32.mrf.mxu1  ;;  %v9967_v28 = vld [vmem:[%s12111_s17] sm:$0xff] }
 0xfd5   :  { %v17319_v2 = vadd.f32 %v14584_v55, %v9668_v16  ;;  %v9761_v42 = vsel %vm17790_vm13, %v17321_v54, 0.0  ;;  %v9783_v61 = vsel %vm17792_vm12, %v9775_v52, 0.0  ;;  %v9773_v17 = vmul.f32 %v17321_v54, %v17321_v54  ;;  %v9968_v16 = vld [vmem:[%s12111_s17 + $0x8] sm:$0xff]  ;;  %vm17805_vm13 = vmmov %vm17796_vm0 }
 0xfd6   :  { %v9749_v10 = vpop.f32.mrf.mxu1  ;;  %vm17807_vm12 = vmmov %vm17796_vm0 }
 0xfd7   :  { %v17323_v7 = vadd.f32 %v9749_v10, %v9658_v40  ;;  %v9770_v18 = vsel %vm17788_vm7, %v17319_v2, 0.0  ;;  %v9776_v41 = vmul.f32 %v17319_v2, %v17319_v2  ;;  %v9777_v22 = vsel %vm17794_vm6, %v9773_v17, 0.0  ;;  %v10032_v40 = vld [vmem:[%s17346_s3 + $0x8] sm:$0xff]  ;;  %v10031_v10 = vld [vmem:[%s17346_s3] sm:$0xff]  ;;  %vm17803_vm7 = vmmov %vm17796_vm0 }
 0xfd8   :  { %9771 = vadd.xlane.f32.xlu1 %v9770_v18  ;;  %vm17809_vm6 = vmmov %vm17796_vm0 }
 0xfd9   :  { %v9764_v63 = vsel %vm17789_vm9, %v17323_v7, 0.0  ;;  %v9786_v19 = vsel %vm17791_vm14, %v9776_v41, 0.0  ;;  %v9774_v4 = vmul.f32 %v17323_v7, %v17323_v7  ;;  %vm17804_vm9 = vmmov %vm17796_vm0 }
 0xfda   :  { %9765 = vadd.xlane.f32.xlu0 %v9764_v63  ;;  %vm17806_vm14 = vmmov %vm17796_vm0 }
 0xfdb   :  { %v9780_v5 = vsel %vm17793_vm15, %v9774_v4, 0.0  ;;  %vm17808_vm15 = vmmov %vm17796_vm0 }
 0xfdc   :  { %9762 = vadd.xlane.f32.xlu1 %v9761_v42 }
 0xfde   :  { %9787 = vadd.xlane.f32.xlu0 %v9786_v19 }
 0xfe0   :  { %9784 = vadd.xlane.f32.xlu1 %v9783_v61 }
 0xfe2   :  { %9781 = vadd.xlane.f32.xlu0 %v9780_v5 }
 0xfe4   :  { %9778 = vadd.xlane.f32.xlu1 %v9777_v22 }
 0xff5   :  { %10047 = vperm.xlu1 %14807, %v10033_v62  }
 0xff8   :  { %10052 = vperm.xlu0 %14806, %v10034_v48  }
0x105d   :  { %v9769_v14 = vpop.xlane.xlu0 %9768 }
0x1061   :  { %v9772_v32 = vpop.xlane.xlu1 %9771 }
0x1062   :  { %14585 = vmatprep.subr.mxu1 %v9772_v32 }
0x1063   :  { %14586 = vmatpush3.msra.mxu1 %v9772_v32  ;;  %v9766_v45 = vpop.xlane.xlu0 %9765 }
0x1064   :  { %14587 = vmatprep.subr.mxu1 %v9769_v14 }
0x1065   :  { %14588 = vmatpush3.msra.mxu1 %v9769_v14  ;;  %v9763_v27 = vpop.xlane.xlu1 %9762 }
0x1066   :  { %14589 = vmatprep.subr.mxu1 %v9766_v45 }
0x1067   :  { %14590 = vmatpush3.msra.mxu1 %v9766_v45  ;;  %v9788_v60 = vpop.xlane.xlu0 %9787 }
0x1068   :  { %14591 = vmatprep.subr.mxu1 %v9763_v27 }
0x1069   :  { %14592 = vmatpush3.msra.mxu1 %v9763_v27  ;;  %v9785_v37 = vpop.xlane.xlu1 %9784 }
0x106a   :  { %14594 = vmatmul.mubr.msk.f32.vlgmr.msra.gmra.mxu1 %vm17795_vm4, %v15448_v6  ;;  %14599 = vmatprep.subr.mxu1 %v9788_v60  ;;  %vm17810_vm4 = vmmov %vm17796_vm0 }
0x106b   :  { %14600 = vmatpush3.msra.mxu1 %v9788_v60  ;;  %14596 = vmatprep.mubr.msk.f32.mxu1 %vm17796_vm0, %v15449_v53  ;;  %v9782_v51 = vpop.xlane.xlu0 %9781  ;;  %vm17819_vm0 = vcmask 556032  }
0x106c   :  { %14601 = vmatprep.subr.mxu1 %v9785_v37 }
0x106d   :  { %14602 = vmatpush3.msra.mxu1 %v9785_v37  ;;  %v9779_v50 = vpop.xlane.xlu1 %9778 }
0x106e   :  { %14597 = vmatmul.mubr.msk.f32.gmra.mxu1 %vm17797_vm3, %v15450_v35  ;;  %14603 = vmatprep.subr.mxu1 %v9782_v51  ;;  %vm17820_vm3 = vcmask 400384  }
0x106f   :  { %14604 = vmatpush3.msra.mxu1 %v9782_v51  ;;  %14607 = vmatprep.mubr.msk.f32.mxu1 %vm17798_vm2, %v17311_v43  ;;  %vm17821_vm2 = vcmask 957440  }
0x1070   :  { %14605 = vmatprep.subr.mxu1 %v9779_v50 }
0x1071   :  { %14606 = vmatpush3.msra.mxu1 %v9779_v50  ;;  %v10048_v18 = vpop.permute.xlu1 %10047 }
0x1072   :  { %14608 = vmatmul.mubr.msk.f32.vlgmr.msra.gmra.mxu1 %vm17799_vm1, %v15448_v6  ;;  %14613 = vmatprep.subr.bf16.mxu1 %v17779_v34  ;;  %vm17822_vm1 = vcmask 801792  }
0x1073   :  { %14610 = vmatprep.mubr.msk.f32.mxu1 %vm17800_vm11, %v15449_v53  ;;  %v10053_v63 = vpop.permute.xlu0 %10052  ;;  %vm17823_vm11 = vcmask 310272  }
0x1076   :  { %14611 = vmatmul.mubr.msk.f32.gmra.mxu1 %vm17801_vm8, %v15450_v35  ;;  %vm17824_vm8 = vcmask 64512  }
0x1077   :  { %14617 = vmatprep.mubr.msk.bf16.mxu1 %vm15491_vm10, %v17779_v34 }
0x112a   :  { %v14595_v36 = vpop.f32.mrf.mxu1 }
0x112b   :  { %9990 = vperm.xlu0 %14806, %v14595_v36   ;;  %v9960_v47 = vmul.f32 %v14595_v36, %v14595_v36 }
0x112c   :  { %v9855_v38 = vpop.f32.mrf.mxu1 }
0x112d   :  { %9985 = vperm.xlu1 %14807, %v9855_v38   ;;  %v9959_v31 = vmul.f32 %v9855_v38, %v9855_v38 }
0x112e   :  { %v14598_v46 = vpop.f32.mrf.mxu1 }
0x112f   :  { %v9962_v12 = vmul.f32 %v14598_v46, %v14598_v46 }
0x1130   :  { %v9865_v15 = vpop.f32.mrf.mxu1 }
0x1131   :  { %10000 = vperm.xlu1 %14807, %v14598_v46   ;;  %9995 = vperm.xlu0 %14806, %v9865_v15   ;;  %v9961_v56 = vmul.f32 %v9865_v15, %v9865_v15  ;;  %v15212_v46 = vld [vmem:[%s15616_s25] sm:$0xff]   ;;  %v15213_v15 = vld [vmem:[%s15616_s25 + $0x8] sm:$0xff]  }
0x1132   :  { %v14609_v49 = vpop.f32.mrf.mxu1 }
0x1133   :  { %v9964_v33 = vsub.f32 %v14609_v49, %v9960_v47  ;;  %v15214_v47 = vld [vmem:[%s15616_s25 + $0x10] sm:$0xff]   ;;  %v15215_v49 = vld [vmem:[%s15616_s25 + $0x18] sm:$0xff]  }
0x1134   :  { %v9940_v8 = vpop.f32.mrf.mxu1 }
0x1135   :  { %v9963_v57 = vsub.f32 %v9940_v8, %v9959_v31  ;;  %v9972_v21 = vadd.f32 1e-05, %v9964_v33  ;;  %v15216_v33 = vld [vmem:[%s15616_s25 + $0x20] sm:$0xff]   ;;  %v15217_v8 = vld [vmem:[%s15616_s25 + $0x28] sm:$0xff]   ;;  %v15218_v31 = vld [vmem:[%s15616_s25 + $0x30] sm:$0xff]  }
0x1136   :  { %v14612_v13 = vpop.f32.mrf.mxu1 }
0x1137   :  { %v9966_v58 = vsub.f32 %v14612_v13, %v9962_v12  ;;  %v9971_v39 = vadd.f32 1e-05, %v9963_v57  ;;  %v15219_v12 = vld [vmem:[%s15616_s25 + $0x38] sm:$0xff]   ;;  %v15220_v13 = vld [vmem:[%s15616_s25 + $0x40] sm:$0xff]   ;;  %s17812_s25 = smov 19  }
0x1138   :  { %v9950_v20 = vpop.f32.mrf.mxu1  ;;  %v15226_v57 = vld [vmem:[%s17425_s20 + $0x64] ss:$8 sps:$4 sm:$0xff]  }
0x1139   :  { %v9974_v0 = vadd.f32 1e-05, %v9966_v58  ;;  %v9965_v1 = vsub.f32 %v9950_v20, %v9961_v56  ;;  %v15223_v56 = vld [vmem:[%s17425_s20 + $0x74] ss:$8 sps:$4 sm:$0xff]   ;;  %v15224_v58 = vld [vmem:[%s17425_s20 + $0x60] ss:$8 sps:$4 sm:$0xff]  }
0x113a   :  { %v15227_v20 = vld [vmem:[%s17425_s20 + $0x50] ss:$8 sps:$4 sm:$0xff]  }
0x113b   :  { %15427 = vrsqrt.f32 %v9974_v0  ;;  %v9973_v25 = vadd.f32 1e-05, %v9965_v1  ;;  %v15232_v0 = vld [vmem:[%s17425_s20 + $0x44] ss:$8 sps:$4 sm:$0xff]   ;;  %v15245_v1 = vld [vmem:[%s17425_s20 + $0x170] ss:$8 sps:$4 sm:$0xff]  }
0x113c   :  { %15429 = vrsqrt.f32 %v9972_v21  ;;  %v15229_v21 = vld [vmem:[%s17425_s20 + $0x54] ss:$8 sps:$4 sm:$0xff]  }
0x113d   :  { %15431 = vrsqrt.f32 %v9973_v25  ;;  %v15230_v25 = vld [vmem:[%s17425_s20 + $0x40] ss:$8 sps:$4 sm:$0xff]  }
0x113e   :  { %15433 = vrsqrt.f32 %v9971_v39  ;;  %v15247_v39 = vld [vmem:[%s17425_s20 + $0x174] ss:$8 sps:$4 sm:$0xff]  }
0x1148   :  { %v15428_v11 = vpop.eup %15427 }
0x1149   :  { %v15430_v59 = vpop.eup %15429  ;;  %v9982_v43 = vmul.f32 %v15428_v11, %v9970_v26  ;;  %v15235_v26 = vld [vmem:[%s17425_s20 + $0x34] ss:$8 sps:$4 sm:$0xff]   ;;  %v15251_v11 = vld [vmem:[%s17425_s20 + $0x160] ss:$8 sps:$4 sm:$0xff]  }
0x114a   :  { %v15432_v9 = vpop.eup %15431  ;;  %v9980_v55 = vmul.f32 %v15430_v59, %v9968_v16  ;;  %v15233_v59 = vld [vmem:[%s17425_s20 + $0x30] ss:$8 sps:$4 sm:$0xff]   ;;  %v15236_v16 = vld [vmem:[%s17425_s20 + $0x20] ss:$8 sps:$4 sm:$0xff]  }
0x114b   :  { %10024 = vperm.xlu0 %14806, %v9982_v43   ;;  %v9981_v29 = vmul.f32 %v15432_v9, %v9969_v3  ;;  %v15434_v23 = vpop.eup %15433  ;;  %v15253_v3 = vld [vmem:[%s17425_s20 + $0x164] ss:$8 sps:$4 sm:$0xff]   ;;  %v15259_v9 = vld [vmem:[%s17425_s20 + $0x154] ss:$8 sps:$4 sm:$0xff]  }
0x114c   :  { %v9979_v30 = vmul.f32 %v15434_v23, %v9967_v28  ;;  %v15238_v43 = vld [vmem:[%s17425_s20 + $0x24] ss:$8 sps:$4 sm:$0xff]   ;;  %v15241_v23 = vld [vmem:[%s17425_s20 + $0x14] ss:$8 sps:$4 sm:$0xff]  }
0x114d   :  { %10019 = vperm.xlu1 %14807, %v9981_v29   ;;  %v15257_v29 = vld [vmem:[%s17425_s20 + $0x150] ss:$8 sps:$4 sm:$0xff]   ;;  %v15265_v28 = vld [vmem:[%s17425_s20 + $0x144] ss:$8 sps:$4 sm:$0xff]  }
0x114f   :  { %10014 = vperm.xlu0 %14806, %v9980_v55   ;;  %v15263_v55 = vld [vmem:[%s17425_s20 + $0x140] ss:$8 sps:$4 sm:$0xff]  }
0x1151   :  { %10009 = vperm.xlu1 %14807, %v9979_v30   ;;  %v15239_v30 = vld [vmem:[%s17425_s20 + $0x10] ss:$8 sps:$4 sm:$0xff]  }
0x1153   :  { %10042 = vperm.xlu0 %14806, %v10032_v40   ;;  %v15244_v40 = vld [vmem:[%s17425_s20 + $0x4] ss:$8 sps:$4 sm:$0xff]  }
0x1155   :  { %10037 = vperm.xlu1 %14807, %v10031_v10   ;;  %v15242_v10 = vld [vmem:[%s17425_s20] ss:$8 sps:$4 sm:$0xff]  }
0x11a6   :  { %v9991_v42 = vpop.permute.xlu0 %9990 }
0x11a7   :  { %v10004_v32 = vsub.f32 %v17323_v7, %v9991_v42  ;;  %v15254_v42 = vld [vmem:[%s17425_s20 + $0xe0] ss:$8 sps:$4 sm:$0xff]  }
0x11a8   :  { %v9986_v41 = vpop.permute.xlu1 %9985 }
0x11a9   :  { %v10003_v60 = vsub.f32 %v17321_v54, %v9986_v41  ;;  %v15256_v41 = vld [vmem:[%s17425_s20 + $0xe4] ss:$8 sps:$4 sm:$0xff]  }
0x11ac   :  { %v9996_v52 = vpop.permute.xlu0 %9995  ;;  %v10001_v19 = vpop.permute.xlu1 %10000 }
0x11ad   :  { %v10006_v4 = vsub.f32 %v17319_v2, %v10001_v19  ;;  %v10005_v17 = vsub.f32 %v17315_v44, %v9996_v52  ;;  %v15262_v52 = vld [vmem:[%s17425_s20 + $0xd4] ss:$8 sps:$4 sm:$0xff]   ;;  %v15260_v19 = vld [vmem:[%s17425_s20 + $0xd0] ss:$8 sps:$4 sm:$0xff]  }
0x11c6   :  { %v10025_v61 = vpop.permute.xlu0 %10024 }
0x11c7   :  { %v10030_v5 = vmul.f32 %v10025_v61, %v10006_v4  ;;  %v15266_v4 = vld [vmem:[%s17425_s20 + $0xc0] ss:$8 sps:$4 sm:$0xff]   ;;  %v15268_v61 = vld [vmem:[%s17425_s20 + $0xc4] ss:$8 sps:$4 sm:$0xff]  }
0x11c8   :  { %v10020_v22 = vpop.permute.xlu1 %10019 }
0x11c9   :  { %v10058_v62 = vadd.f32 %v10053_v63, %v10030_v5  ;;  %v10029_v48 = vmul.f32 %v10020_v22, %v10005_v17  ;;  %v15248_v63 = vld [vmem:[%s17425_s20 + $0xf0] ss:$8 sps:$4 sm:$0xff]   ;;  %v15271_v5 = vld [vmem:[%s17425_s20 + $0x134] ss:$8 sps:$4 sm:$0xff]  }
0x11ca   :  { %v10015_v14 = vpop.permute.xlu0 %10014  ;;  %v15269_v17 = vld [vmem:[%s17425_s20 + $0x130] ss:$8 sps:$4 sm:$0xff]   ;;  %v15274_v22 = vld [vmem:[%s17425_s20 + $0xb4] ss:$8 sps:$4 sm:$0xff]  }
0x11cb   :  { %v10057_v45 = vadd.f32 %v10048_v18, %v10029_v48  ;;  %v10062_v37 = vmax.f32 %v10058_v62, 0.0  ;;  %v10028_v53 = vmul.f32 %v10015_v14, %v10004_v32  ;;  %v15250_v18 = vld [vmem:[%s17425_s20 + $0xf4] ss:$8 sps:$4 sm:$0xff]   ;;  %v15277_v62 = vld [vmem:[%s17425_s20 + $0x124] ss:$8 sps:$4 sm:$0xff]  }
0x11cc   :  { %v10010_v27 = vpop.permute.xlu1 %10009  ;;  %v15272_v48 = vld [vmem:[%s17425_s20 + $0xb0] ss:$8 sps:$4 sm:$0xff]   ;;  %v15275_v14 = vld [vmem:[%s17425_s20 + $0x120] ss:$8 sps:$4 sm:$0xff]  }
0x11cd   :  { %v10061_v6 = vmax.f32 %v10057_v45, 0.0  ;;  %v10027_v35 = vmul.f32 %v10010_v27, %v10003_v60 }
0x11ce   :  { %v10043_v2 = vpop.permute.xlu0 %10042 }
0x11cf   :  { %v10064_v51 = vpack.c.bf16 %v10062_v37, %v10061_v6  ;;  %v10056_v44 = vadd.f32 %v10043_v2, %v10028_v53  ;;  %v15278_v37 = vld [vmem:[%s17425_s20 + $0xa0] ss:$8 sps:$4 sm:$0xff]   ;;  %v15280_v6 = vld [vmem:[%s17425_s20 + $0xa4] ss:$8 sps:$4 sm:$0xff]   ;;  %v15281_v53 = vld [vmem:[%s17425_s20 + $0x110] ss:$8 sps:$4 sm:$0xff]  }
0x11d0   :  { %v10038_v50 = vpop.permute.xlu1 %10037  ;;  %v15283_v2 = vld [vmem:[%s17425_s20 + $0x114] ss:$8 sps:$4 sm:$0xff]  }
0x11d1   :  { %v10055_v36 = vadd.f32 %v10038_v50, %v10027_v35  ;;  %14614 = vmatpush3.bf16.msra.mxu1 %v10064_v51  ;;  %14622 = vmatpush3.bf16.msra.mxu0 %v10064_v51  ;;  %v10060_v7 = vmax.f32 %v10056_v44, 0.0  ;;  %v15289_v50 = vld [vmem:[%s17425_s20 + $0x104] ss:$8 sps:$4 sm:$0xff]  }
0x11d2   :  { %14615 = vmatprep.subr.bf16.mxu1 %v17779_v34  ;;  %14623 = vmatprep.subr.bf16.mxu0 %v17779_v34 }
0x11d3   :  { %v10059_v38 = vmax.f32 %v10055_v36, 0.0 }
0x11d5   :  { %v10063_v54 = vpack.c.bf16 %v10060_v7, %v10059_v38  ;;  %v15284_v38 = vld [vmem:[%s17425_s20 + $0x90] ss:$8 sps:$4 sm:$0xff]  }
0x11d7   :  { %14616 = vmatpush3.bf16.msra.mxu1 %v10063_v54  ;;  %14624 = vmatpush3.bf16.msra.mxu0 %v10063_v54 }
0x11d8   :  { %14629 = vmatprep.subr.bf16.mxu1 %v17779_v34  ;;  %14637 = vmatprep.subr.bf16.mxu0 %v17779_v34 }
0x11da   :  { %14618 = vmatmul.mubr.msk.bf16.vlgmr.msra.gmra.mxu1 %vm17802_vm5, %v15212_v46  ;;  %14626 = vmatmul.mubr.msk.bf16.vlgmr.msra.gmra.mxu0 %vm17803_vm7, %v15213_v15  ;;  %v15287_v15 = vld [vmem:[%s17425_s20 + $0x100] ss:$8 sps:$4 sm:$0xff]   ;;  %vm17825_vm5 = vcmask 711680   ;;  %vm17826_vm7 = vcmask 465920  }
0x11db   :  { %14630 = vmatpush3.bf16.msra.mxu1 %v10064_v51  ;;  %14638 = vmatpush3.bf16.msra.mxu0 %v10064_v51 }
0x11dc   :  { %14631 = vmatprep.subr.bf16.mxu1 %v17779_v34  ;;  %14639 = vmatprep.subr.bf16.mxu0 %v17779_v34 }
0x11dd   :  { %14633 = vmatprep.mubr.msk.bf16.mxu1 %vm15491_vm10, %v17779_v34  ;;  %14641 = vmatprep.mubr.msk.bf16.mxu0 %vm15491_vm10, %v17779_v34 }
0x11df   :  { %14632 = vmatpush3.bf16.msra.mxu1 %v10063_v54  ;;  %14640 = vmatpush3.bf16.msra.mxu0 %v10063_v54 }
0x11e0   :  { %14645 = vmatprep.subr.bf16.mxu1 %v17779_v34  ;;  %14653 = vmatprep.subr.bf16.mxu0 %v17779_v34 }
0x11e2   :  { %14634 = vmatmul.mubr.msk.bf16.vlgmr.msra.gmra.mxu1 %vm17804_vm9, %v15214_v47  ;;  %14642 = vmatmul.mubr.msk.bf16.vlgmr.msra.gmra.mxu0 %vm17805_vm13, %v15215_v49  ;;  %vm17827_vm9 = vmmov %vm17819_vm0 }
0x11e3   :  { %14646 = vmatpush3.bf16.msra.mxu1 %v10064_v51  ;;  %14654 = vmatpush3.bf16.msra.mxu0 %v10064_v51  ;;  %vm17828_vm13 = vmmov %vm17819_vm0 }
0x11e4   :  { %14647 = vmatprep.subr.bf16.mxu1 %v17779_v34  ;;  %14655 = vmatprep.subr.bf16.mxu0 %v17779_v34 }
0x11e5   :  { %14649 = vmatprep.mubr.msk.bf16.mxu1 %vm15491_vm10, %v17779_v34  ;;  %14657 = vmatprep.mubr.msk.bf16.mxu0 %vm15491_vm10, %v17779_v34 }
0x11e7   :  { %14648 = vmatpush3.bf16.msra.mxu1 %v10063_v54  ;;  %14656 = vmatpush3.bf16.msra.mxu0 %v10063_v54 }
0x11e8   :  { %14661 = vmatprep.subr.bf16.mxu1 %v17779_v34  ;;  %14669 = vmatprep.subr.bf16.mxu0 %v17779_v34 }
0x11ea   :  { %14650 = vmatmul.mubr.msk.bf16.vlgmr.msra.gmra.mxu1 %vm17806_vm14, %v15216_v33  ;;  %14658 = vmatmul.mubr.msk.bf16.vlgmr.msra.gmra.mxu0 %vm17807_vm12, %v15217_v8  ;;  %v15295_v33 = vld [vmem:[%s17425_s20 + $0x1b4] ss:$8 sps:$4 sm:$0x1f]   ;;  %vm17829_vm14 = vmmov %vm17819_vm0 }
0x11eb   :  { %14662 = vmatpush3.bf16.msra.mxu1 %v10064_v51  ;;  %14670 = vmatpush3.bf16.msra.mxu0 %v10064_v51  ;;  %vm17830_vm12 = vmmov %vm17819_vm0 }
0x11ec   :  { %14663 = vmatprep.subr.bf16.mxu1 %v17779_v34  ;;  %14671 = vmatprep.subr.bf16.mxu0 %v17779_v34 }
0x11ed   :  { %14665 = vmatprep.mubr.msk.bf16.mxu1 %vm15491_vm10, %v17779_v34  ;;  %14673 = vmatprep.mubr.msk.bf16.mxu0 %vm15491_vm10, %v17779_v34 }
0x11ef   :  { %14664 = vmatpush3.bf16.msra.mxu1 %v10063_v54  ;;  %14672 = vmatpush3.bf16.msra.mxu0 %v10063_v54 }
0x11f0   :  { %14677 = vmatprep.subr.bf16.mxu1 %v17779_v34  ;;  %10939 = vmatprep.subr.bf16.mxu0 %v15223_v56  ;;  %v17811_v56 = vld [vmem:[#allocation3_spill] sm:$0xff] }
0x11f2   :  { %14666 = vmatmul.mubr.msk.bf16.vlgmr.msra.gmra.mxu1 %vm17808_vm15, %v15218_v31  ;;  %14674 = vmatmul.mubr.msk.bf16.vlgmr.msra.gmra.mxu0 %vm17809_vm6, %v15219_v12  ;;  %v15290_v12 = vld [vmem:[%s17425_s20 + $0x80] ss:$8 sps:$4 sm:$0xff]   ;;  %vm17831_vm15 = vcmask 130048  }
0x11f3   :  { %14678 = vmatpush3.bf16.msra.mxu1 %v10064_v51  ;;  %14681 = vmatprep.mubr.msk.bf16.mxu1 %vm15491_vm10, %v17779_v34  ;;  %v15286_v51 = vld [vmem:[%s17425_s20 + $0x94] ss:$8 sps:$4 sm:$0xff]   ;;  %vm17818_vm10 = vcmask 154624   ;;  %vm17832_vm6 = vmmov %vm17831_vm15 }
0x11f4   :  { %14679 = vmatprep.subr.bf16.mxu1 %v17779_v34  ;;  %v15221_v34 = vld [vmem:[%s17425_s20 + $0x70] ss:$8 sps:$4 sm:$0xff]  }
0x11f5   :  { %10940 = vmatpush1.bf16.msra.mxu0 %v15221_v34  ;;  %v15293_v34 = vld [vmem:[%s17425_s20 + $0x1b0] ss:$8 sps:$4 sm:$0x1f]  }
0x11f6   :  { %10941 = vmatprep.subr.bf16.mxu0 %v15226_v57  ;;  %v10937_v57 = vand.u32 %v15295_v33, %v17811_v56 }
0x11f7   :  { %14680 = vmatpush3.bf16.msra.mxu1 %v10063_v54 }
0x11f8   :  { %10982 = vmatprep.subr.bf16.mxu1 %v15247_v39 }
0x11f9   :  { %10942 = vmatpush1.bf16.msra.mxu0 %v15224_v58 }
0x11fa   :  { %14682 = vmatmul.mubr.msk.bf16.vlgmr.msra.gmra.mxu1 %vm17810_vm4, %v15220_v13  ;;  %10943 = vmatprep.subr.bf16.mxu0 %v15229_v21  ;;  %v15292_v13 = vld [vmem:[%s17425_s20 + $0x84] ss:$8 sps:$4 sm:$0xff]   ;;  %vm17833_vm4 = vmmov %vm17832_vm6 }
0x11fb   :  { %10983 = vmatpush1.bf16.msra.mxu1 %v15245_v1  ;;  %v10934_v1 = vand.u32 %v15293_v34, %v17811_v56 }
0x11fc   :  { %10984 = vmatprep.subr.bf16.mxu1 %v15253_v3 }
0x11fd   :  { %10944 = vmatpush1.bf16.msra.mxu0 %v15227_v20 }
0x11fe   :  { %10945 = vmatprep.subr.bf16.mxu0 %v15232_v0 }
0x11ff   :  { %10985 = vmatpush1.bf16.msra.mxu1 %v15251_v11 }
0x1200   :  { %10986 = vmatprep.subr.bf16.mxu1 %v15259_v9 }
0x1201   :  { %10946 = vmatpush1.bf16.msra.mxu0 %v15230_v25 }
0x1202   :  { %10947 = vmatprep.subr.bf16.mxu0 %v15235_v26  ;;  %v15298_v26 = vld [vmem:[%s17425_s20 + $0x1a4] ss:$8 sps:$4 sm:$0xff]  }
0x1203   :  { %10987 = vmatpush1.bf16.msra.mxu1 %v15257_v29 }
0x1204   :  { %10988 = vmatprep.subr.bf16.mxu1 %v15265_v28  ;;  %v15299_v28 = vld [vmem:[%s17425_s20 + $0x190] ss:$8 sps:$4 sm:$0xff]  }
0x1205   :  { %10948 = vmatpush1.bf16.msra.mxu0 %v15233_v59  ;;  %v15296_v59 = vld [vmem:[%s17425_s20 + $0x1a0] ss:$8 sps:$4 sm:$0xff]  }
0x1206   :  { %10949 = vmatprep.subr.bf16.mxu0 %v15238_v43 }
0x1207   :  { %10989 = vmatpush1.bf16.msra.mxu1 %v15263_v55 }
0x1208   :  { %10990 = vmatprep.subr.bf16.mxu1 %v15271_v5 }
0x1209   :  { %10950 = vmatpush1.bf16.msra.mxu0 %v15236_v16  ;;  %v15301_v16 = vld [vmem:[%s17425_s20 + $0x194] ss:$8 sps:$4 sm:$0xff]  }
0x120a   :  { %10951 = vmatprep.subr.bf16.mxu0 %v15241_v23 }
0x120b   :  { %10991 = vmatpush1.bf16.msra.mxu1 %v15269_v17 }
0x120c   :  { %10992 = vmatprep.subr.bf16.mxu1 %v15277_v62 }
0x120d   :  { %10952 = vmatpush1.bf16.msra.mxu0 %v15239_v30  ;;  %v15304_v30 = vld [vmem:[%s17425_s20 + $0x184] ss:$8 sps:$4 sm:$0xff]  }
0x120e   :  { %10953 = vmatprep.subr.bf16.mxu0 %v15244_v40 }
0x120f   :  { %10993 = vmatpush1.bf16.msra.mxu1 %v15275_v14  ;;  %v10642_v14 = vld [vmem:[%s12115_s6 + $0x8] sm:$0xff] }
0x1210   :  { %10994 = vmatprep.subr.bf16.mxu1 %v15283_v2 }
0x1211   :  { %10954 = vmatpush1.bf16.msra.mxu0 %v15242_v10 }
0x1212   :  { %10955 = vmatprep.subr.bf16.mxu0 %v15250_v18 }
0x1213   :  { %10995 = vmatpush1.bf16.msra.mxu1 %v15281_v53 }
0x1214   :  { %10996 = vmatprep.subr.bf16.mxu1 %v15289_v50 }
0x1215   :  { %10956 = vmatpush2.bf16.msra.mxu0 %v15248_v63 }
0x1216   :  { %10957 = vmatprep.subr.bf16.mxu0 %v15256_v41 }
0x1217   :  { %10997 = vmatpush1.bf16.msra.mxu1 %v15287_v15 }
0x1218   :  { %11006 = vmatprep.subr.bf16.mxu1 %v10937_v57 }
0x1219   :  { %10958 = vmatpush2.bf16.msra.mxu0 %v15254_v42  ;;  %v15302_v42 = vld [vmem:[%s17425_s20 + $0x180] ss:$8 sps:$4 sm:$0xff]  }
0x121a   :  { %10959 = vmatprep.subr.bf16.mxu0 %v15262_v52 }
0x121b   :  { %11007 = vmatpush2.bf16.msra.mxu1 %v10934_v1 }
0x121c   :  { %11008 = vmatprep.subr.bf16.mxu1 %v15298_v26 }
0x121d   :  { %10960 = vmatpush2.bf16.msra.mxu0 %v15260_v19 }
0x121e   :  { %10961 = vmatprep.subr.bf16.mxu0 %v15268_v61 }
0x121f   :  { %11009 = vmatpush2.bf16.msra.mxu1 %v15296_v59 }
0x1220   :  { %11010 = vmatprep.subr.bf16.mxu1 %v15301_v16 }
0x1221   :  { %10962 = vmatpush2.bf16.msra.mxu0 %v15266_v4 }
0x1222   :  { %10963 = vmatprep.subr.bf16.mxu0 %v15274_v22 }
0x1223   :  { %11011 = vmatpush2.bf16.msra.mxu1 %v15299_v28 }
0x1224   :  { %11012 = vmatprep.subr.bf16.mxu1 %v15304_v30 }
0x1225   :  { %10964 = vmatpush2.bf16.msra.mxu0 %v15272_v48 }
0x1226   :  { %10965 = vmatprep.subr.bf16.mxu0 %v15280_v6  ;;  %v10641_v6 = vld [vmem:[%s12115_s6] sm:$0xff] }
0x1227   :  { %11013 = vmatpush2.bf16.msra.mxu1 %v15302_v42 }
0x1229   :  { %10966 = vmatpush2.bf16.msra.mxu0 %v15278_v37 }
0x122a   :  { %10967 = vmatprep.subr.bf16.mxu0 %v15286_v51 }
0x122d   :  { %10968 = vmatpush2.bf16.msra.mxu0 %v15284_v38 }
0x122e   :  { %10969 = vmatprep.subr.bf16.mxu0 %v15292_v13 }
0x1231   :  { %10970 = vmatpush2.bf16.msra.mxu0 %v15290_v12 }
0x129a   :  { %v17465_v32 = vpop.f32.mrf.mxu1  ;;  %v10162_v45 = vpop.f32.mrf.mxu0 }
0x129c   :  { %v14619_v27 = vpop.f32.mrf.mxu1  ;;  %v14627_v60 = vpop.f32.mrf.mxu0 }
0x129e   :  { %v17472_v35 = vpop.f32.mrf.mxu1  ;;  %v10165_v44 = vpop.f32.mrf.mxu0 }
0x129f   :  { %v10116_v36 = vpack.c.bf16 %v17472_v35, %v17465_v32  ;;  %v10169_v7 = vpack.c.bf16 %v10165_v44, %v10162_v45 }
0x12a0   :  { %v14620_v54 = vpop.f32.mrf.mxu1  ;;  %v14628_v46 = vpop.f32.mrf.mxu0 }
0x12a1   :  { %10542 = vrot.lane.b32.xlu0 %v10169_v7, %s15470_s16  ;;  %s17813_s16 = smov 98  }
0x12a2   :  { %v10215_v47 = vpop.f32.mrf.mxu1  ;;  %v10268_v49 = vpop.f32.mrf.mxu0 }
0x12a4   :  { %v14635_v8 = vpop.f32.mrf.mxu1  ;;  %v14643_v31 = vpop.f32.mrf.mxu0 }
0x12a6   :  { %v10218_v58 = vpop.f32.mrf.mxu1  ;;  %v10271_v21 = vpop.f32.mrf.mxu0 }
0x12a7   :  { %v10222_v20 = vpack.c.bf16 %v10218_v58, %v10215_v47  ;;  %v10275_v0 = vpack.c.bf16 %v10271_v21, %v10268_v49 }
0x12a8   :  { %v14636_v39 = vpop.f32.mrf.mxu1  ;;  %v14644_v25 = vpop.f32.mrf.mxu0 }
0x12a9   :  { %10548 = vrot.lane.b32.xlu0 %v10275_v0, %s17812_s25  ;;  %10545 = vrot.lane.b32.xlu1 %v10222_v20, %s17813_s16 }
0x12aa   :  { %v10321_v11 = vpop.f32.mrf.mxu1  ;;  %v10374_v3 = vpop.f32.mrf.mxu0 }
0x12ac   :  { %v14651_v43 = vpop.f32.mrf.mxu1  ;;  %v14659_v9 = vpop.f32.mrf.mxu0 }
0x12ae   :  { %v10324_v29 = vpop.f32.mrf.mxu1  ;;  %v10377_v23 = vpop.f32.mrf.mxu0 }
0x12af   :  { %v10328_v55 = vpack.c.bf16 %v10324_v29, %v10321_v11  ;;  %v10381_v18 = vpack.c.bf16 %v10377_v23, %v10374_v3 }
0x12b0   :  { %v14652_v40 = vpop.f32.mrf.mxu1  ;;  %v14660_v10 = vpop.f32.mrf.mxu0 }
0x12b1   :  { %10551 = vrot.lane.b32.xlu1 %v10328_v55, %s17814_s13 }
0x12b2   :  { %v10427_v63 = vpop.f32.mrf.mxu1  ;;  %v10480_v41 = vpop.f32.mrf.mxu0 }
0x12b4   :  { %v14667_v52 = vpop.f32.mrf.mxu1  ;;  %v14675_v19 = vpop.f32.mrf.mxu0 }
0x12b5   :  { %10554 = vrot.lane.b32.xlu1 %v10381_v18, %s17815_s9  ;;  %v11046_v19 = vld [vmem:[%s12116_s11 + $0x8] sm:$0xff] }
0x12b6   :  { %v10430_v4 = vpop.f32.mrf.mxu1  ;;  %v10483_v61 = vpop.f32.mrf.mxu0 }
0x12b7   :  { %v10434_v17 = vpack.c.bf16 %v10430_v4, %v10427_v63  ;;  %v10487_v5 = vpack.c.bf16 %v10483_v61, %v10480_v41  ;;  %v11045_v41 = vld [vmem:[%s12116_s11] sm:$0xff] }
0x12b8   :  { %v14668_v22 = vpop.f32.mrf.mxu1  ;;  %v14676_v62 = vpop.f32.mrf.mxu0 }
0x12b9   :  { %10560 = vrot.lane.b32.xlu1 %v10487_v5, %s17816_s19  ;;  %10557 = vrot.lane.b32.xlu0 %v10434_v17, %s15475_s24  ;;  %v15305_v17 = vld [vmem:[%s16560_s27 + $0x70] ss:$8 sps:$4 sm:$0xff]   ;;  %v15307_v5 = vld [vmem:[%s16560_s27 + $0x74] ss:$8 sps:$4 sm:$0xff]  }
0x12ba   :  { %v10533_v48 = vpop.f32.mrf.mxu1  ;;  %v15310_v22 = vld [vmem:[%s16560_s27 + $0x64] ss:$8 sps:$4 sm:$0xff]   ;;  %11473 = vmatprep.subr.bf16.mxu0 %v15307_v5  ;;  %v15308_v62 = vld [vmem:[%s16560_s27 + $0x60] ss:$8 sps:$4 sm:$0xff]  }
0x12bc   :  { %v14683_v45 = vpop.f32.mrf.mxu1 }
0x12bd   :  { %10650 = vperm.xlu1 %14807, %v10642_v14   ;;  %v15311_v14 = vld [vmem:[%s16560_s27 + $0x50] ss:$8 sps:$4 sm:$0xff]   ;;  %v15316_v45 = vld [vmem:[%s16560_s27 + $0x44] ss:$8 sps:$4 sm:$0xff]  }
0x12be   :  { %v10536_v27 = vpop.f32.mrf.mxu1 }
0x12bf   :  { %v10540_v60 = vpack.c.bf16 %v10536_v27, %v10533_v48  ;;  %v15313_v48 = vld [vmem:[%s16560_s27 + $0x54] ss:$8 sps:$4 sm:$0xff]   ;;  %v15314_v27 = vld [vmem:[%s16560_s27 + $0x40] ss:$8 sps:$4 sm:$0xff]  }
0x12c0   :  { %v14684_v37 = vpop.f32.mrf.mxu1 }
0x12c1   :  { %10563 = vrot.lane.b32.xlu0 %v10540_v60, %s17817_s30  ;;  %v15319_v60 = vld [vmem:[%s16560_s27 + $0x34] ss:$8 sps:$4 sm:$0xff]   ;;  %v15317_v37 = vld [vmem:[%s16560_s27 + $0x30] ss:$8 sps:$4 sm:$0xff]  }
0x12c5   :  { %10645 = vperm.xlu0 %14806, %v10641_v6   ;;  %v15322_v6 = vld [vmem:[%s16560_s27 + $0x24] ss:$8 sps:$4 sm:$0xff]  }
0x1313   :  { %v10543_v53 = vpop.permute.xlu0 %10542 }
0x1314   :  { %v10567_v54 = vsel %vm17820_vm3, %v10116_v36, %v10543_v53 }
0x131b   :  { %v10546_v2 = vpop.permute.xlu1 %10545  ;;  %v10549_v51 = vpop.permute.xlu0 %10548 }
0x131c   :  { %v10572_v50 = vsel %vm17818_vm10, %v10546_v2, %v10549_v51  ;;  %v10569_v15 = vsel %vm17822_vm1, %v10567_v54, %v10546_v2  ;;  %vm17834_vm10 = vmmov %vm17833_vm4  ;;  %v15320_v2 = vld [vmem:[%s16560_s27 + $0x20] ss:$8 sps:$4 sm:$0xff]  }
0x1323   :  { %v10552_v44 = vpop.permute.xlu1 %10551 }
0x1324   :  { %v10574_v7 = vsel %vm17819_vm0, %v10572_v50, %v10552_v44  ;;  %v15325_v44 = vld [vmem:[%s16560_s27 + $0x14] ss:$8 sps:$4 sm:$0xff]   ;;  %vm17835_vm0 = vcmask 1041408  }
0x1325   :  { %vm17836_vm3 = vmmov %vm17835_vm0 }
0x1327   :  { %v10555_v38 = vpop.permute.xlu1 %10554 }
0x1328   :  { %v10576_v46 = vsel %vm17821_vm2, %v10574_v7, %v10555_v38  ;;  %vm17837_vm2 = vmmov %vm17833_vm4 }
0x1329   :  { %10971 = vmatprep.mubr.bf16.mxu0 %v10576_v46  ;;  %v15323_v46 = vld [vmem:[%s16560_s27 + $0x10] ss:$8 sps:$4 sm:$0xff]   ;;  %vm17838_vm1 = vmmov %vm17837_vm2 }
0x132a   :  { %10972 = vmatmul.mubr.bf16.vlgmr.msra.gmra.mxu0 %v10569_v15 }
0x132b   :  { %v10558_v47 = vpop.permute.xlu0 %10557  ;;  %v10561_v33 = vpop.permute.xlu1 %10560  ;;  %11474 = vmatpush1.bf16.msra.mxu0 %v15305_v17 }
0x132c   :  { %v10579_v49 = vsel %vm17823_vm11, %v10555_v38, %v10558_v47  ;;  %11475 = vmatprep.subr.bf16.mxu0 %v15310_v22  ;;  %v15328_v47 = vld [vmem:[%s16560_s27 + $0x4] ss:$8 sps:$4 sm:$0xff]   ;;  %vm17839_vm11 = vmmov %vm17838_vm1 }
0x132d   :  { %v10581_v12 = vsel %vm17825_vm5, %v10579_v49, %v10561_v33  ;;  %vm17841_vm5 = vmmov %vm17835_vm0 }
0x132f   :  { %11476 = vmatpush1.bf16.msra.mxu0 %v15308_v62 }
0x1330   :  { %11477 = vmatprep.subr.bf16.mxu0 %v15313_v48 }
0x1333   :  { %v10564_v8 = vpop.permute.xlu0 %10563  ;;  %11478 = vmatpush1.bf16.msra.mxu0 %v15311_v14 }
0x1334   :  { %v10584_v31 = vsel %vm17824_vm8, %v10561_v33, %v10564_v8  ;;  %11479 = vmatprep.subr.bf16.mxu0 %v15316_v45  ;;  %v11338_v8 = vld [vmem:[%s16560_s27 + $0xc0] sm:$0x33]  ;;  %vm17840_vm8 = vmmov %vm17835_vm0 }
0x1335   :  { %13214 = vmatprep.mubr.msk.bf16.mxu1 %vm17826_vm7, %v10584_v31  ;;  %vm17842_vm7 = vmmov %vm17827_vm9 }
0x1336   :  { %11015 = vmatmul.mubr.bf16.vlgmr.msra.gmra.mxu1 %v10581_v12  ;;  %v15326_v12 = vld [vmem:[%s16560_s27] ss:$8 sps:$4 sm:$0xff]  }
0x1337   :  { %14689 = vmatprep.mubr.msk.f32.mxu1 %vm17831_vm15, %v11045_v41  ;;  %11480 = vmatpush1.bf16.msra.mxu0 %v15314_v27  ;;  %vm17847_vm15 = vmmov %vm17842_vm7 }
0x1338   :  { %v10651_v20 = vpop.permute.xlu1 %10650  ;;  %11481 = vmatprep.subr.bf16.mxu0 %v15319_v60  ;;  %v13219_v60 = vld [vmem:[%s17588_s8 + $0x4] sm:$0xf] }
0x133b   :  { %11482 = vmatpush1.bf16.msra.mxu0 %v15317_v37  ;;  %v11265_v37 = vld [vmem:[%s17588_s8] sm:$0xf] }
0x133c   :  { %11483 = vmatprep.subr.bf16.mxu0 %v15322_v6  ;;  %v15345_v6 = vld [vmem:[%s16560_s27 + $0x13c] ss:$8 sps:$4 sm:$0xff]  }
0x133f   :  { %11484 = vmatpush1.bf16.msra.mxu0 %v15320_v2  ;;  %v15343_v2 = vld [vmem:[%s16560_s27 + $0x138] ss:$8 sps:$4 sm:$0xff]  }
0x1340   :  { %v10646_v13 = vpop.permute.xlu0 %10645  ;;  %11485 = vmatprep.subr.bf16.mxu0 %v15325_v44  ;;  %v15346_v44 = vld [vmem:[%s16560_s27 + $0x128] ss:$8 sps:$4 sm:$0xff]  }
0x1343   :  { %11486 = vmatpush1.bf16.msra.mxu0 %v15323_v46  ;;  %v15357_v46 = vld [vmem:[%s16560_s27 + $0xfc] ss:$8 sps:$4 sm:$0xff]  }
0x1344   :  { %11487 = vmatprep.subr.bf16.mxu0 %v15328_v47  ;;  %v15360_v47 = vld [vmem:[%s16560_s27 + $0xec] ss:$8 sps:$4 sm:$0xff]  }
0x1347   :  { %11488 = vmatpush1.bf16.msra.mxu0 %v15326_v12  ;;  %v15364_v12 = vld [vmem:[%s16560_s27 + $0xc8] ss:$8 sps:$4 sm:$0xff]  }
0x13ea   :  { %v10973_v32 = vpop.f32.mrf.mxu0 }
0x13eb   :  { %v10974_v57 = vadd.f32 %v10973_v32, %v10646_v13  ;;  %v13246_v32 = vcombine.high %v11338_v8, %v11338_v8 }
0x13ec   :  { %v10975_v35 = vpop.f32.mrf.mxu0 }
0x13ed   :  { %v10976_v56 = vadd.f32 %v10975_v35, %v10646_v13  ;;  %v13245_v35 = vcombine.low %v11338_v8, %v11338_v8  ;;  %13247 = vmatprep.subr.msk.bf16.mxu0 %vm17835_vm0, %v13246_v32  ;;  %v15333_v13 = vld [vmem:[%s16560_s27 + $0xb4] ss:$8 sps:$4 sm:$0xff]   ;;  %v15361_v8 = vld [vmem:[%s16560_s27 + $0xd8] ss:$8 sps:$4 sm:$0xff]   ;;  %v13276_v32 = vld [vmem:[%s16560_s27 + $0x188] sm:$0x33] }
0x13ee   :  { %v10977_v36 = vpop.f32.mrf.mxu0 }
0x13ef   :  { %v10978_v1 = vadd.f32 %v10977_v36, %v10651_v20  ;;  %v11468_v36 = vsel %vm17836_vm3, %v13245_v35, 0  ;;  %v13302_v35 = vcombine.high %v13276_v32, %v13276_v32 }
0x13f0   :  { %v10979_v58 = vpop.f32.mrf.mxu0  ;;  %11496 = vmatpush2.bf16.msra.mxu0 %v11468_v36  ;;  %v13301_v36 = vcombine.low %v13276_v32, %v13276_v32 }
0x13f1   :  { %v10980_v26 = vadd.f32 %v10979_v58, %v10651_v20  ;;  %11497 = vmatprep.subr.bf16.mxu0 %v15333_v13  ;;  %v11207_v58 = vld [vmem:[%s12117_s18] sm:$0xff] }
0x13f2   :  { %v11761_v13 = vsel %vm17841_vm5, %v13301_v36, 0 }
0x13f6   :  { %v11016_v34 = vpop.f32.mrf.mxu1 }
0x13f7   :  { %v17516_v39 = vadd.f32 %v11016_v34, %v10974_v57  ;;  %v15331_v34 = vld [vmem:[%s16560_s27 + $0xb0] ss:$8 sps:$4 sm:$0xff]  }
0x13f8   :  { %v11018_v21 = vpop.f32.mrf.mxu1  ;;  %11498 = vmatpush2.bf16.msra.mxu0 %v15331_v34  ;;  %v15371_v34 = vld [vmem:[%s16560_s27 + $0x17c] ss:$8 sps:$4 sm:$0xff]  }
0x13f9   :  { %v17514_v0 = vadd.f32 %v11018_v21, %v10976_v56  ;;  %v11033_v10 = vmul.f32 %v17516_v39, %v17516_v39  ;;  %v11208_v56 = vld [vmem:[%s12117_s18 + $0x8] sm:$0xff] }
0x13fa   :  { %v11020_v25 = vpop.f32.mrf.mxu1  ;;  %v15336_v21 = vld [vmem:[%s16560_s27 + $0xa4] ss:$8 sps:$4 sm:$0xff]  }
0x13fb   :  { %v11025_v11 = vsel %vm17827_vm9, %v17514_v0, 0.0  ;;  %v17520_v3 = vadd.f32 %v11020_v25, %v10978_v1  ;;  %v11034_v9 = vmul.f32 %v17514_v0, %v17514_v0  ;;  %v15334_v1 = vld [vmem:[%s16560_s27 + $0xa0] ss:$8 sps:$4 sm:$0xff]   ;;  %11499 = vmatprep.subr.bf16.mxu0 %v15336_v21  ;;  %v15377_v21 = vld [vmem:[%s16560_s27 + $0x15c] ss:$8 sps:$4 sm:$0xff]   ;;  %vm17843_vm9 = vmmov %vm17838_vm1 }
0x13fc   :  { %v11022_v59 = vpop.f32.mrf.mxu1  ;;  %v11026_v43 = vadd.f32 %v11025_v11, %v17516_v39  ;;  %11500 = vmatpush2.bf16.msra.mxu0 %v15334_v1  ;;  %v11244_v11 = vld [vmem:[%s12118_s1 + $0x8] sm:$0xff] }
0x13fd   :  { %v17525_v16 = vadd.f32 %v11022_v59, %v10980_v26  ;;  %v11035_v28 = vmul.f32 %v17520_v3, %v17520_v3  ;;  %v11037_v40 = vsel %vm17830_vm12, %v11034_v9, 0.0  ;;  %v15339_v59 = vld [vmem:[%s16560_s27 + $0x94] ss:$8 sps:$4 sm:$0xff]   ;;  %v11243_v9 = vld [vmem:[%s12118_s1] sm:$0xff]  ;;  %vm17846_vm12 = vmmov %vm17835_vm0 }
0x13fe   :  { %11027 = vadd.xlane.f32.xlu0 %v11026_v43  ;;  %v11038_v63 = vadd.f32 %v11037_v40, %v11033_v10  ;;  %v15337_v43 = vld [vmem:[%s16560_s27 + $0x90] ss:$8 sps:$4 sm:$0xff]   ;;  %11501 = vmatprep.subr.bf16.mxu0 %v15339_v59  ;;  %v15380_v1 = vld [vmem:[%s16560_s27 + $0x14c] ss:$8 sps:$4 sm:$0xff]  }
0x13ff   :  { %v11036_v29 = vmul.f32 %v17525_v16, %v17525_v16  ;;  %v11029_v23 = vsel %vm17828_vm13, %v17525_v16, 0.0  ;;  %vm17844_vm13 = vmmov %vm17842_vm7 }
0x1400   :  { %v11030_v55 = vadd.f32 %v11029_v23, %v17520_v3  ;;  %11502 = vmatpush2.bf16.msra.mxu0 %v15337_v43  ;;  %v15340_v23 = vld [vmem:[%s16560_s27 + $0x80] ss:$8 sps:$4 sm:$0xff]  }
0x1401   :  { %v11041_v30 = vsel %vm17829_vm14, %v11036_v29, 0.0  ;;  %v15342_v29 = vld [vmem:[%s16560_s27 + $0x84] ss:$8 sps:$4 sm:$0xff]   ;;  %vm17845_vm14 = vmmov %vm17835_vm0 }
0x1402   :  { %11031 = vadd.xlane.f32.xlu1 %v11030_v55  ;;  %v11042_v18 = vadd.f32 %v11041_v30, %v11035_v28  ;;  %v13360_v28 = vld [vmem:[#allocation2] ss:$0 sm:$0xff]  ;;  %11503 = vmatprep.subr.bf16.mxu0 %v15342_v29  ;;  %v15383_v29 = vld [vmem:[%s16560_s27 + $0x204] ss:$8 sps:$4 sm:$0xff]  }
0x1404   :  { %11043 = vadd.xlane.f32.xlu0 %v11042_v18  ;;  %11504 = vmatpush2.bf16.msra.mxu0 %v15340_v23 }
0x1406   :  { %11039 = vadd.xlane.f32.xlu1 %v11038_v63 }
0x1487   :  { %v11028_v42 = vpop.xlane.xlu0 %11027 }
0x148b   :  { %v11032_v52 = vpop.xlane.xlu1 %11031 }
0x148c   :  { %14685 = vmatprep.subr.mxu1 %v11032_v52 }
0x148d   :  { %14686 = vmatpush3.msra.mxu1 %v11032_v52  ;;  %v11044_v4 = vpop.xlane.xlu0 %11043 }
0x148e   :  { %14687 = vmatprep.subr.mxu1 %v11028_v42 }
0x148f   :  { %14688 = vmatpush3.msra.mxu1 %v11028_v42  ;;  %v11040_v61 = vpop.xlane.xlu1 %11039 }
0x1490   :  { %14690 = vmatmul.mubr.msk.f32.vlgmr.msra.gmra.mxu1 %vm17832_vm6, %v11046_v19  ;;  %14692 = vmatprep.subr.mxu1 %v11044_v4  ;;  %vm17848_vm6 = vmmov %vm17842_vm7 }
0x1491   :  { %14693 = vmatpush3.msra.mxu1 %v11044_v4  ;;  %14696 = vmatprep.mubr.msk.f32.mxu1 %vm17833_vm4, %v11045_v41 }
0x1492   :  { %14694 = vmatprep.subr.mxu1 %v11040_v61 }
0x1493   :  { %14695 = vmatpush3.msra.mxu1 %v11040_v61 }
0x1494   :  { %14697 = vmatmul.mubr.msk.f32.vlgmr.msra.gmra.mxu1 %vm17834_vm10, %v11046_v19 }
0x1495   :  { %11303 = vmatprep.mubr.bf16.mxu1 %v17780_v24 }
0x1550   :  { %v14691_v53 = vpop.f32.mrf.mxu1 }
0x1551   :  { %11222 = vperm.xlu1 %14807, %v14691_v53   ;;  %v11204_v50 = vmul.f32 %v14691_v53, %v14691_v53  ;;  %v13250_v53 = vld [vmem:[%s17588_s8 + $0x8] sm:$0xf] }
0x1552   :  { %v11119_v51 = vpop.f32.mrf.mxu1 }
0x1553   :  { %11217 = vperm.xlu0 %14806, %v11119_v51   ;;  %v11203_v38 = vmul.f32 %v11119_v51, %v11119_v51  ;;  %v15348_v51 = vld [vmem:[%s16560_s27 + $0x12c] ss:$8 sps:$4 sm:$0xff]  }
0x1554   :  { %v14698_v7 = vpop.f32.mrf.mxu1 }
0x1555   :  { %v11206_v54 = vsub.f32 %v14698_v7, %v11204_v50  ;;  %v15351_v50 = vld [vmem:[%s16560_s27 + $0x11c] ss:$8 sps:$4 sm:$0xff]   ;;  %v15349_v7 = vld [vmem:[%s16560_s27 + $0x118] ss:$8 sps:$4 sm:$0xff]  }
0x1556   :  { %v11194_v15 = vpop.f32.mrf.mxu1 }
0x1557   :  { %v11210_v49 = vadd.f32 1e-05, %v11206_v54  ;;  %v11205_v33 = vsub.f32 %v11194_v15, %v11203_v38  ;;  %v15354_v38 = vld [vmem:[%s16560_s27 + $0x10c] ss:$8 sps:$4 sm:$0xff]   ;;  %v15352_v54 = vld [vmem:[%s16560_s27 + $0x108] ss:$8 sps:$4 sm:$0xff]  }
0x1558   :  { %v15355_v15 = vld [vmem:[%s16560_s27 + $0xf8] ss:$8 sps:$4 sm:$0xff]  }
0x1559   :  { %15435 = vrsqrt.f32 %v11210_v49  ;;  %v11209_v31 = vadd.f32 1e-05, %v11205_v33  ;;  %v15358_v49 = vld [vmem:[%s16560_s27 + $0xe8] ss:$8 sps:$4 sm:$0xff]   ;;  %v15363_v33 = vld [vmem:[%s16560_s27 + $0xdc] ss:$8 sps:$4 sm:$0xff]  }
0x155b   :  { %15437 = vrsqrt.f32 %v11209_v31  ;;  %v15366_v31 = vld [vmem:[%s16560_s27 + $0xcc] ss:$8 sps:$4 sm:$0xff]  }
0x1566   :  { %v15436_v57 = vpop.eup %15435 }
0x1567   :  { %v11214_v20 = vmul.f32 %v15436_v57, %v11208_v56  ;;  %v15369_v56 = vld [vmem:[%s16560_s27 + $0x178] ss:$8 sps:$4 sm:$0xff]   ;;  %v15374_v57 = vld [vmem:[%s16560_s27 + $0x16c] ss:$8 sps:$4 sm:$0xff]  }
0x1568   :  { %v15438_v25 = vpop.eup %15437 }
0x1569   :  { %11236 = vperm.xlu0 %14806, %v11214_v20   ;;  %v11213_v26 = vmul.f32 %v15438_v25, %v11207_v58  ;;  %v15372_v58 = vld [vmem:[%s16560_s27 + $0x168] ss:$8 sps:$4 sm:$0xff]   ;;  %v15375_v20 = vld [vmem:[%s16560_s27 + $0x158] ss:$8 sps:$4 sm:$0xff]  }
0x156a   :  { %v15378_v25 = vld [vmem:[%s16560_s27 + $0x148] ss:$8 sps:$4 sm:$0xff]  }
0x156b   :  { %11231 = vperm.xlu1 %14807, %v11213_v26  }
0x156d   :  { %11252 = vperm.xlu0 %14806, %v11244_v11  }
0x156f   :  { %11247 = vperm.xlu1 %14807, %v11243_v9  }
0x1573   :  { %12067 = vperm.xlu1 %14807, %v13360_v28  }
0x15cc   :  { %v11223_v30 = vpop.permute.xlu1 %11222 }
0x15cd   :  { %v11227_v10 = vsub.f32 %v17520_v3, %v11223_v30  ;;  %v11228_v18 = vsub.f32 %v17525_v16, %v11223_v30  ;;  %v13305_v30 = vld [vmem:[%s17588_s8 + $0xc] sm:$0xf] }
0x15ce   :  { %v11218_v55 = vpop.permute.xlu0 %11217 }
0x15cf   :  { %v11225_v41 = vsub.f32 %v17516_v39, %v11218_v55  ;;  %v11226_v42 = vsub.f32 %v17514_v0, %v11218_v55 }
0x15e4   :  { %v11237_v40 = vpop.permute.xlu0 %11236 }
0x15e5   :  { %v11241_v52 = vmul.f32 %v11237_v40, %v11227_v10  ;;  %v11242_v19 = vmul.f32 %v11237_v40, %v11228_v18  ;;  %v15381_v40 = vld [vmem:[%s16560_s27 + $0x200] ss:$8 sps:$4 sm:$0xff]   ;;  %v15386_v18 = vld [vmem:[%s16560_s27 + $0x1f4] ss:$8 sps:$4 sm:$0xff]  }
0x15e6   :  { %v11232_v63 = vpop.permute.xlu1 %11231 }
0x15e7   :  { %v11239_v61 = vmul.f32 %v11232_v63, %v11225_v41  ;;  %v11240_v17 = vmul.f32 %v11232_v63, %v11226_v42  ;;  %v15384_v41 = vld [vmem:[%s16560_s27 + $0x1f0] ss:$8 sps:$4 sm:$0xff]  }
0x15e8   :  { %v11253_v4 = vpop.permute.xlu0 %11252 }
0x15e9   :  { %v11257_v5 = vadd.f32 %v11253_v4, %v11241_v52  ;;  %v11258_v22 = vadd.f32 %v11253_v4, %v11242_v19 }
0x15ea   :  { %v11248_v62 = vpop.permute.xlu1 %11247 }
0x15eb   :  { %v11255_v3 = vadd.f32 %v11248_v62, %v11239_v61  ;;  %v11256_v16 = vadd.f32 %v11248_v62, %v11240_v17  ;;  %v11261_v39 = vmax.f32 %v11257_v5, 0.0  ;;  %v11262_v0 = vmax.f32 %v11258_v22, 0.0  ;;  %v15387_v61 = vld [vmem:[%s16560_s27 + $0x1e0] ss:$8 sps:$4 sm:$0xff]   ;;  %v15392_v17 = vld [vmem:[%s16560_s27 + $0x1d4] ss:$8 sps:$4 sm:$0xff]  }
0x15ec   :  { %v15390_v62 = vld [vmem:[%s16560_s27 + $0x1d0] ss:$8 sps:$4 sm:$0xff]  }
0x15ed   :  { %v11259_v48 = vmax.f32 %v11255_v3, 0.0  ;;  %v11260_v14 = vmax.f32 %v11256_v16, 0.0  ;;  %v15395_v3 = vld [vmem:[%s16560_s27 + $0x1c4] ss:$8 sps:$4 sm:$0xff]   ;;  %v15393_v16 = vld [vmem:[%s16560_s27 + $0x1c0] ss:$8 sps:$4 sm:$0xff]  }
0x15ef   :  { %v17590_v45 = vpack.c.bf16 %v11261_v39, %v11259_v48  ;;  %v11264_v27 = vpack.c.bf16 %v11262_v0, %v11260_v14  ;;  %v15398_v39 = vld [vmem:[%s16560_s27 + $0x1b4] ss:$8 sps:$4 sm:$0xff]   ;;  %v15396_v0 = vld [vmem:[%s16560_s27 + $0x1b0] ss:$8 sps:$4 sm:$0xff]   ;;  %v15401_v48 = vld [vmem:[%s16560_s27 + $0x1a4] ss:$8 sps:$4 sm:$0xff]  }
0x15f0   :  { %v15399_v14 = vld [vmem:[%s16560_s27 + $0x1a0] ss:$8 sps:$4 sm:$0xff]  }
0x15f1   :  { %11285 = vmatprep.subr.bf16.mxu1 %v11264_v27  ;;  %11828 = vmatprep.subr.bf16.mxu0 %v11264_v27 }
0x15f2   :  { %11286 = vmatpush1.bf16.msra.mxu1 %v17590_v45 }
0x15f3   :  { %11531 = vmatprep.subr.bf16.mxu1 %v11264_v27 }
0x15f5   :  { %13220 = vmatmul.mubr.msk.bf16.vlgmr.msra.gmra.mxu1 %vm17837_vm2, %v13219_v60  ;;  %v15402_v60 = vld [vmem:[%s16560_s27 + $0x190] ss:$8 sps:$4 sm:$0xff]  }
0x15f6   :  { %11532 = vmatpush1.bf16.msra.mxu1 %v17590_v45  ;;  %11549 = vmatprep.mubr.bf16.mxu1 %v17780_v24 }
0x15f7   :  { %11577 = vmatprep.subr.bf16.mxu1 %v11264_v27  ;;  %v13331_v27 = vld [vmem:[%s16560_s27 + $0x250] sm:$0x33] }
0x15fd   :  { %13249 = vmatmul.mubr.msk.bf16.vlgmr.msra.gmra.mxu1 %vm17838_vm1, %v11265_v37  ;;  %v13357_v37 = vcombine.high %v13331_v27, %v13331_v27 }
0x15fe   :  { %11578 = vmatpush1.bf16.msra.mxu1 %v17590_v45  ;;  %11595 = vmatprep.mubr.bf16.mxu1 %v17780_v24 }
0x15ff   :  { %11766 = vmatprep.subr.bf16.mxu1 %v15345_v6  ;;  %v13356_v6 = vcombine.low %v13331_v27, %v13331_v27 }
0x1605   :  { %13251 = vmatmul.mubr.msk.bf16.vlgmr.msra.gmra.mxu1 %vm17839_vm11, %v13250_v53  ;;  %v12012_v53 = vsel %vm17846_vm12, %v13356_v6, 0 }
0x1606   :  { %11767 = vmatpush1.bf16.msra.mxu1 %v15343_v2  ;;  %v15409_v2 = vld [vmem:[%s16560_s27 + $0x244] ss:$8 sps:$4 sm:$0xff]  }
0x1607   :  { %11768 = vmatprep.subr.bf16.mxu1 %v15348_v51  ;;  %v15407_v51 = vld [vmem:[%s16560_s27 + $0x240] ss:$8 sps:$4 sm:$0xff]  }
0x160a   :  { %11769 = vmatpush1.bf16.msra.mxu1 %v15346_v44  ;;  %v15412_v44 = vld [vmem:[%s16560_s27 + $0x234] ss:$8 sps:$4 sm:$0xff]  }
0x160b   :  { %11770 = vmatprep.subr.bf16.mxu1 %v15351_v50  ;;  %v15410_v50 = vld [vmem:[%s16560_s27 + $0x230] ss:$8 sps:$4 sm:$0xff]  }
0x160e   :  { %11771 = vmatpush1.bf16.msra.mxu1 %v15349_v7  ;;  %v15415_v7 = vld [vmem:[%s16560_s27 + $0x224] ss:$8 sps:$4 sm:$0xff]  }
0x160f   :  { %11772 = vmatprep.subr.bf16.mxu1 %v15354_v38  ;;  %v15413_v38 = vld [vmem:[%s16560_s27 + $0x220] ss:$8 sps:$4 sm:$0xff]  }
0x1612   :  { %11773 = vmatpush1.bf16.msra.mxu1 %v15352_v54  ;;  %v15418_v54 = vld [vmem:[%s16560_s27 + $0x214] ss:$8 sps:$4 sm:$0xff]  }
0x1613   :  { %11774 = vmatprep.subr.bf16.mxu1 %v15357_v46  ;;  %v15416_v46 = vld [vmem:[%s16560_s27 + $0x210] ss:$8 sps:$4 sm:$0xff]  }
0x1616   :  { %11775 = vmatpush1.bf16.msra.mxu1 %v15355_v15 }
0x1617   :  { %11776 = vmatprep.subr.bf16.mxu1 %v15360_v47 }
0x161a   :  { %11777 = vmatpush1.bf16.msra.mxu1 %v15358_v49 }
0x161b   :  { %11778 = vmatprep.subr.bf16.mxu1 %v15363_v33 }
0x161e   :  { %11779 = vmatpush1.bf16.msra.mxu1 %v15361_v8 }
0x161f   :  { %11780 = vmatprep.subr.bf16.mxu1 %v15366_v31 }
0x1622   :  { %11781 = vmatpush1.bf16.msra.mxu1 %v15364_v12 }
0x1623   :  { %13303 = vmatprep.subr.msk.bf16.mxu1 %vm17840_vm8, %v13302_v35 }
0x1626   :  { %11789 = vmatpush2.bf16.msra.mxu1 %v11761_v13 }
0x1627   :  { %11790 = vmatprep.subr.bf16.mxu1 %v15371_v34 }
0x162a   :  { %11791 = vmatpush2.bf16.msra.mxu1 %v15369_v56 }
0x162b   :  { %11792 = vmatprep.subr.bf16.mxu1 %v15374_v57 }
0x162e   :  { %11793 = vmatpush2.bf16.msra.mxu1 %v15372_v58 }
0x162f   :  { %11794 = vmatprep.subr.bf16.mxu1 %v15377_v21 }
0x1632   :  { %11795 = vmatpush2.bf16.msra.mxu1 %v15375_v20 }
0x1633   :  { %11796 = vmatprep.subr.bf16.mxu1 %v15380_v1 }
0x1636   :  { %11797 = vmatpush2.bf16.msra.mxu1 %v15378_v25 }
0x16b5   :  { %v11305_v26 = vpop.f32.mrf.mxu1 }
0x16b6   :  { %v11312_v43 = vpack.c.bf16 %v11305_v26, %v11305_v26 }
0x16b7   :  { %v11307_v11 = vpop.f32.mrf.mxu1 }
0x16b8   :  { %v11313_v59 = vpack.c.bf16 %v11307_v11, %v11307_v11  ;;  %v12068_v11 = vpop.permute.xlu1 %12067 }
0x16b9   :  { %v11309_v9 = vpop.f32.mrf.mxu1 }
0x16ba   :  { %13248 = vmatprep.mubr.msk.bf16.mxu0 %vm17842_vm7, %v11313_v59 }
0x16bb   :  { %v11310_v23 = vpop.f32.mrf.mxu1  ;;  %11506 = vmatmul.mubr.bf16.vlgmr.msra.gmra.mxu0 %v11312_v43 }
0x16bc   :  { %11829 = vmatpush1.bf16.msra.mxu0 %v17590_v45  ;;  %11846 = vmatprep.mubr.bf16.mxu0 %v17780_v24  ;;  %v15389_v24 = vld [vmem:[%s16560_s27 + $0x1e4] ss:$8 sps:$4 sm:$0xff]   ;;  %v15404_v45 = vld [vmem:[%s16560_s27 + $0x194] ss:$8 sps:$4 sm:$0xff]   ;;  %s15525_s27 = smov 33  }
0x16bd   :  { %v17634_v28 = vpop.f32.mrf.mxu1  ;;  %12017 = vmatprep.subr.bf16.mxu0 %v15383_v29  ;;  %s12122_s23 = sld [smem:[%s17674_s0 + %s15525_s27]]  }
0x16bf   :  { %v17636_v55 = vpop.f32.mrf.mxu1 }
0x16c1   :  { %v11555_v10 = vpop.f32.mrf.mxu1 }
0x16c3   :  { %v11556_v63 = vpop.f32.mrf.mxu1  ;;  %13306 = vmatmul.mubr.msk.bf16.vlgmr.msra.gmra.mxu0 %vm17843_vm9, %v13305_v30 }
0x16c4   :  { %12018 = vmatpush1.bf16.msra.mxu0 %v15381_v40 }
0x16c5   :  { %v11597_v42 = vpop.f32.mrf.mxu1  ;;  %12019 = vmatprep.subr.bf16.mxu0 %v15386_v18 }
0x16c6   :  { %v11604_v52 = vpack.c.bf16 %v11597_v42, %v11597_v42 }
0x16c7   :  { %v11599_v19 = vpop.f32.mrf.mxu1 }
0x16c8   :  { %v11605_v4 = vpack.c.bf16 %v11599_v19, %v11599_v19  ;;  %12020 = vmatpush1.bf16.msra.mxu0 %v15384_v41 }
0x16c9   :  { %12021 = vmatprep.subr.bf16.mxu0 %v15389_v24  ;;  %v11601_v5 = vpop.f32.mrf.mxu1 }
0x16ca   :  { %13304 = vmatprep.mubr.msk.bf16.mxu1 %vm17844_vm13, %v11605_v4 }
0x16cb   :  { %11799 = vmatmul.mubr.bf16.vlgmr.msra.gmra.mxu1 %v11604_v52  ;;  %v11602_v22 = vpop.f32.mrf.mxu1 }
0x16cc   :  { %12022 = vmatpush1.bf16.msra.mxu0 %v15387_v61 }
0x16cd   :  { %12023 = vmatprep.subr.bf16.mxu0 %v15392_v17 }
0x16d0   :  { %12024 = vmatpush1.bf16.msra.mxu0 %v15390_v62 }
0x16d1   :  { %12025 = vmatprep.subr.bf16.mxu0 %v15395_v3 }
0x16d4   :  { %12026 = vmatpush1.bf16.msra.mxu0 %v15393_v16 }
0x16d5   :  { %12027 = vmatprep.subr.bf16.mxu0 %v15398_v39 }
0x16d8   :  { %12028 = vmatpush1.bf16.msra.mxu0 %v15396_v0 }
0x16d9   :  { %12029 = vmatprep.subr.bf16.mxu0 %v15401_v48 }
0x16dc   :  { %12030 = vmatpush1.bf16.msra.mxu0 %v15399_v14 }
0x16dd   :  { %12031 = vmatprep.subr.bf16.mxu0 %v15404_v45 }
0x16e0   :  { %12032 = vmatpush1.bf16.msra.mxu0 %v15402_v60 }
0x16e1   :  { %13358 = vmatprep.subr.msk.bf16.mxu0 %vm17845_vm14, %v13357_v37 }
0x16e4   :  { %12040 = vmatpush2.bf16.msra.mxu0 %v12012_v53 }
0x16e5   :  { %12041 = vmatprep.subr.bf16.mxu0 %v15409_v2 }
0x16e8   :  { %12042 = vmatpush2.bf16.msra.mxu0 %v15407_v51 }
0x16e9   :  { %12043 = vmatprep.subr.bf16.mxu0 %v15412_v44 }
0x16ec   :  { %12044 = vmatpush2.bf16.msra.mxu0 %v15410_v50 }
0x16ed   :  { %12045 = vmatprep.subr.bf16.mxu0 %v15415_v7 }
0x16f0   :  { %12046 = vmatpush2.bf16.msra.mxu0 %v15413_v38 }
0x16f1   :  { %12047 = vmatprep.subr.bf16.mxu0 %v15418_v54 }
0x16f4   :  { %12048 = vmatpush2.bf16.msra.mxu0 %v15416_v46 }
0x177b   :  { %v11507_v15 = vpop.f32.mrf.mxu0 }
0x177c   :  { %v11552_v13 = vadd.f32 %v17634_v28, %v11507_v15 }
0x177d   :  { %v11509_v47 = vpop.f32.mrf.mxu0 }
0x177e   :  { %v11554_v56 = vadd.f32 %v17636_v55, %v11509_v47 }
0x177f   :  { %v11511_v49 = vpop.f32.mrf.mxu0 }
0x1781   :  { %v11512_v33 = vpop.f32.mrf.mxu0 }
0x1783   :  { %v11848_v8 = vpop.f32.mrf.mxu0 }
0x1784   :  { %v11855_v32 = vpack.c.bf16 %v11848_v8, %v11848_v8 }
0x1785   :  { %v11850_v31 = vpop.f32.mrf.mxu0 }
0x1786   :  { %v11856_v12 = vpack.c.bf16 %v11850_v31, %v11850_v31 }
0x1787   :  { %v11852_v35 = vpop.f32.mrf.mxu0 }
0x1788   :  { %13359 = vmatprep.mubr.msk.bf16.mxu0 %vm17847_vm15, %v11856_v12 }
0x1789   :  { %12050 = vmatmul.mubr.bf16.vlgmr.msra.gmra.mxu0 %v11855_v32  ;;  %v11853_v36 = vpop.f32.mrf.mxu0 }
0x178b   :  { %v11800_v34 = vpop.f32.mrf.mxu1 }
0x178c   :  { %v11807_v57 = vadd.f32 %v11800_v34, %v11552_v13 }
0x178d   :  { %v11802_v58 = vpop.f32.mrf.mxu1 }
0x178e   :  { %v11808_v21 = vadd.f32 %v11802_v58, %v11554_v56 }
0x178f   :  { %v11804_v20 = vpop.f32.mrf.mxu1 }
0x1791   :  { %v11805_v1 = vpop.f32.mrf.mxu1 }
0x1849   :  { %v12051_v25 = vpop.f32.mrf.mxu0 }
0x184a   :  { %v12058_v26 = vadd.f32 %v12051_v25, %v11807_v57 }
0x184b   :  { %v12053_v59 = vpop.f32.mrf.mxu0 }
0x184c   :  { %v12070_v43 = vadd.f32 %v12068_v11, %v12058_v26  ;;  %v12059_v9 = vadd.f32 %v12053_v59, %v11808_v21 }
0x184d   :  { %v12055_v29 = vpop.f32.mrf.mxu0 }
0x184e   :  { %v13361_v23 = vmul.f32 -1.442695, %v12070_v43  ;;  %v12071_v30 = vadd.f32 %v12068_v11, %v12059_v9 }
0x184f   :  { %v12056_v40 = vpop.f32.mrf.mxu0 }
0x1850   :  { %15439 = vpow2.f32 %v13361_v23  ;;  %v13362_v28 = vmul.f32 -1.442695, %v12071_v30 }
0x1852   :  { %15441 = vpow2.f32 %v13362_v28 }
0x185d   :  { %v15440_v10 = vpop.eup %15439 }
0x185e   :  { %v12078_v55 = vadd.f32 1.0, %v15440_v10 }
0x185f   :  { %v15442_v18 = vpop.eup %15441 }
0x1860   :  { %15443 = vrcp.f32 %v12078_v55  ;;  %v12079_v63 = vadd.f32 1.0, %v15442_v18 }
0x1862   :  { %15445 = vrcp.f32 %v12079_v63 }
0x186d   :  { %v15444_v41 = vpop.eup %15443 }
0x186e   :  { %12084 = vst [vmem:[%s12122_s23] sm:$0xff] %v15444_v41 }
0x186f   :  { %v15446_v42 = vpop.eup %15445 }
0x1870   :  { %12085 = vst.msk [vmem:[%s12122_s23 + $0x8] sm:$0xff] %vm17848_vm6, %v15446_v42 }

</bundles_post_ra>
